<compile_context>
chip_gen: v6e
topology: v6e:2x2x1
jax: 0.10.0
libtpu: 0.0.40
codegen_flags: <defaults>
</compile_context>

<pallas_src>
import functools
import math

import jax
import jax.numpy as jnp
from jax.experimental import pallas as pl
from jax.experimental.pallas import tpu as pltpu

ACT_DTYPE = jnp.bfloat16   # activation / matmul-operand dtype
BN_EPS = 1e-5


# --------------------------------------------------------------------------
# Pallas kernels
# --------------------------------------------------------------------------
def _build_conv_kernel(add_identity, add_conv_shortcut, emit_raw):
    """Fused matmul + bias [+ shortcut] with BN(scale,shift)+ReLU epilogue.

    Ref order: a, w, b, [sc], [xs, ws, bs], scale, shift, [raw_out], z_out.
    Dot operands are bf16; accumulation and epilogue math are f32.
    """
    def kernel(*refs):
        it = iter(refs)
        a_ref = next(it)                                   # (K, TN)    bf16
        w_ref = next(it)                                   # (Cout, K)  bf16
        b_ref = next(it)                                   # (Cout, 1)  f32
        sc_ref = next(it) if add_identity else None        # (Cout, TN) bf16
        if add_conv_shortcut:
            xs_ref = next(it)                              # (K2, TN)   bf16
            ws_ref = next(it)                              # (Cout, K2) bf16
            bs_ref = next(it)                              # (Cout, 1)  f32
        scale_ref = next(it)                               # (Cout, 1)  f32
        shift_ref = next(it)                               # (Cout, 1)  f32
        raw_ref = next(it) if emit_raw else None
        z_ref = next(it)

        acc = jnp.dot(w_ref[...], a_ref[...],
                      preferred_element_type=jnp.float32) + b_ref[...]
        if add_identity:
            acc = acc + sc_ref[...].astype(jnp.float32)
        if add_conv_shortcut:
            acc = acc + jnp.dot(ws_ref[...], xs_ref[...],
                                preferred_element_type=jnp.float32) + bs_ref[...]
        if emit_raw:
            raw_ref[...] = acc.astype(raw_ref.dtype)
        z_ref[...] = jnp.maximum(acc * scale_ref[...] + shift_ref[...],
                                 0.0).astype(z_ref.dtype)

    return kernel


def _gap_fc_kernel(z_ref, pool_ref, wl_ref, bl_ref, o_ref):
    # z: (C, N*HW) bf16, pool: (N*HW, N) averaging matrix, wl: (classes, C) f32.
    pooled = jnp.dot(z_ref[...], pool_ref[...],
                     preferred_element_type=jnp.float32)               # (C, N)
    o_ref[...] = jnp.dot(wl_ref[...], pooled,
                         preferred_element_type=jnp.float32) + bl_ref[...]


# --------------------------------------------------------------------------
# Fused conv wrapper (lane dim = M = N*Ho*Wo, tiled; weights resident)
# --------------------------------------------------------------------------
def _lane_pad(a2, mp):
    return a2 if a2.shape[1] == mp else jnp.pad(a2, ((0, 0), (0, mp - a2.shape[1])))


def fused_conv(a, w, b, scale, shift, *, sc=None, sconv=None, emit_raw=True):
    """z = relu(scale*(W @ a + b [+ shortcut]) + shift); optionally also returns the
    pre-BN sum ("raw").  a:(K,M) bf16, w:(Cout,K) bf16, b/scale/shift:(Cout,1) f32,
    sc:(Cout,M) bf16 identity shortcut, sconv=(xs,ws,bs) for the 1x1-conv shortcut."""
    k, m = a.shape
    cout = w.shape[0]

    # pad the contraction dim to a multiple of 16 (bf16 sublane packing)
    kp = ((k + 15) // 16) * 16
    if kp != k:
        a = jnp.pad(a, ((0, kp - k), (0, 0)))
        w = jnp.pad(w, ((0, 0), (0, kp - k)))
        k = kp
    # pad the lane (M) dim to a multiple of 128 (no-op for the shapes used here)
    mp = ((m + 127) // 128) * 128
    a = _lane_pad(a, mp)

    # big lane tiles; keep >=2 grid steps where possible so both v7x TCs get work
    nl = mp // 128
    tn = (nl // 2) * 128 if (nl >= 2 and nl % 2 == 0) else mp
    grid = (mp // tn,)

    tiled = lambda rows: pl.BlockSpec((rows, tn), lambda j: (0, j))
    resident = lambda shape: pl.BlockSpec(shape, lambda j: (0, 0))

    args = [a, w, b]
    in_specs = [tiled(k), resident((cout, k)), resident((cout, 1))]
    if sc is not None:
        args.append(_lane_pad(sc, mp))
        in_specs.append(tiled(cout))
    if sconv is not None:
        xs, ws, bs = sconv
        k2 = xs.shape[0]
        k2p = ((k2 + 15) // 16) * 16
        if k2p != k2:
            xs = jnp.pad(xs, ((0, k2p - k2), (0, 0)))
            ws = jnp.pad(ws, ((0, 0), (0, k2p - k2)))
            k2 = k2p
        args += [_lane_pad(xs, mp), ws, bs]
        in_specs += [tiled(k2), resident((cout, k2)), resident((cout, 1))]
    args += [scale, shift]
    in_specs += [resident((cout, 1)), resident((cout, 1))]

    out_tile = pl.BlockSpec((cout, tn), lambda j: (0, j))
    if emit_raw:
        out_shape = (jax.ShapeDtypeStruct((cout, mp), ACT_DTYPE),
                     jax.ShapeDtypeStruct((cout, mp), ACT_DTYPE))
        out_specs = (out_tile, out_tile)
    else:
        out_shape = jax.ShapeDtypeStruct((cout, mp), ACT_DTYPE)
        out_specs = out_tile

    out = pl.pallas_call(
        _build_conv_kernel(sc is not None, sconv is not None, emit_raw),
        out_shape=out_shape,
        grid=grid,
        in_specs=in_specs,
        out_specs=out_specs,
        compiler_params=pltpu.CompilerParams(dimension_semantics=("parallel",)),
    )(*args)

    if emit_raw:
        raw, z = out
        if mp != m:
            raw, z = raw[:, :m], z[:, :m]
        return raw, z
    z = out
    return z[:, :m] if mp != m else z


# --------------------------------------------------------------------------
# Glue: im2col in channels-major layout + parameter reformatting (plain JAX)
# --------------------------------------------------------------------------
def im2col_cm(x4, stride):
    """x4: (C, N, H, W) -> (C*9, N*Ho*Wo) patches for a 3x3, pad=1 conv.
    Row order is (cin, kh, kw), matching torch_weight.reshape(Cout, Cin*9)."""
    c, n, h, w = x4.shape
    ho = (h + 2 - 3) // stride + 1
    wo = (w + 2 - 3) // stride + 1
    xp = jnp.pad(x4, ((0, 0), (0, 0), (1, 1), (1, 1)))
    cols = []
    for kh in range(3):
        for kw in range(3):
            cols.append(xp[:, :, kh:kh + (ho - 1) * stride + 1:stride,
                               kw:kw + (wo - 1) * stride + 1:stride])
    pat = jnp.stack(cols, axis=1)                        # (C, 9, N, Ho, Wo)
    return pat.reshape(c * 9, n * ho * wo), ho, wo


def bn_scale_shift(bn):
    gamma, beta, mean, var = bn
    scale = gamma / jnp.sqrt(var + BN_EPS)
    shift = beta - mean * scale
    return (scale.reshape(-1, 1).astype(jnp.float32),
            shift.reshape(-1, 1).astype(jnp.float32))


def conv_w_mat(w):
    return w.reshape(w.shape[0], -1).astype(ACT_DTYPE)


def colvec(v):
    return v.reshape(-1, 1).astype(jnp.float32)


# --------------------------------------------------------------------------
# Deterministic parameter construction (shapes follow the PyTorch __init__)
# --------------------------------------------------------------------------
def wrn_config(depth, widen_factor):
    assert (depth - 4) % 6 == 0, "Wide-resnet depth should be 6n+4"
    n = (depth - 4) // 6
    k = widen_factor
    stages = [16, 16 * k, 32 * k, 64 * k]
    cfg = []
    in_planes = stages[0]
    for planes, stride0 in zip(stages[1:], (1, 2, 2)):
        for b in range(n):
            s = stride0 if b == 0 else 1
            cfg.append(dict(in_planes=in_planes, planes=planes, stride=s,
                            has_shortcut=(s != 1 or in_planes != planes)))
            in_planes = planes
    return cfg, stages


def conv_params(key, cout, cin, ksize):
    k1, k2 = jax.random.split(key)
    fan_in = cin * ksize * ksize
    bound = 1.0 / math.sqrt(fan_in)
    w = jax.random.uniform(k1, (cout, cin, ksize, ksize), jnp.float32, -bound, bound)
    b = jax.random.uniform(k2, (cout,), jnp.float32, -bound, bound)
    return w, b


def bn_params(key, c):
    k1, k2, k3, k4 = jax.random.split(key, 4)
    gamma = 1.0 + 0.1 * jax.random.normal(k1, (c,), jnp.float32)
    beta = 0.1 * jax.random.normal(k2, (c,), jnp.float32)
    mean = 0.1 * jax.random.normal(k3, (c,), jnp.float32)
    var = 1.0 + 0.1 * jax.random.uniform(k4, (c,), jnp.float32)
    return gamma, beta, mean, var


def make_params(key, depth=10, widen_factor=1, num_classes=10):
    cfg, stages = wrn_config(depth, widen_factor)
    keys = iter(jax.random.split(key, 8 * len(cfg) + 8))
    params = {"conv1": conv_params(next(keys), stages[0], 3, 3)}
    blocks = []
    for c in cfg:
        blk = {
            "bn1": bn_params(next(keys), c["in_planes"]),
            "conv1": conv_params(next(keys), c["planes"], c["in_planes"], 3),
            "bn2": bn_params(next(keys), c["planes"]),
            "conv2": conv_params(next(keys), c["planes"], c["planes"], 3),
        }
        if c["has_shortcut"]:
            blk["shortcut"] = conv_params(next(keys), c["planes"], c["in_planes"], 1)
        blocks.append(blk)
    params["blocks"] = blocks
    params["bn_final"] = bn_params(next(keys), stages[3])
    kw, kb = jax.random.split(next(keys))
    bound = 1.0 / math.sqrt(stages[3])
    params["linear"] = (
        jax.random.uniform(kw, (num_classes, stages[3]), jnp.float32, -bound, bound),
        jax.random.uniform(kb, (num_classes,), jnp.float32, -bound, bound),
    )
    return params, cfg


# --------------------------------------------------------------------------
# Forward pass (8 pallas_calls total: stem + 2 per block + fused GAP+linear)
# --------------------------------------------------------------------------
def wide_resnet_forward(params, x_nchw, cfg):
    n = x_nchw.shape[0]
    x_cm = jnp.transpose(x_nchw, (1, 0, 2, 3)).astype(ACT_DTYPE)     # (C, N, H, W)
    blocks = params["blocks"]

    # Stem conv; the first block's bn1+relu is fused into its epilogue.
    w0, b0 = params["conv1"]
    ns, nh = bn_scale_shift(blocks[0]["bn1"])
    a0, ho, wo = im2col_cm(x_cm, stride=1)
    raw, z = fused_conv(a0, conv_w_mat(w0), colvec(b0), ns, nh, emit_raw=True)
    raw4 = raw.reshape(w0.shape[0], n, ho, wo)
    z4 = z.reshape(w0.shape[0], n, ho, wo)

    for i, c in enumerate(cfg):
        blk = blocks[i]
        # bn+relu fused into this block's output: next block's bn1, or the final bn.
        if i + 1 < len(cfg):
            ns, nh = bn_scale_shift(blocks[i + 1]["bn1"])
        else:
            ns, nh = bn_scale_shift(params["bn_final"])

        # conv1 (3x3, stride 1), fused epilogue: bn2 + relu.
        # TODO(synk): nn.Dropout after conv1 is the identity in eval mode; train-mode
        # dropout is not implemented.
        w1, b1 = blk["conv1"]
        s2, t2 = bn_scale_shift(blk["bn2"])
        a1, h1, w1o = im2col_cm(z4, stride=1)
        z1 = fused_conv(a1, conv_w_mat(w1), colvec(b1), s2, t2, emit_raw=False)
        z1_4 = z1.reshape(c["planes"], n, h1, w1o)

        # conv2 (3x3, stride s) + shortcut, fused epilogue: next bn + relu.
        w2, b2 = blk["conv2"]
        a2, h2, w2o = im2col_cm(z1_4, stride=c["stride"])
        if c["has_shortcut"]:
            ws, bs = blk["shortcut"]
            xs = raw4[:, :, ::c["stride"], ::c["stride"]].reshape(
                c["in_planes"], n * h2 * w2o)
            raw, z = fused_conv(a2, conv_w_mat(w2), colvec(b2), ns, nh,
                                sconv=(xs, conv_w_mat(ws), colvec(bs)),
                                emit_raw=True)
        else:
            sc = raw4.reshape(c["planes"], n * h2 * w2o)
            raw, z = fused_conv(a2, conv_w_mat(w2), colvec(b2), ns, nh,
                                sc=sc, emit_raw=True)
        raw4 = raw.reshape(c["planes"], n, h2, w2o)
        z4 = z.reshape(c["planes"], n, h2, w2o)

    # Tail: F.avg_pool2d(out, 8) on the 8x8 map == global mean, then linear,
    # fused into a single kernel via a pooling matmul.
    c_fin, _, hf, wf = z4.shape
    hw = hf * wf
    pool = (jnp.repeat(jnp.eye(n, dtype=jnp.float32), hw, axis=0) / hw).astype(ACT_DTYPE)
    wl, bl = params["linear"]
    logits_t = pl.pallas_call(
        _gap_fc_kernel,
        out_shape=jax.ShapeDtypeStruct((wl.shape[0], n), jnp.float32),
    )(z4.reshape(c_fin, n * hw), pool, wl.astype(jnp.float32), colvec(bl))
    return logits_t.T                                                  # (N, classes)


if __name__ == "__main__":
    key = jax.random.PRNGKey(0)
    pkey, xkey = jax.random.split(key)
    # Wide-ResNet 10x1 (depth=10 -> 1 block per stage), CIFAR-sized 32x32 input, NCHW.
    params, cfg = make_params(pkey, depth=10, widen_factor=1, num_classes=10)
    x = jax.random.normal(xkey, (2, 3, 32, 32), jnp.float32)

    fwd = jax.jit(functools.partial(wide_resnet_forward, cfg=cfg))
    logits = jax.block_until_ready(fwd(params, x))

    assert logits.shape == (2, 10) and logits.dtype == jnp.float32
    assert bool(jnp.all(jnp.isfinite(logits)))
    print("KERNEL_OK")
</pallas_src>

<mosaic_0001>
module attributes {stable_mosaic.version = 11 : i64} {
  func.func @kernel(%arg0: i32, %arg1: memref<32x1024xbf16, #tpu.memory_space<vmem>>, %arg2: memref<16x32xbf16, #tpu.memory_space<vmem>>, %arg3: memref<16x1xf32, #tpu.memory_space<vmem>>, %arg4: memref<16x1xf32, #tpu.memory_space<vmem>>, %arg5: memref<16x1xf32, #tpu.memory_space<vmem>>, %arg6: memref<16x1024xbf16, #tpu.memory_space<vmem>>, %arg7: memref<16x1024xbf16, #tpu.memory_space<vmem>>) attributes {dimension_semantics = [#tpu.dimension_semantics<parallel>], iteration_bounds = array<i64: 2>, scalar_prefetch = 0 : i64, scratch_operands = 0 : i64, tpu.core_type = #tpu.core_type<tc>, window_params = [{transform_indices = @transform_0, window_bounds = array<i64: 32, 1024>}, {pipeline_mode = #tpu.pipeline_mode<synchronous>, transform_indices = @transform_1, window_bounds = array<i64: 16, 32>}, {pipeline_mode = #tpu.pipeline_mode<synchronous>, transform_indices = @transform_2, window_bounds = array<i64: 16, 1>}, {pipeline_mode = #tpu.pipeline_mode<synchronous>, transform_indices = @transform_3, window_bounds = array<i64: 16, 1>}, {pipeline_mode = #tpu.pipeline_mode<synchronous>, transform_indices = @transform_4, window_bounds = array<i64: 16, 1>}, {transform_indices = @transform_5, window_bounds = array<i64: 16, 1024>}, {transform_indices = @transform_6, window_bounds = array<i64: 16, 1024>}]} {
    %c0 = arith.constant 0 : index
    %c0_0 = arith.constant 0 : index
    %0 = vector.load %arg2[%c0, %c0_0] : memref<16x32xbf16, #tpu.memory_space<vmem>>, vector<16x32xbf16>
    %c0_1 = arith.constant 0 : index
    %c0_2 = arith.constant 0 : index
    %1 = vector.load %arg1[%c0_1, %c0_2] : memref<32x1024xbf16, #tpu.memory_space<vmem>>, vector<32x1024xbf16>
    %cst = arith.constant dense<0.000000e+00> : vector<16x1024xf32>
    %2 = tpu.matmul %0, %1, %cst {dimension_numbers = #tpu.dot_dimension_numbers<[1], [0], [0], [1], [0, 0, 1, 1], [], []>} : vector<16x32xbf16>, vector<32x1024xbf16>, vector<16x1024xf32> -> vector<16x1024xf32>
    %c0_3 = arith.constant 0 : index
    %c0_4 = arith.constant 0 : index
    %3 = vector.load %arg3[%c0_3, %c0_4] : memref<16x1xf32, #tpu.memory_space<vmem>>, vector<16x1xf32>
    %4 = vector.broadcast %3 : vector<16x1xf32> to vector<16x1024xf32>
    %5 = arith.addf %2, %4 : vector<16x1024xf32>
    %6 = arith.truncf %5 : vector<16x1024xf32> to vector<16x1024xbf16>
    %c0_5 = arith.constant 0 : index
    %c0_6 = arith.constant 0 : index
    %7 = vector.load %arg6[%c0_5, %c0_6] : memref<16x1024xbf16, #tpu.memory_space<vmem>>, vector<16x1024xbf16>
    tpu.vector_store %arg6[%c0_5, %c0_6], %6 {strides = array<i32>} : memref<16x1024xbf16, #tpu.memory_space<vmem>>, vector<16x1024xbf16>,
    %c0_7 = arith.constant 0 : index
    %c0_8 = arith.constant 0 : index
    %8 = vector.load %arg4[%c0_7, %c0_8] : memref<16x1xf32, #tpu.memory_space<vmem>>, vector<16x1xf32>
    %9 = vector.broadcast %8 : vector<16x1xf32> to vector<16x1024xf32>
    %10 = arith.mulf %5, %9 : vector<16x1024xf32>
    %c0_9 = arith.constant 0 : index
    %c0_10 = arith.constant 0 : index
    %11 = vector.load %arg5[%c0_9, %c0_10] : memref<16x1xf32, #tpu.memory_space<vmem>>, vector<16x1xf32>
    %12 = vector.broadcast %11 : vector<16x1xf32> to vector<16x1024xf32>
    %13 = arith.addf %10, %12 : vector<16x1024xf32>
    %cst_11 = arith.constant 0.000000e+00 : f32
    %14 = vector.broadcast %cst_11 : f32 to vector<16x1024xf32>
    %15 = arith.maximumf %13, %14 : vector<16x1024xf32>
    %16 = arith.truncf %15 : vector<16x1024xf32> to vector<16x1024xbf16>
    %c0_12 = arith.constant 0 : index
    %c0_13 = arith.constant 0 : index
    %17 = vector.load %arg7[%c0_12, %c0_13] : memref<16x1024xbf16, #tpu.memory_space<vmem>>, vector<16x1024xbf16>
    tpu.vector_store %arg7[%c0_12, %c0_13], %16 {strides = array<i32>} : memref<16x1024xbf16, #tpu.memory_space<vmem>>, vector<16x1024xbf16>,
    return
  }
  func.func @transform_0(%arg0: i32) -> (i32, i32) {
    %c0_i32 = arith.constant 0 : i32
    %c0_i32_0 = arith.constant 0 : i32
    return %c0_i32, %arg0 : i32, i32
  }
  func.func @transform_1(%arg0: i32) -> (i32, i32) {
    %c0_i32 = arith.constant 0 : i32
    %c0_i32_0 = arith.constant 0 : i32
    %c0_i32_1 = arith.constant 0 : i32
    return %c0_i32, %c0_i32_0 : i32, i32
  }
  func.func @transform_2(%arg0: i32) -> (i32, i32) {
    %c0_i32 = arith.constant 0 : i32
    %c0_i32_0 = arith.constant 0 : i32
    %c0_i32_1 = arith.constant 0 : i32
    return %c0_i32, %c0_i32_0 : i32, i32
  }
  func.func @transform_3(%arg0: i32) -> (i32, i32) {
    %c0_i32 = arith.constant 0 : i32
    %c0_i32_0 = arith.constant 0 : i32
    %c0_i32_1 = arith.constant 0 : i32
    return %c0_i32, %c0_i32_0 : i32, i32
  }
  func.func @transform_4(%arg0: i32) -> (i32, i32) {
    %c0_i32 = arith.constant 0 : i32
    %c0_i32_0 = arith.constant 0 : i32
    %c0_i32_1 = arith.constant 0 : i32
    return %c0_i32, %c0_i32_0 : i32, i32
  }
  func.func @transform_5(%arg0: i32) -> (i32, i32) {
    %c0_i32 = arith.constant 0 : i32
    %c0_i32_0 = arith.constant 0 : i32
    return %c0_i32, %arg0 : i32, i32
  }
  func.func @transform_6(%arg0: i32) -> (i32, i32) {
    %c0_i32 = arith.constant 0 : i32
    %c0_i32_0 = arith.constant 0 : i32
    return %c0_i32, %arg0 : i32, i32
  }
}

module attributes {stable_mosaic.version = 11 : i64} {
  func.func @kernel(%arg0: i32, %arg1: memref<144x1024xbf16, #tpu.memory_space<vmem>>, %arg2: memref<16x144xbf16, #tpu.memory_space<vmem>>, %arg3: memref<16x1xf32, #tpu.memory_space<vmem>>, %arg4: memref<16x1xf32, #tpu.memory_space<vmem>>, %arg5: memref<16x1xf32, #tpu.memory_space<vmem>>, %arg6: memref<16x1024xbf16, #tpu.memory_space<vmem>>) attributes {dimension_semantics = [#tpu.dimension_semantics<parallel>], iteration_bounds = array<i64: 2>, scalar_prefetch = 0 : i64, scratch_operands = 0 : i64, tpu.core_type = #tpu.core_type<tc>, window_params = [{transform_indices = @transform_0, window_bounds = array<i64: 144, 1024>}, {pipeline_mode = #tpu.pipeline_mode<synchronous>, transform_indices = @transform_1, window_bounds = array<i64: 16, 144>}, {pipeline_mode = #tpu.pipeline_mode<synchronous>, transform_indices = @transform_2, window_bounds = array<i64: 16, 1>}, {pipeline_mode = #tpu.pipeline_mode<synchronous>, transform_indices = @transform_3, window_bounds = array<i64: 16, 1>}, {pipeline_mode = #tpu.pipeline_mode<synchronous>, transform_indices = @transform_4, window_bounds = array<i64: 16, 1>}, {transform_indices = @transform_5, window_bounds = array<i64: 16, 1024>}]} {
    %c0 = arith.constant 0 : index
    %c0_0 = arith.constant 0 : index
    %0 = vector.load %arg2[%c0, %c0_0] : memref<16x144xbf16, #tpu.memory_space<vmem>>, vector<16x144xbf16>
    %c0_1 = arith.constant 0 : index
    %c0_2 = arith.constant 0 : index
    %1 = vector.load %arg1[%c0_1, %c0_2] : memref<144x1024xbf16, #tpu.memory_space<vmem>>, vector<144x1024xbf16>
    %cst = arith.constant dense<0.000000e+00> : vector<16x1024xf32>
    %2 = tpu.matmul %0, %1, %cst {dimension_numbers = #tpu.dot_dimension_numbers<[1], [0], [0], [1], [0, 0, 1, 1], [], []>} : vector<16x144xbf16>, vector<144x1024xbf16>, vector<16x1024xf32> -> vector<16x1024xf32>
    %c0_3 = arith.constant 0 : index
    %c0_4 = arith.constant 0 : index
    %3 = vector.load %arg3[%c0_3, %c0_4] : memref<16x1xf32, #tpu.memory_space<vmem>>, vector<16x1xf32>
    %4 = vector.broadcast %3 : vector<16x1xf32> to vector<16x1024xf32>
    %5 = arith.addf %2, %4 : vector<16x1024xf32>
    %c0_5 = arith.constant 0 : index
    %c0_6 = arith.constant 0 : index
    %6 = vector.load %arg4[%c0_5, %c0_6] : memref<16x1xf32, #tpu.memory_space<vmem>>, vector<16x1xf32>
    %7 = vector.broadcast %6 : vector<16x1xf32> to vector<16x1024xf32>
    %8 = arith.mulf %5, %7 : vector<16x1024xf32>
    %c0_7 = arith.constant 0 : index
    %c0_8 = arith.constant 0 : index
    %9 = vector.load %arg5[%c0_7, %c0_8] : memref<16x1xf32, #tpu.memory_space<vmem>>, vector<16x1xf32>
    %10 = vector.broadcast %9 : vector<16x1xf32> to vector<16x1024xf32>
    %11 = arith.addf %8, %10 : vector<16x1024xf32>
    %cst_9 = arith.constant 0.000000e+00 : f32
    %12 = vector.broadcast %cst_9 : f32 to vector<16x1024xf32>
    %13 = arith.maximumf %11, %12 : vector<16x1024xf32>
    %14 = arith.truncf %13 : vector<16x1024xf32> to vector<16x1024xbf16>
    %c0_10 = arith.constant 0 : index
    %c0_11 = arith.constant 0 : index
    %15 = vector.load %arg6[%c0_10, %c0_11] : memref<16x1024xbf16, #tpu.memory_space<vmem>>, vector<16x1024xbf16>
    tpu.vector_store %arg6[%c0_10, %c0_11], %14 {strides = array<i32>} : memref<16x1024xbf16, #tpu.memory_space<vmem>>, vector<16x1024xbf16>,
    return
  }
  func.func @transform_0(%arg0: i32) -> (i32, i32) {
    %c0_i32 = arith.constant 0 : i32
    %c0_i32_0 = arith.constant 0 : i32
    return %c0_i32, %arg0 : i32, i32
  }
  func.func @transform_1(%arg0: i32) -> (i32, i32) {
    %c0_i32 = arith.constant 0 : i32
    %c0_i32_0 = arith.constant 0 : i32
    %c0_i32_1 = arith.constant 0 : i32
    return %c0_i32, %c0_i32_0 : i32, i32
  }
  func.func @transform_2(%arg0: i32) -> (i32, i32) {
    %c0_i32 = arith.constant 0 : i32
    %c0_i32_0 = arith.constant 0 : i32
    %c0_i32_1 = arith.constant 0 : i32
    return %c0_i32, %c0_i32_0 : i32, i32
  }
  func.func @transform_3(%arg0: i32) -> (i32, i32) {
    %c0_i32 = arith.constant 0 : i32
    %c0_i32_0 = arith.constant 0 : i32
    %c0_i32_1 = arith.constant 0 : i32
    return %c0_i32, %c0_i32_0 : i32, i32
  }
  func.func @transform_4(%arg0: i32) -> (i32, i32) {
    %c0_i32 = arith.constant 0 : i32
    %c0_i32_0 = arith.constant 0 : i32
    %c0_i32_1 = arith.constant 0 : i32
    return %c0_i32, %c0_i32_0 : i32, i32
  }
  func.func @transform_5(%arg0: i32) -> (i32, i32) {
    %c0_i32 = arith.constant 0 : i32
    %c0_i32_0 = arith.constant 0 : i32
    return %c0_i32, %arg0 : i32, i32
  }
}

module attributes {stable_mosaic.version = 11 : i64} {
  func.func @kernel(%arg0: i32, %arg1: memref<144x1024xbf16, #tpu.memory_space<vmem>>, %arg2: memref<16x144xbf16, #tpu.memory_space<vmem>>, %arg3: memref<16x1xf32, #tpu.memory_space<vmem>>, %arg4: memref<16x1024xbf16, #tpu.memory_space<vmem>>, %arg5: memref<16x1xf32, #tpu.memory_space<vmem>>, %arg6: memref<16x1xf32, #tpu.memory_space<vmem>>, %arg7: memref<16x1024xbf16, #tpu.memory_space<vmem>>, %arg8: memref<16x1024xbf16, #tpu.memory_space<vmem>>) attributes {dimension_semantics = [#tpu.dimension_semantics<parallel>], iteration_bounds = array<i64: 2>, scalar_prefetch = 0 : i64, scratch_operands = 0 : i64, tpu.core_type = #tpu.core_type<tc>, window_params = [{transform_indices = @transform_0, window_bounds = array<i64: 144, 1024>}, {pipeline_mode = #tpu.pipeline_mode<synchronous>, transform_indices = @transform_1, window_bounds = array<i64: 16, 144>}, {pipeline_mode = #tpu.pipeline_mode<synchronous>, transform_indices = @transform_2, window_bounds = array<i64: 16, 1>}, {transform_indices = @transform_3, window_bounds = array<i64: 16, 1024>}, {pipeline_mode = #tpu.pipeline_mode<synchronous>, transform_indices = @transform_4, window_bounds = array<i64: 16, 1>}, {pipeline_mode = #tpu.pipeline_mode<synchronous>, transform_indices = @transform_5, window_bounds = array<i64: 16, 1>}, {transform_indices = @transform_6, window_bounds = array<i64: 16, 1024>}, {transform_indices = @transform_7, window_bounds = array<i64: 16, 1024>}]} {
    %c0 = arith.constant 0 : index
    %c0_0 = arith.constant 0 : index
    %0 = vector.load %arg2[%c0, %c0_0] : memref<16x144xbf16, #tpu.memory_space<vmem>>, vector<16x144xbf16>
    %c0_1 = arith.constant 0 : index
    %c0_2 = arith.constant 0 : index
    %1 = vector.load %arg1[%c0_1, %c0_2] : memref<144x1024xbf16, #tpu.memory_space<vmem>>, vector<144x1024xbf16>
    %cst = arith.constant dense<0.000000e+00> : vector<16x1024xf32>
    %2 = tpu.matmul %0, %1, %cst {dimension_numbers = #tpu.dot_dimension_numbers<[1], [0], [0], [1], [0, 0, 1, 1], [], []>} : vector<16x144xbf16>, vector<144x1024xbf16>, vector<16x1024xf32> -> vector<16x1024xf32>
    %c0_3 = arith.constant 0 : index
    %c0_4 = arith.constant 0 : index
    %3 = vector.load %arg3[%c0_3, %c0_4] : memref<16x1xf32, #tpu.memory_space<vmem>>, vector<16x1xf32>
    %4 = vector.broadcast %3 : vector<16x1xf32> to vector<16x1024xf32>
    %5 = arith.addf %2, %4 : vector<16x1024xf32>
    %c0_5 = arith.constant 0 : index
    %c0_6 = arith.constant 0 : index
    %6 = vector.load %arg4[%c0_5, %c0_6] : memref<16x1024xbf16, #tpu.memory_space<vmem>>, vector<16x1024xbf16>
    %7 = arith.extf %6 : vector<16x1024xbf16> to vector<16x1024xf32>
    %8 = arith.addf %5, %7 : vector<16x1024xf32>
    %9 = arith.truncf %8 : vector<16x1024xf32> to vector<16x1024xbf16>
    %c0_7 = arith.constant 0 : index
    %c0_8 = arith.constant 0 : index
    %10 = vector.load %arg7[%c0_7, %c0_8] : memref<16x1024xbf16, #tpu.memory_space<vmem>>, vector<16x1024xbf16>
    tpu.vector_store %arg7[%c0_7, %c0_8], %9 {strides = array<i32>} : memref<16x1024xbf16, #tpu.memory_space<vmem>>, vector<16x1024xbf16>,
    %c0_9 = arith.constant 0 : index
    %c0_10 = arith.constant 0 : index
    %11 = vector.load %arg5[%c0_9, %c0_10] : memref<16x1xf32, #tpu.memory_space<vmem>>, vector<16x1xf32>
    %12 = vector.broadcast %11 : vector<16x1xf32> to vector<16x1024xf32>
    %13 = arith.mulf %8, %12 : vector<16x1024xf32>
    %c0_11 = arith.constant 0 : index
    %c0_12 = arith.constant 0 : index
    %14 = vector.load %arg6[%c0_11, %c0_12] : memref<16x1xf32, #tpu.memory_space<vmem>>, vector<16x1xf32>
    %15 = vector.broadcast %14 : vector<16x1xf32> to vector<16x1024xf32>
    %16 = arith.addf %13, %15 : vector<16x1024xf32>
    %cst_13 = arith.constant 0.000000e+00 : f32
    %17 = vector.broadcast %cst_13 : f32 to vector<16x1024xf32>
    %18 = arith.maximumf %16, %17 : vector<16x1024xf32>
    %19 = arith.truncf %18 : vector<16x1024xf32> to vector<16x1024xbf16>
    %c0_14 = arith.constant 0 : index
    %c0_15 = arith.constant 0 : index
    %20 = vector.load %arg8[%c0_14, %c0_15] : memref<16x1024xbf16, #tpu.memory_space<vmem>>, vector<16x1024xbf16>
    tpu.vector_store %arg8[%c0_14, %c0_15], %19 {strides = array<i32>} : memref<16x1024xbf16, #tpu.memory_space<vmem>>, vector<16x1024xbf16>,
    return
  }
  func.func @transform_0(%arg0: i32) -> (i32, i32) {
    %c0_i32 = arith.constant 0 : i32
    %c0_i32_0 = arith.constant 0 : i32
    return %c0_i32, %arg0 : i32, i32
  }
  func.func @transform_1(%arg0: i32) -> (i32, i32) {
    %c0_i32 = arith.constant 0 : i32
    %c0_i32_0 = arith.constant 0 : i32
    %c0_i32_1 = arith.constant 0 : i32
    return %c0_i32, %c0_i32_0 : i32, i32
  }
  func.func @transform_2(%arg0: i32) -> (i32, i32) {
    %c0_i32 = arith.constant 0 : i32
    %c0_i32_0 = arith.constant 0 : i32
    %c0_i32_1 = arith.constant 0 : i32
    return %c0_i32, %c0_i32_0 : i32, i32
  }
  func.func @transform_3(%arg0: i32) -> (i32, i32) {
    %c0_i32 = arith.constant 0 : i32
    %c0_i32_0 = arith.constant 0 : i32
    return %c0_i32, %arg0 : i32, i32
  }
  func.func @transform_4(%arg0: i32) -> (i32, i32) {
    %c0_i32 = arith.constant 0 : i32
    %c0_i32_0 = arith.constant 0 : i32
    %c0_i32_1 = arith.constant 0 : i32
    return %c0_i32, %c0_i32_0 : i32, i32
  }
  func.func @transform_5(%arg0: i32) -> (i32, i32) {
    %c0_i32 = arith.constant 0 : i32
    %c0_i32_0 = arith.constant 0 : i32
    %c0_i32_1 = arith.constant 0 : i32
    return %c0_i32, %c0_i32_0 : i32, i32
  }
  func.func @transform_6(%arg0: i32) -> (i32, i32) {
    %c0_i32 = arith.constant 0 : i32
    %c0_i32_0 = arith.constant 0 : i32
    return %c0_i32, %arg0 : i32, i32
  }
  func.func @transform_7(%arg0: i32) -> (i32, i32) {
    %c0_i32 = arith.constant 0 : i32
    %c0_i32_0 = arith.constant 0 : i32
    return %c0_i32, %arg0 : i32, i32
  }
}

module attributes {stable_mosaic.version = 11 : i64} {
  func.func @kernel(%arg0: i32, %arg1: memref<144x1024xbf16, #tpu.memory_space<vmem>>, %arg2: memref<32x144xbf16, #tpu.memory_space<vmem>>, %arg3: memref<32x1xf32, #tpu.memory_space<vmem>>, %arg4: memref<32x1xf32, #tpu.memory_space<vmem>>, %arg5: memref<32x1xf32, #tpu.memory_space<vmem>>, %arg6: memref<32x1024xbf16, #tpu.memory_space<vmem>>) attributes {dimension_semantics = [#tpu.dimension_semantics<parallel>], iteration_bounds = array<i64: 2>, scalar_prefetch = 0 : i64, scratch_operands = 0 : i64, tpu.core_type = #tpu.core_type<tc>, window_params = [{transform_indices = @transform_0, window_bounds = array<i64: 144, 1024>}, {pipeline_mode = #tpu.pipeline_mode<synchronous>, transform_indices = @transform_1, window_bounds = array<i64: 32, 144>}, {pipeline_mode = #tpu.pipeline_mode<synchronous>, transform_indices = @transform_2, window_bounds = array<i64: 32, 1>}, {pipeline_mode = #tpu.pipeline_mode<synchronous>, transform_indices = @transform_3, window_bounds = array<i64: 32, 1>}, {pipeline_mode = #tpu.pipeline_mode<synchronous>, transform_indices = @transform_4, window_bounds = array<i64: 32, 1>}, {transform_indices = @transform_5, window_bounds = array<i64: 32, 1024>}]} {
    %c0 = arith.constant 0 : index
    %c0_0 = arith.constant 0 : index
    %0 = vector.load %arg2[%c0, %c0_0] : memref<32x144xbf16, #tpu.memory_space<vmem>>, vector<32x144xbf16>
    %c0_1 = arith.constant 0 : index
    %c0_2 = arith.constant 0 : index
    %1 = vector.load %arg1[%c0_1, %c0_2] : memref<144x1024xbf16, #tpu.memory_space<vmem>>, vector<144x1024xbf16>
    %cst = arith.constant dense<0.000000e+00> : vector<32x1024xf32>
    %2 = tpu.matmul %0, %1, %cst {dimension_numbers = #tpu.dot_dimension_numbers<[1], [0], [0], [1], [0, 0, 1, 1], [], []>} : vector<32x144xbf16>, vector<144x1024xbf16>, vector<32x1024xf32> -> vector<32x1024xf32>
    %c0_3 = arith.constant 0 : index
    %c0_4 = arith.constant 0 : index
    %3 = vector.load %arg3[%c0_3, %c0_4] : memref<32x1xf32, #tpu.memory_space<vmem>>, vector<32x1xf32>
    %4 = vector.broadcast %3 : vector<32x1xf32> to vector<32x1024xf32>
    %5 = arith.addf %2, %4 : vector<32x1024xf32>
    %c0_5 = arith.constant 0 : index
    %c0_6 = arith.constant 0 : index
    %6 = vector.load %arg4[%c0_5, %c0_6] : memref<32x1xf32, #tpu.memory_space<vmem>>, vector<32x1xf32>
    %7 = vector.broadcast %6 : vector<32x1xf32> to vector<32x1024xf32>
    %8 = arith.mulf %5, %7 : vector<32x1024xf32>
    %c0_7 = arith.constant 0 : index
    %c0_8 = arith.constant 0 : index
    %9 = vector.load %arg5[%c0_7, %c0_8] : memref<32x1xf32, #tpu.memory_space<vmem>>, vector<32x1xf32>
    %10 = vector.broadcast %9 : vector<32x1xf32> to vector<32x1024xf32>
    %11 = arith.addf %8, %10 : vector<32x1024xf32>
    %cst_9 = arith.constant 0.000000e+00 : f32
    %12 = vector.broadcast %cst_9 : f32 to vector<32x1024xf32>
    %13 = arith.maximumf %11, %12 : vector<32x1024xf32>
    %14 = arith.truncf %13 : vector<32x1024xf32> to vector<32x1024xbf16>
    %c0_10 = arith.constant 0 : index
    %c0_11 = arith.constant 0 : index
    %15 = vector.load %arg6[%c0_10, %c0_11] : memref<32x1024xbf16, #tpu.memory_space<vmem>>, vector<32x1024xbf16>
    tpu.vector_store %arg6[%c0_10, %c0_11], %14 {strides = array<i32>} : memref<32x1024xbf16, #tpu.memory_space<vmem>>, vector<32x1024xbf16>,
    return
  }
  func.func @transform_0(%arg0: i32) -> (i32, i32) {
    %c0_i32 = arith.constant 0 : i32
    %c0_i32_0 = arith.constant 0 : i32
    return %c0_i32, %arg0 : i32, i32
  }
  func.func @transform_1(%arg0: i32) -> (i32, i32) {
    %c0_i32 = arith.constant 0 : i32
    %c0_i32_0 = arith.constant 0 : i32
    %c0_i32_1 = arith.constant 0 : i32
    return %c0_i32, %c0_i32_0 : i32, i32
  }
  func.func @transform_2(%arg0: i32) -> (i32, i32) {
    %c0_i32 = arith.constant 0 : i32
    %c0_i32_0 = arith.constant 0 : i32
    %c0_i32_1 = arith.constant 0 : i32
    return %c0_i32, %c0_i32_0 : i32, i32
  }
  func.func @transform_3(%arg0: i32) -> (i32, i32) {
    %c0_i32 = arith.constant 0 : i32
    %c0_i32_0 = arith.constant 0 : i32
    %c0_i32_1 = arith.constant 0 : i32
    return %c0_i32, %c0_i32_0 : i32, i32
  }
  func.func @transform_4(%arg0: i32) -> (i32, i32) {
    %c0_i32 = arith.constant 0 : i32
    %c0_i32_0 = arith.constant 0 : i32
    %c0_i32_1 = arith.constant 0 : i32
    return %c0_i32, %c0_i32_0 : i32, i32
  }
  func.func @transform_5(%arg0: i32) -> (i32, i32) {
    %c0_i32 = arith.constant 0 : i32
    %c0_i32_0 = arith.constant 0 : i32
    return %c0_i32, %arg0 : i32, i32
  }
}

module attributes {stable_mosaic.version = 11 : i64} {
  func.func @kernel(%arg0: i32, %arg1: memref<288x256xbf16, #tpu.memory_space<vmem>>, %arg2: memref<32x288xbf16, #tpu.memory_space<vmem>>, %arg3: memref<32x1xf32, #tpu.memory_space<vmem>>, %arg4: memref<16x256xbf16, #tpu.memory_space<vmem>>, %arg5: memref<32x16xbf16, #tpu.memory_space<vmem>>, %arg6: memref<32x1xf32, #tpu.memory_space<vmem>>, %arg7: memref<32x1xf32, #tpu.memory_space<vmem>>, %arg8: memref<32x1xf32, #tpu.memory_space<vmem>>, %arg9: memref<32x256xbf16, #tpu.memory_space<vmem>>, %arg10: memref<32x256xbf16, #tpu.memory_space<vmem>>) attributes {dimension_semantics = [#tpu.dimension_semantics<parallel>], iteration_bounds = array<i64: 2>, scalar_prefetch = 0 : i64, scratch_operands = 0 : i64, tpu.core_type = #tpu.core_type<tc>, window_params = [{transform_indices = @transform_0, window_bounds = array<i64: 288, 256>}, {pipeline_mode = #tpu.pipeline_mode<synchronous>, transform_indices = @transform_1, window_bounds = array<i64: 32, 288>}, {pipeline_mode = #tpu.pipeline_mode<synchronous>, transform_indices = @transform_2, window_bounds = array<i64: 32, 1>}, {transform_indices = @transform_3, window_bounds = array<i64: 16, 256>}, {pipeline_mode = #tpu.pipeline_mode<synchronous>, transform_indices = @transform_4, window_bounds = array<i64: 32, 16>}, {pipeline_mode = #tpu.pipeline_mode<synchronous>, transform_indices = @transform_5, window_bounds = array<i64: 32, 1>}, {pipeline_mode = #tpu.pipeline_mode<synchronous>, transform_indices = @transform_6, window_bounds = array<i64: 32, 1>}, {pipeline_mode = #tpu.pipeline_mode<synchronous>, transform_indices = @transform_7, window_bounds = array<i64: 32, 1>}, {transform_indices = @transform_8, window_bounds = array<i64: 32, 256>}, {transform_indices = @transform_9, window_bounds = array<i64: 32, 256>}]} {
    %c0 = arith.constant 0 : index
    %c0_0 = arith.constant 0 : index
    %0 = vector.load %arg2[%c0, %c0_0] : memref<32x288xbf16, #tpu.memory_space<vmem>>, vector<32x288xbf16>
    %c0_1 = arith.constant 0 : index
    %c0_2 = arith.constant 0 : index
    %1 = vector.load %arg1[%c0_1, %c0_2] : memref<288x256xbf16, #tpu.memory_space<vmem>>, vector<288x256xbf16>
    %cst = arith.constant dense<0.000000e+00> : vector<32x256xf32>
    %2 = tpu.matmul %0, %1, %cst {dimension_numbers = #tpu.dot_dimension_numbers<[1], [0], [0], [1], [0, 0, 1, 1], [], []>} : vector<32x288xbf16>, vector<288x256xbf16>, vector<32x256xf32> -> vector<32x256xf32>
    %c0_3 = arith.constant 0 : index
    %c0_4 = arith.constant 0 : index
    %3 = vector.load %arg3[%c0_3, %c0_4] : memref<32x1xf32, #tpu.memory_space<vmem>>, vector<32x1xf32>
    %4 = vector.broadcast %3 : vector<32x1xf32> to vector<32x256xf32>
    %5 = arith.addf %2, %4 : vector<32x256xf32>
    %c0_5 = arith.constant 0 : index
    %c0_6 = arith.constant 0 : index
    %6 = vector.load %arg5[%c0_5, %c0_6] : memref<32x16xbf16, #tpu.memory_space<vmem>>, vector<32x16xbf16>
    %c0_7 = arith.constant 0 : index
    %c0_8 = arith.constant 0 : index
    %7 = vector.load %arg4[%c0_7, %c0_8] : memref<16x256xbf16, #tpu.memory_space<vmem>>, vector<16x256xbf16>
    %cst_9 = arith.constant dense<0.000000e+00> : vector<32x256xf32>
    %8 = tpu.matmul %6, %7, %cst_9 {dimension_numbers = #tpu.dot_dimension_numbers<[1], [0], [0], [1], [0, 0, 1, 1], [], []>} : vector<32x16xbf16>, vector<16x256xbf16>, vector<32x256xf32> -> vector<32x256xf32>
    %9 = arith.addf %5, %8 : vector<32x256xf32>
    %c0_10 = arith.constant 0 : index
    %c0_11 = arith.constant 0 : index
    %10 = vector.load %arg6[%c0_10, %c0_11] : memref<32x1xf32, #tpu.memory_space<vmem>>, vector<32x1xf32>
    %11 = vector.broadcast %10 : vector<32x1xf32> to vector<32x256xf32>
    %12 = arith.addf %9, %11 : vector<32x256xf32>
    %13 = arith.truncf %12 : vector<32x256xf32> to vector<32x256xbf16>
    %c0_12 = arith.constant 0 : index
    %c0_13 = arith.constant 0 : index
    %14 = vector.load %arg9[%c0_12, %c0_13] : memref<32x256xbf16, #tpu.memory_space<vmem>>, vector<32x256xbf16>
    tpu.vector_store %arg9[%c0_12, %c0_13], %13 {strides = array<i32>} : memref<32x256xbf16, #tpu.memory_space<vmem>>, vector<32x256xbf16>,
    %c0_14 = arith.constant 0 : index
    %c0_15 = arith.constant 0 : index
    %15 = vector.load %arg7[%c0_14, %c0_15] : memref<32x1xf32, #tpu.memory_space<vmem>>, vector<32x1xf32>
    %16 = vector.broadcast %15 : vector<32x1xf32> to vector<32x256xf32>
    %17 = arith.mulf %12, %16 : vector<32x256xf32>
    %c0_16 = arith.constant 0 : index
    %c0_17 = arith.constant 0 : index
    %18 = vector.load %arg8[%c0_16, %c0_17] : memref<32x1xf32, #tpu.memory_space<vmem>>, vector<32x1xf32>
    %19 = vector.broadcast %18 : vector<32x1xf32> to vector<32x256xf32>
    %20 = arith.addf %17, %19 : vector<32x256xf32>
    %cst_18 = arith.constant 0.000000e+00 : f32
    %21 = vector.broadcast %cst_18 : f32 to vector<32x256xf32>
    %22 = arith.maximumf %20, %21 : vector<32x256xf32>
    %23 = arith.truncf %22 : vector<32x256xf32> to vector<32x256xbf16>
    %c0_19 = arith.constant 0 : index
    %c0_20 = arith.constant 0 : index
    %24 = vector.load %arg10[%c0_19, %c0_20] : memref<32x256xbf16, #tpu.memory_space<vmem>>, vector<32x256xbf16>
    tpu.vector_store %arg10[%c0_19, %c0_20], %23 {strides = array<i32>} : memref<32x256xbf16, #tpu.memory_space<vmem>>, vector<32x256xbf16>,
    return
  }
  func.func @transform_0(%arg0: i32) -> (i32, i32) {
    %c0_i32 = arith.constant 0 : i32
    %c0_i32_0 = arith.constant 0 : i32
    return %c0_i32, %arg0 : i32, i32
  }
  func.func @transform_1(%arg0: i32) -> (i32, i32) {
    %c0_i32 = arith.constant 0 : i32
    %c0_i32_0 = arith.constant 0 : i32
    %c0_i32_1 = arith.constant 0 : i32
    return %c0_i32, %c0_i32_0 : i32, i32
  }
  func.func @transform_2(%arg0: i32) -> (i32, i32) {
    %c0_i32 = arith.constant 0 : i32
    %c0_i32_0 = arith.constant 0 : i32
    %c0_i32_1 = arith.constant 0 : i32
    return %c0_i32, %c0_i32_0 : i32, i32
  }
  func.func @transform_3(%arg0: i32) -> (i32, i32) {
    %c0_i32 = arith.constant 0 : i32
    %c0_i32_0 = arith.constant 0 : i32
    return %c0_i32, %arg0 : i32, i32
  }
  func.func @transform_4(%arg0: i32) -> (i32, i32) {
    %c0_i32 = arith.constant 0 : i32
    %c0_i32_0 = arith.constant 0 : i32
    %c0_i32_1 = arith.constant 0 : i32
    return %c0_i32, %c0_i32_0 : i32, i32
  }
  func.func @transform_5(%arg0: i32) -> (i32, i32) {
    %c0_i32 = arith.constant 0 : i32
    %c0_i32_0 = arith.constant 0 : i32
    %c0_i32_1 = arith.constant 0 : i32
    return %c0_i32, %c0_i32_0 : i32, i32
  }
  func.func @transform_6(%arg0: i32) -> (i32, i32) {
    %c0_i32 = arith.constant 0 : i32
    %c0_i32_0 = arith.constant 0 : i32
    %c0_i32_1 = arith.constant 0 : i32
    return %c0_i32, %c0_i32_0 : i32, i32
  }
  func.func @transform_7(%arg0: i32) -> (i32, i32) {
    %c0_i32 = arith.constant 0 : i32
    %c0_i32_0 = arith.constant 0 : i32
    %c0_i32_1 = arith.constant 0 : i32
    return %c0_i32, %c0_i32_0 : i32, i32
  }
  func.func @transform_8(%arg0: i32) -> (i32, i32) {
    %c0_i32 = arith.constant 0 : i32
    %c0_i32_0 = arith.constant 0 : i32
    return %c0_i32, %arg0 : i32, i32
  }
  func.func @transform_9(%arg0: i32) -> (i32, i32) {
    %c0_i32 = arith.constant 0 : i32
    %c0_i32_0 = arith.constant 0 : i32
    return %c0_i32, %arg0 : i32, i32
  }
}

module attributes {stable_mosaic.version = 11 : i64} {
  func.func @kernel(%arg0: i32, %arg1: memref<288x256xbf16, #tpu.memory_space<vmem>>, %arg2: memref<64x288xbf16, #tpu.memory_space<vmem>>, %arg3: memref<64x1xf32, #tpu.memory_space<vmem>>, %arg4: memref<64x1xf32, #tpu.memory_space<vmem>>, %arg5: memref<64x1xf32, #tpu.memory_space<vmem>>, %arg6: memref<64x256xbf16, #tpu.memory_space<vmem>>) attributes {dimension_semantics = [#tpu.dimension_semantics<parallel>], iteration_bounds = array<i64: 2>, scalar_prefetch = 0 : i64, scratch_operands = 0 : i64, tpu.core_type = #tpu.core_type<tc>, window_params = [{transform_indices = @transform_0, window_bounds = array<i64: 288, 256>}, {pipeline_mode = #tpu.pipeline_mode<synchronous>, transform_indices = @transform_1, window_bounds = array<i64: 64, 288>}, {pipeline_mode = #tpu.pipeline_mode<synchronous>, transform_indices = @transform_2, window_bounds = array<i64: 64, 1>}, {pipeline_mode = #tpu.pipeline_mode<synchronous>, transform_indices = @transform_3, window_bounds = array<i64: 64, 1>}, {pipeline_mode = #tpu.pipeline_mode<synchronous>, transform_indices = @transform_4, window_bounds = array<i64: 64, 1>}, {transform_indices = @transform_5, window_bounds = array<i64: 64, 256>}]} {
    %c0 = arith.constant 0 : index
    %c0_0 = arith.constant 0 : index
    %0 = vector.load %arg2[%c0, %c0_0] : memref<64x288xbf16, #tpu.memory_space<vmem>>, vector<64x288xbf16>
    %c0_1 = arith.constant 0 : index
    %c0_2 = arith.constant 0 : index
    %1 = vector.load %arg1[%c0_1, %c0_2] : memref<288x256xbf16, #tpu.memory_space<vmem>>, vector<288x256xbf16>
    %cst = arith.constant dense<0.000000e+00> : vector<64x256xf32>
    %2 = tpu.matmul %0, %1, %cst {dimension_numbers = #tpu.dot_dimension_numbers<[1], [0], [0], [1], [0, 0, 1, 1], [], []>} : vector<64x288xbf16>, vector<288x256xbf16>, vector<64x256xf32> -> vector<64x256xf32>
    %c0_3 = arith.constant 0 : index
    %c0_4 = arith.constant 0 : index
    %3 = vector.load %arg3[%c0_3, %c0_4] : memref<64x1xf32, #tpu.memory_space<vmem>>, vector<64x1xf32>
    %4 = vector.broadcast %3 : vector<64x1xf32> to vector<64x256xf32>
    %5 = arith.addf %2, %4 : vector<64x256xf32>
    %c0_5 = arith.constant 0 : index
    %c0_6 = arith.constant 0 : index
    %6 = vector.load %arg4[%c0_5, %c0_6] : memref<64x1xf32, #tpu.memory_space<vmem>>, vector<64x1xf32>
    %7 = vector.broadcast %6 : vector<64x1xf32> to vector<64x256xf32>
    %8 = arith.mulf %5, %7 : vector<64x256xf32>
    %c0_7 = arith.constant 0 : index
    %c0_8 = arith.constant 0 : index
    %9 = vector.load %arg5[%c0_7, %c0_8] : memref<64x1xf32, #tpu.memory_space<vmem>>, vector<64x1xf32>
    %10 = vector.broadcast %9 : vector<64x1xf32> to vector<64x256xf32>
    %11 = arith.addf %8, %10 : vector<64x256xf32>
    %cst_9 = arith.constant 0.000000e+00 : f32
    %12 = vector.broadcast %cst_9 : f32 to vector<64x256xf32>
    %13 = arith.maximumf %11, %12 : vector<64x256xf32>
    %14 = arith.truncf %13 : vector<64x256xf32> to vector<64x256xbf16>
    %c0_10 = arith.constant 0 : index
    %c0_11 = arith.constant 0 : index
    %15 = vector.load %arg6[%c0_10, %c0_11] : memref<64x256xbf16, #tpu.memory_space<vmem>>, vector<64x256xbf16>
    tpu.vector_store %arg6[%c0_10, %c0_11], %14 {strides = array<i32>} : memref<64x256xbf16, #tpu.memory_space<vmem>>, vector<64x256xbf16>,
    return
  }
  func.func @transform_0(%arg0: i32) -> (i32, i32) {
    %c0_i32 = arith.constant 0 : i32
    %c0_i32_0 = arith.constant 0 : i32
    return %c0_i32, %arg0 : i32, i32
  }
  func.func @transform_1(%arg0: i32) -> (i32, i32) {
    %c0_i32 = arith.constant 0 : i32
    %c0_i32_0 = arith.constant 0 : i32
    %c0_i32_1 = arith.constant 0 : i32
    return %c0_i32, %c0_i32_0 : i32, i32
  }
  func.func @transform_2(%arg0: i32) -> (i32, i32) {
    %c0_i32 = arith.constant 0 : i32
    %c0_i32_0 = arith.constant 0 : i32
    %c0_i32_1 = arith.constant 0 : i32
    return %c0_i32, %c0_i32_0 : i32, i32
  }
  func.func @transform_3(%arg0: i32) -> (i32, i32) {
    %c0_i32 = arith.constant 0 : i32
    %c0_i32_0 = arith.constant 0 : i32
    %c0_i32_1 = arith.constant 0 : i32
    return %c0_i32, %c0_i32_0 : i32, i32
  }
  func.func @transform_4(%arg0: i32) -> (i32, i32) {
    %c0_i32 = arith.constant 0 : i32
    %c0_i32_0 = arith.constant 0 : i32
    %c0_i32_1 = arith.constant 0 : i32
    return %c0_i32, %c0_i32_0 : i32, i32
  }
  func.func @transform_5(%arg0: i32) -> (i32, i32) {
    %c0_i32 = arith.constant 0 : i32
    %c0_i32_0 = arith.constant 0 : i32
    return %c0_i32, %arg0 : i32, i32
  }
}

module attributes {stable_mosaic.version = 11 : i64} {
  func.func @kernel(%arg0: i32, %arg1: memref<576x128xbf16, #tpu.memory_space<vmem>>, %arg2: memref<64x576xbf16, #tpu.memory_space<vmem>>, %arg3: memref<64x1xf32, #tpu.memory_space<vmem>>, %arg4: memref<32x128xbf16, #tpu.memory_space<vmem>>, %arg5: memref<64x32xbf16, #tpu.memory_space<vmem>>, %arg6: memref<64x1xf32, #tpu.memory_space<vmem>>, %arg7: memref<64x1xf32, #tpu.memory_space<vmem>>, %arg8: memref<64x1xf32, #tpu.memory_space<vmem>>, %arg9: memref<64x128xbf16, #tpu.memory_space<vmem>>, %arg10: memref<64x128xbf16, #tpu.memory_space<vmem>>) attributes {dimension_semantics = [#tpu.dimension_semantics<parallel>], iteration_bounds = array<i64: 1>, scalar_prefetch = 0 : i64, scratch_operands = 0 : i64, tpu.core_type = #tpu.core_type<tc>, window_params = [{transform_indices = @transform_0, window_bounds = array<i64: 576, 128>}, {pipeline_mode = #tpu.pipeline_mode<synchronous>, transform_indices = @transform_1, window_bounds = array<i64: 64, 576>}, {pipeline_mode = #tpu.pipeline_mode<synchronous>, transform_indices = @transform_2, window_bounds = array<i64: 64, 1>}, {transform_indices = @transform_3, window_bounds = array<i64: 32, 128>}, {pipeline_mode = #tpu.pipeline_mode<synchronous>, transform_indices = @transform_4, window_bounds = array<i64: 64, 32>}, {pipeline_mode = #tpu.pipeline_mode<synchronous>, transform_indices = @transform_5, window_bounds = array<i64: 64, 1>}, {pipeline_mode = #tpu.pipeline_mode<synchronous>, transform_indices = @transform_6, window_bounds = array<i64: 64, 1>}, {pipeline_mode = #tpu.pipeline_mode<synchronous>, transform_indices = @transform_7, window_bounds = array<i64: 64, 1>}, {transform_indices = @transform_8, window_bounds = array<i64: 64, 128>}, {transform_indices = @transform_9, window_bounds = array<i64: 64, 128>}]} {
    %c0 = arith.constant 0 : index
    %c0_0 = arith.constant 0 : index
    %0 = vector.load %arg2[%c0, %c0_0] : memref<64x576xbf16, #tpu.memory_space<vmem>>, vector<64x576xbf16>
    %c0_1 = arith.constant 0 : index
    %c0_2 = arith.constant 0 : index
    %1 = vector.load %arg1[%c0_1, %c0_2] : memref<576x128xbf16, #tpu.memory_space<vmem>>, vector<576x128xbf16>
    %cst = arith.constant dense<0.000000e+00> : vector<64x128xf32>
    %2 = tpu.matmul %0, %1, %cst {dimension_numbers = #tpu.dot_dimension_numbers<[1], [0], [0], [1], [0, 0, 1, 1], [], []>} : vector<64x576xbf16>, vector<576x128xbf16>, vector<64x128xf32> -> vector<64x128xf32>
    %c0_3 = arith.constant 0 : index
    %c0_4 = arith.constant 0 : index
    %3 = vector.load %arg3[%c0_3, %c0_4] : memref<64x1xf32, #tpu.memory_space<vmem>>, vector<64x1xf32>
    %4 = vector.broadcast %3 : vector<64x1xf32> to vector<64x128xf32>
    %5 = arith.addf %2, %4 : vector<64x128xf32>
    %c0_5 = arith.constant 0 : index
    %c0_6 = arith.constant 0 : index
    %6 = vector.load %arg5[%c0_5, %c0_6] : memref<64x32xbf16, #tpu.memory_space<vmem>>, vector<64x32xbf16>
    %c0_7 = arith.constant 0 : index
    %c0_8 = arith.constant 0 : index
    %7 = vector.load %arg4[%c0_7, %c0_8] : memref<32x128xbf16, #tpu.memory_space<vmem>>, vector<32x128xbf16>
    %cst_9 = arith.constant dense<0.000000e+00> : vector<64x128xf32>
    %8 = tpu.matmul %6, %7, %cst_9 {dimension_numbers = #tpu.dot_dimension_numbers<[1], [0], [0], [1], [0, 0, 1, 1], [], []>} : vector<64x32xbf16>, vector<32x128xbf16>, vector<64x128xf32> -> vector<64x128xf32>
    %9 = arith.addf %5, %8 : vector<64x128xf32>
    %c0_10 = arith.constant 0 : index
    %c0_11 = arith.constant 0 : index
    %10 = vector.load %arg6[%c0_10, %c0_11] : memref<64x1xf32, #tpu.memory_space<vmem>>, vector<64x1xf32>
    %11 = vector.broadcast %10 : vector<64x1xf32> to vector<64x128xf32>
    %12 = arith.addf %9, %11 : vector<64x128xf32>
    %13 = arith.truncf %12 : vector<64x128xf32> to vector<64x128xbf16>
    %c0_12 = arith.constant 0 : index
    %c0_13 = arith.constant 0 : index
    %14 = vector.load %arg9[%c0_12, %c0_13] : memref<64x128xbf16, #tpu.memory_space<vmem>>, vector<64x128xbf16>
    tpu.vector_store %arg9[%c0_12, %c0_13], %13 {strides = array<i32>} : memref<64x128xbf16, #tpu.memory_space<vmem>>, vector<64x128xbf16>,
    %c0_14 = arith.constant 0 : index
    %c0_15 = arith.constant 0 : index
    %15 = vector.load %arg7[%c0_14, %c0_15] : memref<64x1xf32, #tpu.memory_space<vmem>>, vector<64x1xf32>
    %16 = vector.broadcast %15 : vector<64x1xf32> to vector<64x128xf32>
    %17 = arith.mulf %12, %16 : vector<64x128xf32>
    %c0_16 = arith.constant 0 : index
    %c0_17 = arith.constant 0 : index
    %18 = vector.load %arg8[%c0_16, %c0_17] : memref<64x1xf32, #tpu.memory_space<vmem>>, vector<64x1xf32>
    %19 = vector.broadcast %18 : vector<64x1xf32> to vector<64x128xf32>
    %20 = arith.addf %17, %19 : vector<64x128xf32>
    %cst_18 = arith.constant 0.000000e+00 : f32
    %21 = vector.broadcast %cst_18 : f32 to vector<64x128xf32>
    %22 = arith.maximumf %20, %21 : vector<64x128xf32>
    %23 = arith.truncf %22 : vector<64x128xf32> to vector<64x128xbf16>
    %c0_19 = arith.constant 0 : index
    %c0_20 = arith.constant 0 : index
    %24 = vector.load %arg10[%c0_19, %c0_20] : memref<64x128xbf16, #tpu.memory_space<vmem>>, vector<64x128xbf16>
    tpu.vector_store %arg10[%c0_19, %c0_20], %23 {strides = array<i32>} : memref<64x128xbf16, #tpu.memory_space<vmem>>, vector<64x128xbf16>,
    return
  }
  func.func @transform_0(%arg0: i32) -> (i32, i32) {
    %c0_i32 = arith.constant 0 : i32
    %c0_i32_0 = arith.constant 0 : i32
    return %c0_i32, %arg0 : i32, i32
  }
  func.func @transform_1(%arg0: i32) -> (i32, i32) {
    %c0_i32 = arith.constant 0 : i32
    %c0_i32_0 = arith.constant 0 : i32
    %c0_i32_1 = arith.constant 0 : i32
    return %c0_i32, %c0_i32_0 : i32, i32
  }
  func.func @transform_2(%arg0: i32) -> (i32, i32) {
    %c0_i32 = arith.constant 0 : i32
    %c0_i32_0 = arith.constant 0 : i32
    %c0_i32_1 = arith.constant 0 : i32
    return %c0_i32, %c0_i32_0 : i32, i32
  }
  func.func @transform_3(%arg0: i32) -> (i32, i32) {
    %c0_i32 = arith.constant 0 : i32
    %c0_i32_0 = arith.constant 0 : i32
    return %c0_i32, %arg0 : i32, i32
  }
  func.func @transform_4(%arg0: i32) -> (i32, i32) {
    %c0_i32 = arith.constant 0 : i32
    %c0_i32_0 = arith.constant 0 : i32
    %c0_i32_1 = arith.constant 0 : i32
    return %c0_i32, %c0_i32_0 : i32, i32
  }
  func.func @transform_5(%arg0: i32) -> (i32, i32) {
    %c0_i32 = arith.constant 0 : i32
    %c0_i32_0 = arith.constant 0 : i32
    %c0_i32_1 = arith.constant 0 : i32
    return %c0_i32, %c0_i32_0 : i32, i32
  }
  func.func @transform_6(%arg0: i32) -> (i32, i32) {
    %c0_i32 = arith.constant 0 : i32
    %c0_i32_0 = arith.constant 0 : i32
    %c0_i32_1 = arith.constant 0 : i32
    return %c0_i32, %c0_i32_0 : i32, i32
  }
  func.func @transform_7(%arg0: i32) -> (i32, i32) {
    %c0_i32 = arith.constant 0 : i32
    %c0_i32_0 = arith.constant 0 : i32
    %c0_i32_1 = arith.constant 0 : i32
    return %c0_i32, %c0_i32_0 : i32, i32
  }
  func.func @transform_8(%arg0: i32) -> (i32, i32) {
    %c0_i32 = arith.constant 0 : i32
    %c0_i32_0 = arith.constant 0 : i32
    return %c0_i32, %arg0 : i32, i32
  }
  func.func @transform_9(%arg0: i32) -> (i32, i32) {
    %c0_i32 = arith.constant 0 : i32
    %c0_i32_0 = arith.constant 0 : i32
    return %c0_i32, %arg0 : i32, i32
  }
}

module attributes {stable_mosaic.version = 11 : i64} {
  func.func @_gap_fc_kernel(%arg0: memref<64x128xbf16, #tpu.memory_space<vmem>>, %arg1: memref<128x2xbf16, #tpu.memory_space<vmem>>, %arg2: memref<10x64xf32, #tpu.memory_space<vmem>>, %arg3: memref<10x1xf32, #tpu.memory_space<vmem>>, %arg4: memref<10x2xf32, #tpu.memory_space<vmem>>) attributes {dimension_semantics = [], scalar_prefetch = 0 : i64, scratch_operands = 0 : i64, tpu.core_type = #tpu.core_type<tc>} {
    %c0 = arith.constant 0 : index
    %c0_0 = arith.constant 0 : index
    %0 = vector.load %arg0[%c0, %c0_0] : memref<64x128xbf16, #tpu.memory_space<vmem>>, vector<64x128xbf16>
    %c0_1 = arith.constant 0 : index
    %c0_2 = arith.constant 0 : index
    %1 = vector.load %arg1[%c0_1, %c0_2] : memref<128x2xbf16, #tpu.memory_space<vmem>>, vector<128x2xbf16>
    %cst = arith.constant dense<0.000000e+00> : vector<64x2xf32>
    %2 = tpu.matmul %0, %1, %cst {dimension_numbers = #tpu.dot_dimension_numbers<[1], [0], [0], [1], [0, 0, 1, 1], [], []>} : vector<64x128xbf16>, vector<128x2xbf16>, vector<64x2xf32> -> vector<64x2xf32>
    %c0_3 = arith.constant 0 : index
    %c0_4 = arith.constant 0 : index
    %3 = vector.load %arg2[%c0_3, %c0_4] : memref<10x64xf32, #tpu.memory_space<vmem>>, vector<10x64xf32>
    %cst_5 = arith.constant dense<0.000000e+00> : vector<10x2xf32>
    %4 = tpu.matmul %3, %2, %cst_5 {dimension_numbers = #tpu.dot_dimension_numbers<[1], [0], [0], [1], [0, 0, 1, 1], [], []>} : vector<10x64xf32>, vector<64x2xf32>, vector<10x2xf32> -> vector<10x2xf32>
    %c0_6 = arith.constant 0 : index
    %c0_7 = arith.constant 0 : index
    %5 = vector.load %arg3[%c0_6, %c0_7] : memref<10x1xf32, #tpu.memory_space<vmem>>, vector<10x1xf32>
    %6 = vector.broadcast %5 : vector<10x1xf32> to vector<10x2xf32>
    %7 = arith.addf %4, %6 : vector<10x2xf32>
    %c0_8 = arith.constant 0 : index
    %c0_9 = arith.constant 0 : index
    %8 = vector.load %arg4[%c0_8, %c0_9] : memref<10x2xf32, #tpu.memory_space<vmem>>, vector<10x2xf32>
    tpu.vector_store %arg4[%c0_8, %c0_9], %7 {strides = array<i32>} : memref<10x2xf32, #tpu.memory_space<vmem>>, vector<10x2xf32>,
    return
  }
}

</mosaic_0001>

<bundles_post_ra>
// kernel: wide_resnet_forward.8
= control target key start
LH: loop header
LB: loop body
LE: loop exit
PB: predicated region body
PF: predicated region fallthrough
CT: control target
= control target key end

     0   :  { %s1111_s21 = smov 0   ;;  %s1113_s22 = smov 0   ;;  %s1348_s0 = inlined_call_operand.vmem [shape: bf16[32,2048], index: 0, kind: input, shape index: {}]   ;;  %s1349_s1 = inlined_call_operand.vmem [shape: bf16[16,32], index: 1, kind: input, shape index: {}]   ;;  %s1350_s2 = inlined_call_operand.vmem [shape: f32[16,1], index: 2, kind: input, shape index: {}]   ;;  %s1351_s3 = inlined_call_operand.vmem [shape: f32[16,1], index: 3, kind: input, shape index: {}]   ;;  %s1352_s4 = inlined_call_operand.vmem [shape: f32[16,1], index: 4, kind: input, shape index: {}]   ;;  %s1353_s5 = inlined_call_operand.vmem [shape: bf16[16,2048], index: 5, kind: output, shape index: {0}]   ;;  %s1354_s6 = inlined_call_operand.vmem [shape: bf16[16,2048], index: 6, kind: output, shape index: {1}]  }
   0x1   :  { %s1115_s23 = smov 0  }
   0x2 LB: > { %s1127_s24 = sadd.s32 4294967295, %s1073_s23   ;;  %s1130_s25 = sadd.s32 1, %s1073_s23   ;;  %s1073_s23 = sphi %s1115_s23, %s1358_s23   ;;  %s1069_s22 = sphi %s1113_s22, %s1357_s22   ;;  %s1065_s21 = sphi %s1111_s21, %s1356_s21  }
   0x3   : > { %s21_s26 = ssub.s32 %s1073_s23, %s1130_s25  ;;  %s24_s27 = sadd.s32 1, %s1069_s22 }
   0x4   : > { %p22_p0 = scmp.eq.s32.totalorder %s21_s26, 0  ;;  %p31_p1 = scmp.ne.s32.totalorder %s1069_s22, %s1065_s21 }
   0x5   : > { %p32_p2 = scmp.eq.s32.totalorder %s1073_s23, 0  ;;  %p145_p3 = scmp.eq.s32.totalorder %s1127_s24, 1 }
   0x6   : > { %s1140_s28 = scalar_select %p22_p0, %s1069_s22, %s24_s27  }
   0x7   : > { %p33_p4 = por %p32_p2, %p31_p1  ;;  %p1142_p5 = por %p145_p3, %p31_p1 }
   0x8   : > { %p951_p6 = scmp.ge.s32.totalorder %s1073_s23, 2 }
   0xa   : > { %205 = sbr.rel (%p951_p6) target bundleno = 27 (0x1b), region = 32 }
   0xf   : > { %208 = sbr.rel (!%p33_p4) target bundleno = 27 (0x1b), region = 36  ;;  %s210_s30 = sand.u32 (%p33_p4), 1, %s1069_s22  }
  0x10   : > { %s1004_s7 = sshll.u32 (%p33_p4), %s1073_s23, 5  ;;  %s952_s8 = sshll.u32 (%p33_p4), %s210_s30, 7 }
  0x11   : > { %s1152_s11 = scalar_lea.vmem (%p33_p4), %s1348_s0, %s1004_s7  ;;  %s212_s12 = scalar_lea.vmem (%p33_p4), [#allocation2], %s952_s8 }
  0x12   : > { %v228_v0 = vld [vmem:[%s1152_s11] sm:$0xff] (%p33_p4)  ;;  %v230_v1 = vld [vmem:[%s1152_s11 + $0x8] sm:$0xff] (%p33_p4)  ;;  %v232_v2 = vld [vmem:[%s1152_s11 + $0x10] sm:$0xff] (%p33_p4) }
  0x13   : > { %229 = vst [vmem:[%s212_s12] sm:$0xff] (%p33_p4), %v228_v0  ;;  %231 = vst [vmem:[%s212_s12 + $0x8] sm:$0xff] (%p33_p4), %v230_v1  ;;  %v234_v3 = vld [vmem:[%s1152_s11 + $0x18] sm:$0xff] (%p33_p4)  ;;  %v236_v4 = vld [vmem:[%s1152_s11 + $0x40] sm:$0xff] (%p33_p4) }
  0x14   : > { %233 = vst [vmem:[%s212_s12 + $0x10] sm:$0xff] %v232_v2  ;;  %v238_v5 = vld [vmem:[%s1152_s11 + $0x48] sm:$0xff]  ;;  %235 = vst [vmem:[%s212_s12 + $0x18] sm:$0xff] %v234_v3  ;;  %v240_v6 = vld [vmem:[%s1152_s11 + $0x50] sm:$0xff] }
  0x15   : > { %237 = vst [vmem:[%s212_s12 + $0x20] sm:$0xff] %v236_v4  ;;  %239 = vst [vmem:[%s212_s12 + $0x28] sm:$0xff] %v238_v5  ;;  %v242_v7 = vld [vmem:[%s1152_s11 + $0x58] sm:$0xff]  ;;  %v244_v8 = vld [vmem:[%s1152_s11 + $0x80] sm:$0xff] }
  0x16   : > { %241 = vst [vmem:[%s212_s12 + $0x30] sm:$0xff] %v240_v6  ;;  %243 = vst [vmem:[%s212_s12 + $0x38] sm:$0xff] %v242_v7  ;;  %v246_v9 = vld [vmem:[%s1152_s11 + $0x88] sm:$0xff]  ;;  %v248_v10 = vld [vmem:[%s1152_s11 + $0x90] sm:$0xff] }
  0x17   : > { %245 = vst [vmem:[%s212_s12 + $0x40] sm:$0xff] %v244_v8  ;;  %v250_v11 = vld [vmem:[%s1152_s11 + $0x98] sm:$0xff]  ;;  %247 = vst [vmem:[%s212_s12 + $0x48] sm:$0xff] %v246_v9  ;;  %v252_v12 = vld [vmem:[%s1152_s11 + $0xc0] sm:$0xff] }
  0x18   : > { %249 = vst [vmem:[%s212_s12 + $0x50] sm:$0xff] %v248_v10  ;;  %251 = vst [vmem:[%s212_s12 + $0x58] sm:$0xff] %v250_v11  ;;  %v254_v13 = vld [vmem:[%s1152_s11 + $0xc8] sm:$0xff]  ;;  %v256_v14 = vld [vmem:[%s1152_s11 + $0xd0] sm:$0xff] }
  0x19   : > { %253 = vst [vmem:[%s212_s12 + $0x60] sm:$0xff] %v252_v12  ;;  %255 = vst [vmem:[%s212_s12 + $0x68] sm:$0xff] %v254_v13  ;;  %v258_v15 = vld [vmem:[%s1152_s11 + $0xd8] sm:$0xff] }
  0x1a   : > { %257 = vst [vmem:[%s212_s12 + $0x70] sm:$0xff] %v256_v14  ;;  %259 = vst [vmem:[%s212_s12 + $0x78] sm:$0xff] %v258_v15 }
  0x1b PF: > { %p955_p7 = scmp.ge.s32.totalorder %s1073_s23, 1  ;;  %p264_p8 = scmp.lt.s32.totalorder %s1073_s23, 3 }
  0x1d   : > { %p265_p9 = pnand %p955_p7, %p264_p8 }
  0x1e   : > { %s271_s13 = sand.u32 (!%p265_p9), 1, %s1065_s21  }
  0x1f   : > { %268 = sbr.rel (%p265_p9) target bundleno = 280 (0x118), region = 59  ;;  %s956_s14 = sshll.u32 (!%p265_p9), %s271_s13, 7 }
  0x20   : > { %s1185_s19 = scalar_lea.vmem (!%p265_p9), [#allocation2], %s956_s14  ;;  %s1235_s12 = sshll.u32 (!%p265_p9), %s271_s13, 6 }
  0x21   : > { %s1253_s21 = scalar_lea.vmem (!%p265_p9), [#allocation3], %s1235_s12  ;;  %s1274_s13 = scalar_lea.vmem (!%p265_p9), [#allocation4], %s1235_s12 }
  0x24   : > { %v1075_v16 = vmov 0   ;;  %v325_v17 = vld [vmem:[%s1350_s2] sm:$0xff]  ;;  %v318_v21 = vld [vmem:[%s1185_s19 + $0x48] sm:$0xff]  ;;  %v319_v33 = vld [vmem:[%s1185_s19 + $0x50] sm:$0xff]  ;;  %vm422_vm0 = vcmask 261120   ;;  %s1021_s14 = sshll.u32 (%p1142_p5), %s1127_s24, 5 }
  0x25   : > { %458 = vmatprep.mubr.bf16.mxu0 %v1075_v16  ;;  %501 = vmatprep.mubr.bf16.mxu1 %v1075_v16  ;;  %v654_v18 = vld [vmem:[%s1351_s3] sm:$0xff]  ;;  %v322_v23 = vld [vmem:[%s1185_s19 + $0x68] sm:$0xff]  ;;  %v323_v35 = vld [vmem:[%s1185_s19 + $0x70] sm:$0xff]  ;;  %s795_s17 = scalar_lea.vmem (%p1142_p5), %s1353_s5, %s1021_s14 }
  0x26   : > { %1048 = vset.pattern.permute.xlu0 %v1075_v16  ;;  %1049 = vset.pattern.permute.xlu1 %v1075_v16  ;;  %v317_v19 = vld [vmem:[%s1185_s19 + $0x40] sm:$0xff]  ;;  %v326_v27 = vld [vmem:[%s1350_s2 + $0x8] sm:$0xff]  ;;  %v971_v28 = vcombine.high %v318_v21, %v322_v23  ;;  %v970_v29 = vcombine.low %v318_v21, %v322_v23  ;;  %v320_v36 = vld [vmem:[%s1185_s19 + $0x58] sm:$0xff]  ;;  %v973_v41 = vcombine.high %v319_v33, %v323_v35 }
  0x27   : > { %v321_v20 = vld [vmem:[%s1185_s19 + $0x60] sm:$0xff]  ;;  %329 = vperm.xlu0 %1048, %v325_v17   ;;  %658 = vperm.xlu1 %1049, %v654_v18   ;;  %v310_v31 = vld [vmem:[%s1185_s19 + $0x8] sm:$0xff]  ;;  %v324_v37 = vld [vmem:[%s1185_s19 + $0x78] sm:$0xff]  ;;  %v972_v49 = vcombine.low %v319_v33, %v323_v35 }
  0x28   : > { %v969_v22 = vcombine.high %v317_v19, %v321_v20  ;;  %v968_v24 = vcombine.low %v317_v19, %v321_v20  ;;  %v309_v25 = vld [vmem:[%s1185_s19] sm:$0xff]  ;;  %v314_v32 = vld [vmem:[%s1185_s19 + $0x28] sm:$0xff]  ;;  %481 = vmatprep.subr.bf16.mxu1 %v971_v28  ;;  %v975_v43 = vcombine.high %v320_v36, %v324_v37  ;;  %v311_v44 = vld [vmem:[%s1185_s19 + $0x10] sm:$0xff]  ;;  %v974_v51 = vcombine.low %v320_v36, %v324_v37 }
  0x29   : > { %v313_v26 = vld [vmem:[%s1185_s19 + $0x20] sm:$0xff]  ;;  %v963_v34 = vcombine.high %v310_v31, %v314_v32  ;;  %v655_v39 = vld [vmem:[%s1351_s3 + $0x8] sm:$0xff]  ;;  %482 = vmatpush1.bf16.msra.mxu1 %v970_v29  ;;  %v962_v40 = vcombine.low %v310_v31, %v314_v32  ;;  %v315_v45 = vld [vmem:[%s1185_s19 + $0x30] sm:$0xff] }
  0x2a   : > { %v961_v30 = vcombine.high %v309_v25, %v313_v26  ;;  %438 = vmatprep.subr.bf16.mxu0 %v969_v22  ;;  %v960_v38 = vcombine.low %v309_v25, %v313_v26  ;;  %v1050_v42 = vld [vmem:[%s1349_s1] sm:$0xff]   ;;  %v312_v46 = vld [vmem:[%s1185_s19 + $0x18] sm:$0xff]  ;;  %v683_v50 = vld [vmem:[%s1352_s4 + $0x8] sm:$0xff]  ;;  %v965_v52 = vcombine.high %v311_v44, %v315_v45  ;;  %v964_v54 = vcombine.low %v311_v44, %v315_v45 }
  0x2b   : > { %439 = vmatpush1.bf16.msra.mxu0 %v968_v24  ;;  %483 = vmatprep.subr.bf16.mxu1 %v963_v34  ;;  %v316_v47 = vld [vmem:[%s1185_s19 + $0x38] sm:$0xff]  ;;  %v682_v48 = vld [vmem:[%s1352_s4] sm:$0xff] }
  0x2c   : > { %440 = vmatprep.subr.bf16.mxu0 %v961_v30  ;;  %334 = vperm.xlu0 %1048, %v326_v27   ;;  %v967_v53 = vcombine.high %v312_v46, %v316_v47  ;;  %v966_v55 = vcombine.low %v312_v46, %v316_v47 }
  0x2d   : > { %663 = vperm.xlu1 %1049, %v655_v39   ;;  %484 = vmatpush1.bf16.msra.mxu1 %v962_v40 }
  0x2e   : > { %567 = vmatprep.subr.bf16.mxu1 %v975_v43 }
  0x2f   : > { %441 = vmatpush1.bf16.msra.mxu0 %v960_v38 }
  0x30   : > { %524 = vmatprep.subr.bf16.mxu0 %v973_v41  ;;  %686 = vperm.xlu0 %1048, %v682_v48  }
  0x31   : > { %691 = vperm.xlu1 %1049, %v683_v50   ;;  %977 = vmatmul.mubr.msk.bf16.vlgmr.msra.gmra.mxu1 %vm422_vm0, %v1050_v42 }
  0x32   : > { %976 = vmatmul.mubr.msk.bf16.vlgmr.msra.gmra.mxu0 %vm422_vm0, %v1050_v42  ;;  %568 = vmatpush1.bf16.msra.mxu1 %v974_v51 }
  0x33   : > { %525 = vmatpush1.bf16.msra.mxu0 %v972_v49  ;;  %569 = vmatprep.subr.bf16.mxu1 %v967_v53 }
  0x34   : > { %526 = vmatprep.subr.bf16.mxu0 %v965_v52  ;;  %544 = vmatprep.mubr.bf16.mxu0 %v1075_v16 }
  0x35   : > { %587 = vmatprep.mubr.bf16.mxu1 %v1075_v16 }
  0x36   : > { %570 = vmatpush1.bf16.msra.mxu1 %v966_v55 }
  0x37   : > { %527 = vmatpush1.bf16.msra.mxu0 %v964_v54 }
  0x39   : > { %979 = vmatmul.mubr.msk.bf16.vlgmr.msra.gmra.mxu1 %vm422_vm0, %v1050_v42 }
  0x3a   : > { %978 = vmatmul.mubr.msk.bf16.vlgmr.msra.gmra.mxu0 %vm422_vm0, %v1050_v42 }
  0xa2   : > { %v1224_v56 = vpop.permute.xlu0 %329  ;;  %v1226_v57 = vpop.permute.xlu1 %658 }
  0xa7   : > { %v1228_v58 = vpop.permute.xlu0 %334 }
  0xa8   : > { %v1230_v60 = vpop.permute.xlu1 %663 }
  0xab   : > { %v1238_v1 = vpop.permute.xlu0 %686 }
  0xac   : > { %v1250_v18 = vpop.permute.xlu1 %691 }
  0xf1   : > { %v503_v62 = vpop.f32.mrf.mxu1 }
  0xf2   : > { %v460_v59 = vpop.f32.mrf.mxu0  ;;  %v504_v63 = vadd.f32 %v503_v62, %v1224_v56 }
  0xf3   : > { %v461_v61 = vadd.f32 %v460_v59, %v1224_v56  ;;  %v505_v4 = vpop.f32.mrf.mxu1 }
  0xf4   : > { %v462_v0 = vpop.f32.mrf.mxu0  ;;  %v668_v5 = vmul.f32 %v1226_v57, %v504_v63  ;;  %v506_v6 = vadd.f32 %v505_v4, %v1224_v56 }
  0xf5   : > { %v666_v2 = vmul.f32 %v1226_v57, %v461_v61  ;;  %v463_v3 = vadd.f32 %v462_v0, %v1224_v56  ;;  %v507_v11 = vpop.f32.mrf.mxu1 }
  0xf6   : > { %v464_v7 = vpop.f32.mrf.mxu0  ;;  %v1006_v13 = vpack.c.bf16 %v506_v6, %v504_v63  ;;  %v669_v14 = vmul.f32 %v1226_v57, %v506_v6  ;;  %v508_v15 = vadd.f32 %v507_v11, %v1228_v58  ;;  %v696_v16 = vadd.f32 %v1238_v1, %v668_v5 }
  0xf7   : > { %v1005_v8 = vpack.c.bf16 %v463_v3, %v461_v61  ;;  %v667_v9 = vmul.f32 %v1226_v57, %v463_v3  ;;  %v465_v10 = vadd.f32 %v464_v7, %v1228_v58  ;;  %v694_v12 = vadd.f32 %v1238_v1, %v666_v2  ;;  %v509_v23 = vpop.f32.mrf.mxu1 }
  0xf8   : > { %v466_v17 = vpop.f32.mrf.mxu0  ;;  %647 = vst [vmem:[%s1253_s21 + $0x8] sm:$0xff] %v1006_v13  ;;  %v676_v24 = vmul.f32 %v1230_v60, %v508_v15  ;;  %v697_v25 = vadd.f32 %v1238_v1, %v669_v14  ;;  %v712_v26 = vmax.f32 %v696_v16, 0.0  ;;  %v510_v27 = vadd.f32 %v509_v23, %v1228_v58 }
  0xf9   : > { %646 = vst [vmem:[%s1253_s21] sm:$0xff] %v1005_v8  ;;  %v674_v19 = vmul.f32 %v1230_v60, %v465_v10  ;;  %v695_v20 = vadd.f32 %v1238_v1, %v667_v9  ;;  %v710_v21 = vmax.f32 %v694_v12, 0.0  ;;  %v467_v22 = vadd.f32 %v466_v17, %v1228_v58  ;;  %v589_v33 = vpop.f32.mrf.mxu1 }
  0xfa   : > { %v546_v28 = vpop.f32.mrf.mxu0  ;;  %v713_v34 = vmax.f32 %v697_v25, 0.0  ;;  %v1010_v35 = vpack.c.bf16 %v510_v27, %v508_v15  ;;  %v677_v36 = vmul.f32 %v1230_v60, %v510_v27  ;;  %v704_v37 = vadd.f32 %v1250_v18, %v676_v24 }
  0xfb   : > { %v711_v29 = vmax.f32 %v695_v20, 0.0  ;;  %v1009_v30 = vpack.c.bf16 %v467_v22, %v465_v10  ;;  %v675_v31 = vmul.f32 %v1230_v60, %v467_v22  ;;  %v702_v32 = vadd.f32 %v1250_v18, %v674_v19  ;;  %v591_v43 = vpop.f32.mrf.mxu1 }
  0xfc   : > { %v548_v38 = vpop.f32.mrf.mxu0  ;;  %v547_v42 = vadd.f32 %v546_v28, %v1224_v56  ;;  %v1014_v44 = vpack.c.bf16 %v713_v34, %v712_v26  ;;  %651 = vst [vmem:[%s1253_s21 + $0x28] sm:$0xff] %v1010_v35  ;;  %v705_v45 = vadd.f32 %v1250_v18, %v677_v36  ;;  %v720_v46 = vmax.f32 %v704_v37, 0.0 }
  0xfd   : > { %v1013_v39 = vpack.c.bf16 %v711_v29, %v710_v21  ;;  %650 = vst [vmem:[%s1253_s21 + $0x20] sm:$0xff] %v1009_v30  ;;  %v703_v40 = vadd.f32 %v1250_v18, %v675_v31  ;;  %v718_v41 = vmax.f32 %v702_v32, 0.0  ;;  %v590_v47 = vadd.f32 %v589_v33, %v1224_v56  ;;  %v593_v53 = vpop.f32.mrf.mxu1 }
  0xfe   : > { %v550_v48 = vpop.f32.mrf.mxu0  ;;  %v670_v50 = vmul.f32 %v1226_v57, %v547_v42  ;;  %v549_v51 = vadd.f32 %v548_v38, %v1224_v56  ;;  %v592_v52 = vadd.f32 %v591_v43, %v1224_v56  ;;  %775 = vst [vmem:[%s1274_s13 + $0x8] sm:$0xff] %v1014_v44  ;;  %v721_v54 = vmax.f32 %v705_v45, 0.0 }
  0xff   : > { %774 = vst [vmem:[%s1274_s13] sm:$0xff] %v1013_v39  ;;  %v719_v49 = vmax.f32 %v703_v40, 0.0  ;;  %v672_v55 = vmul.f32 %v1226_v57, %v590_v47  ;;  %v551_v59 = vadd.f32 %v550_v48, %v1228_v58  ;;  %v594_v61 = vadd.f32 %v593_v53, %v1228_v58  ;;  %v595_v3 = vpop.f32.mrf.mxu1 }
 0x100   : > { %v698_v63 = vadd.f32 %v1238_v1, %v670_v50  ;;  %v1007_v0 = vpack.c.bf16 %v549_v51, %v547_v42  ;;  %v671_v2 = vmul.f32 %v1226_v57, %v549_v51  ;;  %v552_v56 = vpop.f32.mrf.mxu0  ;;  %v1018_v4 = vpack.c.bf16 %v721_v54, %v720_v46 }
 0x101   : > { %v1017_v62 = vpack.c.bf16 %v719_v49, %v718_v41  ;;  %v700_v5 = vadd.f32 %v1238_v1, %v672_v55  ;;  %v1008_v6 = vpack.c.bf16 %v592_v52, %v590_v47  ;;  %v673_v7 = vmul.f32 %v1226_v57, %v592_v52 }
 0x102   : > { %648 = vst [vmem:[%s1253_s21 + $0x10] sm:$0xff] %v1007_v0  ;;  %v699_v8 = vadd.f32 %v1238_v1, %v671_v2  ;;  %v678_v9 = vmul.f32 %v1230_v60, %v551_v59  ;;  %v680_v10 = vmul.f32 %v1230_v60, %v594_v61  ;;  %779 = vst [vmem:[%s1274_s13 + $0x28] sm:$0xff] %v1018_v4  ;;  %v714_v57 = vmax.f32 %v698_v63, 0.0 }
 0x103   : > { %778 = vst [vmem:[%s1274_s13 + $0x20] sm:$0xff] %v1017_v62  ;;  %649 = vst [vmem:[%s1253_s21 + $0x18] sm:$0xff] %v1008_v6  ;;  %v701_v11 = vadd.f32 %v1238_v1, %v673_v7  ;;  %v553_v12 = vadd.f32 %v552_v56, %v1228_v58  ;;  %v596_v13 = vadd.f32 %v595_v3, %v1228_v58  ;;  %v716_v14 = vmax.f32 %v700_v5, 0.0  ;;  %v818_v35 = vld [vmem:[%s1253_s21 + $0x28] sm:$0xff] (%p1142_p5) }
 0x104   : > { %v715_v15 = vmax.f32 %v699_v8, 0.0  ;;  %v706_v16 = vadd.f32 %v1250_v18, %v678_v9  ;;  %v708_v1 = vadd.f32 %v1250_v18, %v680_v10  ;;  %v816_v34 = vld [vmem:[%s1253_s21 + $0x20] sm:$0xff] (%p1142_p5)  ;;  %819 = vst [vmem:[%s795_s17 + $0x48] sm:$0xff] (%p1142_p5), %v818_v35 }
 0x105   : > { %v717_v17 = vmax.f32 %v701_v11, 0.0  ;;  %v1011_v19 = vpack.c.bf16 %v553_v12, %v551_v59  ;;  %v679_v20 = vmul.f32 %v1230_v60, %v553_v12  ;;  %v1012_v21 = vpack.c.bf16 %v596_v13, %v594_v61  ;;  %817 = vst [vmem:[%s795_s17 + $0x40] sm:$0xff] (%p1142_p5), %v816_v34 }
 0x106   : > { %v1015_v22 = vpack.c.bf16 %v715_v15, %v714_v57  ;;  %v681_v23 = vmul.f32 %v1230_v60, %v596_v13  ;;  %v722_v26 = vmax.f32 %v706_v16, 0.0  ;;  %v724_v28 = vmax.f32 %v708_v1, 0.0  ;;  %v808_v60 = vld [vmem:[%s1253_s21] sm:$0xff] (%p1142_p5) }
 0x107   : > { %v1016_v58 = vpack.c.bf16 %v717_v17, %v716_v14  ;;  %652 = vst [vmem:[%s1253_s21 + $0x30] sm:$0xff] %v1011_v19  ;;  %v707_v24 = vadd.f32 %v1250_v18, %v679_v20  ;;  %653 = vst [vmem:[%s1253_s21 + $0x38] sm:$0xff] %v1012_v21 }
 0x108   : > { %776 = vst [vmem:[%s1274_s13 + $0x10] sm:$0xff] %v1015_v22  ;;  %v709_v25 = vadd.f32 %v1250_v18, %v681_v23  ;;  %v810_v18 = vld [vmem:[%s1253_s21 + $0x8] sm:$0xff] (%p1142_p5)  ;;  %809 = vst [vmem:[%s795_s17] sm:$0xff] (%p1142_p5), %v808_v60 }
 0x109   : > { %777 = vst [vmem:[%s1274_s13 + $0x18] sm:$0xff] %v1016_v58  ;;  %v723_v27 = vmax.f32 %v707_v24, 0.0  ;;  %v812_v32 = vld [vmem:[%s1253_s21 + $0x10] sm:$0xff] (%p1142_p5)  ;;  %811 = vst [vmem:[%s795_s17 + $0x8] sm:$0xff] (%p1142_p5), %v810_v18 }
 0x10a   : > { %v725_v29 = vmax.f32 %v709_v25, 0.0  ;;  %792 = sbr.rel (!%p1142_p5) target bundleno = 272 (0x110), region = 67  ;;  %v814_v33 = vld [vmem:[%s1253_s21 + $0x18] sm:$0xff] (%p1142_p5)  ;;  %813 = vst [vmem:[%s795_s17 + $0x10] sm:$0xff] (%p1142_p5), %v812_v32 }
 0x10b   : > { %v1019_v30 = vpack.c.bf16 %v723_v27, %v722_v26  ;;  %815 = vst [vmem:[%s795_s17 + $0x18] sm:$0xff] (%p1142_p5), %v814_v33 }
 0x10c   : > { %v1020_v31 = vpack.c.bf16 %v725_v29, %v724_v28 }
 0x10d   : > { %780 = vst [vmem:[%s1274_s13 + $0x30] sm:$0xff] %v1019_v30 }
 0x10e   : > { %781 = vst [vmem:[%s1274_s13 + $0x38] sm:$0xff] %v1020_v31  ;;  %v820_v36 = vld [vmem:[%s1253_s21 + $0x30] sm:$0xff] (%p1142_p5)  ;;  %v822_v37 = vld [vmem:[%s1253_s21 + $0x38] sm:$0xff] (%p1142_p5) }
 0x10f   : > { %821 = vst [vmem:[%s795_s17 + $0x50] sm:$0xff] %v820_v36  ;;  %823 = vst [vmem:[%s795_s17 + $0x58] sm:$0xff] %v822_v37 }
 0x110 PF: > { %829 = sbr.rel (!%p1142_p5) target bundleno = 280 (0x118), region = 90  ;;  %s1022_s18 = sshll.u32 (%p1142_p5), %s1127_s24, 5  ;;  %v845_v38 = vld [vmem:[%s1274_s13] sm:$0xff] (%p1142_p5)  ;;  %v847_v39 = vld [vmem:[%s1274_s13 + $0x8] sm:$0xff] (%p1142_p5)  ;;  %v849_v40 = vld [vmem:[%s1274_s13 + $0x10] sm:$0xff] (%p1142_p5) }
 0x111   : > { %s832_s23 = scalar_lea.vmem (%p1142_p5), %s1354_s6, %s1022_s18  ;;  %v851_v41 = vld [vmem:[%s1274_s13 + $0x18] sm:$0xff] (%p1142_p5)  ;;  %v853_v42 = vld [vmem:[%s1274_s13 + $0x20] sm:$0xff] (%p1142_p5)  ;;  %v855_v43 = vld [vmem:[%s1274_s13 + $0x28] sm:$0xff] (%p1142_p5) }
 0x112   : > { %846 = vst [vmem:[%s832_s23] sm:$0xff] (%p1142_p5), %v845_v38  ;;  %848 = vst [vmem:[%s832_s23 + $0x8] sm:$0xff] (%p1142_p5), %v847_v39 }
 0x113   : > { %850 = vst [vmem:[%s832_s23 + $0x10] sm:$0xff] (%p1142_p5), %v849_v40  ;;  %852 = vst [vmem:[%s832_s23 + $0x18] sm:$0xff] (%p1142_p5), %v851_v41 }
 0x114   : > { %854 = vst [vmem:[%s832_s23 + $0x40] sm:$0xff] (%p1142_p5), %v853_v42  ;;  %856 = vst [vmem:[%s832_s23 + $0x48] sm:$0xff] (%p1142_p5), %v855_v43 }
 0x115   : > { %v857_v44 = vld [vmem:[%s1274_s13 + $0x30] sm:$0xff] }
 0x116   : > { %v859_v45 = vld [vmem:[%s1274_s13 + $0x38] sm:$0xff]  ;;  %858 = vst [vmem:[%s832_s23 + $0x50] sm:$0xff] %v857_v44 }
 0x117   : > { %860 = vst [vmem:[%s832_s23 + $0x58] sm:$0xff] %v859_v45 }
 0x118 PF: > { %p14_p10 = scmp.ge.s32.totalorder %s1130_s25, 4   ;;  %s1356_s21 = smov %s1069_s22 }
 0x119   : > { %s1357_s22 = smov %s1140_s28  ;;  %s1358_s23 = smov %s1130_s25 }
 0x11a   :  { %16 = sbr.rel (!%p14_p10) target bundleno = 2 (0x2), region = 156 }

// kernel: wide_resnet_forward.9
= control target key start
LH: loop header
LB: loop body
LE: loop exit
PB: predicated region body
PF: predicated region fallthrough
CT: control target
= control target key end

     0   :  { %s1436_s18 = smov 0   ;;  %s1438_s19 = smov 0   ;;  %s1840_s0 = inlined_call_operand.vmem [shape: bf16[144,2048], index: 0, kind: input, shape index: {}]   ;;  %s1841_s1 = inlined_call_operand.vmem [shape: bf16[16,144], index: 1, kind: input, shape index: {}]   ;;  %s1842_s2 = inlined_call_operand.vmem [shape: f32[16,1], index: 2, kind: input, shape index: {}]   ;;  %s1843_s3 = inlined_call_operand.vmem [shape: f32[16,1], index: 3, kind: input, shape index: {}]   ;;  %s1844_s4 = inlined_call_operand.vmem [shape: f32[16,1], index: 4, kind: input, shape index: {}]   ;;  %s1845_s5 = inlined_call_operand.vmem [shape: bf16[16,2048], index: 5, kind: output, shape index: {}]  }
   0x1   :  { %s1440_s20 = smov 0  }
   0x2 LB: > { %s1240_s21 = sadd.s32 4294967295, %s1403_s20   ;;  %s1453_s22 = sadd.s32 1, %s1403_s20   ;;  %s1403_s20 = sphi %s1440_s20, %s1849_s20   ;;  %s1399_s19 = sphi %s1438_s19, %s1848_s19   ;;  %s1395_s18 = sphi %s1436_s18, %s1847_s18  }
   0x3   : > { %s19_s23 = ssub.s32 %s1403_s20, %s1453_s22  ;;  %s22_s24 = sadd.s32 1, %s1399_s19 }
   0x4   : > { %p20_p0 = scmp.eq.s32.totalorder %s19_s23, 0  ;;  %p29_p1 = scmp.ne.s32.totalorder %s1399_s19, %s1395_s18 }
   0x5   : > { %p30_p2 = scmp.eq.s32.totalorder %s1403_s20, 0  ;;  %p143_p3 = scmp.eq.s32.totalorder %s1240_s21, 1 }
   0x6   : > { %s1464_s25 = scalar_select %p20_p0, %s1399_s19, %s22_s24  }
   0x7   : > { %p31_p4 = por %p30_p2, %p29_p1  ;;  %p1466_p5 = por %p143_p3, %p29_p1 }
   0x8   : > { %p1243_p6 = scmp.ge.s32.totalorder %s1403_s20, 2 }
   0xa   : > { %177 = sbr.rel (%p1243_p6) target bundleno = 56 (0x38), region = 32 }
   0xf   : > { %180 = sbr.rel (!%p31_p4) target bundleno = 56 (0x38), region = 36  ;;  %s182_s27 = sand.u32 (%p31_p4), 1, %s1399_s19  }
  0x10   : > { %s1339_s28 = sshll.u32 (%p31_p4), %s1403_s20, 5  ;;  %s1349_s29 = smul.u32 (%p31_p4), 576, %s182_s27 }
  0x11   : > { %s1476_s7 = scalar_lea.vmem (%p31_p4), %s1840_s0, %s1339_s28 }
  0x12   : > { %v200_v0 = vld [vmem:[%s1476_s7] sm:$0xff] (%p31_p4)  ;;  %v202_v1 = vld [vmem:[%s1476_s7 + $0x8] sm:$0xff] (%p31_p4)  ;;  %v204_v2 = vld [vmem:[%s1476_s7 + $0x10] sm:$0xff] (%p31_p4)  ;;  %s1484_s8 = scalar_lea.vmem (%p31_p4), [#allocation2], %s1349_s29 }
  0x13   : > { %v206_v3 = vld [vmem:[%s1476_s7 + $0x18] sm:$0xff] (%p31_p4)  ;;  %v208_v4 = vld [vmem:[%s1476_s7 + $0x40] sm:$0xff] (%p31_p4)  ;;  %v210_v5 = vld [vmem:[%s1476_s7 + $0x48] sm:$0xff] (%p31_p4)  ;;  %201 = vst [vmem:[%s1484_s8] sm:$0xff] (%p31_p4), %v200_v0 }
  0x14   : > { %203 = vst [vmem:[%s1484_s8 + $0x8] sm:$0xff] %v202_v1  ;;  %205 = vst [vmem:[%s1484_s8 + $0x10] sm:$0xff] %v204_v2  ;;  %v212_v6 = vld [vmem:[%s1476_s7 + $0x50] sm:$0xff]  ;;  %v214_v7 = vld [vmem:[%s1476_s7 + $0x58] sm:$0xff] }
  0x15   : > { %207 = vst [vmem:[%s1484_s8 + $0x18] sm:$0xff] %v206_v3  ;;  %209 = vst [vmem:[%s1484_s8 + $0x20] sm:$0xff] %v208_v4  ;;  %v216_v8 = vld [vmem:[%s1476_s7 + $0x80] sm:$0xff]  ;;  %v218_v9 = vld [vmem:[%s1476_s7 + $0x88] sm:$0xff] }
  0x16   : > { %211 = vst [vmem:[%s1484_s8 + $0x28] sm:$0xff] %v210_v5  ;;  %213 = vst [vmem:[%s1484_s8 + $0x30] sm:$0xff] %v212_v6  ;;  %v220_v10 = vld [vmem:[%s1476_s7 + $0x90] sm:$0xff]  ;;  %v222_v11 = vld [vmem:[%s1476_s7 + $0x98] sm:$0xff] }
  0x17   : > { %215 = vst [vmem:[%s1484_s8 + $0x38] sm:$0xff] %v214_v7  ;;  %217 = vst [vmem:[%s1484_s8 + $0x40] sm:$0xff] %v216_v8  ;;  %v224_v12 = vld [vmem:[%s1476_s7 + $0xc0] sm:$0xff]  ;;  %v226_v13 = vld [vmem:[%s1476_s7 + $0xc8] sm:$0xff] }
  0x18   : > { %219 = vst [vmem:[%s1484_s8 + $0x48] sm:$0xff] %v218_v9  ;;  %221 = vst [vmem:[%s1484_s8 + $0x50] sm:$0xff] %v220_v10  ;;  %v228_v14 = vld [vmem:[%s1476_s7 + $0xd0] sm:$0xff]  ;;  %v230_v15 = vld [vmem:[%s1476_s7 + $0xd8] sm:$0xff] }
  0x19   : > { %223 = vst [vmem:[%s1484_s8 + $0x58] sm:$0xff] %v222_v11  ;;  %225 = vst [vmem:[%s1484_s8 + $0x60] sm:$0xff] %v224_v12  ;;  %v232_v16 = vld [vmem:[%s1476_s7 + $0x100] sm:$0xff]  ;;  %v234_v17 = vld [vmem:[%s1476_s7 + $0x108] sm:$0xff] }
  0x1a   : > { %227 = vst [vmem:[%s1484_s8 + $0x68] sm:$0xff] %v226_v13  ;;  %229 = vst [vmem:[%s1484_s8 + $0x70] sm:$0xff] %v228_v14  ;;  %v236_v18 = vld [vmem:[%s1476_s7 + $0x110] sm:$0xff]  ;;  %v238_v19 = vld [vmem:[%s1476_s7 + $0x118] sm:$0xff] }
  0x1b   : > { %231 = vst [vmem:[%s1484_s8 + $0x78] sm:$0xff] %v230_v15  ;;  %233 = vst [vmem:[%s1484_s8 + $0x80] sm:$0xff] %v232_v16  ;;  %v240_v20 = vld [vmem:[%s1476_s7 + $0x140] sm:$0xff]  ;;  %v242_v21 = vld [vmem:[%s1476_s7 + $0x148] sm:$0xff] }
  0x1c   : > { %235 = vst [vmem:[%s1484_s8 + $0x88] sm:$0xff] %v234_v17  ;;  %237 = vst [vmem:[%s1484_s8 + $0x90] sm:$0xff] %v236_v18  ;;  %v244_v22 = vld [vmem:[%s1476_s7 + $0x150] sm:$0xff]  ;;  %v246_v23 = vld [vmem:[%s1476_s7 + $0x158] sm:$0xff] }
  0x1d   : > { %239 = vst [vmem:[%s1484_s8 + $0x98] sm:$0xff] %v238_v19  ;;  %241 = vst [vmem:[%s1484_s8 + $0xa0] sm:$0xff] %v240_v20  ;;  %v248_v24 = vld [vmem:[%s1476_s7 + $0x180] sm:$0xff]  ;;  %v250_v25 = vld [vmem:[%s1476_s7 + $0x188] sm:$0xff] }
  0x1e   : > { %243 = vst [vmem:[%s1484_s8 + $0xa8] sm:$0xff] %v242_v21  ;;  %245 = vst [vmem:[%s1484_s8 + $0xb0] sm:$0xff] %v244_v22  ;;  %v252_v26 = vld [vmem:[%s1476_s7 + $0x190] sm:$0xff]  ;;  %v254_v27 = vld [vmem:[%s1476_s7 + $0x198] sm:$0xff] }
  0x1f   : > { %247 = vst [vmem:[%s1484_s8 + $0xb8] sm:$0xff] %v246_v23  ;;  %249 = vst [vmem:[%s1484_s8 + $0xc0] sm:$0xff] %v248_v24  ;;  %v256_v28 = vld [vmem:[%s1476_s7 + $0x1c0] sm:$0xff]  ;;  %v258_v29 = vld [vmem:[%s1476_s7 + $0x1c8] sm:$0xff] }
  0x20   : > { %251 = vst [vmem:[%s1484_s8 + $0xc8] sm:$0xff] %v250_v25  ;;  %253 = vst [vmem:[%s1484_s8 + $0xd0] sm:$0xff] %v252_v26  ;;  %v260_v30 = vld [vmem:[%s1476_s7 + $0x1d0] sm:$0xff]  ;;  %v262_v31 = vld [vmem:[%s1476_s7 + $0x1d8] sm:$0xff] }
  0x21   : > { %255 = vst [vmem:[%s1484_s8 + $0xd8] sm:$0xff] %v254_v27  ;;  %257 = vst [vmem:[%s1484_s8 + $0xe0] sm:$0xff] %v256_v28  ;;  %v264_v32 = vld [vmem:[%s1476_s7 + $0x200] sm:$0xff]  ;;  %v266_v33 = vld [vmem:[%s1476_s7 + $0x208] sm:$0xff] }
  0x22   : > { %259 = vst [vmem:[%s1484_s8 + $0xe8] sm:$0xff] %v258_v29  ;;  %261 = vst [vmem:[%s1484_s8 + $0xf0] sm:$0xff] %v260_v30  ;;  %v268_v34 = vld [vmem:[%s1476_s7 + $0x210] sm:$0xff]  ;;  %v270_v35 = vld [vmem:[%s1476_s7 + $0x218] sm:$0xff] }
  0x23   : > { %263 = vst [vmem:[%s1484_s8 + $0xf8] sm:$0xff] %v262_v31  ;;  %265 = vst [vmem:[%s1484_s8 + $0x100] sm:$0xff] %v264_v32  ;;  %v272_v36 = vld [vmem:[%s1476_s7 + $0x240] sm:$0xff]  ;;  %v274_v37 = vld [vmem:[%s1476_s7 + $0x248] sm:$0xff] }
  0x24   : > { %267 = vst [vmem:[%s1484_s8 + $0x108] sm:$0xff] %v266_v33  ;;  %269 = vst [vmem:[%s1484_s8 + $0x110] sm:$0xff] %v268_v34  ;;  %v276_v38 = vld [vmem:[%s1476_s7 + $0x250] sm:$0xff]  ;;  %v278_v39 = vld [vmem:[%s1476_s7 + $0x258] sm:$0xff] }
  0x25   : > { %271 = vst [vmem:[%s1484_s8 + $0x118] sm:$0xff] %v270_v35  ;;  %273 = vst [vmem:[%s1484_s8 + $0x120] sm:$0xff] %v272_v36  ;;  %v280_v40 = vld [vmem:[%s1476_s7 + $0x280] sm:$0xff]  ;;  %v282_v41 = vld [vmem:[%s1476_s7 + $0x288] sm:$0xff] }
  0x26   : > { %275 = vst [vmem:[%s1484_s8 + $0x128] sm:$0xff] %v274_v37  ;;  %277 = vst [vmem:[%s1484_s8 + $0x130] sm:$0xff] %v276_v38  ;;  %v284_v42 = vld [vmem:[%s1476_s7 + $0x290] sm:$0xff]  ;;  %v286_v43 = vld [vmem:[%s1476_s7 + $0x298] sm:$0xff] }
  0x27   : > { %279 = vst [vmem:[%s1484_s8 + $0x138] sm:$0xff] %v278_v39  ;;  %281 = vst [vmem:[%s1484_s8 + $0x140] sm:$0xff] %v280_v40  ;;  %v288_v44 = vld [vmem:[%s1476_s7 + $0x2c0] sm:$0xff]  ;;  %v290_v45 = vld [vmem:[%s1476_s7 + $0x2c8] sm:$0xff] }
  0x28   : > { %283 = vst [vmem:[%s1484_s8 + $0x148] sm:$0xff] %v282_v41  ;;  %285 = vst [vmem:[%s1484_s8 + $0x150] sm:$0xff] %v284_v42  ;;  %v292_v46 = vld [vmem:[%s1476_s7 + $0x2d0] sm:$0xff]  ;;  %v294_v47 = vld [vmem:[%s1476_s7 + $0x2d8] sm:$0xff] }
  0x29   : > { %287 = vst [vmem:[%s1484_s8 + $0x158] sm:$0xff] %v286_v43  ;;  %289 = vst [vmem:[%s1484_s8 + $0x160] sm:$0xff] %v288_v44  ;;  %v296_v48 = vld [vmem:[%s1476_s7 + $0x300] sm:$0xff]  ;;  %v298_v49 = vld [vmem:[%s1476_s7 + $0x308] sm:$0xff] }
  0x2a   : > { %291 = vst [vmem:[%s1484_s8 + $0x168] sm:$0xff] %v290_v45  ;;  %293 = vst [vmem:[%s1484_s8 + $0x170] sm:$0xff] %v292_v46  ;;  %v300_v50 = vld [vmem:[%s1476_s7 + $0x310] sm:$0xff]  ;;  %v302_v51 = vld [vmem:[%s1476_s7 + $0x318] sm:$0xff] }
  0x2b   : > { %295 = vst [vmem:[%s1484_s8 + $0x178] sm:$0xff] %v294_v47  ;;  %297 = vst [vmem:[%s1484_s8 + $0x180] sm:$0xff] %v296_v48  ;;  %v304_v52 = vld [vmem:[%s1476_s7 + $0x340] sm:$0xff]  ;;  %v306_v53 = vld [vmem:[%s1476_s7 + $0x348] sm:$0xff] }
  0x2c   : > { %299 = vst [vmem:[%s1484_s8 + $0x188] sm:$0xff] %v298_v49  ;;  %301 = vst [vmem:[%s1484_s8 + $0x190] sm:$0xff] %v300_v50  ;;  %v308_v54 = vld [vmem:[%s1476_s7 + $0x350] sm:$0xff]  ;;  %v310_v55 = vld [vmem:[%s1476_s7 + $0x358] sm:$0xff] }
  0x2d   : > { %303 = vst [vmem:[%s1484_s8 + $0x198] sm:$0xff] %v302_v51  ;;  %305 = vst [vmem:[%s1484_s8 + $0x1a0] sm:$0xff] %v304_v52  ;;  %v312_v56 = vld [vmem:[%s1476_s7 + $0x380] sm:$0xff]  ;;  %v314_v57 = vld [vmem:[%s1476_s7 + $0x388] sm:$0xff] }
  0x2e   : > { %307 = vst [vmem:[%s1484_s8 + $0x1a8] sm:$0xff] %v306_v53  ;;  %309 = vst [vmem:[%s1484_s8 + $0x1b0] sm:$0xff] %v308_v54  ;;  %v316_v58 = vld [vmem:[%s1476_s7 + $0x390] sm:$0xff]  ;;  %v318_v59 = vld [vmem:[%s1476_s7 + $0x398] sm:$0xff] }
  0x2f   : > { %311 = vst [vmem:[%s1484_s8 + $0x1b8] sm:$0xff] %v310_v55  ;;  %313 = vst [vmem:[%s1484_s8 + $0x1c0] sm:$0xff] %v312_v56  ;;  %v320_v60 = vld [vmem:[%s1476_s7 + $0x3c0] sm:$0xff]  ;;  %v322_v61 = vld [vmem:[%s1476_s7 + $0x3c8] sm:$0xff] }
  0x30   : > { %315 = vst [vmem:[%s1484_s8 + $0x1c8] sm:$0xff] %v314_v57  ;;  %317 = vst [vmem:[%s1484_s8 + $0x1d0] sm:$0xff] %v316_v58  ;;  %v324_v62 = vld [vmem:[%s1476_s7 + $0x3d0] sm:$0xff]  ;;  %v326_v63 = vld [vmem:[%s1476_s7 + $0x3d8] sm:$0xff] }
  0x31   : > { %319 = vst [vmem:[%s1484_s8 + $0x1d8] sm:$0xff] %v318_v59  ;;  %321 = vst [vmem:[%s1484_s8 + $0x1e0] sm:$0xff] %v320_v60  ;;  %v328_v0 = vld [vmem:[%s1476_s7 + $0x400] sm:$0xff]  ;;  %v330_v1 = vld [vmem:[%s1476_s7 + $0x408] sm:$0xff] }
  0x32   : > { %323 = vst [vmem:[%s1484_s8 + $0x1e8] sm:$0xff] %v322_v61  ;;  %325 = vst [vmem:[%s1484_s8 + $0x1f0] sm:$0xff] %v324_v62  ;;  %v332_v2 = vld [vmem:[%s1476_s7 + $0x410] sm:$0xff]  ;;  %v334_v3 = vld [vmem:[%s1476_s7 + $0x418] sm:$0xff] }
  0x33   : > { %327 = vst [vmem:[%s1484_s8 + $0x1f8] sm:$0xff] %v326_v63  ;;  %329 = vst [vmem:[%s1484_s8 + $0x200] sm:$0xff] %v328_v0  ;;  %v336_v4 = vld [vmem:[%s1476_s7 + $0x440] sm:$0xff]  ;;  %v338_v5 = vld [vmem:[%s1476_s7 + $0x448] sm:$0xff] }
  0x34   : > { %331 = vst [vmem:[%s1484_s8 + $0x208] sm:$0xff] %v330_v1  ;;  %333 = vst [vmem:[%s1484_s8 + $0x210] sm:$0xff] %v332_v2  ;;  %v340_v6 = vld [vmem:[%s1476_s7 + $0x450] sm:$0xff]  ;;  %v342_v7 = vld [vmem:[%s1476_s7 + $0x458] sm:$0xff] }
  0x35   : > { %335 = vst [vmem:[%s1484_s8 + $0x218] sm:$0xff] %v334_v3  ;;  %337 = vst [vmem:[%s1484_s8 + $0x220] sm:$0xff] %v336_v4 }
  0x36   : > { %339 = vst [vmem:[%s1484_s8 + $0x228] sm:$0xff] %v338_v5  ;;  %341 = vst [vmem:[%s1484_s8 + $0x230] sm:$0xff] %v340_v6 }
  0x37   : > { %343 = vst [vmem:[%s1484_s8 + $0x238] sm:$0xff] %v342_v7 }
  0x38 PF: > { %p1246_p7 = scmp.ge.s32.totalorder %s1403_s20, 1  ;;  %p348_p8 = scmp.lt.s32.totalorder %s1403_s20, 3 }
  0x3a   : > { %p349_p9 = pnand %p1246_p7, %p348_p8 }
  0x3b   : > { %s355_s9 = sand.u32 (!%p349_p9), 1, %s1395_s18  }
  0x3c   : > { %352 = sbr.rel (%p349_p9) target bundleno = 362 (0x16a), region = 59  ;;  %s1247_s11 = sshll.u32 (!%p349_p9), %s355_s9, 6 }
  0x3d   : > { %s1350_s12 = smul.u32 (!%p349_p9), 576, %s355_s9  ;;  %s1781_s18 = scalar_lea.vmem (!%p349_p9), [#allocation3], %s1247_s11 }
  0x3f   : > { %s1644_s17 = scalar_lea.vmem (!%p349_p9), [#allocation2], %s1350_s12 }
  0x41   : > { %v1630_v8 = vld [vmem:[%s1841_s1 + $0x4] ss:$8 sps:$4 sm:$0xff]   ;;  %vm839_vm0 = vcmask 130048   ;;  %v1405_v11 = vmov 0   ;;  %s1348_s9 = sshll.u32 (%p1466_p5), %s1240_s21, 5 }
  0x42   : > { %v458_v9 = vld [vmem:[%s1842_s2] sm:$0xff]  ;;  %1322 = vmatprep.mubr.msk.bf16.mxu0 %vm839_vm0, %v1630_v8  ;;  %1323 = vmatprep.mubr.msk.bf16.mxu1 %vm839_vm0, %v1630_v8  ;;  %v443_v14 = vld [vmem:[%s1644_s17 + $0x1c8] sm:$0xff]  ;;  %s1152_s14 = scalar_lea.vmem (%p1466_p5), %s1845_s5, %s1348_s9 }
  0x43   : > { %v1015_v10 = vld [vmem:[%s1843_s3] sm:$0xff]  ;;  %1376 = vset.pattern.permute.xlu0 %v1405_v11  ;;  %1377 = vset.pattern.permute.xlu1 %v1405_v11  ;;  %v447_v16 = vld [vmem:[%s1644_s17 + $0x1e8] sm:$0xff] }
  0x44   : > { %v442_v12 = vld [vmem:[%s1644_s17 + $0x1c0] sm:$0xff]  ;;  %462 = vperm.xlu0 %1376, %v458_v9   ;;  %1019 = vperm.xlu1 %1377, %v1015_v10   ;;  %v1309_v20 = vcombine.high %v443_v14, %v447_v16  ;;  %v1308_v21 = vcombine.low %v443_v14, %v447_v16  ;;  %v435_v23 = vld [vmem:[%s1644_s17 + $0x188] sm:$0xff] }
  0x45   : > { %v446_v13 = vld [vmem:[%s1644_s17 + $0x1e0] sm:$0xff]  ;;  %v439_v24 = vld [vmem:[%s1644_s17 + $0x1a8] sm:$0xff] }
  0x46   : > { %v1307_v15 = vcombine.high %v442_v12, %v446_v13  ;;  %v1306_v17 = vcombine.low %v442_v12, %v446_v13  ;;  %v434_v18 = vld [vmem:[%s1644_s17 + $0x180] sm:$0xff]  ;;  %v1301_v26 = vcombine.high %v435_v23, %v439_v24  ;;  %v427_v28 = vld [vmem:[%s1644_s17 + $0x148] sm:$0xff]  ;;  %886 = vmatprep.subr.bf16.mxu1 %v1309_v20  ;;  %v1300_v33 = vcombine.low %v435_v23, %v439_v24  ;;  %v444_v23 = vld [vmem:[%s1644_s17 + $0x1d0] sm:$0xff] }
  0x47   : > { %v438_v19 = vld [vmem:[%s1644_s17 + $0x1a0] sm:$0xff]  ;;  %v431_v29 = vld [vmem:[%s1644_s17 + $0x168] sm:$0xff]  ;;  %887 = vmatpush1.bf16.msra.mxu1 %v1308_v21  ;;  %v448_v24 = vld [vmem:[%s1644_s17 + $0x1f0] sm:$0xff] }
  0x48   : > { %v1299_v22 = vcombine.high %v434_v18, %v438_v19  ;;  %v426_v25 = vld [vmem:[%s1644_s17 + $0x140] sm:$0xff]  ;;  %843 = vmatprep.subr.bf16.mxu0 %v1307_v15  ;;  %v1298_v30 = vcombine.low %v434_v18, %v438_v19  ;;  %v459_v31 = vld [vmem:[%s1842_s2 + $0x8] sm:$0xff]  ;;  %888 = vmatprep.subr.bf16.mxu1 %v1301_v26  ;;  %v1293_v35 = vcombine.high %v427_v28, %v431_v29  ;;  %v449_v26 = vld [vmem:[%s1644_s17 + $0x1f8] sm:$0xff] }
  0x49   : > { %v430_v27 = vld [vmem:[%s1644_s17 + $0x160] sm:$0xff]  ;;  %844 = vmatpush1.bf16.msra.mxu0 %v1306_v17  ;;  %v1016_v32 = vld [vmem:[%s1843_s3 + $0x8] sm:$0xff]  ;;  %467 = vperm.xlu0 %1376, %v459_v31   ;;  %v1292_v43 = vcombine.low %v427_v28, %v431_v29  ;;  %v1311_v29 = vcombine.high %v444_v23, %v448_v24  ;;  %v436_v31 = vld [vmem:[%s1644_s17 + $0x190] sm:$0xff] }
  0x4a   : > { %845 = vmatprep.subr.bf16.mxu0 %v1299_v22  ;;  %v1291_v34 = vcombine.high %v426_v25, %v430_v27  ;;  %v418_v36 = vld [vmem:[%s1644_s17 + $0x100] sm:$0xff]  ;;  %v419_v38 = vld [vmem:[%s1644_s17 + $0x108] sm:$0xff]  ;;  %1024 = vperm.xlu1 %1377, %v1016_v32   ;;  %v1290_v40 = vcombine.low %v426_v25, %v430_v27  ;;  %v445_v25 = vld [vmem:[%s1644_s17 + $0x1d8] sm:$0xff] }
  0x4b   : > { %v422_v37 = vld [vmem:[%s1644_s17 + $0x120] sm:$0xff]  ;;  %v423_v39 = vld [vmem:[%s1644_s17 + $0x128] sm:$0xff]  ;;  %889 = vmatpush1.bf16.msra.mxu1 %v1300_v33  ;;  %v440_v32 = vld [vmem:[%s1644_s17 + $0x1b0] sm:$0xff] }
  0x4c   : > { %v1043_v41 = vld [vmem:[%s1844_s4] sm:$0xff]  ;;  %v1044_v42 = vld [vmem:[%s1844_s4 + $0x8] sm:$0xff]  ;;  %v1283_v44 = vcombine.high %v418_v36, %v422_v37  ;;  %890 = vmatprep.subr.bf16.mxu1 %v1293_v35  ;;  %v1285_v45 = vcombine.high %v419_v38, %v423_v39  ;;  %v1282_v50 = vcombine.low %v418_v36, %v422_v37  ;;  %v1284_v51 = vcombine.low %v419_v38, %v423_v39  ;;  %v441_v35 = vld [vmem:[%s1644_s17 + $0x1b8] sm:$0xff] }
  0x4d   : > { %846 = vmatpush1.bf16.msra.mxu0 %v1298_v30  ;;  %v410_v46 = vld [vmem:[%s1644_s17 + $0xc0] sm:$0xff]  ;;  %v411_v48 = vld [vmem:[%s1644_s17 + $0xc8] sm:$0xff]  ;;  %1047 = vperm.xlu0 %1376, %v1043_v41   ;;  %v1313_v30 = vcombine.high %v445_v25, %v449_v26  ;;  %v1310_v36 = vcombine.low %v444_v23, %v448_v24  ;;  %v1312_v37 = vcombine.low %v445_v25, %v449_v26  ;;  %v432_v41 = vld [vmem:[%s1644_s17 + $0x170] sm:$0xff] }
  0x4e   : > { %847 = vmatprep.subr.bf16.mxu0 %v1291_v34  ;;  %v414_v47 = vld [vmem:[%s1644_s17 + $0xe0] sm:$0xff]  ;;  %v415_v49 = vld [vmem:[%s1644_s17 + $0xe8] sm:$0xff]  ;;  %1052 = vperm.xlu1 %1377, %v1044_v42   ;;  %v437_v34 = vld [vmem:[%s1644_s17 + $0x198] sm:$0xff]  ;;  %v1303_v38 = vcombine.high %v436_v31, %v440_v32 }
  0x4f   : > { %891 = vmatpush1.bf16.msra.mxu1 %v1292_v43  ;;  %v1275_v52 = vcombine.high %v410_v46, %v414_v47  ;;  %v1277_v53 = vcombine.high %v411_v48, %v415_v49  ;;  %v402_v54 = vld [vmem:[%s1644_s17 + $0x80] sm:$0xff]  ;;  %v403_v56 = vld [vmem:[%s1644_s17 + $0x88] sm:$0xff]  ;;  %v1274_v58 = vcombine.low %v410_v46, %v414_v47  ;;  %v1276_v59 = vcombine.low %v411_v48, %v415_v49  ;;  %v429_v42 = vld [vmem:[%s1644_s17 + $0x158] sm:$0xff] }
  0x50   : > { %892 = vmatprep.subr.bf16.mxu1 %v1285_v45  ;;  %v406_v55 = vld [vmem:[%s1644_s17 + $0xa0] sm:$0xff]  ;;  %v407_v57 = vld [vmem:[%s1644_s17 + $0xa8] sm:$0xff]  ;;  %v1305_v39 = vcombine.high %v437_v34, %v441_v35  ;;  %v433_v43 = vld [vmem:[%s1644_s17 + $0x178] sm:$0xff]  ;;  %v1304_v45 = vcombine.low %v437_v34, %v441_v35 }
  0x51   : > { %848 = vmatpush1.bf16.msra.mxu0 %v1290_v40  ;;  %v1267_v60 = vcombine.high %v402_v54, %v406_v55  ;;  %v1269_v61 = vcombine.high %v403_v56, %v407_v57  ;;  %v394_v62 = vld [vmem:[%s1644_s17 + $0x40] sm:$0xff]  ;;  %v395_v0 = vld [vmem:[%s1644_s17 + $0x48] sm:$0xff]  ;;  %v1266_v2 = vcombine.low %v402_v54, %v406_v55  ;;  %v1268_v3 = vcombine.low %v403_v56, %v407_v57  ;;  %v428_v40 = vld [vmem:[%s1644_s17 + $0x150] sm:$0xff] }
  0x52   : > { %849 = vmatprep.subr.bf16.mxu0 %v1283_v44  ;;  %v398_v63 = vld [vmem:[%s1644_s17 + $0x60] sm:$0xff]  ;;  %v399_v1 = vld [vmem:[%s1644_s17 + $0x68] sm:$0xff]  ;;  %v1302_v44 = vcombine.low %v436_v31, %v440_v32  ;;  %v1295_v46 = vcombine.high %v428_v40, %v432_v41  ;;  %v1297_v47 = vcombine.high %v429_v42, %v433_v43  ;;  %v420_v48 = vld [vmem:[%s1644_s17 + $0x110] sm:$0xff] }
  0x53   : > { %893 = vmatpush1.bf16.msra.mxu1 %v1284_v51  ;;  %v1259_v4 = vcombine.high %v394_v62, %v398_v63  ;;  %v1261_v5 = vcombine.high %v395_v0, %v399_v1  ;;  %v386_v6 = vld [vmem:[%s1644_s17] sm:$0xff]  ;;  %v387_v9 = vld [vmem:[%s1644_s17 + $0x8] sm:$0xff]  ;;  %v1258_v11 = vcombine.low %v394_v62, %v398_v63  ;;  %v1260_v12 = vcombine.low %v395_v0, %v399_v1  ;;  %v424_v49 = vld [vmem:[%s1644_s17 + $0x130] sm:$0xff] }
  0x54   : > { %894 = vmatprep.subr.bf16.mxu1 %v1277_v53  ;;  %v390_v7 = vld [vmem:[%s1644_s17 + $0x20] sm:$0xff]  ;;  %v391_v10 = vld [vmem:[%s1644_s17 + $0x28] sm:$0xff]  ;;  %v425_v51 = vld [vmem:[%s1644_s17 + $0x138] sm:$0xff]  ;;  %v1296_v53 = vcombine.low %v429_v42, %v433_v43  ;;  %v1287_v54 = vcombine.high %v420_v48, %v424_v49 }
  0x55   : > { %850 = vmatpush1.bf16.msra.mxu0 %v1282_v50  ;;  %v1251_v13 = vcombine.high %v386_v6, %v390_v7  ;;  %v1253_v14 = vcombine.high %v387_v9, %v391_v10  ;;  %v450_v15 = vld [vmem:[%s1644_s17 + $0x200] sm:$0xff]  ;;  %v451_v17 = vld [vmem:[%s1644_s17 + $0x208] sm:$0xff]  ;;  %v1250_v19 = vcombine.low %v386_v6, %v390_v7  ;;  %v1252_v20 = vcombine.low %v387_v9, %v391_v10  ;;  %v421_v50 = vld [vmem:[%s1644_s17 + $0x118] sm:$0xff] }
  0x56   : > { %851 = vmatprep.subr.bf16.mxu0 %v1275_v52  ;;  %v454_v16 = vld [vmem:[%s1644_s17 + $0x220] sm:$0xff]  ;;  %v455_v18 = vld [vmem:[%s1644_s17 + $0x228] sm:$0xff]  ;;  %v1294_v52 = vcombine.low %v428_v40, %v432_v41  ;;  %v1289_v55 = vcombine.high %v421_v50, %v425_v51  ;;  %v412_v56 = vld [vmem:[%s1644_s17 + $0xd0] sm:$0xff] }
  0x57   : > { %895 = vmatpush1.bf16.msra.mxu1 %v1276_v59  ;;  %v1315_v21 = vcombine.high %v450_v15, %v454_v16  ;;  %v1317_v22 = vcombine.high %v451_v17, %v455_v18  ;;  %v1314_v27 = vcombine.low %v450_v15, %v454_v16  ;;  %v1316_v28 = vcombine.low %v451_v17, %v455_v18  ;;  %v1703_v33 = vld [vmem:[%s1841_s1] ss:$8 sps:$4 sm:$0xff]   ;;  %v416_v57 = vld [vmem:[%s1644_s17 + $0xf0] sm:$0xff]  ;;  %v417_v59 = vld [vmem:[%s1644_s17 + $0xf8] sm:$0xff] }
  0x58   : > { %896 = vmatprep.subr.bf16.mxu1 %v1269_v61  ;;  %v1279_v61 = vcombine.high %v412_v56, %v416_v57  ;;  %v404_v63 = vld [vmem:[%s1644_s17 + $0x90] sm:$0xff]  ;;  %v405_v1 = vld [vmem:[%s1644_s17 + $0x98] sm:$0xff] }
  0x59   : > { %852 = vmatpush1.bf16.msra.mxu0 %v1274_v58  ;;  %v413_v58 = vld [vmem:[%s1644_s17 + $0xd8] sm:$0xff]  ;;  %v408_v0 = vld [vmem:[%s1644_s17 + $0xb0] sm:$0xff] }
  0x5a   : > { %853 = vmatprep.subr.bf16.mxu0 %v1267_v60  ;;  %v1286_v60 = vcombine.low %v420_v48, %v424_v49  ;;  %v1281_v62 = vcombine.high %v413_v58, %v417_v59  ;;  %v396_v7 = vld [vmem:[%s1644_s17 + $0x50] sm:$0xff]  ;;  %v397_v10 = vld [vmem:[%s1644_s17 + $0x58] sm:$0xff] }
  0x5b   : > { %897 = vmatpush1.bf16.msra.mxu1 %v1268_v3  ;;  %v1278_v3 = vcombine.low %v412_v56, %v416_v57  ;;  %v400_v9 = vld [vmem:[%s1644_s17 + $0x70] sm:$0xff]  ;;  %v389_v18 = vld [vmem:[%s1644_s17 + $0x18] sm:$0xff] }
  0x5c   : > { %898 = vmatprep.subr.bf16.mxu1 %v1261_v5  ;;  %v1271_v5 = vcombine.high %v404_v63, %v408_v0  ;;  %v388_v16 = vld [vmem:[%s1644_s17 + $0x10] sm:$0xff]  ;;  %v453_v26 = vld [vmem:[%s1644_s17 + $0x218] sm:$0xff] }
  0x5d   : > { %854 = vmatpush1.bf16.msra.mxu0 %v1266_v2  ;;  %v409_v2 = vld [vmem:[%s1644_s17 + $0xb8] sm:$0xff]  ;;  %v392_v17 = vld [vmem:[%s1644_s17 + $0x30] sm:$0xff] }
  0x5e   : > { %855 = vmatprep.subr.bf16.mxu0 %v1259_v4  ;;  %v1280_v4 = vcombine.low %v413_v58, %v417_v59  ;;  %v1273_v6 = vcombine.high %v405_v1, %v409_v2  ;;  %v452_v24 = vld [vmem:[%s1644_s17 + $0x210] sm:$0xff] }
  0x5f   : > { %899 = vmatpush1.bf16.msra.mxu1 %v1260_v12  ;;  %v1270_v12 = vcombine.low %v404_v63, %v408_v0  ;;  %v456_v25 = vld [vmem:[%s1644_s17 + $0x230] sm:$0xff] }
  0x60   : > { %900 = vmatprep.subr.bf16.mxu1 %v1253_v14  ;;  %v1263_v14 = vcombine.high %v396_v7, %v400_v9  ;;  %v1318_v32 = vcombine.low %v452_v24, %v456_v25 }
  0x61   : > { %856 = vmatpush1.bf16.msra.mxu0 %v1258_v11  ;;  %v401_v11 = vld [vmem:[%s1644_s17 + $0x78] sm:$0xff] }
  0x62   : > { %857 = vmatprep.subr.bf16.mxu0 %v1251_v13  ;;  %v1272_v13 = vcombine.low %v405_v1, %v409_v2  ;;  %v1265_v15 = vcombine.high %v397_v10, %v401_v11 }
  0x63   : > { %901 = vmatpush1.bf16.msra.mxu1 %v1252_v20  ;;  %v1262_v20 = vcombine.low %v396_v7, %v400_v9 }
  0x64   : > { %916 = vmatprep.subr.bf16.mxu1 %v1317_v22  ;;  %v1255_v22 = vcombine.high %v388_v16, %v392_v17 }
  0x65   : > { %858 = vmatpush1.bf16.msra.mxu0 %v1250_v19  ;;  %v393_v19 = vld [vmem:[%s1644_s17 + $0x38] sm:$0xff] }
  0x66   : > { %873 = vmatprep.subr.bf16.mxu0 %v1315_v21  ;;  %v1264_v21 = vcombine.low %v397_v10, %v401_v11  ;;  %v1257_v23 = vcombine.high %v389_v18, %v393_v19 }
  0x67   : > { %917 = vmatpush2.bf16.msra.mxu1 %v1316_v28  ;;  %v1254_v28 = vcombine.low %v388_v16, %v392_v17 }
  0x68   : > { %972 = vmatprep.subr.bf16.mxu1 %v1313_v30  ;;  %v1319_v30 = vcombine.high %v452_v24, %v456_v25 }
  0x69   : > { %874 = vmatpush2.bf16.msra.mxu0 %v1314_v27  ;;  %v457_v27 = vld [vmem:[%s1644_s17 + $0x238] sm:$0xff] }
  0x6a   : > { %929 = vmatprep.subr.bf16.mxu0 %v1311_v29  ;;  %919 = vmatmul.mubr.bf16.vlgmr.msra.gmra.mxu1 %v1703_v33  ;;  %v1256_v29 = vcombine.low %v389_v18, %v393_v19  ;;  %v1321_v31 = vcombine.high %v453_v26, %v457_v27  ;;  %v1320_v34 = vcombine.low %v453_v26, %v457_v27 }
  0x6b   : > { %973 = vmatpush1.bf16.msra.mxu1 %v1312_v37  ;;  %1325 = vmatprep.mubr.msk.bf16.mxu1 %vm839_vm0, %v1630_v8 }
  0x6c   : > { %876 = vmatmul.mubr.bf16.vlgmr.msra.gmra.mxu0 %v1703_v33  ;;  %974 = vmatprep.subr.bf16.mxu1 %v1305_v39 }
  0x6d   : > { %930 = vmatpush1.bf16.msra.mxu0 %v1310_v36  ;;  %1324 = vmatprep.mubr.msk.bf16.mxu0 %vm839_vm0, %v1630_v8  ;;  %v1288_v8 = vcombine.low %v421_v50, %v425_v51 }
  0x6e   : > { %931 = vmatprep.subr.bf16.mxu0 %v1303_v38 }
  0x6f   : > { %975 = vmatpush1.bf16.msra.mxu1 %v1304_v45 }
  0x70   : > { %976 = vmatprep.subr.bf16.mxu1 %v1297_v47 }
  0x71   : > { %932 = vmatpush1.bf16.msra.mxu0 %v1302_v44 }
  0x72   : > { %933 = vmatprep.subr.bf16.mxu0 %v1295_v46 }
  0x73   : > { %977 = vmatpush1.bf16.msra.mxu1 %v1296_v53 }
  0x74   : > { %978 = vmatprep.subr.bf16.mxu1 %v1289_v55 }
  0x75   : > { %934 = vmatpush1.bf16.msra.mxu0 %v1294_v52 }
  0x76   : > { %935 = vmatprep.subr.bf16.mxu0 %v1287_v54 }
  0x77   : > { %979 = vmatpush1.bf16.msra.mxu1 %v1288_v8 }
  0x78   : > { %980 = vmatprep.subr.bf16.mxu1 %v1281_v62 }
  0x79   : > { %936 = vmatpush1.bf16.msra.mxu0 %v1286_v60 }
  0x7a   : > { %937 = vmatprep.subr.bf16.mxu0 %v1279_v61 }
  0x7b   : > { %981 = vmatpush1.bf16.msra.mxu1 %v1280_v4 }
  0x7c   : > { %982 = vmatprep.subr.bf16.mxu1 %v1273_v6 }
  0x7d   : > { %938 = vmatpush1.bf16.msra.mxu0 %v1278_v3 }
  0x7e   : > { %939 = vmatprep.subr.bf16.mxu0 %v1271_v5 }
  0x7f   : > { %983 = vmatpush1.bf16.msra.mxu1 %v1272_v13 }
  0x80   : > { %984 = vmatprep.subr.bf16.mxu1 %v1265_v15 }
  0x81   : > { %940 = vmatpush1.bf16.msra.mxu0 %v1270_v12 }
  0x82   : > { %941 = vmatprep.subr.bf16.mxu0 %v1263_v14 }
  0x83   : > { %985 = vmatpush1.bf16.msra.mxu1 %v1264_v21 }
  0x84   : > { %986 = vmatprep.subr.bf16.mxu1 %v1257_v23 }
  0x85   : > { %942 = vmatpush1.bf16.msra.mxu0 %v1262_v20 }
  0x86   : > { %943 = vmatprep.subr.bf16.mxu0 %v1255_v22 }
  0x87   : > { %987 = vmatpush1.bf16.msra.mxu1 %v1256_v29 }
  0x88   : > { %1002 = vmatprep.subr.bf16.mxu1 %v1321_v31 }
  0x89   : > { %944 = vmatpush1.bf16.msra.mxu0 %v1254_v28 }
  0x8a   : > { %959 = vmatprep.subr.bf16.mxu0 %v1319_v30 }
  0x8b   : > { %1003 = vmatpush2.bf16.msra.mxu1 %v1320_v34 }
  0x8d   : > { %960 = vmatpush2.bf16.msra.mxu0 %v1318_v32 }
  0x8e   : > { %1005 = vmatmul.mubr.bf16.vlgmr.msra.gmra.mxu1 %v1703_v33 }
  0x90   : > { %962 = vmatmul.mubr.bf16.vlgmr.msra.gmra.mxu0 %v1703_v33 }
  0xbf   : > { %v1743_v35 = vpop.permute.xlu0 %462  ;;  %v1745_v36 = vpop.permute.xlu1 %1019 }
  0xc4   : > { %v1747_v37 = vpop.permute.xlu0 %467 }
  0xc5   : > { %v1749_v39 = vpop.permute.xlu1 %1024 }
  0xc8   : > { %v1753_v44 = vpop.permute.xlu0 %1047 }
  0xc9   : > { %v1765_v58 = vpop.permute.xlu1 %1052 }
 0x12a   : > { %v920_v41 = vpop.f32.mrf.mxu1 }
 0x12b   : > { %v921_v42 = vadd.f32 %v920_v41, %v1743_v35 }
 0x12c   : > { %v877_v38 = vpop.f32.mrf.mxu0  ;;  %v922_v46 = vpop.f32.mrf.mxu1 }
 0x12d   : > { %v878_v40 = vadd.f32 %v877_v38, %v1743_v35  ;;  %v1029_v47 = vmul.f32 %v1745_v36, %v921_v42  ;;  %v923_v48 = vadd.f32 %v922_v46, %v1743_v35 }
 0x12e   : > { %v879_v43 = vpop.f32.mrf.mxu0  ;;  %v924_v52 = vpop.f32.mrf.mxu1 }
 0x12f   : > { %v1027_v45 = vmul.f32 %v1745_v36, %v878_v40  ;;  %v880_v33 = vadd.f32 %v879_v43, %v1743_v35  ;;  %v1030_v54 = vmul.f32 %v1745_v36, %v923_v48  ;;  %v925_v55 = vadd.f32 %v924_v52, %v1747_v37 }
 0x130   : > { %v881_v49 = vpop.f32.mrf.mxu0  ;;  %v1057_v56 = vadd.f32 %v1753_v44, %v1029_v47  ;;  %v926_v62 = vpop.f32.mrf.mxu1 }
 0x131   : > { %v1028_v50 = vmul.f32 %v1745_v36, %v880_v33  ;;  %v882_v51 = vadd.f32 %v881_v49, %v1747_v37  ;;  %v1055_v53 = vadd.f32 %v1753_v44, %v1027_v45  ;;  %v1037_v63 = vmul.f32 %v1749_v39, %v925_v55 }
 0x132   : > { %v883_v57 = vpop.f32.mrf.mxu0  ;;  %v1058_v0 = vadd.f32 %v1753_v44, %v1030_v54  ;;  %v1073_v1 = vmax.f32 %v1057_v56, 0.0  ;;  %v927_v2 = vadd.f32 %v926_v62, %v1747_v37 }
 0x133   : > { %v1035_v59 = vmul.f32 %v1749_v39, %v882_v51  ;;  %v1056_v60 = vadd.f32 %v1753_v44, %v1028_v50  ;;  %v1071_v8 = vmax.f32 %v1055_v53, 0.0  ;;  %v884_v61 = vadd.f32 %v883_v57, %v1747_v37 }
 0x134   : > { %v1074_v6 = vmax.f32 %v1058_v0, 0.0  ;;  %v1038_v7 = vmul.f32 %v1749_v39, %v927_v2  ;;  %v1065_v9 = vadd.f32 %v1765_v58, %v1037_v63 }
 0x135   : > { %v1072_v3 = vmax.f32 %v1056_v60, 0.0  ;;  %v1036_v4 = vmul.f32 %v1749_v39, %v884_v61  ;;  %v1063_v5 = vadd.f32 %v1765_v58, %v1035_v59 }
 0x136   : > { %v1341_v12 = vpack.c.bf16 %v1074_v6, %v1073_v1  ;;  %v1066_v13 = vadd.f32 %v1765_v58, %v1038_v7  ;;  %v1081_v16 = vmax.f32 %v1065_v9, 0.0 }
 0x137   : > { %v1340_v10 = vpack.c.bf16 %v1072_v3, %v1071_v8  ;;  %v1064_v11 = vadd.f32 %v1765_v58, %v1036_v4  ;;  %v1079_v14 = vmax.f32 %v1063_v5, 0.0 }
 0x138   : > { %1136 = vst [vmem:[%s1781_s18 + $0x8] sm:$0xff] %v1341_v12  ;;  %v1082_v17 = vmax.f32 %v1066_v13, 0.0 }
 0x139   : > { %1135 = vst [vmem:[%s1781_s18] sm:$0xff] %v1340_v10  ;;  %v1080_v15 = vmax.f32 %v1064_v11, 0.0 }
 0x13a   : > { %v1345_v19 = vpack.c.bf16 %v1082_v17, %v1081_v16 }
 0x13b   : > { %v1344_v18 = vpack.c.bf16 %v1080_v15, %v1079_v14 }
 0x13c   : > { %1140 = vst [vmem:[%s1781_s18 + $0x28] sm:$0xff] %v1345_v19 }
 0x13d   : > { %1139 = vst [vmem:[%s1781_s18 + $0x20] sm:$0xff] %v1344_v18 }
 0x143   : > { %v1175_v4 = vld [vmem:[%s1781_s18 + $0x28] sm:$0xff] (%p1466_p5) }
 0x144   : > { %v1173_v3 = vld [vmem:[%s1781_s18 + $0x20] sm:$0xff] (%p1466_p5)  ;;  %1176 = vst [vmem:[%s1152_s14 + $0x48] sm:$0xff] (%p1466_p5), %v1175_v4 }
 0x145   : > { %1174 = vst [vmem:[%s1152_s14 + $0x40] sm:$0xff] (%p1466_p5), %v1173_v3 }
 0x14e   : > { %v1006_v22 = vpop.f32.mrf.mxu1 }
 0x14f   : > { %v1007_v23 = vadd.f32 %v1006_v22, %v1743_v35 }
 0x150   : > { %v963_v20 = vpop.f32.mrf.mxu0  ;;  %v1008_v27 = vpop.f32.mrf.mxu1 }
 0x151   : > { %v964_v21 = vadd.f32 %v963_v20, %v1743_v35  ;;  %v1033_v28 = vmul.f32 %v1745_v36, %v1007_v23  ;;  %v1009_v29 = vadd.f32 %v1008_v27, %v1743_v35 }
 0x152   : > { %v965_v24 = vpop.f32.mrf.mxu0  ;;  %v1010_v38 = vpop.f32.mrf.mxu1 }
 0x153   : > { %v1031_v25 = vmul.f32 %v1745_v36, %v964_v21  ;;  %v966_v26 = vadd.f32 %v965_v24, %v1743_v35  ;;  %v1061_v40 = vadd.f32 %v1753_v44, %v1033_v28  ;;  %v1034_v41 = vmul.f32 %v1745_v36, %v1009_v29 }
 0x154   : > { %v967_v30 = vpop.f32.mrf.mxu0  ;;  %v1011_v42 = vadd.f32 %v1010_v38, %v1747_v37  ;;  %v1012_v46 = vpop.f32.mrf.mxu1 }
 0x155   : > { %v1059_v31 = vadd.f32 %v1753_v44, %v1031_v25  ;;  %v1032_v32 = vmul.f32 %v1745_v36, %v966_v26  ;;  %v968_v34 = vadd.f32 %v967_v30, %v1747_v37  ;;  %v1062_v47 = vadd.f32 %v1753_v44, %v1034_v41 }
 0x156   : > { %v969_v43 = vpop.f32.mrf.mxu0  ;;  %v1041_v48 = vmul.f32 %v1749_v39, %v1011_v42  ;;  %v1013_v49 = vadd.f32 %v1012_v46, %v1747_v37  ;;  %v1077_v53 = vmax.f32 %v1061_v40, 0.0 }
 0x157   : > { %v1060_v45 = vadd.f32 %v1753_v44, %v1032_v32  ;;  %v1039_v33 = vmul.f32 %v1749_v39, %v968_v34  ;;  %v970_v35 = vadd.f32 %v969_v43, %v1747_v37  ;;  %v1075_v50 = vmax.f32 %v1059_v31, 0.0 }
 0x158   : > { %v1078_v54 = vmax.f32 %v1062_v47, 0.0  ;;  %v1069_v55 = vadd.f32 %v1765_v58, %v1041_v48  ;;  %v1042_v56 = vmul.f32 %v1749_v39, %v1013_v49 }
 0x159   : > { %v1076_v36 = vmax.f32 %v1060_v45, 0.0  ;;  %v1067_v51 = vadd.f32 %v1765_v58, %v1039_v33  ;;  %v1040_v52 = vmul.f32 %v1749_v39, %v970_v35  ;;  %v1165_v39 = vld [vmem:[%s1781_s18] sm:$0xff] (%p1466_p5) }
 0x15a   : > { %v1343_v59 = vpack.c.bf16 %v1078_v54, %v1077_v53  ;;  %v1070_v37 = vadd.f32 %v1765_v58, %v1042_v56  ;;  %v1085_v61 = vmax.f32 %v1069_v55, 0.0  ;;  %1166 = vst [vmem:[%s1152_s14] sm:$0xff] (%p1466_p5), %v1165_v39 }
 0x15b   : > { %v1342_v44 = vpack.c.bf16 %v1076_v36, %v1075_v50  ;;  %v1068_v57 = vadd.f32 %v1765_v58, %v1040_v52  ;;  %v1083_v60 = vmax.f32 %v1067_v51, 0.0  ;;  %v1167_v58 = vld [vmem:[%s1781_s18 + $0x8] sm:$0xff] (%p1466_p5) }
 0x15c   : > { %1138 = vst [vmem:[%s1781_s18 + $0x18] sm:$0xff] %v1343_v59  ;;  %v1086_v62 = vmax.f32 %v1070_v37, 0.0  ;;  %1168 = vst [vmem:[%s1152_s14 + $0x8] sm:$0xff] (%p1466_p5), %v1167_v58 }
 0x15d   : > { %1137 = vst [vmem:[%s1781_s18 + $0x10] sm:$0xff] %v1342_v44  ;;  %v1084_v8 = vmax.f32 %v1068_v57, 0.0  ;;  %1149 = sbr.rel (!%p1466_p5) target bundleno = 362 (0x16a), region = 67 }
 0x15e   : > { %v1347_v0 = vpack.c.bf16 %v1086_v62, %v1085_v61 }
 0x15f   : > { %v1346_v63 = vpack.c.bf16 %v1084_v8, %v1083_v60 }
 0x160   : > { %1142 = vst [vmem:[%s1781_s18 + $0x38] sm:$0xff] %v1347_v0 }
 0x161   : > { %1141 = vst [vmem:[%s1781_s18 + $0x30] sm:$0xff] %v1346_v63 }
 0x163   : > { %v1171_v2 = vld [vmem:[%s1781_s18 + $0x18] sm:$0xff] }
 0x164   : > { %v1169_v1 = vld [vmem:[%s1781_s18 + $0x10] sm:$0xff]  ;;  %1172 = vst [vmem:[%s1152_s14 + $0x18] sm:$0xff] %v1171_v2 }
 0x165   : > { %1170 = vst [vmem:[%s1152_s14 + $0x10] sm:$0xff] %v1169_v1 }
 0x167   : > { %v1179_v6 = vld [vmem:[%s1781_s18 + $0x38] sm:$0xff] }
 0x168   : > { %v1177_v5 = vld [vmem:[%s1781_s18 + $0x30] sm:$0xff]  ;;  %1180 = vst [vmem:[%s1152_s14 + $0x58] sm:$0xff] %v1179_v6 }
 0x169   : > { %1178 = vst [vmem:[%s1152_s14 + $0x50] sm:$0xff] %v1177_v5 }
 0x16a PF: > { %p12_p10 = scmp.ge.s32.totalorder %s1453_s22, 4   ;;  %s1847_s18 = smov %s1399_s19 }
 0x16b   : > { %s1848_s19 = smov %s1464_s25  ;;  %s1849_s20 = smov %s1453_s22 }
 0x16c   :  { %14 = sbr.rel (!%p12_p10) target bundleno = 2 (0x2), region = 121 }

// kernel: wide_resnet_forward.10
= control target key start
LH: loop header
LB: loop body
LE: loop exit
PB: predicated region body
PF: predicated region fallthrough
CT: control target
= control target key end

     0   :  { %s1772_s24 = smov 0   ;;  %s1774_s25 = smov 0   ;;  %s2228_s0 = inlined_call_operand.vmem [shape: bf16[144,2048], index: 0, kind: input, shape index: {}]   ;;  %s2229_s1 = inlined_call_operand.vmem [shape: bf16[16,144], index: 1, kind: input, shape index: {}]   ;;  %s2230_s2 = inlined_call_operand.vmem [shape: f32[16,1], index: 2, kind: input, shape index: {}]   ;;  %s2231_s3 = inlined_call_operand.vmem [shape: bf16[16,2048], index: 3, kind: input, shape index: {}]   ;;  %s2232_s4 = inlined_call_operand.vmem [shape: f32[16,1], index: 4, kind: input, shape index: {}]   ;;  %s2233_s5 = inlined_call_operand.vmem [shape: f32[16,1], index: 5, kind: input, shape index: {}]   ;;  %s2234_s6 = inlined_call_operand.vmem [shape: bf16[16,2048], index: 6, kind: output, shape index: {0}]   ;;  %s2235_s7 = inlined_call_operand.vmem [shape: bf16[16,2048], index: 7, kind: output, shape index: {1}]  }
   0x1   :  { %s1776_s26 = smov 0  }
   0x2 LB: > { %s1788_s27 = sadd.s32 4294967295, %s1729_s26   ;;  %s1791_s28 = sadd.s32 1, %s1729_s26   ;;  %s1729_s26 = sphi %s1776_s26, %s2240_s26   ;;  %s1725_s25 = sphi %s1774_s25, %s2239_s25   ;;  %s1721_s24 = sphi %s1772_s24, %s2238_s24  }
   0x3   : > { %s22_s29 = ssub.s32 %s1729_s26, %s1791_s28  ;;  %s25_s30 = sadd.s32 1, %s1725_s25 }
   0x4   : > { %p23_p0 = scmp.eq.s32.totalorder %s22_s29, 0  ;;  %p32_p1 = scmp.ne.s32.totalorder %s1725_s25, %s1721_s24 }
   0x5   : > { %p33_p2 = scmp.eq.s32.totalorder %s1729_s26, 0  ;;  %p172_p3 = scmp.eq.s32.totalorder %s1788_s27, 1 }
   0x6   : > { %s1801_s8 = scalar_select %p23_p0, %s1725_s25, %s25_s30  }
   0x7   : > { %p1803_p4 = por %p33_p2, %p32_p1  ;;  %p1807_p5 = por %p172_p3, %p32_p1 }
   0x8   : > { %p1543_p6 = scmp.ge.s32.totalorder %s1729_s26, 2 }
   0xa   : > { %232 = sbr.rel (%p1543_p6) target bundleno = 64 (0x40), region = 32 }
   0xf   : > { %235 = sbr.rel (!%p1803_p4) target bundleno = 56 (0x38), region = 36  ;;  %s237_s11 = sand.u32 (%p1803_p4), 1, %s1725_s25  }
  0x10   : > { %s1655_s12 = sshll.u32 (%p1803_p4), %s1729_s26, 5  ;;  %s1675_s13 = smul.u32 (%p1803_p4), 576, %s237_s11 }
  0x11   : > { %s1819_s16 = scalar_lea.vmem (%p1803_p4), %s2228_s0, %s1655_s12 }
  0x12   : > { %v255_v0 = vld [vmem:[%s1819_s16] sm:$0xff] (%p1803_p4)  ;;  %v257_v1 = vld [vmem:[%s1819_s16 + $0x8] sm:$0xff] (%p1803_p4)  ;;  %v259_v2 = vld [vmem:[%s1819_s16 + $0x10] sm:$0xff] (%p1803_p4)  ;;  %s1827_s17 = scalar_lea.vmem (%p1803_p4), [#allocation2], %s1675_s13 }
  0x13   : > { %v261_v3 = vld [vmem:[%s1819_s16 + $0x18] sm:$0xff] (%p1803_p4)  ;;  %v263_v4 = vld [vmem:[%s1819_s16 + $0x40] sm:$0xff] (%p1803_p4)  ;;  %v265_v5 = vld [vmem:[%s1819_s16 + $0x48] sm:$0xff] (%p1803_p4)  ;;  %256 = vst [vmem:[%s1827_s17] sm:$0xff] (%p1803_p4), %v255_v0 }
  0x14   : > { %258 = vst [vmem:[%s1827_s17 + $0x8] sm:$0xff] %v257_v1  ;;  %260 = vst [vmem:[%s1827_s17 + $0x10] sm:$0xff] %v259_v2  ;;  %v267_v6 = vld [vmem:[%s1819_s16 + $0x50] sm:$0xff]  ;;  %v269_v7 = vld [vmem:[%s1819_s16 + $0x58] sm:$0xff] }
  0x15   : > { %262 = vst [vmem:[%s1827_s17 + $0x18] sm:$0xff] %v261_v3  ;;  %264 = vst [vmem:[%s1827_s17 + $0x20] sm:$0xff] %v263_v4  ;;  %v271_v8 = vld [vmem:[%s1819_s16 + $0x80] sm:$0xff]  ;;  %v273_v9 = vld [vmem:[%s1819_s16 + $0x88] sm:$0xff] }
  0x16   : > { %266 = vst [vmem:[%s1827_s17 + $0x28] sm:$0xff] %v265_v5  ;;  %268 = vst [vmem:[%s1827_s17 + $0x30] sm:$0xff] %v267_v6  ;;  %v275_v10 = vld [vmem:[%s1819_s16 + $0x90] sm:$0xff]  ;;  %v277_v11 = vld [vmem:[%s1819_s16 + $0x98] sm:$0xff] }
  0x17   : > { %270 = vst [vmem:[%s1827_s17 + $0x38] sm:$0xff] %v269_v7  ;;  %272 = vst [vmem:[%s1827_s17 + $0x40] sm:$0xff] %v271_v8  ;;  %v279_v12 = vld [vmem:[%s1819_s16 + $0xc0] sm:$0xff]  ;;  %v281_v13 = vld [vmem:[%s1819_s16 + $0xc8] sm:$0xff] }
  0x18   : > { %274 = vst [vmem:[%s1827_s17 + $0x48] sm:$0xff] %v273_v9  ;;  %276 = vst [vmem:[%s1827_s17 + $0x50] sm:$0xff] %v275_v10  ;;  %v283_v14 = vld [vmem:[%s1819_s16 + $0xd0] sm:$0xff]  ;;  %v285_v15 = vld [vmem:[%s1819_s16 + $0xd8] sm:$0xff] }
  0x19   : > { %278 = vst [vmem:[%s1827_s17 + $0x58] sm:$0xff] %v277_v11  ;;  %280 = vst [vmem:[%s1827_s17 + $0x60] sm:$0xff] %v279_v12  ;;  %v287_v16 = vld [vmem:[%s1819_s16 + $0x100] sm:$0xff]  ;;  %v289_v17 = vld [vmem:[%s1819_s16 + $0x108] sm:$0xff] }
  0x1a   : > { %282 = vst [vmem:[%s1827_s17 + $0x68] sm:$0xff] %v281_v13  ;;  %284 = vst [vmem:[%s1827_s17 + $0x70] sm:$0xff] %v283_v14  ;;  %v291_v18 = vld [vmem:[%s1819_s16 + $0x110] sm:$0xff]  ;;  %v293_v19 = vld [vmem:[%s1819_s16 + $0x118] sm:$0xff] }
  0x1b   : > { %286 = vst [vmem:[%s1827_s17 + $0x78] sm:$0xff] %v285_v15  ;;  %288 = vst [vmem:[%s1827_s17 + $0x80] sm:$0xff] %v287_v16  ;;  %v295_v20 = vld [vmem:[%s1819_s16 + $0x140] sm:$0xff]  ;;  %v297_v21 = vld [vmem:[%s1819_s16 + $0x148] sm:$0xff] }
  0x1c   : > { %290 = vst [vmem:[%s1827_s17 + $0x88] sm:$0xff] %v289_v17  ;;  %292 = vst [vmem:[%s1827_s17 + $0x90] sm:$0xff] %v291_v18  ;;  %v299_v22 = vld [vmem:[%s1819_s16 + $0x150] sm:$0xff]  ;;  %v301_v23 = vld [vmem:[%s1819_s16 + $0x158] sm:$0xff] }
  0x1d   : > { %294 = vst [vmem:[%s1827_s17 + $0x98] sm:$0xff] %v293_v19  ;;  %296 = vst [vmem:[%s1827_s17 + $0xa0] sm:$0xff] %v295_v20  ;;  %v303_v24 = vld [vmem:[%s1819_s16 + $0x180] sm:$0xff]  ;;  %v305_v25 = vld [vmem:[%s1819_s16 + $0x188] sm:$0xff] }
  0x1e   : > { %298 = vst [vmem:[%s1827_s17 + $0xa8] sm:$0xff] %v297_v21  ;;  %300 = vst [vmem:[%s1827_s17 + $0xb0] sm:$0xff] %v299_v22  ;;  %v307_v26 = vld [vmem:[%s1819_s16 + $0x190] sm:$0xff]  ;;  %v309_v27 = vld [vmem:[%s1819_s16 + $0x198] sm:$0xff] }
  0x1f   : > { %302 = vst [vmem:[%s1827_s17 + $0xb8] sm:$0xff] %v301_v23  ;;  %304 = vst [vmem:[%s1827_s17 + $0xc0] sm:$0xff] %v303_v24  ;;  %v311_v28 = vld [vmem:[%s1819_s16 + $0x1c0] sm:$0xff]  ;;  %v313_v29 = vld [vmem:[%s1819_s16 + $0x1c8] sm:$0xff] }
  0x20   : > { %306 = vst [vmem:[%s1827_s17 + $0xc8] sm:$0xff] %v305_v25  ;;  %308 = vst [vmem:[%s1827_s17 + $0xd0] sm:$0xff] %v307_v26  ;;  %v315_v30 = vld [vmem:[%s1819_s16 + $0x1d0] sm:$0xff]  ;;  %v317_v31 = vld [vmem:[%s1819_s16 + $0x1d8] sm:$0xff] }
  0x21   : > { %310 = vst [vmem:[%s1827_s17 + $0xd8] sm:$0xff] %v309_v27  ;;  %312 = vst [vmem:[%s1827_s17 + $0xe0] sm:$0xff] %v311_v28  ;;  %v319_v32 = vld [vmem:[%s1819_s16 + $0x200] sm:$0xff]  ;;  %v321_v33 = vld [vmem:[%s1819_s16 + $0x208] sm:$0xff] }
  0x22   : > { %314 = vst [vmem:[%s1827_s17 + $0xe8] sm:$0xff] %v313_v29  ;;  %316 = vst [vmem:[%s1827_s17 + $0xf0] sm:$0xff] %v315_v30  ;;  %v323_v34 = vld [vmem:[%s1819_s16 + $0x210] sm:$0xff]  ;;  %v325_v35 = vld [vmem:[%s1819_s16 + $0x218] sm:$0xff] }
  0x23   : > { %318 = vst [vmem:[%s1827_s17 + $0xf8] sm:$0xff] %v317_v31  ;;  %320 = vst [vmem:[%s1827_s17 + $0x100] sm:$0xff] %v319_v32  ;;  %v327_v36 = vld [vmem:[%s1819_s16 + $0x240] sm:$0xff]  ;;  %v329_v37 = vld [vmem:[%s1819_s16 + $0x248] sm:$0xff] }
  0x24   : > { %322 = vst [vmem:[%s1827_s17 + $0x108] sm:$0xff] %v321_v33  ;;  %324 = vst [vmem:[%s1827_s17 + $0x110] sm:$0xff] %v323_v34  ;;  %v331_v38 = vld [vmem:[%s1819_s16 + $0x250] sm:$0xff]  ;;  %v333_v39 = vld [vmem:[%s1819_s16 + $0x258] sm:$0xff] }
  0x25   : > { %326 = vst [vmem:[%s1827_s17 + $0x118] sm:$0xff] %v325_v35  ;;  %328 = vst [vmem:[%s1827_s17 + $0x120] sm:$0xff] %v327_v36  ;;  %v335_v40 = vld [vmem:[%s1819_s16 + $0x280] sm:$0xff]  ;;  %v337_v41 = vld [vmem:[%s1819_s16 + $0x288] sm:$0xff] }
  0x26   : > { %330 = vst [vmem:[%s1827_s17 + $0x128] sm:$0xff] %v329_v37  ;;  %332 = vst [vmem:[%s1827_s17 + $0x130] sm:$0xff] %v331_v38  ;;  %v339_v42 = vld [vmem:[%s1819_s16 + $0x290] sm:$0xff]  ;;  %v341_v43 = vld [vmem:[%s1819_s16 + $0x298] sm:$0xff] }
  0x27   : > { %334 = vst [vmem:[%s1827_s17 + $0x138] sm:$0xff] %v333_v39  ;;  %336 = vst [vmem:[%s1827_s17 + $0x140] sm:$0xff] %v335_v40  ;;  %v343_v44 = vld [vmem:[%s1819_s16 + $0x2c0] sm:$0xff]  ;;  %v345_v45 = vld [vmem:[%s1819_s16 + $0x2c8] sm:$0xff] }
  0x28   : > { %338 = vst [vmem:[%s1827_s17 + $0x148] sm:$0xff] %v337_v41  ;;  %340 = vst [vmem:[%s1827_s17 + $0x150] sm:$0xff] %v339_v42  ;;  %v347_v46 = vld [vmem:[%s1819_s16 + $0x2d0] sm:$0xff]  ;;  %v349_v47 = vld [vmem:[%s1819_s16 + $0x2d8] sm:$0xff] }
  0x29   : > { %342 = vst [vmem:[%s1827_s17 + $0x158] sm:$0xff] %v341_v43  ;;  %344 = vst [vmem:[%s1827_s17 + $0x160] sm:$0xff] %v343_v44  ;;  %v351_v48 = vld [vmem:[%s1819_s16 + $0x300] sm:$0xff]  ;;  %v353_v49 = vld [vmem:[%s1819_s16 + $0x308] sm:$0xff] }
  0x2a   : > { %346 = vst [vmem:[%s1827_s17 + $0x168] sm:$0xff] %v345_v45  ;;  %348 = vst [vmem:[%s1827_s17 + $0x170] sm:$0xff] %v347_v46  ;;  %v355_v50 = vld [vmem:[%s1819_s16 + $0x310] sm:$0xff]  ;;  %v357_v51 = vld [vmem:[%s1819_s16 + $0x318] sm:$0xff] }
  0x2b   : > { %350 = vst [vmem:[%s1827_s17 + $0x178] sm:$0xff] %v349_v47  ;;  %352 = vst [vmem:[%s1827_s17 + $0x180] sm:$0xff] %v351_v48  ;;  %v359_v52 = vld [vmem:[%s1819_s16 + $0x340] sm:$0xff]  ;;  %v361_v53 = vld [vmem:[%s1819_s16 + $0x348] sm:$0xff] }
  0x2c   : > { %354 = vst [vmem:[%s1827_s17 + $0x188] sm:$0xff] %v353_v49  ;;  %356 = vst [vmem:[%s1827_s17 + $0x190] sm:$0xff] %v355_v50  ;;  %v363_v54 = vld [vmem:[%s1819_s16 + $0x350] sm:$0xff]  ;;  %v365_v55 = vld [vmem:[%s1819_s16 + $0x358] sm:$0xff] }
  0x2d   : > { %358 = vst [vmem:[%s1827_s17 + $0x198] sm:$0xff] %v357_v51  ;;  %360 = vst [vmem:[%s1827_s17 + $0x1a0] sm:$0xff] %v359_v52  ;;  %v367_v56 = vld [vmem:[%s1819_s16 + $0x380] sm:$0xff]  ;;  %v369_v57 = vld [vmem:[%s1819_s16 + $0x388] sm:$0xff] }
  0x2e   : > { %362 = vst [vmem:[%s1827_s17 + $0x1a8] sm:$0xff] %v361_v53  ;;  %364 = vst [vmem:[%s1827_s17 + $0x1b0] sm:$0xff] %v363_v54  ;;  %v371_v58 = vld [vmem:[%s1819_s16 + $0x390] sm:$0xff]  ;;  %v373_v59 = vld [vmem:[%s1819_s16 + $0x398] sm:$0xff] }
  0x2f   : > { %366 = vst [vmem:[%s1827_s17 + $0x1b8] sm:$0xff] %v365_v55  ;;  %368 = vst [vmem:[%s1827_s17 + $0x1c0] sm:$0xff] %v367_v56  ;;  %v375_v60 = vld [vmem:[%s1819_s16 + $0x3c0] sm:$0xff]  ;;  %v377_v61 = vld [vmem:[%s1819_s16 + $0x3c8] sm:$0xff] }
  0x30   : > { %370 = vst [vmem:[%s1827_s17 + $0x1c8] sm:$0xff] %v369_v57  ;;  %372 = vst [vmem:[%s1827_s17 + $0x1d0] sm:$0xff] %v371_v58  ;;  %v379_v62 = vld [vmem:[%s1819_s16 + $0x3d0] sm:$0xff]  ;;  %v381_v63 = vld [vmem:[%s1819_s16 + $0x3d8] sm:$0xff] }
  0x31   : > { %374 = vst [vmem:[%s1827_s17 + $0x1d8] sm:$0xff] %v373_v59  ;;  %376 = vst [vmem:[%s1827_s17 + $0x1e0] sm:$0xff] %v375_v60  ;;  %v383_v0 = vld [vmem:[%s1819_s16 + $0x400] sm:$0xff]  ;;  %v385_v1 = vld [vmem:[%s1819_s16 + $0x408] sm:$0xff] }
  0x32   : > { %378 = vst [vmem:[%s1827_s17 + $0x1e8] sm:$0xff] %v377_v61  ;;  %380 = vst [vmem:[%s1827_s17 + $0x1f0] sm:$0xff] %v379_v62  ;;  %v387_v2 = vld [vmem:[%s1819_s16 + $0x410] sm:$0xff]  ;;  %v389_v3 = vld [vmem:[%s1819_s16 + $0x418] sm:$0xff] }
  0x33   : > { %382 = vst [vmem:[%s1827_s17 + $0x1f8] sm:$0xff] %v381_v63  ;;  %384 = vst [vmem:[%s1827_s17 + $0x200] sm:$0xff] %v383_v0  ;;  %v391_v4 = vld [vmem:[%s1819_s16 + $0x440] sm:$0xff]  ;;  %v393_v5 = vld [vmem:[%s1819_s16 + $0x448] sm:$0xff] }
  0x34   : > { %386 = vst [vmem:[%s1827_s17 + $0x208] sm:$0xff] %v385_v1  ;;  %388 = vst [vmem:[%s1827_s17 + $0x210] sm:$0xff] %v387_v2  ;;  %v395_v6 = vld [vmem:[%s1819_s16 + $0x450] sm:$0xff]  ;;  %v397_v7 = vld [vmem:[%s1819_s16 + $0x458] sm:$0xff] }
  0x35   : > { %390 = vst [vmem:[%s1827_s17 + $0x218] sm:$0xff] %v389_v3  ;;  %392 = vst [vmem:[%s1827_s17 + $0x220] sm:$0xff] %v391_v4 }
  0x36   : > { %394 = vst [vmem:[%s1827_s17 + $0x228] sm:$0xff] %v393_v5  ;;  %396 = vst [vmem:[%s1827_s17 + $0x230] sm:$0xff] %v395_v6 }
  0x37   : > { %398 = vst [vmem:[%s1827_s17 + $0x238] sm:$0xff] %v397_v7 }
  0x38 PF: > { %404 = sbr.rel (!%p1803_p4) target bundleno = 64 (0x40), region = 59  ;;  %s406_s18 = sand.u32 (%p1803_p4), 1, %s1725_s25  }
  0x39   : > { %s1656_s19 = sshll.u32 (%p1803_p4), %s1729_s26, 5  ;;  %s1546_s20 = sshll.u32 (%p1803_p4), %s406_s18, 6 }
  0x3a   : > { %s411_s23 = scalar_lea.vmem (%p1803_p4), %s2231_s3, %s1656_s19  ;;  %s408_s29 = scalar_lea.vmem (%p1803_p4), [#allocation3], %s1546_s20 }
  0x3b   : > { %v424_v8 = vld [vmem:[%s411_s23] sm:$0xff] (%p1803_p4)  ;;  %v426_v9 = vld [vmem:[%s411_s23 + $0x8] sm:$0xff] (%p1803_p4)  ;;  %v428_v10 = vld [vmem:[%s411_s23 + $0x10] sm:$0xff] (%p1803_p4) }
  0x3c   : > { %425 = vst [vmem:[%s408_s29] sm:$0xff] (%p1803_p4), %v424_v8  ;;  %427 = vst [vmem:[%s408_s29 + $0x8] sm:$0xff] (%p1803_p4), %v426_v9  ;;  %v430_v11 = vld [vmem:[%s411_s23 + $0x18] sm:$0xff] (%p1803_p4)  ;;  %v432_v12 = vld [vmem:[%s411_s23 + $0x40] sm:$0xff] (%p1803_p4) }
  0x3d   : > { %429 = vst [vmem:[%s408_s29 + $0x10] sm:$0xff] %v428_v10  ;;  %v434_v13 = vld [vmem:[%s411_s23 + $0x48] sm:$0xff]  ;;  %431 = vst [vmem:[%s408_s29 + $0x18] sm:$0xff] %v430_v11  ;;  %v436_v14 = vld [vmem:[%s411_s23 + $0x50] sm:$0xff] }
  0x3e   : > { %433 = vst [vmem:[%s408_s29 + $0x20] sm:$0xff] %v432_v12  ;;  %435 = vst [vmem:[%s408_s29 + $0x28] sm:$0xff] %v434_v13  ;;  %v438_v15 = vld [vmem:[%s411_s23 + $0x58] sm:$0xff] }
  0x3f   : > { %437 = vst [vmem:[%s408_s29 + $0x30] sm:$0xff] %v436_v14  ;;  %439 = vst [vmem:[%s408_s29 + $0x38] sm:$0xff] %v438_v15 }
  0x40 PF: > { %p1549_p7 = scmp.ge.s32.totalorder %s1729_s26, 1  ;;  %p444_p8 = scmp.lt.s32.totalorder %s1729_s26, 3 }
  0x42   : > { %p445_p9 = pnand %p1549_p7, %p444_p8 }
  0x43   : > { %s451_s30 = sand.u32 (!%p445_p9), 1, %s1721_s24  }
  0x44   : > { %448 = sbr.rel (%p445_p9) target bundleno = 375 (0x177), region = 82 }
  0x45   : > { %s1676_s12 = smul.u32 (!%p445_p9), 576, %s451_s30 }
  0x47   : > { %s1994_s26 = scalar_lea.vmem (!%p445_p9), [#allocation2], %s1676_s12  ;;  %s2095_s12 = sshll.u32 (!%p445_p9), %s451_s30, 6 }
  0x48   : > { %s2100_s13 = scalar_lea.vmem (!%p445_p9), [#allocation3], %s2095_s12  ;;  %s2127_s24 = scalar_lea.vmem (!%p445_p9), [#allocation4], %s2095_s12 }
  0x49   : > { %v1980_v16 = vld [vmem:[%s2229_s1 + $0x4] ss:$8 sps:$4 sm:$0xff]   ;;  %vm956_vm0 = vcmask 130048   ;;  %v1731_v19 = vmov 0   ;;  %s2148_s30 = scalar_lea.vmem [#allocation5], %s2095_s12  ;;  %s1673_s14 = sshll.u32 (%p1807_p5), %s1788_s27, 5 }
  0x4a   : > { %v575_v17 = vld [vmem:[%s2230_s2] sm:$0xff]  ;;  %1627 = vmatprep.mubr.msk.bf16.mxu0 %vm956_vm0, %v1980_v16  ;;  %1628 = vmatprep.mubr.msk.bf16.mxu1 %vm956_vm0, %v1980_v16  ;;  %v560_v22 = vld [vmem:[%s1994_s26 + $0x1c8] sm:$0xff] }
  0x4b   : > { %v1228_v18 = vld [vmem:[%s2232_s4] sm:$0xff]  ;;  %1702 = vset.pattern.permute.xlu0 %v1731_v19  ;;  %1703 = vset.pattern.permute.xlu1 %v1731_v19  ;;  %v564_v24 = vld [vmem:[%s1994_s26 + $0x1e8] sm:$0xff] }
  0x4c   : > { %v559_v20 = vld [vmem:[%s1994_s26 + $0x1c0] sm:$0xff]  ;;  %579 = vperm.xlu0 %1702, %v575_v17   ;;  %1232 = vperm.xlu1 %1703, %v1228_v18   ;;  %v1614_v28 = vcombine.high %v560_v22, %v564_v24  ;;  %v1613_v29 = vcombine.low %v560_v22, %v564_v24  ;;  %v552_v31 = vld [vmem:[%s1994_s26 + $0x188] sm:$0xff] }
  0x4d   : > { %v563_v21 = vld [vmem:[%s1994_s26 + $0x1e0] sm:$0xff]  ;;  %v556_v32 = vld [vmem:[%s1994_s26 + $0x1a8] sm:$0xff] }
  0x4e   : > { %v1612_v23 = vcombine.high %v559_v20, %v563_v21  ;;  %v1611_v25 = vcombine.low %v559_v20, %v563_v21  ;;  %v551_v26 = vld [vmem:[%s1994_s26 + $0x180] sm:$0xff]  ;;  %v1606_v34 = vcombine.high %v552_v31, %v556_v32  ;;  %v544_v36 = vld [vmem:[%s1994_s26 + $0x148] sm:$0xff]  ;;  %1003 = vmatprep.subr.bf16.mxu1 %v1614_v28  ;;  %v1605_v41 = vcombine.low %v552_v31, %v556_v32  ;;  %v561_v31 = vld [vmem:[%s1994_s26 + $0x1d0] sm:$0xff] }
  0x4f   : > { %v555_v27 = vld [vmem:[%s1994_s26 + $0x1a0] sm:$0xff]  ;;  %v548_v37 = vld [vmem:[%s1994_s26 + $0x168] sm:$0xff]  ;;  %1004 = vmatpush1.bf16.msra.mxu1 %v1613_v29  ;;  %v565_v32 = vld [vmem:[%s1994_s26 + $0x1f0] sm:$0xff] }
  0x50   : > { %v1604_v30 = vcombine.high %v551_v26, %v555_v27  ;;  %v543_v33 = vld [vmem:[%s1994_s26 + $0x140] sm:$0xff]  ;;  %960 = vmatprep.subr.bf16.mxu0 %v1612_v23  ;;  %v1603_v38 = vcombine.low %v551_v26, %v555_v27  ;;  %v576_v39 = vld [vmem:[%s2230_s2 + $0x8] sm:$0xff]  ;;  %1005 = vmatprep.subr.bf16.mxu1 %v1606_v34  ;;  %v1598_v43 = vcombine.high %v544_v36, %v548_v37  ;;  %v566_v34 = vld [vmem:[%s1994_s26 + $0x1f8] sm:$0xff] }
  0x51   : > { %v547_v35 = vld [vmem:[%s1994_s26 + $0x160] sm:$0xff]  ;;  %961 = vmatpush1.bf16.msra.mxu0 %v1611_v25  ;;  %v1229_v40 = vld [vmem:[%s2232_s4 + $0x8] sm:$0xff]  ;;  %584 = vperm.xlu0 %1702, %v576_v39   ;;  %v1597_v51 = vcombine.low %v544_v36, %v548_v37  ;;  %v1616_v37 = vcombine.high %v561_v31, %v565_v32  ;;  %v553_v39 = vld [vmem:[%s1994_s26 + $0x190] sm:$0xff] }
  0x52   : > { %962 = vmatprep.subr.bf16.mxu0 %v1604_v30  ;;  %v1596_v42 = vcombine.high %v543_v33, %v547_v35  ;;  %v535_v44 = vld [vmem:[%s1994_s26 + $0x100] sm:$0xff]  ;;  %v536_v46 = vld [vmem:[%s1994_s26 + $0x108] sm:$0xff]  ;;  %1237 = vperm.xlu1 %1703, %v1229_v40   ;;  %v1595_v48 = vcombine.low %v543_v33, %v547_v35  ;;  %v562_v33 = vld [vmem:[%s1994_s26 + $0x1d8] sm:$0xff] }
  0x53   : > { %v539_v45 = vld [vmem:[%s1994_s26 + $0x120] sm:$0xff]  ;;  %v540_v47 = vld [vmem:[%s1994_s26 + $0x128] sm:$0xff]  ;;  %1006 = vmatpush1.bf16.msra.mxu1 %v1605_v41  ;;  %v557_v40 = vld [vmem:[%s1994_s26 + $0x1b0] sm:$0xff] }
  0x54   : > { %v1256_v49 = vld [vmem:[%s2233_s5] sm:$0xff]  ;;  %v1257_v50 = vld [vmem:[%s2233_s5 + $0x8] sm:$0xff]  ;;  %v1588_v52 = vcombine.high %v535_v44, %v539_v45  ;;  %1007 = vmatprep.subr.bf16.mxu1 %v1598_v43  ;;  %v1590_v53 = vcombine.high %v536_v46, %v540_v47  ;;  %v1587_v58 = vcombine.low %v535_v44, %v539_v45  ;;  %v1589_v59 = vcombine.low %v536_v46, %v540_v47  ;;  %v558_v43 = vld [vmem:[%s1994_s26 + $0x1b8] sm:$0xff] }
  0x55   : > { %963 = vmatpush1.bf16.msra.mxu0 %v1603_v38  ;;  %v527_v54 = vld [vmem:[%s1994_s26 + $0xc0] sm:$0xff]  ;;  %v528_v56 = vld [vmem:[%s1994_s26 + $0xc8] sm:$0xff]  ;;  %1260 = vperm.xlu0 %1702, %v1256_v49   ;;  %v1618_v38 = vcombine.high %v562_v33, %v566_v34  ;;  %v1615_v44 = vcombine.low %v561_v31, %v565_v32  ;;  %v1617_v45 = vcombine.low %v562_v33, %v566_v34  ;;  %v549_v49 = vld [vmem:[%s1994_s26 + $0x170] sm:$0xff] }
  0x56   : > { %964 = vmatprep.subr.bf16.mxu0 %v1596_v42  ;;  %v531_v55 = vld [vmem:[%s1994_s26 + $0xe0] sm:$0xff]  ;;  %v532_v57 = vld [vmem:[%s1994_s26 + $0xe8] sm:$0xff]  ;;  %1265 = vperm.xlu1 %1703, %v1257_v50   ;;  %v554_v42 = vld [vmem:[%s1994_s26 + $0x198] sm:$0xff]  ;;  %v1608_v46 = vcombine.high %v553_v39, %v557_v40 }
  0x57   : > { %1008 = vmatpush1.bf16.msra.mxu1 %v1597_v51  ;;  %v1580_v60 = vcombine.high %v527_v54, %v531_v55  ;;  %v1582_v61 = vcombine.high %v528_v56, %v532_v57  ;;  %v519_v62 = vld [vmem:[%s1994_s26 + $0x80] sm:$0xff]  ;;  %v520_v0 = vld [vmem:[%s1994_s26 + $0x88] sm:$0xff]  ;;  %v1579_v2 = vcombine.low %v527_v54, %v531_v55  ;;  %v1581_v3 = vcombine.low %v528_v56, %v532_v57  ;;  %v546_v50 = vld [vmem:[%s1994_s26 + $0x158] sm:$0xff] }
  0x58   : > { %1009 = vmatprep.subr.bf16.mxu1 %v1590_v53  ;;  %v523_v63 = vld [vmem:[%s1994_s26 + $0xa0] sm:$0xff]  ;;  %v524_v1 = vld [vmem:[%s1994_s26 + $0xa8] sm:$0xff]  ;;  %v1610_v47 = vcombine.high %v554_v42, %v558_v43  ;;  %v550_v51 = vld [vmem:[%s1994_s26 + $0x178] sm:$0xff]  ;;  %v1609_v53 = vcombine.low %v554_v42, %v558_v43 }
  0x59   : > { %965 = vmatpush1.bf16.msra.mxu0 %v1595_v48  ;;  %v1572_v4 = vcombine.high %v519_v62, %v523_v63  ;;  %v1574_v5 = vcombine.high %v520_v0, %v524_v1  ;;  %v511_v6 = vld [vmem:[%s1994_s26 + $0x40] sm:$0xff]  ;;  %v512_v8 = vld [vmem:[%s1994_s26 + $0x48] sm:$0xff]  ;;  %v1571_v10 = vcombine.low %v519_v62, %v523_v63  ;;  %v1573_v11 = vcombine.low %v520_v0, %v524_v1  ;;  %v545_v48 = vld [vmem:[%s1994_s26 + $0x150] sm:$0xff] }
  0x5a   : > { %966 = vmatprep.subr.bf16.mxu0 %v1588_v52  ;;  %v515_v7 = vld [vmem:[%s1994_s26 + $0x60] sm:$0xff]  ;;  %v516_v9 = vld [vmem:[%s1994_s26 + $0x68] sm:$0xff]  ;;  %v1607_v52 = vcombine.low %v553_v39, %v557_v40  ;;  %v1600_v54 = vcombine.high %v545_v48, %v549_v49  ;;  %v1602_v55 = vcombine.high %v546_v50, %v550_v51  ;;  %v537_v56 = vld [vmem:[%s1994_s26 + $0x110] sm:$0xff] }
  0x5b   : > { %1010 = vmatpush1.bf16.msra.mxu1 %v1589_v59  ;;  %v1564_v12 = vcombine.high %v511_v6, %v515_v7  ;;  %v1566_v13 = vcombine.high %v512_v8, %v516_v9  ;;  %v503_v14 = vld [vmem:[%s1994_s26] sm:$0xff]  ;;  %v504_v17 = vld [vmem:[%s1994_s26 + $0x8] sm:$0xff]  ;;  %v1563_v19 = vcombine.low %v511_v6, %v515_v7  ;;  %v1565_v20 = vcombine.low %v512_v8, %v516_v9  ;;  %v541_v57 = vld [vmem:[%s1994_s26 + $0x130] sm:$0xff] }
  0x5c   : > { %1011 = vmatprep.subr.bf16.mxu1 %v1582_v61  ;;  %v507_v15 = vld [vmem:[%s1994_s26 + $0x20] sm:$0xff]  ;;  %v508_v18 = vld [vmem:[%s1994_s26 + $0x28] sm:$0xff]  ;;  %v542_v59 = vld [vmem:[%s1994_s26 + $0x138] sm:$0xff]  ;;  %v1601_v61 = vcombine.low %v546_v50, %v550_v51  ;;  %v1592_v62 = vcombine.high %v537_v56, %v541_v57 }
  0x5d   : > { %967 = vmatpush1.bf16.msra.mxu0 %v1587_v58  ;;  %v1556_v21 = vcombine.high %v503_v14, %v507_v15  ;;  %v1558_v22 = vcombine.high %v504_v17, %v508_v18  ;;  %v567_v23 = vld [vmem:[%s1994_s26 + $0x200] sm:$0xff]  ;;  %v568_v25 = vld [vmem:[%s1994_s26 + $0x208] sm:$0xff]  ;;  %v1555_v27 = vcombine.low %v503_v14, %v507_v15  ;;  %v1557_v28 = vcombine.low %v504_v17, %v508_v18  ;;  %v538_v58 = vld [vmem:[%s1994_s26 + $0x118] sm:$0xff] }
  0x5e   : > { %968 = vmatprep.subr.bf16.mxu0 %v1580_v60  ;;  %v571_v24 = vld [vmem:[%s1994_s26 + $0x220] sm:$0xff]  ;;  %v572_v26 = vld [vmem:[%s1994_s26 + $0x228] sm:$0xff]  ;;  %v1599_v60 = vcombine.low %v545_v48, %v549_v49  ;;  %v1594_v63 = vcombine.high %v538_v58, %v542_v59  ;;  %v529_v0 = vld [vmem:[%s1994_s26 + $0xd0] sm:$0xff] }
  0x5f   : > { %1012 = vmatpush1.bf16.msra.mxu1 %v1581_v3  ;;  %v1620_v29 = vcombine.high %v567_v23, %v571_v24  ;;  %v1622_v30 = vcombine.high %v568_v25, %v572_v26  ;;  %v1619_v35 = vcombine.low %v567_v23, %v571_v24  ;;  %v1621_v36 = vcombine.low %v568_v25, %v572_v26  ;;  %v2053_v41 = vld [vmem:[%s2229_s1] ss:$8 sps:$4 sm:$0xff]   ;;  %v533_v1 = vld [vmem:[%s1994_s26 + $0xf0] sm:$0xff]  ;;  %v534_v3 = vld [vmem:[%s1994_s26 + $0xf8] sm:$0xff] }
  0x60   : > { %1013 = vmatprep.subr.bf16.mxu1 %v1574_v5  ;;  %v1584_v5 = vcombine.high %v529_v0, %v533_v1  ;;  %v521_v7 = vld [vmem:[%s1994_s26 + $0x90] sm:$0xff]  ;;  %v522_v9 = vld [vmem:[%s1994_s26 + $0x98] sm:$0xff]  ;;  %v1136_v50 = vld [vmem:[%s2100_s13 + $0x20] sm:$0xff] }
  0x61   : > { %969 = vmatpush1.bf16.msra.mxu0 %v1579_v2  ;;  %v530_v2 = vld [vmem:[%s1994_s26 + $0xd8] sm:$0xff]  ;;  %v525_v8 = vld [vmem:[%s1994_s26 + $0xb0] sm:$0xff] }
  0x62   : > { %970 = vmatprep.subr.bf16.mxu0 %v1572_v4  ;;  %v1591_v4 = vcombine.low %v537_v56, %v541_v57  ;;  %v1586_v6 = vcombine.high %v530_v2, %v534_v3  ;;  %v513_v15 = vld [vmem:[%s1994_s26 + $0x50] sm:$0xff]  ;;  %v514_v18 = vld [vmem:[%s1994_s26 + $0x58] sm:$0xff] }
  0x63   : > { %1014 = vmatpush1.bf16.msra.mxu1 %v1573_v11  ;;  %v1583_v11 = vcombine.low %v529_v0, %v533_v1  ;;  %v517_v17 = vld [vmem:[%s1994_s26 + $0x70] sm:$0xff]  ;;  %v506_v26 = vld [vmem:[%s1994_s26 + $0x18] sm:$0xff] }
  0x64   : > { %1015 = vmatprep.subr.bf16.mxu1 %v1566_v13  ;;  %v1576_v13 = vcombine.high %v521_v7, %v525_v8  ;;  %v505_v24 = vld [vmem:[%s1994_s26 + $0x10] sm:$0xff]  ;;  %v570_v34 = vld [vmem:[%s1994_s26 + $0x218] sm:$0xff] }
  0x65   : > { %971 = vmatpush1.bf16.msra.mxu0 %v1571_v10  ;;  %v526_v10 = vld [vmem:[%s1994_s26 + $0xb8] sm:$0xff]  ;;  %v509_v25 = vld [vmem:[%s1994_s26 + $0x30] sm:$0xff] }
  0x66   : > { %972 = vmatprep.subr.bf16.mxu0 %v1564_v12  ;;  %v1585_v12 = vcombine.low %v530_v2, %v534_v3  ;;  %v1578_v14 = vcombine.high %v522_v9, %v526_v10  ;;  %v569_v32 = vld [vmem:[%s1994_s26 + $0x210] sm:$0xff] }
  0x67   : > { %1016 = vmatpush1.bf16.msra.mxu1 %v1565_v20  ;;  %v1575_v20 = vcombine.low %v521_v7, %v525_v8  ;;  %v573_v33 = vld [vmem:[%s1994_s26 + $0x230] sm:$0xff] }
  0x68   : > { %1017 = vmatprep.subr.bf16.mxu1 %v1558_v22  ;;  %v1568_v22 = vcombine.high %v513_v15, %v517_v17  ;;  %v1623_v40 = vcombine.low %v569_v32, %v573_v33 }
  0x69   : > { %973 = vmatpush1.bf16.msra.mxu0 %v1563_v19  ;;  %v518_v19 = vld [vmem:[%s1994_s26 + $0x78] sm:$0xff] }
  0x6a   : > { %974 = vmatprep.subr.bf16.mxu0 %v1556_v21  ;;  %v1577_v21 = vcombine.low %v522_v9, %v526_v10  ;;  %v1570_v23 = vcombine.high %v514_v18, %v518_v19 }
  0x6b   : > { %1018 = vmatpush1.bf16.msra.mxu1 %v1557_v28  ;;  %v1567_v28 = vcombine.low %v513_v15, %v517_v17 }
  0x6c   : > { %1033 = vmatprep.subr.bf16.mxu1 %v1622_v30  ;;  %v1560_v30 = vcombine.high %v505_v24, %v509_v25 }
  0x6d   : > { %975 = vmatpush1.bf16.msra.mxu0 %v1555_v27  ;;  %v510_v27 = vld [vmem:[%s1994_s26 + $0x38] sm:$0xff] }
  0x6e   : > { %990 = vmatprep.subr.bf16.mxu0 %v1620_v29  ;;  %v1569_v29 = vcombine.low %v514_v18, %v518_v19  ;;  %v1562_v31 = vcombine.high %v506_v26, %v510_v27 }
  0x6f   : > { %1034 = vmatpush2.bf16.msra.mxu1 %v1621_v36  ;;  %v1559_v36 = vcombine.low %v505_v24, %v509_v25 }
  0x70   : > { %1089 = vmatprep.subr.bf16.mxu1 %v1618_v38  ;;  %v1624_v38 = vcombine.high %v569_v32, %v573_v33 }
  0x71   : > { %991 = vmatpush2.bf16.msra.mxu0 %v1619_v35  ;;  %v574_v35 = vld [vmem:[%s1994_s26 + $0x238] sm:$0xff]  ;;  %s1369_s26 = scalar_lea.vmem (%p1807_p5), %s2234_s6, %s1673_s14 }
  0x72   : > { %1046 = vmatprep.subr.bf16.mxu0 %v1616_v37  ;;  %1036 = vmatmul.mubr.bf16.vlgmr.msra.gmra.mxu1 %v2053_v41  ;;  %v1561_v37 = vcombine.low %v506_v26, %v510_v27  ;;  %v1626_v39 = vcombine.high %v570_v34, %v574_v35  ;;  %v1625_v42 = vcombine.low %v570_v34, %v574_v35 }
  0x73   : > { %1090 = vmatpush1.bf16.msra.mxu1 %v1617_v45  ;;  %1630 = vmatprep.mubr.msk.bf16.mxu1 %vm956_vm0, %v1980_v16  ;;  %v1133_v45 = vld [vmem:[%s2100_s13 + $0x8] sm:$0xff] }
  0x74   : > { %993 = vmatmul.mubr.bf16.vlgmr.msra.gmra.mxu0 %v2053_v41  ;;  %1091 = vmatprep.subr.bf16.mxu1 %v1610_v47  ;;  %v1142_v49 = vunpack.c.l.bf16 %v1133_v45  ;;  %v1143_v57 = vunpack.c.h.bf16 %v1133_v45 }
  0x75   : > { %1047 = vmatpush1.bf16.msra.mxu0 %v1615_v44  ;;  %1629 = vmatprep.mubr.msk.bf16.mxu0 %vm956_vm0, %v1980_v16  ;;  %v1593_v16 = vcombine.low %v538_v58, %v542_v59  ;;  %v1132_v44 = vld [vmem:[%s2100_s13] sm:$0xff] }
  0x76   : > { %1048 = vmatprep.subr.bf16.mxu0 %v1608_v46  ;;  %v1140_v47 = vunpack.c.l.bf16 %v1132_v44 }
  0x77   : > { %1092 = vmatpush1.bf16.msra.mxu1 %v1609_v53  ;;  %v1141_v53 = vunpack.c.h.bf16 %v1132_v44 }
  0x78   : > { %1093 = vmatprep.subr.bf16.mxu1 %v1602_v55 }
  0x79   : > { %1049 = vmatpush1.bf16.msra.mxu0 %v1607_v52 }
  0x7a   : > { %1050 = vmatprep.subr.bf16.mxu0 %v1600_v54  ;;  %v1137_v54 = vld [vmem:[%s2100_s13 + $0x28] sm:$0xff] }
  0x7b   : > { %1094 = vmatpush1.bf16.msra.mxu1 %v1601_v61  ;;  %v1148_v61 = vunpack.c.l.bf16 %v1136_v50  ;;  %v1150_v1 = vunpack.c.l.bf16 %v1137_v54  ;;  %v1151_v10 = vunpack.c.h.bf16 %v1137_v54 }
  0x7c   : > { %1095 = vmatprep.subr.bf16.mxu1 %v1594_v63 }
  0x7d   : > { %1051 = vmatpush1.bf16.msra.mxu0 %v1599_v60 }
  0x7e   : > { %1052 = vmatprep.subr.bf16.mxu0 %v1592_v62 }
  0x7f   : > { %1096 = vmatpush1.bf16.msra.mxu1 %v1593_v16 }
  0x80   : > { %1097 = vmatprep.subr.bf16.mxu1 %v1586_v6 }
  0x81   : > { %1053 = vmatpush1.bf16.msra.mxu0 %v1591_v4 }
  0x82   : > { %1054 = vmatprep.subr.bf16.mxu0 %v1584_v5  ;;  %v1149_v5 = vunpack.c.h.bf16 %v1136_v50 }
  0x83   : > { %1098 = vmatpush1.bf16.msra.mxu1 %v1585_v12 }
  0x84   : > { %1099 = vmatprep.subr.bf16.mxu1 %v1578_v14 }
  0x85   : > { %1055 = vmatpush1.bf16.msra.mxu0 %v1583_v11 }
  0x86   : > { %1056 = vmatprep.subr.bf16.mxu0 %v1576_v13 }
  0x87   : > { %1100 = vmatpush1.bf16.msra.mxu1 %v1577_v21 }
  0x88   : > { %1101 = vmatprep.subr.bf16.mxu1 %v1570_v23 }
  0x89   : > { %1057 = vmatpush1.bf16.msra.mxu0 %v1575_v20 }
  0x8a   : > { %1058 = vmatprep.subr.bf16.mxu0 %v1568_v22 }
  0x8b   : > { %1102 = vmatpush1.bf16.msra.mxu1 %v1569_v29 }
  0x8c   : > { %1103 = vmatprep.subr.bf16.mxu1 %v1562_v31 }
  0x8d   : > { %1059 = vmatpush1.bf16.msra.mxu0 %v1567_v28 }
  0x8e   : > { %1060 = vmatprep.subr.bf16.mxu0 %v1560_v30 }
  0x8f   : > { %1104 = vmatpush1.bf16.msra.mxu1 %v1561_v37 }
  0x90   : > { %1119 = vmatprep.subr.bf16.mxu1 %v1626_v39 }
  0x91   : > { %1061 = vmatpush1.bf16.msra.mxu0 %v1559_v36 }
  0x92   : > { %1076 = vmatprep.subr.bf16.mxu0 %v1624_v38 }
  0x93   : > { %1120 = vmatpush2.bf16.msra.mxu1 %v1625_v42 }
  0x95   : > { %1077 = vmatpush2.bf16.msra.mxu0 %v1623_v40 }
  0x96   : > { %1122 = vmatmul.mubr.bf16.vlgmr.msra.gmra.mxu1 %v2053_v41 }
  0x98   : > { %1079 = vmatmul.mubr.bf16.vlgmr.msra.gmra.mxu0 %v2053_v41 }
  0xc7   : > { %v2097_v43 = vpop.permute.xlu0 %579  ;;  %v2104_v46 = vpop.permute.xlu1 %1232 }
  0xcc   : > { %v2106_v41 = vpop.permute.xlu0 %584 }
  0xcd   : > { %v2114_v2 = vpop.permute.xlu1 %1237 }
  0xd0   : > { %v2119_v11 = vpop.permute.xlu0 %1260 }
  0xd1   : > { %v2135_v29 = vpop.permute.xlu1 %1265 }
 0x132   : > { %v1037_v52 = vpop.f32.mrf.mxu1 }
 0x133   : > { %v1038_v55 = vadd.f32 %v1037_v52, %v2097_v43 }
 0x134   : > { %v994_v48 = vpop.f32.mrf.mxu0  ;;  %v1039_v60 = vpop.f32.mrf.mxu1 }
 0x135   : > { %v995_v51 = vadd.f32 %v994_v48, %v2097_v43  ;;  %v1158_v62 = vadd.f32 %v1142_v49, %v1038_v55  ;;  %v1040_v63 = vadd.f32 %v1039_v60, %v2097_v43  ;;  %v1134_v55 = vld [vmem:[%s2100_s13 + $0x10] sm:$0xff] }
 0x136   : > { %v996_v56 = vpop.f32.mrf.mxu0  ;;  %v1041_v16 = vpop.f32.mrf.mxu1  ;;  %v1138_v60 = vld [vmem:[%s2100_s13 + $0x30] sm:$0xff] }
 0x137   : > { %v1156_v58 = vadd.f32 %v1140_v47, %v995_v51  ;;  %v997_v59 = vadd.f32 %v996_v56, %v2097_v43  ;;  %v1159_v7 = vadd.f32 %v1143_v57, %v1040_v63  ;;  %v1042_v8 = vadd.f32 %v1041_v16, %v2106_v41  ;;  %v1135_v56 = vld [vmem:[%s2100_s13 + $0x18] sm:$0xff] }
 0x138   : > { %v998_v0 = vpop.f32.mrf.mxu0  ;;  %v1242_v12 = vmul.f32 %v2104_v46, %v1158_v62  ;;  %v1043_v18 = vpop.f32.mrf.mxu1  ;;  %v1144_v57 = vunpack.c.l.bf16 %v1134_v55  ;;  %v1145_v63 = vunpack.c.h.bf16 %v1134_v55 }
 0x139   : > { %v1157_v3 = vadd.f32 %v1141_v53, %v997_v59  ;;  %v999_v4 = vadd.f32 %v998_v0, %v2106_v41  ;;  %v1240_v6 = vmul.f32 %v2104_v46, %v1156_v58  ;;  %v1658_v19 = vpack.c.bf16 %v1159_v7, %v1158_v62  ;;  %v1139_v0 = vld [vmem:[%s2100_s13 + $0x38] sm:$0xff] }
 0x13a   : > { %v1000_v9 = vpop.f32.mrf.mxu0  ;;  %v1243_v20 = vmul.f32 %v2104_v46, %v1159_v7  ;;  %v1166_v21 = vadd.f32 %v1150_v1, %v1042_v8  ;;  %v1044_v22 = vadd.f32 %v1043_v18, %v2106_v41  ;;  %v1270_v26 = vadd.f32 %v2119_v11, %v1242_v12 }
 0x13b   : > { %v1657_v13 = vpack.c.bf16 %v1157_v3, %v1156_v58  ;;  %v1241_v14 = vmul.f32 %v2104_v46, %v1157_v3  ;;  %v1164_v15 = vadd.f32 %v1148_v61, %v999_v4  ;;  %v1001_v17 = vadd.f32 %v1000_v9, %v2106_v41  ;;  %1221 = vst [vmem:[%s2127_s24 + $0x8] sm:$0xff] %v1658_v19 }
 0x13c   : > { %v1268_v24 = vadd.f32 %v2119_v11, %v1240_v6  ;;  %v1167_v27 = vadd.f32 %v1151_v10, %v1044_v22  ;;  %v1271_v28 = vadd.f32 %v2119_v11, %v1243_v20  ;;  %v1250_v31 = vmul.f32 %v2114_v2, %v1166_v21 }
 0x13d   : > { %1220 = vst [vmem:[%s2127_s24] sm:$0xff] %v1657_v13  ;;  %v1165_v23 = vadd.f32 %v1149_v5, %v1001_v17  ;;  %v1269_v25 = vadd.f32 %v2119_v11, %v1241_v14  ;;  %v1248_v30 = vmul.f32 %v2114_v2, %v1164_v15  ;;  %v1286_v38 = vmax.f32 %v1270_v26, 0.0 }
 0x13e   : > { %v1284_v34 = vmax.f32 %v1268_v24, 0.0  ;;  %v1662_v36 = vpack.c.bf16 %v1167_v27, %v1166_v21  ;;  %v1251_v37 = vmul.f32 %v2114_v2, %v1167_v27  ;;  %v1287_v39 = vmax.f32 %v1271_v28, 0.0 }
 0x13f   : > { %v1661_v32 = vpack.c.bf16 %v1165_v23, %v1164_v15  ;;  %v1249_v33 = vmul.f32 %v2114_v2, %v1165_v23  ;;  %v1285_v35 = vmax.f32 %v1269_v25, 0.0  ;;  %v1276_v42 = vadd.f32 %v2135_v29, %v1248_v30 }
 0x140   : > { %v1278_v45 = vadd.f32 %v2135_v29, %v1250_v31  ;;  %1225 = vst [vmem:[%s2127_s24 + $0x28] sm:$0xff] %v1662_v36  ;;  %v1666_v47 = vpack.c.bf16 %v1287_v39, %v1286_v38  ;;  %v1279_v48 = vadd.f32 %v2135_v29, %v1251_v37  ;;  %v1146_v59 = vunpack.c.l.bf16 %v1135_v56 }
 0x141   : > { %1224 = vst [vmem:[%s2127_s24 + $0x20] sm:$0xff] %v1661_v32  ;;  %v1665_v40 = vpack.c.bf16 %v1285_v35, %v1284_v34  ;;  %v1277_v44 = vadd.f32 %v2135_v29, %v1249_v33  ;;  %v1292_v49 = vmax.f32 %v1276_v42, 0.0  ;;  %v1147_v4 = vunpack.c.h.bf16 %v1135_v56 }
 0x142   : > { %1349 = vst [vmem:[%s2148_s30 + $0x8] sm:$0xff] %v1666_v47  ;;  %v1294_v51 = vmax.f32 %v1278_v45, 0.0  ;;  %v1295_v52 = vmax.f32 %v1279_v48, 0.0  ;;  %v1152_v7 = vunpack.c.l.bf16 %v1138_v60  ;;  %v1154_v12 = vunpack.c.l.bf16 %v1139_v0 }
 0x143   : > { %1348 = vst [vmem:[%s2148_s30] sm:$0xff] %v1665_v40  ;;  %v1293_v50 = vmax.f32 %v1277_v44, 0.0  ;;  %v1153_v18 = vunpack.c.h.bf16 %v1138_v60  ;;  %v1155_v23 = vunpack.c.h.bf16 %v1139_v0 }
 0x144   : > { %v1670_v54 = vpack.c.bf16 %v1295_v52, %v1294_v51 }
 0x145   : > { %v1669_v53 = vpack.c.bf16 %v1293_v50, %v1292_v49 }
 0x146   : > { %1353 = vst [vmem:[%s2148_s30 + $0x28] sm:$0xff] %v1670_v54 }
 0x147   : > { %1352 = vst [vmem:[%s2148_s30 + $0x20] sm:$0xff] %v1669_v53  ;;  %v1392_v0 = vld [vmem:[%s2127_s24 + $0x28] sm:$0xff] (%p1807_p5) }
 0x148   : > { %1393 = vst [vmem:[%s1369_s26 + $0x48] sm:$0xff] (%p1807_p5), %v1392_v0 }
 0x156   : > { %v1123_v62 = vpop.f32.mrf.mxu1 }
 0x157   : > { %v1124_v1 = vadd.f32 %v1123_v62, %v2097_v43 }
 0x158   : > { %v1080_v58 = vpop.f32.mrf.mxu0  ;;  %v1125_v6 = vpop.f32.mrf.mxu1 }
 0x159   : > { %v1081_v61 = vadd.f32 %v1080_v58, %v2097_v43  ;;  %v1162_v8 = vadd.f32 %v1146_v59, %v1124_v1  ;;  %v1126_v9 = vadd.f32 %v1125_v6, %v2097_v43 }
 0x15a   : > { %v1082_v3 = vpop.f32.mrf.mxu0  ;;  %v1127_v17 = vpop.f32.mrf.mxu1 }
 0x15b   : > { %v1160_v16 = vadd.f32 %v1144_v57, %v1081_v61  ;;  %v1083_v5 = vadd.f32 %v1082_v3, %v2097_v43  ;;  %v1246_v19 = vmul.f32 %v2104_v46, %v1162_v8  ;;  %v1163_v20 = vadd.f32 %v1147_v4, %v1126_v9 }
 0x15c   : > { %v1084_v10 = vpop.f32.mrf.mxu0  ;;  %v1128_v21 = vadd.f32 %v1127_v17, %v2106_v41  ;;  %v1129_v27 = vpop.f32.mrf.mxu1 }
 0x15d   : > { %v1244_v13 = vmul.f32 %v2104_v46, %v1160_v16  ;;  %v1161_v14 = vadd.f32 %v1145_v63, %v1083_v5  ;;  %v1085_v15 = vadd.f32 %v1084_v10, %v2106_v41  ;;  %v1274_v28 = vadd.f32 %v2119_v11, %v1246_v19  ;;  %v1390_v63 = vld [vmem:[%s2127_s24 + $0x20] sm:$0xff] (%p1807_p5) }
 0x15e   : > { %v1086_v22 = vpop.f32.mrf.mxu0  ;;  %v1660_v30 = vpack.c.bf16 %v1163_v20, %v1162_v8  ;;  %v1247_v31 = vmul.f32 %v2104_v46, %v1163_v20  ;;  %v1170_v32 = vadd.f32 %v1154_v12, %v1128_v21  ;;  %v1130_v38 = vadd.f32 %v1129_v27, %v2106_v41  ;;  %1391 = vst [vmem:[%s1369_s26 + $0x40] sm:$0xff] (%p1807_p5), %v1390_v63 }
 0x15f   : > { %v1272_v43 = vadd.f32 %v2119_v11, %v1244_v13  ;;  %v1659_v24 = vpack.c.bf16 %v1161_v14, %v1160_v16  ;;  %v1245_v25 = vmul.f32 %v2104_v46, %v1161_v14  ;;  %v1168_v26 = vadd.f32 %v1152_v7, %v1085_v15 }
 0x160   : > { %v1087_v35 = vadd.f32 %v1086_v22, %v2106_v41  ;;  %1223 = vst [vmem:[%s2127_s24 + $0x18] sm:$0xff] %v1660_v30  ;;  %v1275_v36 = vadd.f32 %v2119_v11, %v1247_v31  ;;  %v1254_v37 = vmul.f32 %v2114_v2, %v1170_v32  ;;  %v1290_v42 = vmax.f32 %v1274_v28, 0.0 }
 0x161   : > { %1222 = vst [vmem:[%s2127_s24 + $0x10] sm:$0xff] %v1659_v24  ;;  %v1273_v33 = vadd.f32 %v2119_v11, %v1245_v25  ;;  %v1252_v34 = vmul.f32 %v2114_v2, %v1168_v26  ;;  %v1288_v39 = vmax.f32 %v1272_v43, 0.0  ;;  %v1171_v45 = vadd.f32 %v1155_v23, %v1130_v38 }
 0x162   : > { %v1169_v46 = vadd.f32 %v1153_v18, %v1087_v35  ;;  %v1291_v44 = vmax.f32 %v1275_v36, 0.0  ;;  %v1282_v51 = vadd.f32 %v2135_v29, %v1254_v37 }
 0x163   : > { %v1289_v40 = vmax.f32 %v1273_v33, 0.0  ;;  %v1280_v48 = vadd.f32 %v2135_v29, %v1252_v34  ;;  %v1664_v41 = vpack.c.bf16 %v1171_v45, %v1170_v32  ;;  %v1255_v52 = vmul.f32 %v2114_v2, %v1171_v45 }
 0x164   : > { %v1663_v49 = vpack.c.bf16 %v1169_v46, %v1168_v26  ;;  %v1253_v11 = vmul.f32 %v2114_v2, %v1169_v46  ;;  %v1668_v50 = vpack.c.bf16 %v1291_v44, %v1290_v42  ;;  %v1298_v57 = vmax.f32 %v1282_v51, 0.0  ;;  %v1382_v2 = vld [vmem:[%s2127_s24] sm:$0xff] (%p1807_p5) }
 0x165   : > { %v1667_v47 = vpack.c.bf16 %v1289_v40, %v1288_v39  ;;  %1227 = vst [vmem:[%s2127_s24 + $0x38] sm:$0xff] %v1664_v41  ;;  %v1283_v54 = vadd.f32 %v2135_v29, %v1255_v52  ;;  %v1296_v55 = vmax.f32 %v1280_v48, 0.0  ;;  %1383 = vst [vmem:[%s1369_s26] sm:$0xff] (%p1807_p5), %v1382_v2 }
 0x166   : > { %1226 = vst [vmem:[%s2127_s24 + $0x30] sm:$0xff] %v1663_v49  ;;  %v1281_v53 = vadd.f32 %v2135_v29, %v1253_v11  ;;  %1351 = vst [vmem:[%s2148_s30 + $0x18] sm:$0xff] %v1668_v50  ;;  %v1384_v29 = vld [vmem:[%s2127_s24 + $0x8] sm:$0xff] (%p1807_p5) }
 0x167   : > { %1350 = vst [vmem:[%s2148_s30 + $0x10] sm:$0xff] %v1667_v47  ;;  %v1299_v58 = vmax.f32 %v1283_v54, 0.0  ;;  %v1388_v62 = vld [vmem:[%s2127_s24 + $0x18] sm:$0xff] (%p1807_p5)  ;;  %1385 = vst [vmem:[%s1369_s26 + $0x8] sm:$0xff] (%p1807_p5), %v1384_v29 }
 0x168   : > { %v1297_v56 = vmax.f32 %v1281_v53, 0.0  ;;  %1366 = sbr.rel (!%p1807_p5) target bundleno = 367 (0x16f), region = 94  ;;  %v1386_v61 = vld [vmem:[%s2127_s24 + $0x10] sm:$0xff] (%p1807_p5)  ;;  %1389 = vst [vmem:[%s1369_s26 + $0x18] sm:$0xff] (%p1807_p5), %v1388_v62 }
 0x169   : > { %v1672_v60 = vpack.c.bf16 %v1299_v58, %v1298_v57  ;;  %1387 = vst [vmem:[%s1369_s26 + $0x10] sm:$0xff] (%p1807_p5), %v1386_v61 }
 0x16a   : > { %v1671_v59 = vpack.c.bf16 %v1297_v56, %v1296_v55 }
 0x16b   : > { %1355 = vst [vmem:[%s2148_s30 + $0x38] sm:$0xff] %v1672_v60 }
 0x16c   : > { %1354 = vst [vmem:[%s2148_s30 + $0x30] sm:$0xff] %v1671_v59  ;;  %v1396_v3 = vld [vmem:[%s2127_s24 + $0x38] sm:$0xff] (%p1807_p5) }
 0x16d   : > { %v1394_v1 = vld [vmem:[%s2127_s24 + $0x30] sm:$0xff]  ;;  %1397 = vst [vmem:[%s1369_s26 + $0x58] sm:$0xff] %v1396_v3 }
 0x16e   : > { %1395 = vst [vmem:[%s1369_s26 + $0x50] sm:$0xff] %v1394_v1 }
 0x16f PF: > { %1403 = sbr.rel (!%p1807_p5) target bundleno = 375 (0x177), region = 117  ;;  %s1674_s17 = sshll.u32 (%p1807_p5), %s1788_s27, 5  ;;  %v1419_v4 = vld [vmem:[%s2148_s30] sm:$0xff] (%p1807_p5)  ;;  %v1421_v16 = vld [vmem:[%s2148_s30 + $0x8] sm:$0xff] (%p1807_p5)  ;;  %v1425_v6 = vld [vmem:[%s2148_s30 + $0x18] sm:$0xff] (%p1807_p5) }
 0x170   : > { %v1423_v5 = vld [vmem:[%s2148_s30 + $0x10] sm:$0xff] (%p1807_p5)  ;;  %s1406_s20 = scalar_lea.vmem (%p1807_p5), %s2235_s7, %s1674_s17  ;;  %v1427_v7 = vld [vmem:[%s2148_s30 + $0x20] sm:$0xff] (%p1807_p5)  ;;  %v1429_v8 = vld [vmem:[%s2148_s30 + $0x28] sm:$0xff] (%p1807_p5) }
 0x171   : > { %1420 = vst [vmem:[%s1406_s20] sm:$0xff] (%p1807_p5), %v1419_v4  ;;  %1422 = vst [vmem:[%s1406_s20 + $0x8] sm:$0xff] (%p1807_p5), %v1421_v16 }
 0x172   : > { %1424 = vst [vmem:[%s1406_s20 + $0x10] sm:$0xff] (%p1807_p5), %v1423_v5  ;;  %1426 = vst [vmem:[%s1406_s20 + $0x18] sm:$0xff] (%p1807_p5), %v1425_v6 }
 0x173   : > { %1428 = vst [vmem:[%s1406_s20 + $0x40] sm:$0xff] (%p1807_p5), %v1427_v7  ;;  %1430 = vst [vmem:[%s1406_s20 + $0x48] sm:$0xff] (%p1807_p5), %v1429_v8 }
 0x174   : > { %v1433_v10 = vld [vmem:[%s2148_s30 + $0x38] sm:$0xff] }
 0x175   : > { %v1431_v9 = vld [vmem:[%s2148_s30 + $0x30] sm:$0xff]  ;;  %1434 = vst [vmem:[%s1406_s20 + $0x58] sm:$0xff] %v1433_v10 }
 0x176   : > { %1432 = vst [vmem:[%s1406_s20 + $0x50] sm:$0xff] %v1431_v9 }
 0x177 PF: > { %p15_p10 = scmp.ge.s32.totalorder %s1791_s28, 4   ;;  %s2238_s24 = smov %s1725_s25 }
 0x178   : > { %s2239_s25 = smov %s1801_s8  ;;  %s2240_s26 = smov %s1791_s28 }
 0x179   :  { %17 = sbr.rel (!%p15_p10) target bundleno = 2 (0x2), region = 191 }

// kernel: wide_resnet_forward.11
= control target key start
LH: loop header
LB: loop body
LE: loop exit
PB: predicated region body
PF: predicated region fallthrough
CT: control target
= control target key end

     0   :  { %s1671_s18 = smov 0   ;;  %s1673_s19 = smov 0   ;;  %s2194_s0 = inlined_call_operand.vmem [shape: bf16[144,2048], index: 0, kind: input, shape index: {}]   ;;  %s2195_s1 = inlined_call_operand.vmem [shape: bf16[32,144], index: 1, kind: input, shape index: {}]   ;;  %s2196_s2 = inlined_call_operand.vmem [shape: f32[32,1], index: 2, kind: input, shape index: {}]   ;;  %s2197_s3 = inlined_call_operand.vmem [shape: f32[32,1], index: 3, kind: input, shape index: {}]   ;;  %s2198_s4 = inlined_call_operand.vmem [shape: f32[32,1], index: 4, kind: input, shape index: {}]   ;;  %s2199_s5 = inlined_call_operand.vmem [shape: bf16[32,2048], index: 5, kind: output, shape index: {}]  }
   0x1   :  { %s1675_s20 = smov 0  }
   0x2 LB: > { %s1450_s21 = sadd.s32 4294967295, %s1638_s20   ;;  %s1688_s22 = sadd.s32 1, %s1638_s20   ;;  %s1638_s20 = sphi %s1675_s20, %s2203_s20   ;;  %s1634_s19 = sphi %s1673_s19, %s2202_s19   ;;  %s1630_s18 = sphi %s1671_s18, %s2201_s18  }
   0x3   : > { %s19_s23 = ssub.s32 %s1638_s20, %s1688_s22  ;;  %s22_s24 = sadd.s32 1, %s1634_s19 }
   0x4   : > { %p20_p0 = scmp.eq.s32.totalorder %s19_s23, 0  ;;  %p29_p1 = scmp.ne.s32.totalorder %s1634_s19, %s1630_s18 }
   0x5   : > { %p30_p2 = scmp.eq.s32.totalorder %s1638_s20, 0  ;;  %p143_p3 = scmp.eq.s32.totalorder %s1450_s21, 1 }
   0x6   : > { %s1699_s25 = scalar_select %p20_p0, %s1634_s19, %s22_s24  }
   0x7   : > { %p31_p4 = por %p30_p2, %p29_p1  ;;  %p1701_p5 = por %p143_p3, %p29_p1 }
   0x8   : > { %p1453_p6 = scmp.ge.s32.totalorder %s1638_s20, 2 }
   0xa   : > { %177 = sbr.rel (%p1453_p6) target bundleno = 56 (0x38), region = 32 }
   0xf   : > { %180 = sbr.rel (!%p31_p4) target bundleno = 56 (0x38), region = 36  ;;  %s182_s27 = sand.u32 (%p31_p4), 1, %s1634_s19  }
  0x10   : > { %s1563_s28 = sshll.u32 (%p31_p4), %s1638_s20, 5  ;;  %s1581_s29 = smul.u32 (%p31_p4), 576, %s182_s27 }
  0x11   : > { %s1711_s7 = scalar_lea.vmem (%p31_p4), %s2194_s0, %s1563_s28 }
  0x12   : > { %v200_v0 = vld [vmem:[%s1711_s7] sm:$0xff] (%p31_p4)  ;;  %v202_v1 = vld [vmem:[%s1711_s7 + $0x8] sm:$0xff] (%p31_p4)  ;;  %v204_v2 = vld [vmem:[%s1711_s7 + $0x10] sm:$0xff] (%p31_p4)  ;;  %s1719_s8 = scalar_lea.vmem (%p31_p4), [#allocation2], %s1581_s29 }
  0x13   : > { %v206_v3 = vld [vmem:[%s1711_s7 + $0x18] sm:$0xff] (%p31_p4)  ;;  %v208_v4 = vld [vmem:[%s1711_s7 + $0x40] sm:$0xff] (%p31_p4)  ;;  %v210_v5 = vld [vmem:[%s1711_s7 + $0x48] sm:$0xff] (%p31_p4)  ;;  %201 = vst [vmem:[%s1719_s8] sm:$0xff] (%p31_p4), %v200_v0 }
  0x14   : > { %203 = vst [vmem:[%s1719_s8 + $0x8] sm:$0xff] %v202_v1  ;;  %205 = vst [vmem:[%s1719_s8 + $0x10] sm:$0xff] %v204_v2  ;;  %v212_v6 = vld [vmem:[%s1711_s7 + $0x50] sm:$0xff]  ;;  %v214_v7 = vld [vmem:[%s1711_s7 + $0x58] sm:$0xff] }
  0x15   : > { %207 = vst [vmem:[%s1719_s8 + $0x18] sm:$0xff] %v206_v3  ;;  %209 = vst [vmem:[%s1719_s8 + $0x20] sm:$0xff] %v208_v4  ;;  %v216_v8 = vld [vmem:[%s1711_s7 + $0x80] sm:$0xff]  ;;  %v218_v9 = vld [vmem:[%s1711_s7 + $0x88] sm:$0xff] }
  0x16   : > { %211 = vst [vmem:[%s1719_s8 + $0x28] sm:$0xff] %v210_v5  ;;  %213 = vst [vmem:[%s1719_s8 + $0x30] sm:$0xff] %v212_v6  ;;  %v220_v10 = vld [vmem:[%s1711_s7 + $0x90] sm:$0xff]  ;;  %v222_v11 = vld [vmem:[%s1711_s7 + $0x98] sm:$0xff] }
  0x17   : > { %215 = vst [vmem:[%s1719_s8 + $0x38] sm:$0xff] %v214_v7  ;;  %217 = vst [vmem:[%s1719_s8 + $0x40] sm:$0xff] %v216_v8  ;;  %v224_v12 = vld [vmem:[%s1711_s7 + $0xc0] sm:$0xff]  ;;  %v226_v13 = vld [vmem:[%s1711_s7 + $0xc8] sm:$0xff] }
  0x18   : > { %219 = vst [vmem:[%s1719_s8 + $0x48] sm:$0xff] %v218_v9  ;;  %221 = vst [vmem:[%s1719_s8 + $0x50] sm:$0xff] %v220_v10  ;;  %v228_v14 = vld [vmem:[%s1711_s7 + $0xd0] sm:$0xff]  ;;  %v230_v15 = vld [vmem:[%s1711_s7 + $0xd8] sm:$0xff] }
  0x19   : > { %223 = vst [vmem:[%s1719_s8 + $0x58] sm:$0xff] %v222_v11  ;;  %225 = vst [vmem:[%s1719_s8 + $0x60] sm:$0xff] %v224_v12  ;;  %v232_v16 = vld [vmem:[%s1711_s7 + $0x100] sm:$0xff]  ;;  %v234_v17 = vld [vmem:[%s1711_s7 + $0x108] sm:$0xff] }
  0x1a   : > { %227 = vst [vmem:[%s1719_s8 + $0x68] sm:$0xff] %v226_v13  ;;  %229 = vst [vmem:[%s1719_s8 + $0x70] sm:$0xff] %v228_v14  ;;  %v236_v18 = vld [vmem:[%s1711_s7 + $0x110] sm:$0xff]  ;;  %v238_v19 = vld [vmem:[%s1711_s7 + $0x118] sm:$0xff] }
  0x1b   : > { %231 = vst [vmem:[%s1719_s8 + $0x78] sm:$0xff] %v230_v15  ;;  %233 = vst [vmem:[%s1719_s8 + $0x80] sm:$0xff] %v232_v16  ;;  %v240_v20 = vld [vmem:[%s1711_s7 + $0x140] sm:$0xff]  ;;  %v242_v21 = vld [vmem:[%s1711_s7 + $0x148] sm:$0xff] }
  0x1c   : > { %235 = vst [vmem:[%s1719_s8 + $0x88] sm:$0xff] %v234_v17  ;;  %237 = vst [vmem:[%s1719_s8 + $0x90] sm:$0xff] %v236_v18  ;;  %v244_v22 = vld [vmem:[%s1711_s7 + $0x150] sm:$0xff]  ;;  %v246_v23 = vld [vmem:[%s1711_s7 + $0x158] sm:$0xff] }
  0x1d   : > { %239 = vst [vmem:[%s1719_s8 + $0x98] sm:$0xff] %v238_v19  ;;  %241 = vst [vmem:[%s1719_s8 + $0xa0] sm:$0xff] %v240_v20  ;;  %v248_v24 = vld [vmem:[%s1711_s7 + $0x180] sm:$0xff]  ;;  %v250_v25 = vld [vmem:[%s1711_s7 + $0x188] sm:$0xff] }
  0x1e   : > { %243 = vst [vmem:[%s1719_s8 + $0xa8] sm:$0xff] %v242_v21  ;;  %245 = vst [vmem:[%s1719_s8 + $0xb0] sm:$0xff] %v244_v22  ;;  %v252_v26 = vld [vmem:[%s1711_s7 + $0x190] sm:$0xff]  ;;  %v254_v27 = vld [vmem:[%s1711_s7 + $0x198] sm:$0xff] }
  0x1f   : > { %247 = vst [vmem:[%s1719_s8 + $0xb8] sm:$0xff] %v246_v23  ;;  %249 = vst [vmem:[%s1719_s8 + $0xc0] sm:$0xff] %v248_v24  ;;  %v256_v28 = vld [vmem:[%s1711_s7 + $0x1c0] sm:$0xff]  ;;  %v258_v29 = vld [vmem:[%s1711_s7 + $0x1c8] sm:$0xff] }
  0x20   : > { %251 = vst [vmem:[%s1719_s8 + $0xc8] sm:$0xff] %v250_v25  ;;  %253 = vst [vmem:[%s1719_s8 + $0xd0] sm:$0xff] %v252_v26  ;;  %v260_v30 = vld [vmem:[%s1711_s7 + $0x1d0] sm:$0xff]  ;;  %v262_v31 = vld [vmem:[%s1711_s7 + $0x1d8] sm:$0xff] }
  0x21   : > { %255 = vst [vmem:[%s1719_s8 + $0xd8] sm:$0xff] %v254_v27  ;;  %257 = vst [vmem:[%s1719_s8 + $0xe0] sm:$0xff] %v256_v28  ;;  %v264_v32 = vld [vmem:[%s1711_s7 + $0x200] sm:$0xff]  ;;  %v266_v33 = vld [vmem:[%s1711_s7 + $0x208] sm:$0xff] }
  0x22   : > { %259 = vst [vmem:[%s1719_s8 + $0xe8] sm:$0xff] %v258_v29  ;;  %261 = vst [vmem:[%s1719_s8 + $0xf0] sm:$0xff] %v260_v30  ;;  %v268_v34 = vld [vmem:[%s1711_s7 + $0x210] sm:$0xff]  ;;  %v270_v35 = vld [vmem:[%s1711_s7 + $0x218] sm:$0xff] }
  0x23   : > { %263 = vst [vmem:[%s1719_s8 + $0xf8] sm:$0xff] %v262_v31  ;;  %265 = vst [vmem:[%s1719_s8 + $0x100] sm:$0xff] %v264_v32  ;;  %v272_v36 = vld [vmem:[%s1711_s7 + $0x240] sm:$0xff]  ;;  %v274_v37 = vld [vmem:[%s1711_s7 + $0x248] sm:$0xff] }
  0x24   : > { %267 = vst [vmem:[%s1719_s8 + $0x108] sm:$0xff] %v266_v33  ;;  %269 = vst [vmem:[%s1719_s8 + $0x110] sm:$0xff] %v268_v34  ;;  %v276_v38 = vld [vmem:[%s1711_s7 + $0x250] sm:$0xff]  ;;  %v278_v39 = vld [vmem:[%s1711_s7 + $0x258] sm:$0xff] }
  0x25   : > { %271 = vst [vmem:[%s1719_s8 + $0x118] sm:$0xff] %v270_v35  ;;  %273 = vst [vmem:[%s1719_s8 + $0x120] sm:$0xff] %v272_v36  ;;  %v280_v40 = vld [vmem:[%s1711_s7 + $0x280] sm:$0xff]  ;;  %v282_v41 = vld [vmem:[%s1711_s7 + $0x288] sm:$0xff] }
  0x26   : > { %275 = vst [vmem:[%s1719_s8 + $0x128] sm:$0xff] %v274_v37  ;;  %277 = vst [vmem:[%s1719_s8 + $0x130] sm:$0xff] %v276_v38  ;;  %v284_v42 = vld [vmem:[%s1711_s7 + $0x290] sm:$0xff]  ;;  %v286_v43 = vld [vmem:[%s1711_s7 + $0x298] sm:$0xff] }
  0x27   : > { %279 = vst [vmem:[%s1719_s8 + $0x138] sm:$0xff] %v278_v39  ;;  %281 = vst [vmem:[%s1719_s8 + $0x140] sm:$0xff] %v280_v40  ;;  %v288_v44 = vld [vmem:[%s1711_s7 + $0x2c0] sm:$0xff]  ;;  %v290_v45 = vld [vmem:[%s1711_s7 + $0x2c8] sm:$0xff] }
  0x28   : > { %283 = vst [vmem:[%s1719_s8 + $0x148] sm:$0xff] %v282_v41  ;;  %285 = vst [vmem:[%s1719_s8 + $0x150] sm:$0xff] %v284_v42  ;;  %v292_v46 = vld [vmem:[%s1711_s7 + $0x2d0] sm:$0xff]  ;;  %v294_v47 = vld [vmem:[%s1711_s7 + $0x2d8] sm:$0xff] }
  0x29   : > { %287 = vst [vmem:[%s1719_s8 + $0x158] sm:$0xff] %v286_v43  ;;  %289 = vst [vmem:[%s1719_s8 + $0x160] sm:$0xff] %v288_v44  ;;  %v296_v48 = vld [vmem:[%s1711_s7 + $0x300] sm:$0xff]  ;;  %v298_v49 = vld [vmem:[%s1711_s7 + $0x308] sm:$0xff] }
  0x2a   : > { %291 = vst [vmem:[%s1719_s8 + $0x168] sm:$0xff] %v290_v45  ;;  %293 = vst [vmem:[%s1719_s8 + $0x170] sm:$0xff] %v292_v46  ;;  %v300_v50 = vld [vmem:[%s1711_s7 + $0x310] sm:$0xff]  ;;  %v302_v51 = vld [vmem:[%s1711_s7 + $0x318] sm:$0xff] }
  0x2b   : > { %295 = vst [vmem:[%s1719_s8 + $0x178] sm:$0xff] %v294_v47  ;;  %297 = vst [vmem:[%s1719_s8 + $0x180] sm:$0xff] %v296_v48  ;;  %v304_v52 = vld [vmem:[%s1711_s7 + $0x340] sm:$0xff]  ;;  %v306_v53 = vld [vmem:[%s1711_s7 + $0x348] sm:$0xff] }
  0x2c   : > { %299 = vst [vmem:[%s1719_s8 + $0x188] sm:$0xff] %v298_v49  ;;  %301 = vst [vmem:[%s1719_s8 + $0x190] sm:$0xff] %v300_v50  ;;  %v308_v54 = vld [vmem:[%s1711_s7 + $0x350] sm:$0xff]  ;;  %v310_v55 = vld [vmem:[%s1711_s7 + $0x358] sm:$0xff] }
  0x2d   : > { %303 = vst [vmem:[%s1719_s8 + $0x198] sm:$0xff] %v302_v51  ;;  %305 = vst [vmem:[%s1719_s8 + $0x1a0] sm:$0xff] %v304_v52  ;;  %v312_v56 = vld [vmem:[%s1711_s7 + $0x380] sm:$0xff]  ;;  %v314_v57 = vld [vmem:[%s1711_s7 + $0x388] sm:$0xff] }
  0x2e   : > { %307 = vst [vmem:[%s1719_s8 + $0x1a8] sm:$0xff] %v306_v53  ;;  %309 = vst [vmem:[%s1719_s8 + $0x1b0] sm:$0xff] %v308_v54  ;;  %v316_v58 = vld [vmem:[%s1711_s7 + $0x390] sm:$0xff]  ;;  %v318_v59 = vld [vmem:[%s1711_s7 + $0x398] sm:$0xff] }
  0x2f   : > { %311 = vst [vmem:[%s1719_s8 + $0x1b8] sm:$0xff] %v310_v55  ;;  %313 = vst [vmem:[%s1719_s8 + $0x1c0] sm:$0xff] %v312_v56  ;;  %v320_v60 = vld [vmem:[%s1711_s7 + $0x3c0] sm:$0xff]  ;;  %v322_v61 = vld [vmem:[%s1711_s7 + $0x3c8] sm:$0xff] }
  0x30   : > { %315 = vst [vmem:[%s1719_s8 + $0x1c8] sm:$0xff] %v314_v57  ;;  %317 = vst [vmem:[%s1719_s8 + $0x1d0] sm:$0xff] %v316_v58  ;;  %v324_v62 = vld [vmem:[%s1711_s7 + $0x3d0] sm:$0xff]  ;;  %v326_v63 = vld [vmem:[%s1711_s7 + $0x3d8] sm:$0xff] }
  0x31   : > { %319 = vst [vmem:[%s1719_s8 + $0x1d8] sm:$0xff] %v318_v59  ;;  %321 = vst [vmem:[%s1719_s8 + $0x1e0] sm:$0xff] %v320_v60  ;;  %v328_v0 = vld [vmem:[%s1711_s7 + $0x400] sm:$0xff]  ;;  %v330_v1 = vld [vmem:[%s1711_s7 + $0x408] sm:$0xff] }
  0x32   : > { %323 = vst [vmem:[%s1719_s8 + $0x1e8] sm:$0xff] %v322_v61  ;;  %325 = vst [vmem:[%s1719_s8 + $0x1f0] sm:$0xff] %v324_v62  ;;  %v332_v2 = vld [vmem:[%s1711_s7 + $0x410] sm:$0xff]  ;;  %v334_v3 = vld [vmem:[%s1711_s7 + $0x418] sm:$0xff] }
  0x33   : > { %327 = vst [vmem:[%s1719_s8 + $0x1f8] sm:$0xff] %v326_v63  ;;  %329 = vst [vmem:[%s1719_s8 + $0x200] sm:$0xff] %v328_v0  ;;  %v336_v4 = vld [vmem:[%s1711_s7 + $0x440] sm:$0xff]  ;;  %v338_v5 = vld [vmem:[%s1711_s7 + $0x448] sm:$0xff] }
  0x34   : > { %331 = vst [vmem:[%s1719_s8 + $0x208] sm:$0xff] %v330_v1  ;;  %333 = vst [vmem:[%s1719_s8 + $0x210] sm:$0xff] %v332_v2  ;;  %v340_v6 = vld [vmem:[%s1711_s7 + $0x450] sm:$0xff]  ;;  %v342_v7 = vld [vmem:[%s1711_s7 + $0x458] sm:$0xff] }
  0x35   : > { %335 = vst [vmem:[%s1719_s8 + $0x218] sm:$0xff] %v334_v3  ;;  %337 = vst [vmem:[%s1719_s8 + $0x220] sm:$0xff] %v336_v4 }
  0x36   : > { %339 = vst [vmem:[%s1719_s8 + $0x228] sm:$0xff] %v338_v5  ;;  %341 = vst [vmem:[%s1719_s8 + $0x230] sm:$0xff] %v340_v6 }
  0x37   : > { %343 = vst [vmem:[%s1719_s8 + $0x238] sm:$0xff] %v342_v7 }
  0x38 PF: > { %p1456_p7 = scmp.ge.s32.totalorder %s1638_s20, 1  ;;  %p348_p8 = scmp.lt.s32.totalorder %s1638_s20, 3 }
  0x3a   : > { %p349_p9 = pnand %p1456_p7, %p348_p8 }
  0x3b   : > { %s355_s9 = sand.u32 (!%p349_p9), 1, %s1630_s18  }
  0x3c   : > { %352 = sbr.rel (%p349_p9) target bundleno = 369 (0x171), region = 59 }
  0x3d   : > { %s1582_s12 = smul.u32 (!%p349_p9), 576, %s355_s9 }
  0x3f   : > { %s1879_s17 = scalar_lea.vmem (!%p349_p9), [#allocation2], %s1582_s12 }
  0x41   : > { %v1865_v8 = vld [vmem:[%s2195_s1 + $0x4] ss:$8 sps:$4 sm:$0xff]   ;;  %vm862_vm0 = vcmask 130048   ;;  %v1640_v10 = vmov 0   ;;  %v462_v11 = vld [vmem:[%s2196_s2 + $0x10] sm:$0xff]  ;;  %v463_v32 = vld [vmem:[%s2196_s2 + $0x18] sm:$0xff] }
  0x42   : > { %1534 = vmatprep.mubr.msk.bf16.mxu0 %vm862_vm0, %v1865_v8  ;;  %1536 = vmatprep.mubr.msk.bf16.mxu1 %vm862_vm0, %v1865_v8  ;;  %v460_v9 = vld [vmem:[%s2196_s2] sm:$0xff]  ;;  %v445_v14 = vld [vmem:[%s1879_s17 + $0x1c8] sm:$0xff] }
  0x43   : > { %1608 = vset.pattern.permute.xlu0 %v1640_v10  ;;  %1609 = vset.pattern.permute.xlu1 %v1640_v10  ;;  %v444_v12 = vld [vmem:[%s1879_s17 + $0x1c0] sm:$0xff]  ;;  %v449_v16 = vld [vmem:[%s1879_s17 + $0x1e8] sm:$0xff] }
  0x44   : > { %v448_v13 = vld [vmem:[%s1879_s17 + $0x1e0] sm:$0xff]  ;;  %466 = vperm.xlu0 %1608, %v460_v9   ;;  %476 = vperm.xlu1 %1609, %v462_v11   ;;  %v1521_v20 = vcombine.high %v445_v14, %v449_v16  ;;  %v1520_v21 = vcombine.low %v445_v14, %v449_v16  ;;  %v437_v23 = vld [vmem:[%s1879_s17 + $0x188] sm:$0xff] }
  0x45   : > { %v1519_v15 = vcombine.high %v444_v12, %v448_v13  ;;  %v1518_v17 = vcombine.low %v444_v12, %v448_v13  ;;  %v436_v18 = vld [vmem:[%s1879_s17 + $0x180] sm:$0xff]  ;;  %v441_v24 = vld [vmem:[%s1879_s17 + $0x1a8] sm:$0xff] }
  0x46   : > { %v440_v19 = vld [vmem:[%s1879_s17 + $0x1a0] sm:$0xff]  ;;  %v1513_v26 = vcombine.high %v437_v23, %v441_v24  ;;  %v429_v28 = vld [vmem:[%s1879_s17 + $0x148] sm:$0xff]  ;;  %922 = vmatprep.subr.bf16.mxu1 %v1521_v20  ;;  %v1512_v33 = vcombine.low %v437_v23, %v441_v24 }
  0x47   : > { %v1511_v22 = vcombine.high %v436_v18, %v440_v19  ;;  %v428_v25 = vld [vmem:[%s1879_s17 + $0x140] sm:$0xff]  ;;  %869 = vmatprep.subr.bf16.mxu0 %v1519_v15  ;;  %v433_v29 = vld [vmem:[%s1879_s17 + $0x168] sm:$0xff]  ;;  %v1510_v30 = vcombine.low %v436_v18, %v440_v19  ;;  %923 = vmatpush1.bf16.msra.mxu1 %v1520_v21  ;;  %v1083_v19 = vld [vmem:[%s2197_s3 + $0x10] sm:$0xff] }
  0x48   : > { %v432_v27 = vld [vmem:[%s1879_s17 + $0x160] sm:$0xff]  ;;  %870 = vmatpush1.bf16.msra.mxu0 %v1518_v17  ;;  %v461_v31 = vld [vmem:[%s2196_s2 + $0x8] sm:$0xff]  ;;  %924 = vmatprep.subr.bf16.mxu1 %v1513_v26  ;;  %v1505_v35 = vcombine.high %v429_v28, %v433_v29  ;;  %v1504_v41 = vcombine.low %v429_v28, %v433_v29  ;;  %v1084_v21 = vld [vmem:[%s2197_s3 + $0x18] sm:$0xff] }
  0x49   : > { %871 = vmatprep.subr.bf16.mxu0 %v1511_v22  ;;  %v1503_v34 = vcombine.high %v428_v25, %v432_v27  ;;  %v420_v36 = vld [vmem:[%s1879_s17 + $0x100] sm:$0xff]  ;;  %v421_v38 = vld [vmem:[%s1879_s17 + $0x108] sm:$0xff]  ;;  %471 = vperm.xlu0 %1608, %v461_v31   ;;  %v1502_v40 = vcombine.low %v428_v25, %v432_v27  ;;  %v446_v25 = vld [vmem:[%s1879_s17 + $0x1d0] sm:$0xff] }
  0x4a   : > { %v424_v37 = vld [vmem:[%s1879_s17 + $0x120] sm:$0xff]  ;;  %v425_v39 = vld [vmem:[%s1879_s17 + $0x128] sm:$0xff]  ;;  %481 = vperm.xlu1 %1609, %v463_v32   ;;  %v450_v26 = vld [vmem:[%s1879_s17 + $0x1f0] sm:$0xff] }
  0x4b   : > { %925 = vmatpush1.bf16.msra.mxu1 %v1512_v33  ;;  %v1495_v42 = vcombine.high %v420_v36, %v424_v37  ;;  %v1497_v43 = vcombine.high %v421_v38, %v425_v39  ;;  %v412_v44 = vld [vmem:[%s1879_s17 + $0xc0] sm:$0xff]  ;;  %v413_v46 = vld [vmem:[%s1879_s17 + $0xc8] sm:$0xff]  ;;  %v1494_v48 = vcombine.low %v420_v36, %v424_v37  ;;  %v1496_v49 = vcombine.low %v421_v38, %v425_v39  ;;  %v447_v27 = vld [vmem:[%s1879_s17 + $0x1d8] sm:$0xff] }
  0x4c   : > { %872 = vmatpush1.bf16.msra.mxu0 %v1510_v30  ;;  %926 = vmatprep.subr.bf16.mxu1 %v1505_v35  ;;  %v416_v45 = vld [vmem:[%s1879_s17 + $0xe0] sm:$0xff]  ;;  %v417_v47 = vld [vmem:[%s1879_s17 + $0xe8] sm:$0xff]  ;;  %v451_v28 = vld [vmem:[%s1879_s17 + $0x1f8] sm:$0xff]  ;;  %v1523_v33 = vcombine.high %v446_v25, %v450_v26 }
  0x4d   : > { %873 = vmatprep.subr.bf16.mxu0 %v1503_v34  ;;  %v1487_v50 = vcombine.high %v412_v44, %v416_v45  ;;  %v1489_v51 = vcombine.high %v413_v46, %v417_v47  ;;  %v404_v52 = vld [vmem:[%s1879_s17 + $0x80] sm:$0xff]  ;;  %v405_v54 = vld [vmem:[%s1879_s17 + $0x88] sm:$0xff]  ;;  %v1486_v56 = vcombine.low %v412_v44, %v416_v45  ;;  %v1488_v57 = vcombine.low %v413_v46, %v417_v47  ;;  %v438_v36 = vld [vmem:[%s1879_s17 + $0x190] sm:$0xff] }
  0x4e   : > { %v408_v53 = vld [vmem:[%s1879_s17 + $0xa0] sm:$0xff]  ;;  %v409_v55 = vld [vmem:[%s1879_s17 + $0xa8] sm:$0xff]  ;;  %v1525_v35 = vcombine.high %v447_v27, %v451_v28  ;;  %v442_v37 = vld [vmem:[%s1879_s17 + $0x1b0] sm:$0xff] }
  0x4f   : > { %927 = vmatpush1.bf16.msra.mxu1 %v1504_v41  ;;  %v1479_v58 = vcombine.high %v404_v52, %v408_v53  ;;  %v1481_v59 = vcombine.high %v405_v54, %v409_v55  ;;  %v396_v60 = vld [vmem:[%s1879_s17 + $0x40] sm:$0xff]  ;;  %v397_v62 = vld [vmem:[%s1879_s17 + $0x48] sm:$0xff]  ;;  %v1478_v0 = vcombine.low %v404_v52, %v408_v53  ;;  %v1480_v1 = vcombine.low %v405_v54, %v409_v55  ;;  %v439_v38 = vld [vmem:[%s1879_s17 + $0x198] sm:$0xff] }
  0x50   : > { %874 = vmatpush1.bf16.msra.mxu0 %v1502_v40  ;;  %928 = vmatprep.subr.bf16.mxu1 %v1497_v43  ;;  %v400_v61 = vld [vmem:[%s1879_s17 + $0x60] sm:$0xff]  ;;  %v401_v63 = vld [vmem:[%s1879_s17 + $0x68] sm:$0xff]  ;;  %v443_v39 = vld [vmem:[%s1879_s17 + $0x1b8] sm:$0xff]  ;;  %v1522_v41 = vcombine.low %v446_v25, %v450_v26  ;;  %v1524_v43 = vcombine.low %v447_v27, %v451_v28  ;;  %v1515_v44 = vcombine.high %v438_v36, %v442_v37 }
  0x51   : > { %875 = vmatprep.subr.bf16.mxu0 %v1495_v42  ;;  %v1471_v2 = vcombine.high %v396_v60, %v400_v61  ;;  %v1473_v3 = vcombine.high %v397_v62, %v401_v63  ;;  %v388_v4 = vld [vmem:[%s1879_s17] sm:$0xff]  ;;  %v389_v6 = vld [vmem:[%s1879_s17 + $0x8] sm:$0xff]  ;;  %v1470_v9 = vcombine.low %v396_v60, %v400_v61  ;;  %v1472_v12 = vcombine.low %v397_v62, %v401_v63  ;;  %v1139_v40 = vld [vmem:[%s2198_s4 + $0x10] sm:$0xff] }
  0x52   : > { %v392_v5 = vld [vmem:[%s1879_s17 + $0x20] sm:$0xff]  ;;  %v393_v7 = vld [vmem:[%s1879_s17 + $0x28] sm:$0xff]  ;;  %v1140_v42 = vld [vmem:[%s2198_s4 + $0x18] sm:$0xff]  ;;  %v1517_v45 = vcombine.high %v439_v38, %v443_v39  ;;  %v1516_v52 = vcombine.low %v439_v38, %v443_v39 }
  0x53   : > { %929 = vmatpush1.bf16.msra.mxu1 %v1496_v49  ;;  %v1081_v10 = vld [vmem:[%s2197_s3] sm:$0xff]  ;;  %v1082_v11 = vld [vmem:[%s2197_s3 + $0x8] sm:$0xff]  ;;  %v1463_v13 = vcombine.high %v388_v4, %v392_v5  ;;  %v1465_v14 = vcombine.high %v389_v6, %v393_v7  ;;  %v1462_v20 = vcombine.low %v388_v4, %v392_v5  ;;  %v1464_v22 = vcombine.low %v389_v6, %v393_v7  ;;  %v430_v46 = vld [vmem:[%s1879_s17 + $0x150] sm:$0xff] }
  0x54   : > { %876 = vmatpush1.bf16.msra.mxu0 %v1494_v48  ;;  %930 = vmatprep.subr.bf16.mxu1 %v1489_v51  ;;  %v452_v15 = vld [vmem:[%s1879_s17 + $0x200] sm:$0xff]  ;;  %v453_v17 = vld [vmem:[%s1879_s17 + $0x208] sm:$0xff]  ;;  %v434_v47 = vld [vmem:[%s1879_s17 + $0x170] sm:$0xff]  ;;  %v1514_v51 = vcombine.low %v438_v36, %v442_v37 }
  0x55   : > { %877 = vmatprep.subr.bf16.mxu0 %v1487_v50  ;;  %v456_v16 = vld [vmem:[%s1879_s17 + $0x220] sm:$0xff]  ;;  %1087 = vperm.xlu0 %1608, %v1081_v10   ;;  %v457_v18 = vld [vmem:[%s1879_s17 + $0x228] sm:$0xff]  ;;  %v1965_v48 = vld [vmem:[%s2195_s1 + $0x14] ss:$8 sps:$4 sm:$0xff]   ;;  %v1507_v53 = vcombine.high %v430_v46, %v434_v47  ;;  %v1506_v60 = vcombine.low %v430_v46, %v434_v47 }
  0x56   : > { %1092 = vperm.xlu1 %1609, %v1082_v11   ;;  %v1527_v23 = vcombine.high %v452_v15, %v456_v16  ;;  %v1529_v24 = vcombine.high %v453_v17, %v457_v18  ;;  %v1137_v29 = vld [vmem:[%s2198_s4] sm:$0xff]  ;;  %v1526_v30 = vcombine.low %v452_v15, %v456_v16  ;;  %v1138_v31 = vld [vmem:[%s2198_s4 + $0x8] sm:$0xff]  ;;  %v1528_v32 = vcombine.low %v453_v17, %v457_v18  ;;  %v431_v49 = vld [vmem:[%s1879_s17 + $0x158] sm:$0xff] }
  0x57   : > { %931 = vmatpush1.bf16.msra.mxu1 %v1488_v57  ;;  %v1948_v34 = vld [vmem:[%s2195_s1] ss:$8 sps:$4 sm:$0xff]   ;;  %v435_v50 = vld [vmem:[%s1879_s17 + $0x178] sm:$0xff]  ;;  %v422_v55 = vld [vmem:[%s1879_s17 + $0x110] sm:$0xff] }
  0x58   : > { %878 = vmatpush1.bf16.msra.mxu0 %v1486_v56  ;;  %932 = vmatprep.subr.bf16.mxu1 %v1481_v59  ;;  %v1509_v54 = vcombine.high %v431_v49, %v435_v50  ;;  %v426_v56 = vld [vmem:[%s1879_s17 + $0x130] sm:$0xff]  ;;  %v423_v57 = vld [vmem:[%s1879_s17 + $0x118] sm:$0xff]  ;;  %v1508_v61 = vcombine.low %v431_v49, %v435_v50 }
  0x59   : > { %879 = vmatprep.subr.bf16.mxu0 %v1479_v58  ;;  %1097 = vperm.xlu0 %1608, %v1083_v19   ;;  %v427_v58 = vld [vmem:[%s1879_s17 + $0x138] sm:$0xff]  ;;  %v1499_v62 = vcombine.high %v422_v55, %v426_v56  ;;  %v1498_v4 = vcombine.low %v422_v55, %v426_v56  ;;  %v410_v10 = vld [vmem:[%s1879_s17 + $0xb0] sm:$0xff] }
  0x5a   : > { %1102 = vperm.xlu1 %1609, %v1084_v21   ;;  %v1982_v59 = vld [vmem:[%s2195_s1 + $0x10] ss:$8 sps:$4 sm:$0xff]   ;;  %v1501_v63 = vcombine.high %v423_v57, %v427_v58  ;;  %v1500_v5 = vcombine.low %v423_v57, %v427_v58 }
  0x5b   : > { %933 = vmatpush1.bf16.msra.mxu1 %v1480_v1  ;;  %v418_v1 = vld [vmem:[%s1879_s17 + $0xf0] sm:$0xff]  ;;  %v407_v11 = vld [vmem:[%s1879_s17 + $0x98] sm:$0xff] }
  0x5c   : > { %880 = vmatpush1.bf16.msra.mxu0 %v1478_v0  ;;  %934 = vmatprep.subr.bf16.mxu1 %v1473_v3  ;;  %v414_v0 = vld [vmem:[%s1879_s17 + $0xd0] sm:$0xff]  ;;  %v419_v3 = vld [vmem:[%s1879_s17 + $0xf8] sm:$0xff] }
  0x5d   : > { %881 = vmatprep.subr.bf16.mxu0 %v1471_v2  ;;  %1143 = vperm.xlu0 %1608, %v1137_v29   ;;  %v415_v2 = vld [vmem:[%s1879_s17 + $0xd8] sm:$0xff]  ;;  %v1491_v6 = vcombine.high %v414_v0, %v418_v1  ;;  %v398_v17 = vld [vmem:[%s1879_s17 + $0x50] sm:$0xff] }
  0x5e   : > { %1148 = vperm.xlu1 %1609, %v1138_v31   ;;  %v1493_v7 = vcombine.high %v415_v2, %v419_v3  ;;  %v402_v18 = vld [vmem:[%s1879_s17 + $0x70] sm:$0xff]  ;;  %v399_v19 = vld [vmem:[%s1879_s17 + $0x58] sm:$0xff] }
  0x5f   : > { %935 = vmatpush1.bf16.msra.mxu1 %v1472_v12  ;;  %v411_v12 = vld [vmem:[%s1879_s17 + $0xb8] sm:$0xff]  ;;  %v394_v25 = vld [vmem:[%s1879_s17 + $0x30] sm:$0xff]  ;;  %v1474_v28 = vcombine.low %v398_v17, %v402_v18 }
  0x60   : > { %882 = vmatpush1.bf16.msra.mxu0 %v1470_v9  ;;  %936 = vmatprep.subr.bf16.mxu1 %v1465_v14  ;;  %v406_v9 = vld [vmem:[%s1879_s17 + $0x90] sm:$0xff]  ;;  %v1492_v14 = vcombine.low %v415_v2, %v419_v3  ;;  %v1485_v16 = vcombine.high %v407_v11, %v411_v12  ;;  %v391_v26 = vld [vmem:[%s1879_s17 + $0x18] sm:$0xff] }
  0x61   : > { %883 = vmatprep.subr.bf16.mxu0 %v1463_v13  ;;  %1153 = vperm.xlu0 %1608, %v1139_v40   ;;  %v1490_v13 = vcombine.low %v414_v0, %v418_v1  ;;  %v1483_v15 = vcombine.high %v406_v9, %v410_v10  ;;  %v1482_v21 = vcombine.low %v406_v9, %v410_v10  ;;  %v395_v27 = vld [vmem:[%s1879_s17 + $0x38] sm:$0xff] }
  0x62   : > { %1158 = vperm.xlu1 %1609, %v1140_v42   ;;  %v1469_v31 = vcombine.high %v391_v26, %v395_v27  ;;  %v459_v36 = vld [vmem:[%s1879_s17 + $0x238] sm:$0xff]  ;;  %v1468_v38 = vcombine.low %v391_v26, %v395_v27 }
  0x63   : > { %937 = vmatpush1.bf16.msra.mxu1 %v1464_v22  ;;  %v1475_v22 = vcombine.high %v398_v17, %v402_v18 }
  0x64   : > { %884 = vmatpush1.bf16.msra.mxu0 %v1462_v20  ;;  %952 = vmatprep.subr.bf16.mxu1 %v1529_v24  ;;  %v403_v20 = vld [vmem:[%s1879_s17 + $0x78] sm:$0xff]  ;;  %v390_v24 = vld [vmem:[%s1879_s17 + $0x10] sm:$0xff] }
  0x65   : > { %899 = vmatprep.subr.bf16.mxu0 %v1527_v23  ;;  %v1477_v23 = vcombine.high %v399_v19, %v403_v20  ;;  %v1476_v29 = vcombine.low %v399_v19, %v403_v20  ;;  %v1466_v37 = vcombine.low %v390_v24, %v394_v25 }
  0x67   : > { %953 = vmatpush2.bf16.msra.mxu1 %v1528_v32  ;;  %v454_v32 = vld [vmem:[%s1879_s17 + $0x210] sm:$0xff] }
  0x68   : > { %900 = vmatpush2.bf16.msra.mxu0 %v1526_v30  ;;  %1028 = vmatprep.subr.bf16.mxu1 %v1525_v35  ;;  %v1467_v30 = vcombine.high %v390_v24, %v394_v25  ;;  %v455_v35 = vld [vmem:[%s1879_s17 + $0x218] sm:$0xff] }
  0x69   : > { %975 = vmatprep.subr.bf16.mxu0 %v1523_v33  ;;  %v458_v33 = vld [vmem:[%s1879_s17 + $0x230] sm:$0xff]  ;;  %v1533_v40 = vcombine.high %v455_v35, %v459_v36  ;;  %v1532_v42 = vcombine.low %v455_v35, %v459_v36  ;;  %s2053_s17 = sshll.u32 %s355_s9, 7  ;;  %s1580_s9 = sshll.u32 (%p1701_p5), %s1450_s21, 5 }
  0x6a   : > { %955 = vmatmul.mubr.bf16.vlgmr.msra.gmra.mxu1 %v1948_v34  ;;  %v1531_v39 = vcombine.high %v454_v32, %v458_v33  ;;  %s2073_s18 = scalar_lea.vmem [#allocation3], %s2053_s17  ;;  %s1346_s26 = scalar_lea.vmem (%p1701_p5), %s2199_s5, %s1580_s9 }
  0x6b   : > { %902 = vmatmul.mubr.bf16.vlgmr.msra.gmra.mxu0 %v1948_v34  ;;  %1029 = vmatpush1.bf16.msra.mxu1 %v1524_v43 }
  0x6c   : > { %976 = vmatpush1.bf16.msra.mxu0 %v1522_v41  ;;  %1030 = vmatprep.subr.bf16.mxu1 %v1517_v45  ;;  %v1530_v41 = vcombine.low %v454_v32, %v458_v33 }
  0x6d   : > { %977 = vmatprep.subr.bf16.mxu0 %v1515_v44  ;;  %1535 = vmatprep.mubr.msk.bf16.mxu0 %vm862_vm0, %v1965_v48 }
  0x6e   : > { %1537 = vmatprep.mubr.msk.bf16.mxu1 %vm862_vm0, %v1965_v48 }
  0x6f   : > { %1031 = vmatpush1.bf16.msra.mxu1 %v1516_v52 }
  0x70   : > { %978 = vmatpush1.bf16.msra.mxu0 %v1514_v51  ;;  %1032 = vmatprep.subr.bf16.mxu1 %v1509_v54 }
  0x71   : > { %979 = vmatprep.subr.bf16.mxu0 %v1507_v53 }
  0x72   : > { %965 = vmatmul.mubr.bf16.gmra.mxu1 %v1982_v59 }
  0x73   : > { %912 = vmatmul.mubr.bf16.gmra.mxu0 %v1982_v59  ;;  %1033 = vmatpush1.bf16.msra.mxu1 %v1508_v61 }
  0x74   : > { %980 = vmatpush1.bf16.msra.mxu0 %v1506_v60  ;;  %1034 = vmatprep.subr.bf16.mxu1 %v1501_v63 }
  0x75   : > { %981 = vmatprep.subr.bf16.mxu0 %v1499_v62  ;;  %1538 = vmatprep.mubr.msk.bf16.mxu0 %vm862_vm0, %v1865_v8 }
  0x76   : > { %1540 = vmatprep.mubr.msk.bf16.mxu1 %vm862_vm0, %v1865_v8  ;;  %v1484_v8 = vcombine.low %v407_v11, %v411_v12 }
  0x77   : > { %1035 = vmatpush1.bf16.msra.mxu1 %v1500_v5 }
  0x78   : > { %982 = vmatpush1.bf16.msra.mxu0 %v1498_v4  ;;  %1036 = vmatprep.subr.bf16.mxu1 %v1493_v7 }
  0x79   : > { %983 = vmatprep.subr.bf16.mxu0 %v1491_v6 }
  0x7b   : > { %1037 = vmatpush1.bf16.msra.mxu1 %v1492_v14 }
  0x7c   : > { %984 = vmatpush1.bf16.msra.mxu0 %v1490_v13  ;;  %1038 = vmatprep.subr.bf16.mxu1 %v1485_v16 }
  0x7d   : > { %985 = vmatprep.subr.bf16.mxu0 %v1483_v15 }
  0x7f   : > { %1039 = vmatpush1.bf16.msra.mxu1 %v1484_v8 }
  0x80   : > { %986 = vmatpush1.bf16.msra.mxu0 %v1482_v21  ;;  %1040 = vmatprep.subr.bf16.mxu1 %v1477_v23 }
  0x81   : > { %987 = vmatprep.subr.bf16.mxu0 %v1475_v22 }
  0x83   : > { %1041 = vmatpush1.bf16.msra.mxu1 %v1476_v29 }
  0x84   : > { %988 = vmatpush1.bf16.msra.mxu0 %v1474_v28  ;;  %1042 = vmatprep.subr.bf16.mxu1 %v1469_v31 }
  0x85   : > { %989 = vmatprep.subr.bf16.mxu0 %v1467_v30 }
  0x87   : > { %1043 = vmatpush1.bf16.msra.mxu1 %v1468_v38 }
  0x88   : > { %990 = vmatpush1.bf16.msra.mxu0 %v1466_v37  ;;  %1058 = vmatprep.subr.bf16.mxu1 %v1533_v40 }
  0x89   : > { %1005 = vmatprep.subr.bf16.mxu0 %v1531_v39 }
  0x8b   : > { %1059 = vmatpush2.bf16.msra.mxu1 %v1532_v42 }
  0x8c   : > { %1006 = vmatpush2.bf16.msra.mxu0 %v1530_v41 }
  0x8e   : > { %1061 = vmatmul.mubr.bf16.vlgmr.msra.gmra.mxu1 %v1948_v34 }
  0x8f   : > { %1008 = vmatmul.mubr.bf16.vlgmr.msra.gmra.mxu0 %v1948_v34  ;;  %1541 = vmatprep.mubr.msk.bf16.mxu1 %vm862_vm0, %v1965_v48 }
  0x90   : > { %1539 = vmatprep.mubr.msk.bf16.mxu0 %vm862_vm0, %v1965_v48 }
  0x96   : > { %1071 = vmatmul.mubr.bf16.gmra.mxu1 %v1982_v59 }
  0x97   : > { %1018 = vmatmul.mubr.bf16.gmra.mxu0 %v1982_v59 }
  0xbf   : > { %v2018_v43 = vpop.permute.xlu0 %466  ;;  %v2020_v44 = vpop.permute.xlu1 %476 }
  0xc4   : > { %v2022_v45 = vpop.permute.xlu0 %471 }
  0xc5   : > { %v2024_v46 = vpop.permute.xlu1 %481 }
  0xd0   : > { %v2026_v47 = vpop.permute.xlu0 %1087 }
  0xd1   : > { %v2028_v34 = vpop.permute.xlu1 %1092 }
  0xd4   : > { %v2030_v49 = vpop.permute.xlu0 %1097 }
  0xd5   : > { %v2032_v48 = vpop.permute.xlu1 %1102 }
  0xd8   : > { %v2036_v55 = vpop.permute.xlu0 %1143 }
  0xd9   : > { %v2048_v6 = vpop.permute.xlu1 %1148 }
  0xdc   : > { %v2068_v32 = vpop.permute.xlu0 %1153 }
 0x12a   : > { %v956_v52 = vpop.f32.mrf.mxu1 }
 0x12b   : > { %v903_v50 = vpop.f32.mrf.mxu0  ;;  %v957_v53 = vadd.f32 %v956_v52, %v2018_v43 }
 0x12c   : > { %v904_v51 = vadd.f32 %v903_v50, %v2018_v43  ;;  %v958_v58 = vpop.f32.mrf.mxu1 }
 0x12d   : > { %v905_v54 = vpop.f32.mrf.mxu0  ;;  %v1107_v59 = vmul.f32 %v2026_v47, %v957_v53  ;;  %v959_v60 = vadd.f32 %v958_v58, %v2018_v43 }
 0x12e   : > { %v1105_v56 = vmul.f32 %v2026_v47, %v904_v51  ;;  %v906_v57 = vadd.f32 %v905_v54, %v2018_v43  ;;  %v960_v0 = vpop.f32.mrf.mxu1  ;;  %v2081_v54 = vpop.permute.xlu1 %1158 }
 0x12f   : > { %v907_v61 = vpop.f32.mrf.mxu0  ;;  %v1108_v2 = vmul.f32 %v2026_v47, %v959_v60  ;;  %v961_v3 = vadd.f32 %v960_v0, %v2022_v45  ;;  %v1163_v4 = vadd.f32 %v2036_v55, %v1107_v59 }
 0x130   : > { %v1106_v62 = vmul.f32 %v2026_v47, %v906_v57  ;;  %v908_v63 = vadd.f32 %v907_v61, %v2022_v45  ;;  %v1161_v1 = vadd.f32 %v2036_v55, %v1105_v56  ;;  %v962_v12 = vpop.f32.mrf.mxu1 }
 0x131   : > { %v909_v5 = vpop.f32.mrf.mxu0  ;;  %v1115_v13 = vmul.f32 %v2028_v34, %v961_v3  ;;  %v1164_v14 = vadd.f32 %v2036_v55, %v1108_v2  ;;  %v1195_v15 = vmax.f32 %v1163_v4, 0.0  ;;  %v963_v16 = vadd.f32 %v962_v12, %v2022_v45 }
 0x132   : > { %v1113_v7 = vmul.f32 %v2028_v34, %v908_v63  ;;  %v1162_v9 = vadd.f32 %v2036_v55, %v1106_v62  ;;  %v1193_v10 = vmax.f32 %v1161_v1, 0.0  ;;  %v910_v11 = vadd.f32 %v909_v5, %v2022_v45  ;;  %v966_v8 = vpop.f32.mrf.mxu1 }
 0x133   : > { %v913_v17 = vpop.f32.mrf.mxu0  ;;  %v1196_v22 = vmax.f32 %v1164_v14, 0.0  ;;  %v1116_v23 = vmul.f32 %v2028_v34, %v963_v16  ;;  %v1171_v24 = vadd.f32 %v2048_v6, %v1115_v13  ;;  %v967_v25 = vadd.f32 %v966_v8, %v2020_v44 }
 0x134   : > { %v1194_v18 = vmax.f32 %v1162_v9, 0.0  ;;  %v1114_v19 = vmul.f32 %v2028_v34, %v910_v11  ;;  %v1169_v20 = vadd.f32 %v2048_v6, %v1113_v7  ;;  %v914_v21 = vadd.f32 %v913_v17, %v2020_v44  ;;  %v968_v31 = vpop.f32.mrf.mxu1 }
 0x135   : > { %v915_v26 = vpop.f32.mrf.mxu0  ;;  %v1565_v33 = vpack.c.bf16 %v1196_v22, %v1195_v15  ;;  %v1172_v35 = vadd.f32 %v2048_v6, %v1116_v23  ;;  %v1203_v36 = vmax.f32 %v1171_v24, 0.0  ;;  %v1123_v37 = vmul.f32 %v2030_v49, %v967_v25 }
 0x136   : > { %v1564_v27 = vpack.c.bf16 %v1194_v18, %v1193_v10  ;;  %v1170_v28 = vadd.f32 %v2048_v6, %v1114_v19  ;;  %v1201_v29 = vmax.f32 %v1169_v20, 0.0  ;;  %v1121_v30 = vmul.f32 %v2030_v49, %v914_v21  ;;  %v970_v50 = vpop.f32.mrf.mxu1 }
 0x137   : > { %v917_v38 = vpop.f32.mrf.mxu0  ;;  %v916_v40 = vadd.f32 %v915_v26, %v2020_v44  ;;  %v969_v41 = vadd.f32 %v968_v31, %v2020_v44  ;;  %1322 = vst [vmem:[%s2073_s18 + $0x8] sm:$0xff] %v1565_v33  ;;  %v1204_v51 = vmax.f32 %v1172_v35, 0.0  ;;  %v971_v52 = vadd.f32 %v970_v50, %v2024_v46 }
 0x138   : > { %1321 = vst [vmem:[%s2073_s18] sm:$0xff] %v1564_v27  ;;  %v1202_v39 = vmax.f32 %v1170_v28, 0.0  ;;  %v918_v42 = vadd.f32 %v917_v38, %v2024_v46  ;;  %v1177_v56 = vadd.f32 %v2068_v32, %v1121_v30  ;;  %v1179_v57 = vadd.f32 %v2068_v32, %v1123_v37  ;;  %v972_v62 = vpop.f32.mrf.mxu1 }
 0x139   : > { %v919_v53 = vpop.f32.mrf.mxu0  ;;  %v1122_v59 = vmul.f32 %v2030_v49, %v916_v40  ;;  %v1124_v60 = vmul.f32 %v2030_v49, %v969_v41  ;;  %v1569_v63 = vpack.c.bf16 %v1204_v51, %v1203_v36  ;;  %v1131_v0 = vmul.f32 %v2032_v48, %v971_v52 }
 0x13a   : > { %v1568_v58 = vpack.c.bf16 %v1202_v39, %v1201_v29  ;;  %v1129_v61 = vmul.f32 %v2032_v48, %v918_v42  ;;  %v920_v1 = vadd.f32 %v919_v53, %v2024_v46  ;;  %v973_v2 = vadd.f32 %v972_v62, %v2024_v46 }
 0x13b   : > { %v1178_v4 = vadd.f32 %v2068_v32, %v1122_v59  ;;  %v1180_v5 = vadd.f32 %v2068_v32, %v1124_v60  ;;  %v1209_v7 = vmax.f32 %v1177_v56, 0.0  ;;  %1326 = vst [vmem:[%s2073_s18 + $0x28] sm:$0xff] %v1569_v63  ;;  %v1187_v11 = vadd.f32 %v2081_v54, %v1131_v0 }
 0x13c   : > { %1325 = vst [vmem:[%s2073_s18 + $0x20] sm:$0xff] %v1568_v58  ;;  %v1185_v3 = vadd.f32 %v2081_v54, %v1129_v61  ;;  %v1130_v9 = vmul.f32 %v2032_v48, %v920_v1  ;;  %v1132_v10 = vmul.f32 %v2032_v48, %v973_v2  ;;  %v1211_v12 = vmax.f32 %v1179_v57, 0.0 }
 0x13d   : > { %v1210_v13 = vmax.f32 %v1178_v4, 0.0  ;;  %v1212_v14 = vmax.f32 %v1180_v5, 0.0  ;;  %v1219_v18 = vmax.f32 %v1187_v11, 0.0 }
 0x13e   : > { %v1186_v15 = vadd.f32 %v2081_v54, %v1130_v9  ;;  %v1188_v16 = vadd.f32 %v2081_v54, %v1132_v10  ;;  %v1217_v17 = vmax.f32 %v1185_v3, 0.0 }
 0x13f   : > { %v1572_v19 = vpack.c.bf16 %v1210_v13, %v1209_v7  ;;  %v1573_v20 = vpack.c.bf16 %v1212_v14, %v1211_v12 }
 0x140   : > { %v1218_v21 = vmax.f32 %v1186_v15, 0.0  ;;  %v1220_v8 = vmax.f32 %v1188_v16, 0.0 }
 0x141   : > { %1329 = vst [vmem:[%s2073_s18 + $0x40] sm:$0xff] %v1572_v19  ;;  %1330 = vst [vmem:[%s2073_s18 + $0x48] sm:$0xff] %v1573_v20 }
 0x142   : > { %v1576_v22 = vpack.c.bf16 %v1218_v21, %v1217_v17  ;;  %v1577_v23 = vpack.c.bf16 %v1220_v8, %v1219_v18 }
 0x144   : > { %1333 = vst [vmem:[%s2073_s18 + $0x60] sm:$0xff] %v1576_v22  ;;  %1334 = vst [vmem:[%s2073_s18 + $0x68] sm:$0xff] %v1577_v23 }
 0x14e   : > { %v1062_v26 = vpop.f32.mrf.mxu1 }
 0x14f   : > { %v1009_v24 = vpop.f32.mrf.mxu0  ;;  %v1063_v27 = vadd.f32 %v1062_v26, %v2018_v43 }
 0x150   : > { %v1010_v25 = vadd.f32 %v1009_v24, %v2018_v43  ;;  %v1064_v31 = vpop.f32.mrf.mxu1 }
 0x151   : > { %v1011_v28 = vpop.f32.mrf.mxu0  ;;  %v1111_v33 = vmul.f32 %v2026_v47, %v1063_v27  ;;  %v1065_v35 = vadd.f32 %v1064_v31, %v2018_v43 }
 0x152   : > { %v1109_v29 = vmul.f32 %v2026_v47, %v1010_v25  ;;  %v1012_v30 = vadd.f32 %v1011_v28, %v2018_v43  ;;  %v1066_v40 = vpop.f32.mrf.mxu1 }
 0x153   : > { %v1013_v36 = vpop.f32.mrf.mxu0  ;;  %v1167_v41 = vadd.f32 %v2036_v55, %v1111_v33  ;;  %v1112_v42 = vmul.f32 %v2026_v47, %v1065_v35  ;;  %v1067_v50 = vadd.f32 %v1066_v40, %v2022_v45 }
 0x154   : > { %v1165_v37 = vadd.f32 %v2036_v55, %v1109_v29  ;;  %v1110_v38 = vmul.f32 %v2026_v47, %v1012_v30  ;;  %v1014_v39 = vadd.f32 %v1013_v36, %v2022_v45  ;;  %v1068_v57 = vpop.f32.mrf.mxu1 }
 0x155   : > { %v1015_v51 = vpop.f32.mrf.mxu0  ;;  %v1199_v58 = vmax.f32 %v1167_v41, 0.0  ;;  %v1168_v59 = vadd.f32 %v2036_v55, %v1112_v42  ;;  %v1119_v60 = vmul.f32 %v2028_v34, %v1067_v50  ;;  %v1069_v61 = vadd.f32 %v1068_v57, %v2022_v45 }
 0x156   : > { %v1197_v52 = vmax.f32 %v1165_v37, 0.0  ;;  %v1166_v53 = vadd.f32 %v2036_v55, %v1110_v38  ;;  %v1117_v43 = vmul.f32 %v2028_v34, %v1014_v39  ;;  %v1016_v56 = vadd.f32 %v1015_v51, %v2022_v45  ;;  %v1072_v2 = vpop.f32.mrf.mxu1 }
 0x157   : > { %v1019_v62 = vpop.f32.mrf.mxu0  ;;  %v1200_v3 = vmax.f32 %v1168_v59, 0.0  ;;  %v1175_v4 = vadd.f32 %v2048_v6, %v1119_v60  ;;  %v1120_v5 = vmul.f32 %v2028_v34, %v1069_v61  ;;  %v1073_v55 = vadd.f32 %v1072_v2, %v2020_v44  ;;  %v1377_v2 = vld [vmem:[%s2073_s18 + $0x48] sm:$0xff] (%p1701_p5) }
 0x158   : > { %v1198_v47 = vmax.f32 %v1166_v53, 0.0  ;;  %v1173_v63 = vadd.f32 %v2048_v6, %v1117_v43  ;;  %v1118_v0 = vmul.f32 %v2028_v34, %v1016_v56  ;;  %v1020_v1 = vadd.f32 %v1019_v62, %v2020_v44  ;;  %v1074_v12 = vpop.f32.mrf.mxu1  ;;  %v1367_v62 = vld [vmem:[%s2073_s18 + $0x20] sm:$0xff] (%p1701_p5)  ;;  %1378 = vst [vmem:[%s1346_s26 + $0x88] sm:$0xff] (%p1701_p5), %v1377_v2 }
 0x159   : > { %v1021_v7 = vpop.f32.mrf.mxu0  ;;  %v1567_v13 = vpack.c.bf16 %v1200_v3, %v1199_v58  ;;  %v1207_v14 = vmax.f32 %v1175_v4, 0.0  ;;  %v1176_v15 = vadd.f32 %v2048_v6, %v1120_v5  ;;  %v1127_v16 = vmul.f32 %v2030_v49, %v1073_v55  ;;  %1368 = vst [vmem:[%s1346_s26 + $0x40] sm:$0xff] (%p1701_p5), %v1367_v62  ;;  %v1383_v5 = vld [vmem:[%s2073_s18 + $0x60] sm:$0xff] (%p1701_p5)  ;;  %v1385_v55 = vld [vmem:[%s2073_s18 + $0x68] sm:$0xff] (%p1701_p5) }
 0x15a   : > { %v1566_v9 = vpack.c.bf16 %v1198_v47, %v1197_v52  ;;  %v1205_v45 = vmax.f32 %v1173_v63, 0.0  ;;  %v1174_v10 = vadd.f32 %v2048_v6, %v1118_v0  ;;  %v1125_v11 = vmul.f32 %v2030_v49, %v1020_v1  ;;  %v1076_v21 = vpop.f32.mrf.mxu1  ;;  %v1369_v47 = vld [vmem:[%s2073_s18 + $0x28] sm:$0xff] (%p1701_p5)  ;;  %v1375_v1 = vld [vmem:[%s2073_s18 + $0x40] sm:$0xff] (%p1701_p5)  ;;  %1384 = vst [vmem:[%s1346_s26 + $0xc0] sm:$0xff] (%p1701_p5), %v1383_v5  ;;  %1386 = vst [vmem:[%s1346_s26 + $0xc8] sm:$0xff] (%p1701_p5), %v1385_v55 }
 0x15b   : > { %v1023_v17 = vpop.f32.mrf.mxu0  ;;  %v1022_v19 = vadd.f32 %v1021_v7, %v2020_v44  ;;  %v1075_v20 = vadd.f32 %v1074_v12, %v2020_v44  ;;  %1324 = vst [vmem:[%s2073_s18 + $0x18] sm:$0xff] %v1567_v13  ;;  %v1208_v8 = vmax.f32 %v1176_v15, 0.0  ;;  %v1183_v22 = vadd.f32 %v2068_v32, %v1127_v16  ;;  %1370 = vst [vmem:[%s1346_s26 + $0x48] sm:$0xff] (%p1701_p5), %v1369_v47 }
 0x15c   : > { %1323 = vst [vmem:[%s2073_s18 + $0x10] sm:$0xff] %v1566_v9  ;;  %v1206_v34 = vmax.f32 %v1174_v10, 0.0  ;;  %v1181_v18 = vadd.f32 %v2068_v32, %v1125_v11  ;;  %v1024_v6 = vadd.f32 %v1023_v17, %v2024_v46  ;;  %v1077_v23 = vadd.f32 %v1076_v21, %v2024_v46  ;;  %v1078_v28 = vpop.f32.mrf.mxu1  ;;  %1376 = vst [vmem:[%s1346_s26 + $0x80] sm:$0xff] (%p1701_p5), %v1375_v1 }
 0x15d   : > { %v1025_v24 = vpop.f32.mrf.mxu0  ;;  %v1126_v26 = vmul.f32 %v2030_v49, %v1022_v19  ;;  %v1128_v27 = vmul.f32 %v2030_v49, %v1075_v20  ;;  %v1571_v29 = vpack.c.bf16 %v1208_v8, %v1207_v14  ;;  %v1079_v36 = vadd.f32 %v1078_v28, %v2024_v46 }
 0x15e   : > { %v1570_v25 = vpack.c.bf16 %v1206_v34, %v1205_v45  ;;  %v1133_v44 = vmul.f32 %v2032_v48, %v1024_v6  ;;  %v1135_v30 = vmul.f32 %v2032_v48, %v1077_v23  ;;  %v1026_v35 = vadd.f32 %v1025_v24, %v2024_v46 }
 0x15f   : > { %v1182_v31 = vadd.f32 %v2068_v32, %v1126_v26  ;;  %v1184_v33 = vadd.f32 %v2068_v32, %v1128_v27  ;;  %1328 = vst [vmem:[%s2073_s18 + $0x38] sm:$0xff] %v1571_v29  ;;  %v1213_v37 = vmax.f32 %v1181_v18, 0.0  ;;  %v1215_v49 = vmax.f32 %v1183_v22, 0.0 }
 0x160   : > { %1327 = vst [vmem:[%s2073_s18 + $0x30] sm:$0xff] %v1570_v25  ;;  %v1189_v38 = vadd.f32 %v2081_v54, %v1133_v44  ;;  %v1191_v39 = vadd.f32 %v2081_v54, %v1135_v30  ;;  %v1134_v42 = vmul.f32 %v2032_v48, %v1026_v35  ;;  %v1136_v32 = vmul.f32 %v2032_v48, %v1079_v36  ;;  %v1359_v48 = vld [vmem:[%s2073_s18] sm:$0xff] (%p1701_p5) }
 0x161   : > { %v1214_v40 = vmax.f32 %v1182_v31, 0.0  ;;  %v1216_v41 = vmax.f32 %v1184_v33, 0.0  ;;  %1360 = vst [vmem:[%s1346_s26] sm:$0xff] (%p1701_p5), %v1359_v48 }
 0x162   : > { %v1190_v52 = vadd.f32 %v2081_v54, %v1134_v42  ;;  %v1192_v46 = vadd.f32 %v2081_v54, %v1136_v32  ;;  %v1221_v53 = vmax.f32 %v1189_v38, 0.0  ;;  %v1223_v43 = vmax.f32 %v1191_v39, 0.0  ;;  %v1361_v54 = vld [vmem:[%s2073_s18 + $0x8] sm:$0xff] (%p1701_p5)  ;;  %v1365_v61 = vld [vmem:[%s2073_s18 + $0x18] sm:$0xff] (%p1701_p5) }
 0x163   : > { %v1574_v50 = vpack.c.bf16 %v1214_v40, %v1213_v37  ;;  %v1575_v51 = vpack.c.bf16 %v1216_v41, %v1215_v49  ;;  %v1363_v60 = vld [vmem:[%s2073_s18 + $0x10] sm:$0xff] (%p1701_p5)  ;;  %1362 = vst [vmem:[%s1346_s26 + $0x8] sm:$0xff] (%p1701_p5), %v1361_v54  ;;  %1366 = vst [vmem:[%s1346_s26 + $0x18] sm:$0xff] (%p1701_p5), %v1365_v61 }
 0x164   : > { %v1222_v56 = vmax.f32 %v1190_v52, 0.0  ;;  %v1224_v57 = vmax.f32 %v1192_v46, 0.0  ;;  %1343 = sbr.rel (!%p1701_p5) target bundleno = 369 (0x171), region = 67  ;;  %1364 = vst [vmem:[%s1346_s26 + $0x10] sm:$0xff] (%p1701_p5), %v1363_v60 }
 0x165   : > { %1331 = vst [vmem:[%s2073_s18 + $0x50] sm:$0xff] %v1574_v50  ;;  %1332 = vst [vmem:[%s2073_s18 + $0x58] sm:$0xff] %v1575_v51 }
 0x166   : > { %v1578_v58 = vpack.c.bf16 %v1222_v56, %v1221_v53  ;;  %v1579_v59 = vpack.c.bf16 %v1224_v57, %v1223_v43  ;;  %v1373_v0 = vld [vmem:[%s2073_s18 + $0x38] sm:$0xff] (%p1701_p5) }
 0x167   : > { %v1371_v63 = vld [vmem:[%s2073_s18 + $0x30] sm:$0xff] (%p1701_p5)  ;;  %1374 = vst [vmem:[%s1346_s26 + $0x58] sm:$0xff] (%p1701_p5), %v1373_v0 }
 0x168   : > { %1335 = vst [vmem:[%s2073_s18 + $0x70] sm:$0xff] %v1578_v58  ;;  %1336 = vst [vmem:[%s2073_s18 + $0x78] sm:$0xff] %v1579_v59 }
 0x169   : > { %1372 = vst [vmem:[%s1346_s26 + $0x50] sm:$0xff] %v1371_v63 }
 0x16c   : > { %v1379_v3 = vld [vmem:[%s2073_s18 + $0x50] sm:$0xff]  ;;  %v1381_v4 = vld [vmem:[%s2073_s18 + $0x58] sm:$0xff] }
 0x16d   : > { %1380 = vst [vmem:[%s1346_s26 + $0x90] sm:$0xff] %v1379_v3  ;;  %1382 = vst [vmem:[%s1346_s26 + $0x98] sm:$0xff] %v1381_v4 }
 0x16f   : > { %v1387_v7 = vld [vmem:[%s2073_s18 + $0x70] sm:$0xff]  ;;  %v1389_v9 = vld [vmem:[%s2073_s18 + $0x78] sm:$0xff] }
 0x170   : > { %1388 = vst [vmem:[%s1346_s26 + $0xd0] sm:$0xff] %v1387_v7  ;;  %1390 = vst [vmem:[%s1346_s26 + $0xd8] sm:$0xff] %v1389_v9 }
 0x171 PF: > { %p12_p10 = scmp.ge.s32.totalorder %s1688_s22, 4   ;;  %s2201_s18 = smov %s1634_s19 }
 0x172   : > { %s2202_s19 = smov %s1699_s25  ;;  %s2203_s20 = smov %s1688_s22 }
 0x173   :  { %14 = sbr.rel (!%p12_p10) target bundleno = 2 (0x2), region = 121 }

// kernel: wide_resnet_forward.12
= control target key start
LH: loop header
LB: loop body
LE: loop exit
PB: predicated region body
PF: predicated region fallthrough
CT: control target
= control target key end

     0   :  { %s1694_s30 = smov 0   ;;  %s1696_s10 = smov 0   ;;  %s2021_s0 = inlined_call_operand.vmem [shape: bf16[288,512], index: 0, kind: input, shape index: {}]   ;;  %s2022_s1 = inlined_call_operand.vmem [shape: bf16[32,288], index: 1, kind: input, shape index: {}]   ;;  %s2023_s2 = inlined_call_operand.vmem [shape: f32[32,1], index: 2, kind: input, shape index: {}]   ;;  %s2024_s3 = inlined_call_operand.vmem [shape: bf16[16,512], index: 3, kind: input, shape index: {}]   ;;  %s2025_s4 = inlined_call_operand.vmem [shape: bf16[32,16], index: 4, kind: input, shape index: {}]   ;;  %s2026_s5 = inlined_call_operand.vmem [shape: f32[32,1], index: 5, kind: input, shape index: {}]   ;;  %s2027_s6 = inlined_call_operand.vmem [shape: f32[32,1], index: 6, kind: input, shape index: {}]   ;;  %s2028_s7 = inlined_call_operand.vmem [shape: f32[32,1], index: 7, kind: input, shape index: {}]   ;;  %s2029_s8 = inlined_call_operand.vmem [shape: bf16[32,512], index: 8, kind: output, shape index: {0}]   ;;  %s2030_s9 = inlined_call_operand.vmem [shape: bf16[32,512], index: 9, kind: output, shape index: {1}]  }
   0x1   :  { %s1698_s11 = smov 0  }
   0x2 LB: > { %s1710_s12 = sadd.s32 4294967295, %s1641_s11   ;;  %s1713_s13 = sadd.s32 1, %s1641_s11   ;;  %s1641_s11 = sphi %s1698_s11, %s2035_s11   ;;  %s1637_s10 = sphi %s1696_s10, %s2034_s10   ;;  %s1633_s30 = sphi %s1694_s30, %s2033_s30  }
   0x3   : > { %s24_s14 = ssub.s32 %s1641_s11, %s1713_s13  ;;  %s27_s15 = sadd.s32 1, %s1637_s10 }
   0x4   : > { %p25_p0 = scmp.eq.s32.totalorder %s24_s14, 0  ;;  %p34_p1 = scmp.ne.s32.totalorder %s1637_s10, %s1633_s30 }
   0x5   : > { %p35_p2 = scmp.eq.s32.totalorder %s1641_s11, 0  ;;  %p216_p3 = scmp.eq.s32.totalorder %s1710_s12, 1 }
   0x6   : > { %s1723_s16 = scalar_select %p25_p0, %s1637_s10, %s27_s15  }
   0x7   : > { %p1725_p4 = por %p35_p2, %p34_p1  ;;  %p1729_p5 = por %p216_p3, %p34_p1 }
   0x8   : > { %p1435_p6 = scmp.ge.s32.totalorder %s1641_s11, 2 }
   0xa   : > { %282 = sbr.rel (%p1435_p6) target bundleno = 42 (0x2a), region = 40 }
   0xf   : > { %285 = sbr.rel (!%p1725_p4) target bundleno = 37 (0x25), region = 44  ;;  %s287_s19 = sand.u32 (%p1725_p4), 1, %s1637_s10  }
  0x10   : > { %s1511_s20 = sshll.u32 (%p1725_p4), %s1641_s11, 3  ;;  %s1523_s21 = smul.u32 (%p1725_p4), 288, %s287_s19 }
  0x11   : > { %s1741_s24 = scalar_lea.vmem (%p1725_p4), %s2021_s0, %s1511_s20 }
  0x12   : > { %v391_v0 = vld [vmem:[%s1741_s24] sm:$0xff] (%p1725_p4)  ;;  %v393_v1 = vld [vmem:[%s1741_s24 + $0x10] sm:$0xff] (%p1725_p4)  ;;  %s1749_s25 = scalar_lea.vmem (%p1725_p4), [#allocation2], %s1523_s21 }
  0x13   : > { %v395_v2 = vld [vmem:[%s1741_s24 + $0x20] sm:$0xff] (%p1725_p4)  ;;  %v397_v3 = vld [vmem:[%s1741_s24 + $0x30] sm:$0xff] (%p1725_p4)  ;;  %392 = vst [vmem:[%s1749_s25] sm:$0xff] (%p1725_p4), %v391_v0  ;;  %394 = vst [vmem:[%s1749_s25 + $0x8] sm:$0xff] (%p1725_p4), %v393_v1 }
  0x14   : > { %v399_v4 = vld [vmem:[%s1741_s24 + $0x40] sm:$0xff]  ;;  %v401_v5 = vld [vmem:[%s1741_s24 + $0x50] sm:$0xff]  ;;  %396 = vst [vmem:[%s1749_s25 + $0x10] sm:$0xff] %v395_v2  ;;  %398 = vst [vmem:[%s1749_s25 + $0x18] sm:$0xff] %v397_v3 }
  0x15   : > { %400 = vst [vmem:[%s1749_s25 + $0x20] sm:$0xff] %v399_v4  ;;  %402 = vst [vmem:[%s1749_s25 + $0x28] sm:$0xff] %v401_v5  ;;  %v403_v6 = vld [vmem:[%s1741_s24 + $0x60] sm:$0xff]  ;;  %v405_v7 = vld [vmem:[%s1741_s24 + $0x70] sm:$0xff] }
  0x16   : > { %v407_v8 = vld [vmem:[%s1741_s24 + $0x80] sm:$0xff]  ;;  %404 = vst [vmem:[%s1749_s25 + $0x30] sm:$0xff] %v403_v6  ;;  %406 = vst [vmem:[%s1749_s25 + $0x38] sm:$0xff] %v405_v7  ;;  %v409_v9 = vld [vmem:[%s1741_s24 + $0x90] sm:$0xff] }
  0x17   : > { %408 = vst [vmem:[%s1749_s25 + $0x40] sm:$0xff] %v407_v8  ;;  %v411_v10 = vld [vmem:[%s1741_s24 + $0xa0] sm:$0xff]  ;;  %v413_v11 = vld [vmem:[%s1741_s24 + $0xb0] sm:$0xff]  ;;  %410 = vst [vmem:[%s1749_s25 + $0x48] sm:$0xff] %v409_v9 }
  0x18   : > { %412 = vst [vmem:[%s1749_s25 + $0x50] sm:$0xff] %v411_v10  ;;  %414 = vst [vmem:[%s1749_s25 + $0x58] sm:$0xff] %v413_v11  ;;  %v415_v12 = vld [vmem:[%s1741_s24 + $0xc0] sm:$0xff]  ;;  %v417_v13 = vld [vmem:[%s1741_s24 + $0xd0] sm:$0xff] }
  0x19   : > { %v419_v14 = vld [vmem:[%s1741_s24 + $0xe0] sm:$0xff]  ;;  %416 = vst [vmem:[%s1749_s25 + $0x60] sm:$0xff] %v415_v12  ;;  %418 = vst [vmem:[%s1749_s25 + $0x68] sm:$0xff] %v417_v13  ;;  %v421_v15 = vld [vmem:[%s1741_s24 + $0xf0] sm:$0xff] }
  0x1a   : > { %420 = vst [vmem:[%s1749_s25 + $0x70] sm:$0xff] %v419_v14  ;;  %v423_v16 = vld [vmem:[%s1741_s24 + $0x100] sm:$0xff]  ;;  %v425_v17 = vld [vmem:[%s1741_s24 + $0x110] sm:$0xff]  ;;  %422 = vst [vmem:[%s1749_s25 + $0x78] sm:$0xff] %v421_v15 }
  0x1b   : > { %424 = vst [vmem:[%s1749_s25 + $0x80] sm:$0xff] %v423_v16  ;;  %426 = vst [vmem:[%s1749_s25 + $0x88] sm:$0xff] %v425_v17  ;;  %v427_v18 = vld [vmem:[%s1741_s24 + $0x120] sm:$0xff]  ;;  %v429_v19 = vld [vmem:[%s1741_s24 + $0x130] sm:$0xff] }
  0x1c   : > { %v431_v20 = vld [vmem:[%s1741_s24 + $0x140] sm:$0xff]  ;;  %428 = vst [vmem:[%s1749_s25 + $0x90] sm:$0xff] %v427_v18  ;;  %430 = vst [vmem:[%s1749_s25 + $0x98] sm:$0xff] %v429_v19  ;;  %v433_v21 = vld [vmem:[%s1741_s24 + $0x150] sm:$0xff] }
  0x1d   : > { %432 = vst [vmem:[%s1749_s25 + $0xa0] sm:$0xff] %v431_v20  ;;  %v435_v22 = vld [vmem:[%s1741_s24 + $0x160] sm:$0xff]  ;;  %v437_v23 = vld [vmem:[%s1741_s24 + $0x170] sm:$0xff]  ;;  %434 = vst [vmem:[%s1749_s25 + $0xa8] sm:$0xff] %v433_v21 }
  0x1e   : > { %436 = vst [vmem:[%s1749_s25 + $0xb0] sm:$0xff] %v435_v22  ;;  %438 = vst [vmem:[%s1749_s25 + $0xb8] sm:$0xff] %v437_v23  ;;  %v439_v24 = vld [vmem:[%s1741_s24 + $0x180] sm:$0xff]  ;;  %v441_v25 = vld [vmem:[%s1741_s24 + $0x190] sm:$0xff] }
  0x1f   : > { %v443_v26 = vld [vmem:[%s1741_s24 + $0x1a0] sm:$0xff]  ;;  %440 = vst [vmem:[%s1749_s25 + $0xc0] sm:$0xff] %v439_v24  ;;  %442 = vst [vmem:[%s1749_s25 + $0xc8] sm:$0xff] %v441_v25  ;;  %v445_v27 = vld [vmem:[%s1741_s24 + $0x1b0] sm:$0xff] }
  0x20   : > { %444 = vst [vmem:[%s1749_s25 + $0xd0] sm:$0xff] %v443_v26  ;;  %v447_v28 = vld [vmem:[%s1741_s24 + $0x1c0] sm:$0xff]  ;;  %v449_v29 = vld [vmem:[%s1741_s24 + $0x1d0] sm:$0xff]  ;;  %446 = vst [vmem:[%s1749_s25 + $0xd8] sm:$0xff] %v445_v27 }
  0x21   : > { %448 = vst [vmem:[%s1749_s25 + $0xe0] sm:$0xff] %v447_v28  ;;  %450 = vst [vmem:[%s1749_s25 + $0xe8] sm:$0xff] %v449_v29  ;;  %v451_v30 = vld [vmem:[%s1741_s24 + $0x1e0] sm:$0xff]  ;;  %v453_v31 = vld [vmem:[%s1741_s24 + $0x1f0] sm:$0xff] }
  0x22   : > { %v455_v32 = vld [vmem:[%s1741_s24 + $0x200] sm:$0xff]  ;;  %452 = vst [vmem:[%s1749_s25 + $0xf0] sm:$0xff] %v451_v30  ;;  %454 = vst [vmem:[%s1749_s25 + $0xf8] sm:$0xff] %v453_v31  ;;  %v457_v33 = vld [vmem:[%s1741_s24 + $0x210] sm:$0xff] }
  0x23   : > { %456 = vst [vmem:[%s1749_s25 + $0x100] sm:$0xff] %v455_v32  ;;  %v459_v34 = vld [vmem:[%s1741_s24 + $0x220] sm:$0xff]  ;;  %v461_v35 = vld [vmem:[%s1741_s24 + $0x230] sm:$0xff]  ;;  %458 = vst [vmem:[%s1749_s25 + $0x108] sm:$0xff] %v457_v33 }
  0x24   : > { %460 = vst [vmem:[%s1749_s25 + $0x110] sm:$0xff] %v459_v34  ;;  %462 = vst [vmem:[%s1749_s25 + $0x118] sm:$0xff] %v461_v35 }
  0x25 PF: > { %468 = sbr.rel (!%p1725_p4) target bundleno = 42 (0x2a), region = 82  ;;  %s470_s26 = sand.u32 (%p1725_p4), 1, %s1637_s10  }
  0x26   : > { %s1512_s27 = sshll.u32 (%p1725_p4), %s1641_s11, 3  ;;  %s1438_s28 = sshll.u32 (%p1725_p4), %s470_s26, 4 }
  0x27   : > { %s475_s15 = scalar_lea.vmem (%p1725_p4), %s2024_s3, %s1512_s27  ;;  %s472_s19 = scalar_lea.vmem (%p1725_p4), [#allocation3], %s1438_s28 }
  0x28   : > { %v506_v36 = vld [vmem:[%s475_s15] sm:$0xff] (%p1725_p4)  ;;  %v508_v37 = vld [vmem:[%s475_s15 + $0x10] sm:$0xff] (%p1725_p4) }
  0x29   : > { %507 = vst [vmem:[%s472_s19] sm:$0xff] (%p1725_p4), %v506_v36  ;;  %509 = vst [vmem:[%s472_s19 + $0x8] sm:$0xff] (%p1725_p4), %v508_v37 }
  0x2a PF: > { %p1441_p7 = scmp.ge.s32.totalorder %s1641_s11, 1  ;;  %p514_p8 = scmp.lt.s32.totalorder %s1641_s11, 3 }
  0x2c   : > { %p515_p9 = pnand %p1441_p7, %p514_p8 }
  0x2d   : > { %s1827_s17 = sand.u32 (!%p515_p9), 1, %s1633_s30  }
  0x2e   : > { %518 = sbr.rel (%p515_p9) target bundleno = 351 (0x15f), region = 120  ;;  %s1442_s21 = sshll.u32 (!%p515_p9), %s1827_s17, 4 }
  0x2f   : > { %s1524_s20 = smul.u32 (!%p515_p9), 288, %s1827_s17  ;;  %s1834_s22 = scalar_lea.vmem (!%p515_p9), [#allocation3], %s1442_s21 }
  0x31   : > { %s1836_s23 = scalar_lea.vmem (!%p515_p9), [#allocation2], %s1524_s20 }
  0x33   : > { %v1643_v38 = vmov 0   ;;  %v1552_v39 = vld [vmem:[%s1836_s23 + $0x74] ss:$8 sps:$4 sm:$0xff]   ;;  %v1554_v40 = vld [vmem:[%s1836_s23 + $0x70] ss:$8 sps:$4 sm:$0xff]   ;;  %vm853_vm0 = vcmask 261120  }
  0x34   : > { %945 = vmatprep.mubr.bf16.mxu1 %v1643_v38  ;;  %1551 = vset.pattern.permute.xlu1 %v1643_v38  ;;  %v1555_v41 = vld [vmem:[%s1836_s23 + $0x64] ss:$8 sps:$4 sm:$0xff]   ;;  %v1557_v42 = vld [vmem:[%s1836_s23 + $0x60] ss:$8 sps:$4 sm:$0xff]   ;;  %v1558_v43 = vld [vmem:[%s1836_s23 + $0x54] ss:$8 sps:$4 sm:$0xff]  }
  0x35   : > { %1550 = vset.pattern.permute.xlu0 %v1643_v38  ;;  %860 = vmatprep.subr.bf16.mxu0 %v1552_v39  ;;  %v1560_v44 = vld [vmem:[%s1836_s23 + $0x50] ss:$8 sps:$4 sm:$0xff]   ;;  %v1561_v45 = vld [vmem:[%s1836_s23 + $0x44] ss:$8 sps:$4 sm:$0xff]   ;;  %v1563_v46 = vld [vmem:[%s1836_s23 + $0x40] ss:$8 sps:$4 sm:$0xff]  }
  0x36   : > { %861 = vmatpush1.bf16.msra.mxu0 %v1554_v40  ;;  %v1564_v47 = vld [vmem:[%s1836_s23 + $0x34] ss:$8 sps:$4 sm:$0xff]   ;;  %v1584_v49 = vld [vmem:[%s1836_s23 + $0x110] ss:$8 sps:$4 sm:$0xff]   ;;  %v1567_v51 = vld [vmem:[%s1836_s23 + $0x24] ss:$8 sps:$4 sm:$0xff]  }
  0x37   : > { %862 = vmatprep.subr.bf16.mxu0 %v1555_v41  ;;  %v1582_v48 = vld [vmem:[%s1836_s23 + $0x114] ss:$8 sps:$4 sm:$0xff]   ;;  %v1566_v50 = vld [vmem:[%s1836_s23 + $0x30] ss:$8 sps:$4 sm:$0xff]   ;;  %v1588_v52 = vld [vmem:[%s1836_s23 + $0x104] ss:$8 sps:$4 sm:$0xff]  }
  0x38   : > { %925 = vmatprep.subr.bf16.mxu1 %v1582_v48  ;;  %v1590_v53 = vld [vmem:[%s1836_s23 + $0x100] ss:$8 sps:$4 sm:$0xff]   ;;  %v1570_v56 = vld [vmem:[%s1836_s23 + $0x14] ss:$8 sps:$4 sm:$0xff]   ;;  %v1572_v59 = vld [vmem:[%s1836_s23 + $0x10] ss:$8 sps:$4 sm:$0xff]  }
  0x39   : > { %926 = vmatpush1.bf16.msra.mxu1 %v1584_v49  ;;  %v1594_v54 = vld [vmem:[%s2022_s1 + $0x8] ss:$12 sps:$4 sm:$0xff]   ;;  %v1573_v60 = vld [vmem:[%s1836_s23 + $0x4] ss:$8 sps:$4 sm:$0xff]   ;;  %v1578_v3 = vld [vmem:[%s1836_s23 + $0xf0] ss:$8 sps:$4 sm:$0xff]  }
  0x3a   : > { %863 = vmatpush1.bf16.msra.mxu0 %v1557_v42  ;;  %927 = vmatprep.subr.bf16.mxu1 %v1588_v52  ;;  %v1569_v55 = vld [vmem:[%s1836_s23 + $0x20] ss:$8 sps:$4 sm:$0xff]   ;;  %v1600_v57 = vld [vmem:[%s1834_s22 + $0x4] ss:$8 sps:$4 sm:$0xff]   ;;  %vm992_vm1 = vcmask 130048  }
  0x3b   : > { %864 = vmatprep.subr.bf16.mxu0 %v1558_v43  ;;  %v1598_v58 = vld [vmem:[%s1834_s22] ss:$8 sps:$4 sm:$0xff]   ;;  %v1576_v63 = vld [vmem:[%s1836_s23 + $0xf4] ss:$8 sps:$4 sm:$0xff]   ;;  %v1579_v6 = vld [vmem:[%s1836_s23 + $0xe4] ss:$8 sps:$4 sm:$0xff]  }
  0x3c   : > { %v1614_v61 = vld [vmem:[%s2022_s1 + $0x4] ss:$12 sps:$4 sm:$0xff]   ;;  %v1575_v62 = vld [vmem:[%s1836_s23] ss:$8 sps:$4 sm:$0xff]   ;;  %v622_v4 = vld [vmem:[%s2023_s2 + $0x18] sm:$0xff] }
  0x3d   : > { %928 = vmatpush1.bf16.msra.mxu1 %v1590_v53  ;;  %v1604_v0 = vld [vmem:[%s2022_s1 + $0x20] ss:$12 sps:$4 sm:$0xff]   ;;  %892 = vmatprep.mubr.bf16.mxu0 %v1614_v61  ;;  %v621_v1 = vld [vmem:[%s2023_s2 + $0x10] sm:$0xff]  ;;  %v1063_v13 = vld [vmem:[%s2026_s5 + $0x18] sm:$0xff] }
  0x3e   : > { %865 = vmatpush1.bf16.msra.mxu0 %v1560_v44  ;;  %1013 = vmatprep.subr.bf16.mxu1 %v1600_v57  ;;  %v619_v2 = vld [vmem:[%s2023_s2] sm:$0xff]  ;;  %v620_v5 = vld [vmem:[%s2023_s2 + $0x8] sm:$0xff]  ;;  %v1585_v10 = vld [vmem:[%s1836_s23 + $0xd4] ss:$8 sps:$4 sm:$0xff]  }
  0x3f   : > { %866 = vmatprep.subr.bf16.mxu0 %v1561_v45  ;;  %635 = vperm.xlu1 %1551, %v621_v1   ;;  %v1581_v7 = vld [vmem:[%s1836_s23 + $0xe0] ss:$8 sps:$4 sm:$0xff]   ;;  %v1587_v12 = vld [vmem:[%s1836_s23 + $0xd0] ss:$8 sps:$4 sm:$0xff]   ;;  %v1591_v15 = vld [vmem:[%s1836_s23 + $0xc4] ss:$8 sps:$4 sm:$0xff]  }
  0x40   : > { %1487 = vmatmul.mubr.msk.bf16.vlgmr.msra.gmra.mxu1 %vm853_vm0, %v1594_v54  ;;  %625 = vperm.xlu0 %1550, %v619_v2   ;;  %v1061_v8 = vld [vmem:[%s2026_s5 + $0x8] sm:$0xff]  ;;  %v1060_v9 = vld [vmem:[%s2026_s5] sm:$0xff]  ;;  %v1062_v14 = vld [vmem:[%s2026_s5 + $0x10] sm:$0xff] }
  0x41   : > { %1014 = vmatpush1.bf16.msra.mxu1 %v1598_v58  ;;  %955 = vmatprep.mubr.bf16.mxu1 %v1643_v38  ;;  %v1611_v11 = vld [vmem:[%s2025_s4] sm:$0xff]   ;;  %v1121_v17 = vld [vmem:[%s2027_s6 + $0x8] sm:$0xff]  ;;  %v1595_v19 = vld [vmem:[%s1836_s23 + $0xb4] ss:$8 sps:$4 sm:$0xff]  }
  0x42   : > { %867 = vmatpush1.bf16.msra.mxu0 %v1563_v46  ;;  %v1593_v16 = vld [vmem:[%s1836_s23 + $0xc0] ss:$8 sps:$4 sm:$0xff]   ;;  %v1597_v21 = vld [vmem:[%s1836_s23 + $0xb0] ss:$8 sps:$4 sm:$0xff]   ;;  %v1601_v24 = vld [vmem:[%s1836_s23 + $0xa4] ss:$8 sps:$4 sm:$0xff]  }
  0x43   : > { %868 = vmatprep.subr.bf16.mxu0 %v1564_v47  ;;  %640 = vperm.xlu1 %1551, %v622_v4   ;;  %v1120_v18 = vld [vmem:[%s2027_s6] sm:$0xff]  ;;  %v1615_v20 = vld [vmem:[%s2025_s4 + $0x8] sm:$0xff]   ;;  %v1123_v22 = vld [vmem:[%s2027_s6 + $0x18] sm:$0xff] }
  0x44   : > { %630 = vperm.xlu0 %1550, %v620_v5   ;;  %v1122_v23 = vld [vmem:[%s2027_s6 + $0x10] sm:$0xff]  ;;  %v1603_v25 = vld [vmem:[%s1836_s23 + $0xa0] ss:$8 sps:$4 sm:$0xff]   ;;  %v1155_v30 = vld [vmem:[%s2028_s7 + $0x18] sm:$0xff] }
  0x45   : > { %v1153_v26 = vld [vmem:[%s2028_s7 + $0x8] sm:$0xff]  ;;  %v1152_v27 = vld [vmem:[%s2028_s7] sm:$0xff]  ;;  %v1605_v28 = vld [vmem:[%s1836_s23 + $0x94] ss:$8 sps:$4 sm:$0xff]  }
  0x46   : > { %869 = vmatpush1.bf16.msra.mxu0 %v1566_v50  ;;  %v1607_v29 = vld [vmem:[%s1836_s23 + $0x90] ss:$8 sps:$4 sm:$0xff]   ;;  %v1608_v32 = vld [vmem:[%s1836_s23 + $0x84] ss:$8 sps:$4 sm:$0xff]   ;;  %v1610_v33 = vld [vmem:[%s1836_s23 + $0x80] ss:$8 sps:$4 sm:$0xff]  }
  0x47   : > { %870 = vmatprep.subr.bf16.mxu0 %v1567_v51  ;;  %1071 = vperm.xlu1 %1551, %v1061_v8   ;;  %v1154_v31 = vld [vmem:[%s2028_s7 + $0x10] sm:$0xff]  ;;  %v1612_v34 = vld [vmem:[%s2022_s1] ss:$12 sps:$4 sm:$0xff]   ;;  %v1616_v35 = vld [vmem:[%s2022_s1 + $0x1c] ss:$12 sps:$4 sm:$0xff]   ;;  %s1443_s23 = sshll.u32 %s1827_s17, 5 }
  0x48   : > { %1488 = vmatmul.mubr.msk.bf16.gmra.mxu1 %vm853_vm0, %v1604_v0  ;;  %1066 = vperm.xlu0 %1550, %v1060_v9   ;;  %v1618_v36 = vld [vmem:[%s2022_s1 + $0x18] ss:$12 sps:$4 sm:$0xff]   ;;  %s1968_s28 = scalar_lea.vmem [#allocation4], %s1443_s23  ;;  %s1978_s29 = scalar_lea.vmem [#allocation5], %s1443_s23 }
  0x49   : > { %1031 = vmatprep.mubr.bf16.mxu1 %v1643_v38  ;;  %s1521_s17 = sshll.u32 (%p1729_p5), %s1710_s12, 3 }
  0x4a   : > { %871 = vmatpush1.bf16.msra.mxu0 %v1569_v55  ;;  %s1233_s19 = scalar_lea.vmem (%p1729_p5), %s2029_s8, %s1521_s17 }
  0x4b   : > { %872 = vmatprep.subr.bf16.mxu0 %v1570_v56  ;;  %1081 = vperm.xlu1 %1551, %v1063_v13  }
  0x4c   : > { %1076 = vperm.xlu0 %1550, %v1062_v14  }
  0x4e   : > { %873 = vmatpush1.bf16.msra.mxu0 %v1572_v59 }
  0x4f   : > { %874 = vmatprep.subr.bf16.mxu0 %v1573_v60  ;;  %1131 = vperm.xlu1 %1551, %v1121_v17  }
  0x50   : > { %1493 = vmatmul.mubr.msk.bf16.vlgmr.msra.gmra.mxu1 %vm992_vm1, %v1611_v11  ;;  %1126 = vperm.xlu0 %1550, %v1120_v18  }
  0x51   : > { %1041 = vmatprep.mubr.bf16.mxu1 %v1643_v38 }
  0x52   : > { %875 = vmatpush1.bf16.msra.mxu0 %v1575_v62 }
  0x53   : > { %876 = vmatprep.subr.bf16.mxu0 %v1576_v63  ;;  %1141 = vperm.xlu1 %1551, %v1123_v22  }
  0x54   : > { %1136 = vperm.xlu0 %1550, %v1122_v23  }
  0x56   : > { %877 = vmatpush2.bf16.msra.mxu0 %v1578_v3 }
  0x57   : > { %878 = vmatprep.subr.bf16.mxu0 %v1579_v6  ;;  %1163 = vperm.xlu1 %1551, %v1153_v26  }
  0x58   : > { %1494 = vmatmul.mubr.msk.bf16.gmra.mxu1 %vm992_vm1, %v1615_v20  ;;  %1158 = vperm.xlu0 %1550, %v1152_v27  }
  0x5a   : > { %879 = vmatpush2.bf16.msra.mxu0 %v1581_v7 }
  0x5b   : > { %880 = vmatprep.subr.bf16.mxu0 %v1585_v10  ;;  %1173 = vperm.xlu1 %1551, %v1155_v30  }
  0x5c   : > { %1168 = vperm.xlu0 %1550, %v1154_v31  }
  0x5e   : > { %881 = vmatpush2.bf16.msra.mxu0 %v1587_v12 }
  0x5f   : > { %882 = vmatprep.subr.bf16.mxu0 %v1591_v15 }
  0x62   : > { %883 = vmatpush2.bf16.msra.mxu0 %v1593_v16 }
  0x63   : > { %884 = vmatprep.subr.bf16.mxu0 %v1595_v19 }
  0x66   : > { %885 = vmatpush2.bf16.msra.mxu0 %v1597_v21 }
  0x67   : > { %886 = vmatprep.subr.bf16.mxu0 %v1601_v24 }
  0x6a   : > { %887 = vmatpush2.bf16.msra.mxu0 %v1603_v25 }
  0x6b   : > { %888 = vmatprep.subr.bf16.mxu0 %v1605_v28 }
  0x6e   : > { %889 = vmatpush2.bf16.msra.mxu0 %v1607_v29 }
  0x6f   : > { %890 = vmatprep.subr.bf16.mxu0 %v1608_v32 }
  0x72   : > { %891 = vmatpush2.bf16.msra.mxu0 %v1610_v33 }
  0x75   : > { %893 = vmatmul.mubr.bf16.vlgmr.msra.gmra.mxu0 %v1612_v34 }
  0x76   : > { %902 = vmatprep.mubr.bf16.mxu0 %v1616_v35 }
  0x7d   : > { %903 = vmatmul.mubr.bf16.gmra.mxu0 %v1618_v36 }
  0xba   : > { %v636_v43 = vpop.permute.xlu1 %635 }
  0xbb   : > { %v626_v41 = vpop.permute.xlu0 %625 }
  0xbe   : > { %v641_v47 = vpop.permute.xlu1 %640 }
  0xbf   : > { %v631_v45 = vpop.permute.xlu0 %630 }
  0xc2   : > { %v1072_v50 = vpop.permute.xlu1 %1071 }
  0xc3   : > { %v1067_v48 = vpop.permute.xlu0 %1066 }
  0xc6   : > { %v1959_v54 = vpop.permute.xlu1 %1081 }
  0xc7   : > { %v1957_v52 = vpop.permute.xlu0 %1076 }
  0xca   : > { %v1132_v58 = vpop.permute.xlu1 %1131 }
  0xcb   : > { %v1127_v55 = vpop.permute.xlu0 %1126 }
  0xce   : > { %v1963_v7 = vpop.permute.xlu1 %1141 }
  0xcf   : > { %v1961_v62 = vpop.permute.xlu0 %1136 }
  0xd2   : > { %v1164_v29 = vpop.permute.xlu1 %1163 }
  0xd3   : > { %v1159_v13 = vpop.permute.xlu0 %1158 }
 0x100   : > { %v947_v37 = vpop.f32.mrf.mxu1 }
 0x102   : > { %v949_v38 = vpop.f32.mrf.mxu1 }
 0x104   : > { %v951_v39 = vpop.f32.mrf.mxu1 }
 0x106   : > { %v953_v40 = vpop.f32.mrf.mxu1 }
 0x108   : > { %v957_v42 = vpop.f32.mrf.mxu1 }
 0x10a   : > { %v959_v44 = vpop.f32.mrf.mxu1 }
 0x10c   : > { %v961_v46 = vpop.f32.mrf.mxu1 }
 0x10e   : > { %v1955_v49 = vpop.f32.mrf.mxu1 }
 0x110   : > { %v1033_v51 = vpop.f32.mrf.mxu1 }
 0x112   : > { %v1035_v53 = vpop.f32.mrf.mxu1 }
 0x114   : > { %v1037_v56 = vpop.f32.mrf.mxu1 }
 0x116   : > { %v1039_v61 = vpop.f32.mrf.mxu1 }
 0x118   : > { %v1043_v6 = vpop.f32.mrf.mxu1 }
 0x11a   : > { %v1045_v19 = vpop.f32.mrf.mxu1 }
 0x135   : > { %v894_v57 = vpop.f32.mrf.mxu0 }
 0x136   : > { %v895_v59 = vadd.f32 %v894_v57, %v626_v41 }
 0x137   : > { %v896_v60 = vpop.f32.mrf.mxu0 }
 0x138   : > { %v948_v63 = vadd.f32 %v947_v37, %v895_v59  ;;  %v897_v0 = vadd.f32 %v896_v60, %v626_v41  ;;  %v1047_v37 = vpop.f32.mrf.mxu1  ;;  %v1169_v60 = vpop.permute.xlu0 %1168 }
 0x139   : > { %v898_v1 = vpop.f32.mrf.mxu0 }
 0x13a   : > { %v1052_v2 = vadd.f32 %v1033_v51, %v948_v63  ;;  %v950_v3 = vadd.f32 %v949_v38, %v897_v0  ;;  %v899_v4 = vadd.f32 %v898_v1, %v631_v45  ;;  %v1049_v59 = vpop.f32.mrf.mxu1 }
 0x13b   : > { %v900_v5 = vpop.f32.mrf.mxu0 }
 0x13c   : > { %v1084_v8 = vadd.f32 %v1067_v48, %v1052_v2  ;;  %v1053_v9 = vadd.f32 %v1035_v53, %v950_v3  ;;  %v952_v10 = vadd.f32 %v951_v39, %v899_v4  ;;  %v901_v11 = vadd.f32 %v900_v5, %v631_v45  ;;  %v1174_v2 = vpop.permute.xlu1 %1173 }
 0x13d   : > { %v904_v12 = vpop.f32.mrf.mxu0 }
 0x13e   : > { %v1144_v14 = vmul.f32 %v1127_v55, %v1084_v8  ;;  %v1085_v15 = vadd.f32 %v1067_v48, %v1053_v9  ;;  %v1054_v16 = vadd.f32 %v1037_v56, %v952_v10  ;;  %v954_v17 = vadd.f32 %v953_v40, %v901_v11 }
 0x13f   : > { %v905_v18 = vadd.f32 %v904_v12, %v636_v43  ;;  %v906_v20 = vpop.f32.mrf.mxu0 }
 0x140   : > { %v1176_v21 = vadd.f32 %v1159_v13, %v1144_v14  ;;  %v1513_v22 = vpack.c.bf16 %v1085_v15, %v1084_v8  ;;  %v1145_v23 = vmul.f32 %v1127_v55, %v1085_v15  ;;  %v1086_v24 = vadd.f32 %v1072_v50, %v1054_v16 }
 0x141   : > { %v1055_v25 = vadd.f32 %v1039_v61, %v954_v17  ;;  %v958_v26 = vadd.f32 %v957_v42, %v905_v18  ;;  %v907_v27 = vadd.f32 %v906_v20, %v636_v43  ;;  %v908_v28 = vpop.f32.mrf.mxu0 }
 0x142   : > { %1116 = vst [vmem:[%s1968_s28] sm:$0xff] %v1513_v22  ;;  %v1177_v30 = vadd.f32 %v1159_v13, %v1145_v23  ;;  %v1146_v31 = vmul.f32 %v1132_v58, %v1086_v24  ;;  %v909_v32 = vadd.f32 %v908_v28, %v641_v47  ;;  %v1184_v33 = vmax.f32 %v1176_v21, 0.0 }
 0x143   : > { %v1087_v34 = vadd.f32 %v1072_v50, %v1055_v25  ;;  %v1056_v35 = vadd.f32 %v1043_v6, %v958_v26  ;;  %v960_v36 = vadd.f32 %v959_v44, %v907_v27  ;;  %v910_v38 = vpop.f32.mrf.mxu0 }
 0x144   : > { %v1185_v39 = vmax.f32 %v1177_v30, 0.0  ;;  %v1178_v40 = vadd.f32 %v1164_v29, %v1146_v31  ;;  %v962_v41 = vadd.f32 %v961_v46, %v909_v32  ;;  %v911_v42 = vadd.f32 %v910_v38, %v641_v47 }
 0x145   : > { %v1514_v43 = vpack.c.bf16 %v1087_v34, %v1086_v24  ;;  %v1147_v45 = vmul.f32 %v1132_v58, %v1087_v34  ;;  %v1088_v48 = vadd.f32 %v1957_v52, %v1056_v35  ;;  %v1057_v51 = vadd.f32 %v1045_v19, %v960_v36 }
 0x146   : > { %v1517_v53 = vpack.c.bf16 %v1185_v39, %v1184_v33  ;;  %v1058_v55 = vadd.f32 %v1047_v37, %v962_v41  ;;  %v964_v56 = vadd.f32 %v1955_v49, %v911_v42  ;;  %v1186_v46 = vmax.f32 %v1178_v40, 0.0 }
 0x147   : > { %1117 = vst [vmem:[%s1968_s28 + $0x8] sm:$0xff] %v1514_v43  ;;  %v1179_v50 = vadd.f32 %v1164_v29, %v1147_v45  ;;  %v1148_v44 = vmul.f32 %v1961_v62, %v1088_v48  ;;  %v1089_v57 = vadd.f32 %v1957_v52, %v1057_v51 }
 0x148   : > { %1216 = vst [vmem:[%s1978_s29] sm:$0xff] %v1517_v53  ;;  %v1090_v47 = vadd.f32 %v1959_v54, %v1058_v55  ;;  %v1059_v58 = vadd.f32 %v1049_v59, %v964_v56 }
 0x149   : > { %v1187_v49 = vmax.f32 %v1179_v50, 0.0  ;;  %v1180_v61 = vadd.f32 %v1169_v60, %v1148_v44  ;;  %v1515_v63 = vpack.c.bf16 %v1089_v57, %v1088_v48  ;;  %v1149_v0 = vmul.f32 %v1961_v62, %v1089_v57 }
 0x14a   : > { %v1150_v52 = vmul.f32 %v1963_v7, %v1090_v47  ;;  %v1091_v1 = vadd.f32 %v1959_v54, %v1059_v58 }
 0x14b   : > { %v1518_v3 = vpack.c.bf16 %v1187_v49, %v1186_v46  ;;  %1118 = vst [vmem:[%s1968_s28 + $0x10] sm:$0xff] %v1515_v63  ;;  %v1181_v4 = vadd.f32 %v1169_v60, %v1149_v0  ;;  %v1188_v9 = vmax.f32 %v1180_v61, 0.0 }
 0x14c   : > { %v1182_v5 = vadd.f32 %v1174_v2, %v1150_v52  ;;  %v1516_v6 = vpack.c.bf16 %v1091_v1, %v1090_v47  ;;  %v1151_v8 = vmul.f32 %v1963_v7, %v1091_v1  ;;  %v1268_v7 = vld [vmem:[%s1968_s28] sm:$0xff] (%p1729_p5) }
 0x14d   : > { %1217 = vst [vmem:[%s1978_s29 + $0x8] sm:$0xff] %v1518_v3  ;;  %v1189_v10 = vmax.f32 %v1181_v4, 0.0  ;;  %1269 = vst [vmem:[%s1233_s19] sm:$0xff] (%p1729_p5), %v1268_v7 }
 0x14e   : > { %1119 = vst [vmem:[%s1968_s28 + $0x18] sm:$0xff] %v1516_v6  ;;  %v1183_v11 = vadd.f32 %v1174_v2, %v1151_v8  ;;  %v1190_v12 = vmax.f32 %v1182_v5, 0.0  ;;  %v1270_v14 = vld [vmem:[%s1968_s28 + $0x8] sm:$0xff] (%p1729_p5) }
 0x14f   : > { %v1519_v62 = vpack.c.bf16 %v1189_v10, %v1188_v9  ;;  %1271 = vst [vmem:[%s1233_s19 + $0x10] sm:$0xff] (%p1729_p5), %v1270_v14 }
 0x150   : > { %v1191_v13 = vmax.f32 %v1183_v11, 0.0  ;;  %1230 = sbr.rel (!%p1729_p5) target bundleno = 343 (0x157), region = 132 }
 0x151   : > { %1218 = vst [vmem:[%s1978_s29 + $0x10] sm:$0xff] %v1519_v62 }
 0x152   : > { %v1520_v54 = vpack.c.bf16 %v1191_v13, %v1190_v12  ;;  %v1272_v15 = vld [vmem:[%s1968_s28 + $0x10] sm:$0xff] (%p1729_p5) }
 0x153   : > { %1273 = vst [vmem:[%s1233_s19 + $0x20] sm:$0xff] (%p1729_p5), %v1272_v15 }
 0x154   : > { %1219 = vst [vmem:[%s1978_s29 + $0x18] sm:$0xff] %v1520_v54 }
 0x155   : > { %v1274_v16 = vld [vmem:[%s1968_s28 + $0x18] sm:$0xff] }
 0x156   : > { %1275 = vst [vmem:[%s1233_s19 + $0x30] sm:$0xff] %v1274_v16 }
 0x157 PF: > { %1281 = sbr.rel (!%p1729_p5) target bundleno = 351 (0x15f), region = 170  ;;  %s1522_s20 = sshll.u32 (%p1729_p5), %s1710_s12, 3  ;;  %v1319_v17 = vld [vmem:[%s1978_s29] sm:$0xff] (%p1729_p5)  ;;  %v1321_v18 = vld [vmem:[%s1978_s29 + $0x8] sm:$0xff] (%p1729_p5) }
 0x158   : > { %s1284_s30 = scalar_lea.vmem (%p1729_p5), %s2030_s9, %s1522_s20 }
 0x159   : > { %1320 = vst [vmem:[%s1284_s30] sm:$0xff] (%p1729_p5), %v1319_v17  ;;  %1322 = vst [vmem:[%s1284_s30 + $0x10] sm:$0xff] (%p1729_p5), %v1321_v18 }
 0x15a   : > { %v1323_v19 = vld [vmem:[%s1978_s29 + $0x10] sm:$0xff] (%p1729_p5) }
 0x15b   : > { %1324 = vst [vmem:[%s1284_s30 + $0x20] sm:$0xff] (%p1729_p5), %v1323_v19 }
 0x15d   : > { %v1325_v20 = vld [vmem:[%s1978_s29 + $0x18] sm:$0xff] }
 0x15e   : > { %1326 = vst [vmem:[%s1284_s30 + $0x30] sm:$0xff] %v1325_v20 }
 0x15f PF: > { %p17_p10 = scmp.ge.s32.totalorder %s1713_s13, 4   ;;  %s2033_s30 = smov %s1637_s10 }
 0x160   : > { %s2034_s10 = smov %s1723_s16  ;;  %s2035_s11 = smov %s1713_s13 }
 0x161   :  { %19 = sbr.rel (!%p17_p10) target bundleno = 2 (0x2), region = 259 }

// kernel: wide_resnet_forward.13
= control target key start
LH: loop header
LB: loop body
LE: loop exit
PB: predicated region body
PF: predicated region fallthrough
CT: control target
= control target key end

     0   :  { %s1461_s18 = smov 0   ;;  %s1463_s19 = smov 0   ;;  %s1815_s0 = inlined_call_operand.vmem [shape: bf16[288,512], index: 0, kind: input, shape index: {}]   ;;  %s1816_s1 = inlined_call_operand.vmem [shape: bf16[64,288], index: 1, kind: input, shape index: {}]   ;;  %s1817_s2 = inlined_call_operand.vmem [shape: f32[64,1], index: 2, kind: input, shape index: {}]   ;;  %s1818_s3 = inlined_call_operand.vmem [shape: f32[64,1], index: 3, kind: input, shape index: {}]   ;;  %s1819_s4 = inlined_call_operand.vmem [shape: f32[64,1], index: 4, kind: input, shape index: {}]   ;;  %s1820_s5 = inlined_call_operand.vmem [shape: bf16[64,512], index: 5, kind: output, shape index: {}]  }
   0x1   :  { %s1465_s20 = smov 0  }
   0x2 LB: > { %s1224_s21 = sadd.s32 4294967295, %s1428_s20   ;;  %s1478_s22 = sadd.s32 1, %s1428_s20   ;;  %s1428_s20 = sphi %s1465_s20, %s1824_s20   ;;  %s1424_s19 = sphi %s1463_s19, %s1823_s19   ;;  %s1420_s18 = sphi %s1461_s18, %s1822_s18  }
   0x3   : > { %s19_s23 = ssub.s32 %s1428_s20, %s1478_s22  ;;  %s22_s24 = sadd.s32 1, %s1424_s19 }
   0x4   : > { %p20_p0 = scmp.eq.s32.totalorder %s19_s23, 0  ;;  %p29_p1 = scmp.ne.s32.totalorder %s1424_s19, %s1420_s18 }
   0x5   : > { %p30_p2 = scmp.eq.s32.totalorder %s1428_s20, 0  ;;  %p143_p3 = scmp.eq.s32.totalorder %s1224_s21, 1 }
   0x6   : > { %s1489_s25 = scalar_select %p20_p0, %s1424_s19, %s22_s24  }
   0x7   : > { %p31_p4 = por %p30_p2, %p29_p1  ;;  %p1491_p5 = por %p143_p3, %p29_p1 }
   0x8   : > { %p1227_p6 = scmp.ge.s32.totalorder %s1428_s20, 2 }
   0xa   : > { %177 = sbr.rel (%p1227_p6) target bundleno = 37 (0x25), region = 32 }
   0xf   : > { %180 = sbr.rel (!%p31_p4) target bundleno = 37 (0x25), region = 36  ;;  %s182_s27 = sand.u32 (%p31_p4), 1, %s1424_s19  }
  0x10   : > { %s1297_s28 = sshll.u32 (%p31_p4), %s1428_s20, 3  ;;  %s1307_s29 = smul.u32 (%p31_p4), 288, %s182_s27 }
  0x11   : > { %s1501_s7 = scalar_lea.vmem (%p31_p4), %s1815_s0, %s1297_s28 }
  0x12   : > { %v286_v0 = vld [vmem:[%s1501_s7] sm:$0xff] (%p31_p4)  ;;  %v288_v1 = vld [vmem:[%s1501_s7 + $0x10] sm:$0xff] (%p31_p4)  ;;  %s1509_s8 = scalar_lea.vmem (%p31_p4), [#allocation2], %s1307_s29 }
  0x13   : > { %v290_v2 = vld [vmem:[%s1501_s7 + $0x20] sm:$0xff] (%p31_p4)  ;;  %v292_v3 = vld [vmem:[%s1501_s7 + $0x30] sm:$0xff] (%p31_p4)  ;;  %287 = vst [vmem:[%s1509_s8] sm:$0xff] (%p31_p4), %v286_v0  ;;  %289 = vst [vmem:[%s1509_s8 + $0x8] sm:$0xff] (%p31_p4), %v288_v1 }
  0x14   : > { %v294_v4 = vld [vmem:[%s1501_s7 + $0x40] sm:$0xff]  ;;  %v296_v5 = vld [vmem:[%s1501_s7 + $0x50] sm:$0xff]  ;;  %291 = vst [vmem:[%s1509_s8 + $0x10] sm:$0xff] %v290_v2  ;;  %293 = vst [vmem:[%s1509_s8 + $0x18] sm:$0xff] %v292_v3 }
  0x15   : > { %295 = vst [vmem:[%s1509_s8 + $0x20] sm:$0xff] %v294_v4  ;;  %297 = vst [vmem:[%s1509_s8 + $0x28] sm:$0xff] %v296_v5  ;;  %v298_v6 = vld [vmem:[%s1501_s7 + $0x60] sm:$0xff]  ;;  %v300_v7 = vld [vmem:[%s1501_s7 + $0x70] sm:$0xff] }
  0x16   : > { %v302_v8 = vld [vmem:[%s1501_s7 + $0x80] sm:$0xff]  ;;  %299 = vst [vmem:[%s1509_s8 + $0x30] sm:$0xff] %v298_v6  ;;  %301 = vst [vmem:[%s1509_s8 + $0x38] sm:$0xff] %v300_v7  ;;  %v304_v9 = vld [vmem:[%s1501_s7 + $0x90] sm:$0xff] }
  0x17   : > { %303 = vst [vmem:[%s1509_s8 + $0x40] sm:$0xff] %v302_v8  ;;  %v306_v10 = vld [vmem:[%s1501_s7 + $0xa0] sm:$0xff]  ;;  %v308_v11 = vld [vmem:[%s1501_s7 + $0xb0] sm:$0xff]  ;;  %305 = vst [vmem:[%s1509_s8 + $0x48] sm:$0xff] %v304_v9 }
  0x18   : > { %307 = vst [vmem:[%s1509_s8 + $0x50] sm:$0xff] %v306_v10  ;;  %309 = vst [vmem:[%s1509_s8 + $0x58] sm:$0xff] %v308_v11  ;;  %v310_v12 = vld [vmem:[%s1501_s7 + $0xc0] sm:$0xff]  ;;  %v312_v13 = vld [vmem:[%s1501_s7 + $0xd0] sm:$0xff] }
  0x19   : > { %v314_v14 = vld [vmem:[%s1501_s7 + $0xe0] sm:$0xff]  ;;  %311 = vst [vmem:[%s1509_s8 + $0x60] sm:$0xff] %v310_v12  ;;  %313 = vst [vmem:[%s1509_s8 + $0x68] sm:$0xff] %v312_v13  ;;  %v316_v15 = vld [vmem:[%s1501_s7 + $0xf0] sm:$0xff] }
  0x1a   : > { %315 = vst [vmem:[%s1509_s8 + $0x70] sm:$0xff] %v314_v14  ;;  %v318_v16 = vld [vmem:[%s1501_s7 + $0x100] sm:$0xff]  ;;  %v320_v17 = vld [vmem:[%s1501_s7 + $0x110] sm:$0xff]  ;;  %317 = vst [vmem:[%s1509_s8 + $0x78] sm:$0xff] %v316_v15 }
  0x1b   : > { %319 = vst [vmem:[%s1509_s8 + $0x80] sm:$0xff] %v318_v16  ;;  %321 = vst [vmem:[%s1509_s8 + $0x88] sm:$0xff] %v320_v17  ;;  %v322_v18 = vld [vmem:[%s1501_s7 + $0x120] sm:$0xff]  ;;  %v324_v19 = vld [vmem:[%s1501_s7 + $0x130] sm:$0xff] }
  0x1c   : > { %v326_v20 = vld [vmem:[%s1501_s7 + $0x140] sm:$0xff]  ;;  %323 = vst [vmem:[%s1509_s8 + $0x90] sm:$0xff] %v322_v18  ;;  %325 = vst [vmem:[%s1509_s8 + $0x98] sm:$0xff] %v324_v19  ;;  %v328_v21 = vld [vmem:[%s1501_s7 + $0x150] sm:$0xff] }
  0x1d   : > { %327 = vst [vmem:[%s1509_s8 + $0xa0] sm:$0xff] %v326_v20  ;;  %v330_v22 = vld [vmem:[%s1501_s7 + $0x160] sm:$0xff]  ;;  %v332_v23 = vld [vmem:[%s1501_s7 + $0x170] sm:$0xff]  ;;  %329 = vst [vmem:[%s1509_s8 + $0xa8] sm:$0xff] %v328_v21 }
  0x1e   : > { %331 = vst [vmem:[%s1509_s8 + $0xb0] sm:$0xff] %v330_v22  ;;  %333 = vst [vmem:[%s1509_s8 + $0xb8] sm:$0xff] %v332_v23  ;;  %v334_v24 = vld [vmem:[%s1501_s7 + $0x180] sm:$0xff]  ;;  %v336_v25 = vld [vmem:[%s1501_s7 + $0x190] sm:$0xff] }
  0x1f   : > { %v338_v26 = vld [vmem:[%s1501_s7 + $0x1a0] sm:$0xff]  ;;  %335 = vst [vmem:[%s1509_s8 + $0xc0] sm:$0xff] %v334_v24  ;;  %337 = vst [vmem:[%s1509_s8 + $0xc8] sm:$0xff] %v336_v25  ;;  %v340_v27 = vld [vmem:[%s1501_s7 + $0x1b0] sm:$0xff] }
  0x20   : > { %339 = vst [vmem:[%s1509_s8 + $0xd0] sm:$0xff] %v338_v26  ;;  %v342_v28 = vld [vmem:[%s1501_s7 + $0x1c0] sm:$0xff]  ;;  %v344_v29 = vld [vmem:[%s1501_s7 + $0x1d0] sm:$0xff]  ;;  %341 = vst [vmem:[%s1509_s8 + $0xd8] sm:$0xff] %v340_v27 }
  0x21   : > { %343 = vst [vmem:[%s1509_s8 + $0xe0] sm:$0xff] %v342_v28  ;;  %345 = vst [vmem:[%s1509_s8 + $0xe8] sm:$0xff] %v344_v29  ;;  %v346_v30 = vld [vmem:[%s1501_s7 + $0x1e0] sm:$0xff]  ;;  %v348_v31 = vld [vmem:[%s1501_s7 + $0x1f0] sm:$0xff] }
  0x22   : > { %v350_v32 = vld [vmem:[%s1501_s7 + $0x200] sm:$0xff]  ;;  %347 = vst [vmem:[%s1509_s8 + $0xf0] sm:$0xff] %v346_v30  ;;  %349 = vst [vmem:[%s1509_s8 + $0xf8] sm:$0xff] %v348_v31  ;;  %v352_v33 = vld [vmem:[%s1501_s7 + $0x210] sm:$0xff] }
  0x23   : > { %351 = vst [vmem:[%s1509_s8 + $0x100] sm:$0xff] %v350_v32  ;;  %v354_v34 = vld [vmem:[%s1501_s7 + $0x220] sm:$0xff]  ;;  %v356_v35 = vld [vmem:[%s1501_s7 + $0x230] sm:$0xff]  ;;  %353 = vst [vmem:[%s1509_s8 + $0x108] sm:$0xff] %v352_v33 }
  0x24   : > { %355 = vst [vmem:[%s1509_s8 + $0x110] sm:$0xff] %v354_v34  ;;  %357 = vst [vmem:[%s1509_s8 + $0x118] sm:$0xff] %v356_v35 }
  0x25 PF: > { %p1230_p7 = scmp.ge.s32.totalorder %s1428_s20, 1  ;;  %p362_p8 = scmp.lt.s32.totalorder %s1428_s20, 3 }
  0x27   : > { %p363_p9 = pnand %p1230_p7, %p362_p8 }
  0x28   : > { %s369_s9 = sand.u32 (!%p363_p9), 1, %s1420_s18  }
  0x29   : > { %366 = sbr.rel (%p363_p9) target bundleno = 357 (0x165), region = 74  ;;  %s1231_s23 = sshll.u32 (!%p363_p9), %s369_s9, 6 }
  0x2a   : > { %s1308_s10 = smul.u32 (!%p363_p9), 288, %s369_s9  ;;  %s1761_s18 = scalar_lea.vmem (!%p363_p9), [#allocation3], %s1231_s23 }
  0x2c   : > { %s1588_s13 = scalar_lea.vmem (!%p363_p9), [#allocation2], %s1308_s10 }
  0x2e   : > { %v1430_v36 = vmov 0   ;;  %v1393_v37 = vld [vmem:[%s1816_s1 + $0x4] ss:$12 sps:$4 sm:$0xff]   ;;  %v1336_v38 = vld [vmem:[%s1588_s13 + $0x74] ss:$8 sps:$4 sm:$0xff]   ;;  %vm738_vm0 = vcmask 261120  }
  0x2f   : > { %856 = vmatprep.mubr.bf16.mxu1 %v1430_v36  ;;  %1335 = vset.pattern.permute.xlu1 %v1430_v36  ;;  %v1338_v39 = vld [vmem:[%s1588_s13 + $0x70] ss:$8 sps:$4 sm:$0xff]   ;;  %v1339_v40 = vld [vmem:[%s1588_s13 + $0x64] ss:$8 sps:$4 sm:$0xff]   ;;  %v1341_v41 = vld [vmem:[%s1588_s13 + $0x60] ss:$8 sps:$4 sm:$0xff]  }
  0x30   : > { %1334 = vset.pattern.permute.xlu0 %v1430_v36  ;;  %783 = vmatprep.mubr.bf16.mxu0 %v1393_v37  ;;  %v1342_v42 = vld [vmem:[%s1588_s13 + $0x54] ss:$8 sps:$4 sm:$0xff]   ;;  %v1344_v43 = vld [vmem:[%s1588_s13 + $0x50] ss:$8 sps:$4 sm:$0xff]   ;;  %v1345_v44 = vld [vmem:[%s1588_s13 + $0x44] ss:$8 sps:$4 sm:$0xff]  }
  0x31   : > { %751 = vmatprep.subr.bf16.mxu0 %v1336_v38  ;;  %v1347_v45 = vld [vmem:[%s1588_s13 + $0x40] ss:$8 sps:$4 sm:$0xff]   ;;  %v1348_v46 = vld [vmem:[%s1588_s13 + $0x34] ss:$8 sps:$4 sm:$0xff]   ;;  %v1350_v47 = vld [vmem:[%s1588_s13 + $0x30] ss:$8 sps:$4 sm:$0xff]  }
  0x32   : > { %752 = vmatpush1.bf16.msra.mxu0 %v1338_v39  ;;  %v1351_v48 = vld [vmem:[%s1588_s13 + $0x24] ss:$8 sps:$4 sm:$0xff]   ;;  %v1353_v49 = vld [vmem:[%s1588_s13 + $0x20] ss:$8 sps:$4 sm:$0xff]   ;;  %v1377_v50 = vld [vmem:[%s1588_s13 + $0x114] ss:$8 sps:$4 sm:$0xff]  }
  0x33   : > { %753 = vmatprep.subr.bf16.mxu0 %v1339_v40  ;;  %v1380_v51 = vld [vmem:[%s1588_s13 + $0x110] ss:$8 sps:$4 sm:$0xff]   ;;  %v1354_v52 = vld [vmem:[%s1588_s13 + $0x14] ss:$8 sps:$4 sm:$0xff]   ;;  %836 = vmatprep.subr.bf16.mxu1 %v1377_v50  ;;  %v1383_v53 = vld [vmem:[%s1588_s13 + $0x104] ss:$8 sps:$4 sm:$0xff]  }
  0x34   : > { %837 = vmatpush1.bf16.msra.mxu1 %v1380_v51  ;;  %v1386_v54 = vld [vmem:[%s1588_s13 + $0x100] ss:$8 sps:$4 sm:$0xff]   ;;  %v1356_v55 = vld [vmem:[%s1588_s13 + $0x10] ss:$8 sps:$4 sm:$0xff]   ;;  %v1357_v56 = vld [vmem:[%s1588_s13 + $0x4] ss:$8 sps:$4 sm:$0xff]  }
  0x35   : > { %838 = vmatprep.subr.bf16.mxu1 %v1383_v53  ;;  %v1389_v57 = vld [vmem:[%s1816_s1 + $0x8] ss:$12 sps:$4 sm:$0xff]   ;;  %v450_v60 = vld [vmem:[%s1817_s2] sm:$0xff]  ;;  %v453_v62 = vld [vmem:[%s1817_s2 + $0x18] sm:$0xff]  ;;  %s1306_s9 = sshll.u32 (%p1491_p5), %s1224_s21, 3 }
  0x36   : > { %754 = vmatpush1.bf16.msra.mxu0 %v1341_v41  ;;  %v1359_v58 = vld [vmem:[%s1588_s13] ss:$8 sps:$4 sm:$0xff]   ;;  %v452_v59 = vld [vmem:[%s1817_s2 + $0x10] sm:$0xff]  ;;  %460 = vperm.xlu0 %1334, %v450_v60   ;;  %v1363_v1 = vld [vmem:[%s1588_s13 + $0xe4] ss:$8 sps:$4 sm:$0xff]   ;;  %s1106_s28 = scalar_lea.vmem (%p1491_p5), %s1820_s5, %s1306_s9 }
  0x37   : > { %755 = vmatprep.subr.bf16.mxu0 %v1342_v42  ;;  %v1360_v61 = vld [vmem:[%s1588_s13 + $0xf4] ss:$8 sps:$4 sm:$0xff]   ;;  %470 = vperm.xlu1 %1335, %v452_v59   ;;  %v451_v63 = vld [vmem:[%s1817_s2 + $0x8] sm:$0xff]  ;;  %v1362_v0 = vld [vmem:[%s1588_s13 + $0xf0] ss:$8 sps:$4 sm:$0xff]  }
  0x38   : > { %839 = vmatpush1.bf16.msra.mxu1 %v1386_v54  ;;  %v1394_v2 = vld [vmem:[%s1816_s1 + $0x20] ss:$12 sps:$4 sm:$0xff]   ;;  %v1366_v6 = vld [vmem:[%s1588_s13 + $0xd4] ss:$8 sps:$4 sm:$0xff]   ;;  %v1368_v9 = vld [vmem:[%s1588_s13 + $0xd0] ss:$8 sps:$4 sm:$0xff]  }
  0x39   : > { %v455_v3 = vld [vmem:[%s1817_s2 + $0x28] sm:$0xff]  ;;  %v454_v4 = vld [vmem:[%s1817_s2 + $0x20] sm:$0xff]  ;;  %v457_v7 = vld [vmem:[%s1817_s2 + $0x38] sm:$0xff] }
  0x3a   : > { %756 = vmatpush1.bf16.msra.mxu0 %v1344_v43  ;;  %465 = vperm.xlu0 %1334, %v451_v63   ;;  %v1365_v5 = vld [vmem:[%s1588_s13 + $0xe0] ss:$8 sps:$4 sm:$0xff]   ;;  %v456_v8 = vld [vmem:[%s1817_s2 + $0x30] sm:$0xff]  ;;  %v1369_v10 = vld [vmem:[%s1588_s13 + $0xc4] ss:$8 sps:$4 sm:$0xff]  }
  0x3b   : > { %757 = vmatprep.subr.bf16.mxu0 %v1345_v44  ;;  %1280 = vmatmul.mubr.msk.bf16.vlgmr.msra.gmra.mxu1 %vm738_vm0, %v1389_v57  ;;  %v1398_v11 = vld [vmem:[%s1816_s1 + $0x38] ss:$12 sps:$4 sm:$0xff]   ;;  %v898_v12 = vld [vmem:[%s1818_s3 + $0x8] sm:$0xff]  ;;  %v1372_v15 = vld [vmem:[%s1588_s13 + $0xb4] ss:$8 sps:$4 sm:$0xff]  }
  0x3c   : > { %866 = vmatprep.mubr.bf16.mxu1 %v1430_v36  ;;  %475 = vperm.xlu1 %1335, %v453_v62   ;;  %v897_v13 = vld [vmem:[%s1818_s3] sm:$0xff]  ;;  %v900_v16 = vld [vmem:[%s1818_s3 + $0x18] sm:$0xff]  ;;  %v899_v17 = vld [vmem:[%s1818_s3 + $0x10] sm:$0xff] }
  0x3d   : > { %v1371_v14 = vld [vmem:[%s1588_s13 + $0xc0] ss:$8 sps:$4 sm:$0xff]   ;;  %v1374_v18 = vld [vmem:[%s1588_s13 + $0xb0] ss:$8 sps:$4 sm:$0xff]   ;;  %v1375_v19 = vld [vmem:[%s1588_s13 + $0xa4] ss:$8 sps:$4 sm:$0xff]  }
  0x3e   : > { %758 = vmatpush1.bf16.msra.mxu0 %v1347_v45  ;;  %480 = vperm.xlu0 %1334, %v454_v4   ;;  %v1402_v20 = vld [vmem:[%s1816_s1 + $0x50] ss:$12 sps:$4 sm:$0xff]   ;;  %v902_v21 = vld [vmem:[%s1818_s3 + $0x28] sm:$0xff]  ;;  %v901_v22 = vld [vmem:[%s1818_s3 + $0x20] sm:$0xff] }
  0x3f   : > { %759 = vmatprep.subr.bf16.mxu0 %v1348_v46  ;;  %v1379_v23 = vld [vmem:[%s1588_s13 + $0xa0] ss:$8 sps:$4 sm:$0xff]   ;;  %v1381_v24 = vld [vmem:[%s1588_s13 + $0x94] ss:$8 sps:$4 sm:$0xff]   ;;  %v1385_v27 = vld [vmem:[%s1588_s13 + $0x90] ss:$8 sps:$4 sm:$0xff]  }
  0x40   : > { %485 = vperm.xlu1 %1335, %v455_v3   ;;  %v904_v25 = vld [vmem:[%s1818_s3 + $0x38] sm:$0xff]  ;;  %v903_v26 = vld [vmem:[%s1818_s3 + $0x30] sm:$0xff]  ;;  %v1387_v28 = vld [vmem:[%s1588_s13 + $0x84] ss:$8 sps:$4 sm:$0xff]  }
  0x41   : > { %v962_v29 = vld [vmem:[%s1819_s4 + $0x8] sm:$0xff]  ;;  %v961_v30 = vld [vmem:[%s1819_s4] sm:$0xff]  ;;  %v964_v32 = vld [vmem:[%s1819_s4 + $0x18] sm:$0xff] }
  0x42   : > { %760 = vmatpush1.bf16.msra.mxu0 %v1350_v47  ;;  %490 = vperm.xlu0 %1334, %v456_v8   ;;  %v1390_v31 = vld [vmem:[%s1588_s13 + $0x80] ss:$8 sps:$4 sm:$0xff]   ;;  %v963_v34 = vld [vmem:[%s1819_s4 + $0x10] sm:$0xff]  ;;  %v968_v38 = vld [vmem:[%s1819_s4 + $0x38] sm:$0xff] }
  0x43   : > { %761 = vmatprep.subr.bf16.mxu0 %v1351_v48  ;;  %1281 = vmatmul.mubr.msk.bf16.gmra.mxu1 %vm738_vm0, %v1394_v2  ;;  %v1391_v33 = vld [vmem:[%s1816_s1] ss:$12 sps:$4 sm:$0xff]   ;;  %v1395_v35 = vld [vmem:[%s1816_s1 + $0x1c] ss:$12 sps:$4 sm:$0xff]   ;;  %v1397_v39 = vld [vmem:[%s1816_s1 + $0x18] ss:$12 sps:$4 sm:$0xff]  }
  0x44   : > { %876 = vmatprep.mubr.bf16.mxu1 %v1430_v36  ;;  %495 = vperm.xlu1 %1335, %v457_v7   ;;  %v965_v37 = vld [vmem:[%s1819_s4 + $0x20] sm:$0xff]  ;;  %v967_v40 = vld [vmem:[%s1819_s4 + $0x30] sm:$0xff]  ;;  %v1403_v43 = vld [vmem:[%s1816_s1 + $0x4c] ss:$12 sps:$4 sm:$0xff]  }
  0x45   : > { %v1399_v41 = vld [vmem:[%s1816_s1 + $0x34] ss:$12 sps:$4 sm:$0xff]   ;;  %v1401_v42 = vld [vmem:[%s1816_s1 + $0x30] ss:$12 sps:$4 sm:$0xff]  }
  0x46   : > { %762 = vmatpush1.bf16.msra.mxu0 %v1353_v49  ;;  %907 = vperm.xlu0 %1334, %v897_v13   ;;  %v1405_v44 = vld [vmem:[%s1816_s1 + $0x48] ss:$12 sps:$4 sm:$0xff]  }
  0x47   : > { %763 = vmatprep.subr.bf16.mxu0 %v1354_v52 }
  0x48   : > { %912 = vperm.xlu1 %1335, %v898_v12  }
  0x4a   : > { %764 = vmatpush1.bf16.msra.mxu0 %v1356_v55  ;;  %917 = vperm.xlu0 %1334, %v899_v17  }
  0x4b   : > { %765 = vmatprep.subr.bf16.mxu0 %v1357_v56  ;;  %1282 = vmatmul.mubr.msk.bf16.gmra.mxu1 %vm738_vm0, %v1398_v11 }
  0x4c   : > { %886 = vmatprep.mubr.bf16.mxu1 %v1430_v36  ;;  %922 = vperm.xlu1 %1335, %v900_v16   ;;  %v966_v36 = vld [vmem:[%s1819_s4 + $0x28] sm:$0xff] }
  0x4e   : > { %766 = vmatpush1.bf16.msra.mxu0 %v1359_v58  ;;  %927 = vperm.xlu0 %1334, %v901_v22  }
  0x4f   : > { %767 = vmatprep.subr.bf16.mxu0 %v1360_v61 }
  0x50   : > { %932 = vperm.xlu1 %1335, %v902_v21  }
  0x52   : > { %768 = vmatpush2.bf16.msra.mxu0 %v1362_v0  ;;  %937 = vperm.xlu0 %1334, %v903_v26  }
  0x53   : > { %769 = vmatprep.subr.bf16.mxu0 %v1363_v1  ;;  %1283 = vmatmul.mubr.msk.bf16.gmra.mxu1 %vm738_vm0, %v1402_v20 }
  0x54   : > { %942 = vperm.xlu1 %1335, %v904_v25  }
  0x56   : > { %770 = vmatpush2.bf16.msra.mxu0 %v1365_v5  ;;  %971 = vperm.xlu0 %1334, %v961_v30  }
  0x57   : > { %771 = vmatprep.subr.bf16.mxu0 %v1366_v6 }
  0x58   : > { %976 = vperm.xlu1 %1335, %v962_v29  }
  0x5a   : > { %772 = vmatpush2.bf16.msra.mxu0 %v1368_v9  ;;  %981 = vperm.xlu0 %1334, %v963_v34  }
  0x5b   : > { %773 = vmatprep.subr.bf16.mxu0 %v1369_v10 }
  0x5c   : > { %986 = vperm.xlu1 %1335, %v964_v32  }
  0x5e   : > { %774 = vmatpush2.bf16.msra.mxu0 %v1371_v14  ;;  %991 = vperm.xlu0 %1334, %v965_v37  }
  0x5f   : > { %775 = vmatprep.subr.bf16.mxu0 %v1372_v15 }
  0x60   : > { %996 = vperm.xlu1 %1335, %v966_v36  }
  0x62   : > { %776 = vmatpush2.bf16.msra.mxu0 %v1374_v18  ;;  %1001 = vperm.xlu0 %1334, %v967_v40  }
  0x63   : > { %777 = vmatprep.subr.bf16.mxu0 %v1375_v19 }
  0x64   : > { %1006 = vperm.xlu1 %1335, %v968_v38  }
  0x66   : > { %778 = vmatpush2.bf16.msra.mxu0 %v1379_v23 }
  0x67   : > { %779 = vmatprep.subr.bf16.mxu0 %v1381_v24 }
  0x6a   : > { %780 = vmatpush2.bf16.msra.mxu0 %v1385_v27 }
  0x6b   : > { %781 = vmatprep.subr.bf16.mxu0 %v1387_v28 }
  0x6e   : > { %782 = vmatpush2.bf16.msra.mxu0 %v1390_v31 }
  0x71   : > { %784 = vmatmul.mubr.bf16.vlgmr.msra.gmra.mxu0 %v1391_v33 }
  0x72   : > { %793 = vmatprep.mubr.bf16.mxu0 %v1395_v35 }
  0x79   : > { %794 = vmatmul.mubr.bf16.gmra.mxu0 %v1397_v39 }
  0x7a   : > { %803 = vmatprep.mubr.bf16.mxu0 %v1399_v41 }
  0x81   : > { %804 = vmatmul.mubr.bf16.gmra.mxu0 %v1401_v42 }
  0x82   : > { %813 = vmatprep.mubr.bf16.mxu0 %v1403_v43 }
  0x89   : > { %814 = vmatmul.mubr.bf16.gmra.mxu0 %v1405_v44 }
  0xb1   : > { %v461_v45 = vpop.permute.xlu0 %460 }
  0xb2   : > { %v471_v46 = vpop.permute.xlu1 %470 }
  0xb5   : > { %v466_v47 = vpop.permute.xlu0 %465 }
  0xb7   : > { %v1738_v48 = vpop.permute.xlu1 %475 }
  0xb9   : > { %v1740_v49 = vpop.permute.xlu0 %480 }
  0xbb   : > { %v1742_v51 = vpop.permute.xlu1 %485 }
  0xbd   : > { %v1744_v52 = vpop.permute.xlu0 %490 }
  0xbf   : > { %v1746_v54 = vpop.permute.xlu1 %495 }
  0xc1   : > { %v908_v56 = vpop.permute.xlu0 %907 }
  0xc3   : > { %v913_v58 = vpop.permute.xlu1 %912 }
  0xc5   : > { %v918_v59 = vpop.permute.xlu0 %917 }
  0xc7   : > { %v1748_v61 = vpop.permute.xlu1 %922 }
  0xc9   : > { %v1750_v63 = vpop.permute.xlu0 %927 }
  0xcb   : > { %v1752_v1 = vpop.permute.xlu1 %932 }
  0xcd   : > { %v1754_v2 = vpop.permute.xlu0 %937 }
  0xcf   : > { %v1756_v7 = vpop.permute.xlu1 %942 }
  0xd1   : > { %v972_v15 = vpop.permute.xlu0 %971 }
  0xd3   : > { %v977_v26 = vpop.permute.xlu1 %976 }
  0xd5   : > { %v982_v43 = vpop.permute.xlu0 %981 }
  0xfb   : > { %v858_v50 = vpop.f32.mrf.mxu1 }
  0xfd   : > { %v860_v53 = vpop.f32.mrf.mxu1 }
  0xff   : > { %v862_v55 = vpop.f32.mrf.mxu1 }
 0x101   : > { %v864_v57 = vpop.f32.mrf.mxu1 }
 0x103   : > { %v868_v60 = vpop.f32.mrf.mxu1 }
 0x105   : > { %v870_v62 = vpop.f32.mrf.mxu1 }
 0x107   : > { %v872_v0 = vpop.f32.mrf.mxu1 }
 0x109   : > { %v874_v4 = vpop.f32.mrf.mxu1 }
 0x10b   : > { %v878_v11 = vpop.f32.mrf.mxu1 }
 0x10d   : > { %v880_v22 = vpop.f32.mrf.mxu1 }
 0x10f   : > { %v882_v36 = vpop.f32.mrf.mxu1 }
 0x131   : > { %v785_v3 = vpop.f32.mrf.mxu0 }
 0x132   : > { %v786_v5 = vadd.f32 %v785_v3, %v461_v45 }
 0x133   : > { %v787_v6 = vpop.f32.mrf.mxu0 }
 0x134   : > { %v859_v8 = vadd.f32 %v858_v50, %v786_v5  ;;  %v788_v9 = vadd.f32 %v787_v6, %v461_v45 }
 0x135   : > { %v789_v10 = vpop.f32.mrf.mxu0 }
 0x136   : > { %v945_v12 = vmul.f32 %v908_v56, %v859_v8  ;;  %v861_v13 = vadd.f32 %v860_v53, %v788_v9  ;;  %v790_v14 = vadd.f32 %v789_v10, %v466_v47  ;;  %v987_v8 = vpop.permute.xlu1 %986 }
 0x137   : > { %v791_v16 = vpop.f32.mrf.mxu0 }
 0x138   : > { %v1009_v17 = vadd.f32 %v972_v15, %v945_v12  ;;  %v946_v18 = vmul.f32 %v908_v56, %v861_v13  ;;  %v863_v19 = vadd.f32 %v862_v55, %v790_v14  ;;  %v792_v20 = vadd.f32 %v791_v16, %v466_v47  ;;  %v884_v56 = vpop.f32.mrf.mxu1 }
 0x139   : > { %v795_v21 = vpop.f32.mrf.mxu0 }
 0x13a   : > { %v1010_v23 = vadd.f32 %v972_v15, %v946_v18  ;;  %v947_v24 = vmul.f32 %v913_v58, %v863_v19  ;;  %v865_v25 = vadd.f32 %v864_v57, %v792_v20  ;;  %v1025_v27 = vmax.f32 %v1009_v17, 0.0  ;;  %v888_v13 = vpop.f32.mrf.mxu1  ;;  %v992_v17 = vpop.permute.xlu0 %991 }
 0x13b   : > { %v796_v28 = vadd.f32 %v795_v21, %v471_v46  ;;  %v797_v29 = vpop.f32.mrf.mxu0 }
 0x13c   : > { %v1026_v30 = vmax.f32 %v1010_v23, 0.0  ;;  %v1011_v31 = vadd.f32 %v977_v26, %v947_v24  ;;  %v948_v32 = vmul.f32 %v913_v58, %v865_v25  ;;  %v798_v33 = vadd.f32 %v797_v29, %v471_v46  ;;  %v890_v24 = vpop.f32.mrf.mxu1 }
 0x13d   : > { %v869_v34 = vadd.f32 %v868_v60, %v796_v28  ;;  %v799_v35 = vpop.f32.mrf.mxu0 }
 0x13e   : > { %v1298_v37 = vpack.c.bf16 %v1026_v30, %v1025_v27  ;;  %v1012_v38 = vadd.f32 %v977_v26, %v948_v32  ;;  %v871_v39 = vadd.f32 %v870_v62, %v798_v33  ;;  %v800_v41 = vadd.f32 %v799_v35, %v1738_v48 }
 0x13f   : > { %v949_v40 = vmul.f32 %v918_v59, %v869_v34  ;;  %v801_v42 = vpop.f32.mrf.mxu0  ;;  %v1027_v44 = vmax.f32 %v1011_v31, 0.0  ;;  %v997_v31 = vpop.permute.xlu1 %996 }
 0x140   : > { %1089 = vst [vmem:[%s1761_s18] sm:$0xff] %v1298_v37  ;;  %v1028_v45 = vmax.f32 %v1012_v38, 0.0  ;;  %v950_v47 = vmul.f32 %v918_v59, %v871_v39  ;;  %v802_v46 = vadd.f32 %v801_v42, %v1738_v48  ;;  %v873_v53 = vadd.f32 %v872_v0, %v800_v41 }
 0x141   : > { %v1013_v50 = vadd.f32 %v982_v43, %v949_v40  ;;  %v805_v55 = vpop.f32.mrf.mxu0 }
 0x142   : > { %v1299_v57 = vpack.c.bf16 %v1028_v45, %v1027_v44  ;;  %v1014_v58 = vadd.f32 %v982_v43, %v950_v47  ;;  %v875_v60 = vadd.f32 %v874_v4, %v802_v46  ;;  %v806_v62 = vadd.f32 %v805_v55, %v1740_v49  ;;  %v1002_v45 = vpop.permute.xlu0 %1001 }
 0x143   : > { %v1029_v3 = vmax.f32 %v1013_v50, 0.0  ;;  %v951_v5 = vmul.f32 %v1748_v61, %v873_v53  ;;  %v807_v6 = vpop.f32.mrf.mxu0 }
 0x144   : > { %1090 = vst [vmem:[%s1761_s18 + $0x8] sm:$0xff] %v1299_v57  ;;  %v1030_v9 = vmax.f32 %v1014_v58, 0.0  ;;  %v952_v59 = vmul.f32 %v1748_v61, %v875_v60  ;;  %v879_v48 = vadd.f32 %v878_v11, %v806_v62  ;;  %v808_v0 = vadd.f32 %v807_v6, %v1740_v49  ;;  %v1007_v60 = vpop.permute.xlu1 %1006 }
 0x145   : > { %v1015_v10 = vadd.f32 %v987_v8, %v951_v5  ;;  %v809_v12 = vpop.f32.mrf.mxu0 }
 0x146   : > { %v1300_v14 = vpack.c.bf16 %v1030_v9, %v1029_v3  ;;  %v1016_v4 = vadd.f32 %v987_v8, %v952_v59  ;;  %v953_v15 = vmul.f32 %v1750_v63, %v879_v48  ;;  %v881_v16 = vadd.f32 %v880_v22, %v808_v0 }
 0x147   : > { %v1031_v18 = vmax.f32 %v1015_v10, 0.0  ;;  %v810_v19 = vadd.f32 %v809_v12, %v1742_v51  ;;  %v811_v20 = vpop.f32.mrf.mxu0 }
 0x148   : > { %1091 = vst [vmem:[%s1761_s18 + $0x10] sm:$0xff] %v1300_v14  ;;  %v1032_v21 = vmax.f32 %v1016_v4, 0.0  ;;  %v1017_v61 = vadd.f32 %v992_v17, %v953_v15  ;;  %v954_v11 = vmul.f32 %v1750_v63, %v881_v16  ;;  %v812_v49 = vadd.f32 %v811_v20, %v1742_v51 }
 0x149   : > { %v883_v23 = vadd.f32 %v882_v36, %v810_v19  ;;  %v815_v25 = vpop.f32.mrf.mxu0  ;;  %v892_v36 = vpop.f32.mrf.mxu1 }
 0x14a   : > { %v1301_v26 = vpack.c.bf16 %v1032_v21, %v1031_v18  ;;  %v1018_v27 = vadd.f32 %v992_v17, %v954_v11  ;;  %v885_v28 = vadd.f32 %v884_v56, %v812_v49  ;;  %v816_v29 = vadd.f32 %v815_v25, %v1744_v52 }
 0x14b   : > { %v955_v22 = vmul.f32 %v1752_v1, %v883_v23  ;;  %v817_v30 = vpop.f32.mrf.mxu0  ;;  %v1033_v32 = vmax.f32 %v1017_v61, 0.0  ;;  %v894_v53 = vpop.f32.mrf.mxu1  ;;  %v1151_v48 = vld [vmem:[%s1761_s18 + $0x8] sm:$0xff] (%p1491_p5) }
 0x14c   : > { %1092 = vst [vmem:[%s1761_s18 + $0x18] sm:$0xff] %v1301_v26  ;;  %v1034_v33 = vmax.f32 %v1018_v27, 0.0  ;;  %v956_v63 = vmul.f32 %v1752_v1, %v885_v28  ;;  %v818_v51 = vadd.f32 %v817_v30, %v1744_v52  ;;  %v889_v35 = vadd.f32 %v888_v13, %v816_v29  ;;  %1152 = vst [vmem:[%s1106_s28 + $0x10] sm:$0xff] (%p1491_p5), %v1151_v48 }
 0x14d   : > { %v1019_v34 = vadd.f32 %v997_v31, %v955_v22  ;;  %v819_v37 = vpop.f32.mrf.mxu0 }
 0x14e   : > { %v1302_v38 = vpack.c.bf16 %v1034_v33, %v1033_v32  ;;  %v1020_v39 = vadd.f32 %v997_v31, %v956_v63  ;;  %v891_v40 = vadd.f32 %v890_v24, %v818_v51  ;;  %v820_v41 = vadd.f32 %v819_v37, %v1746_v54 }
 0x14f   : > { %v1035_v42 = vmax.f32 %v1019_v34, 0.0  ;;  %v957_v43 = vmul.f32 %v1754_v2, %v889_v35  ;;  %v821_v44 = vpop.f32.mrf.mxu0  ;;  %v1153_v0 = vld [vmem:[%s1761_s18 + $0x10] sm:$0xff] (%p1491_p5) }
 0x150   : > { %1093 = vst [vmem:[%s1761_s18 + $0x20] sm:$0xff] %v1302_v38  ;;  %v1036_v47 = vmax.f32 %v1020_v39, 0.0  ;;  %v958_v1 = vmul.f32 %v1754_v2, %v891_v40  ;;  %v893_v52 = vadd.f32 %v892_v36, %v820_v41  ;;  %v822_v46 = vadd.f32 %v821_v44, %v1746_v54  ;;  %1154 = vst [vmem:[%s1106_s28 + $0x20] sm:$0xff] (%p1491_p5), %v1153_v0 }
 0x151   : > { %v1021_v50 = vadd.f32 %v1002_v45, %v957_v43 }
 0x152   : > { %v1303_v55 = vpack.c.bf16 %v1036_v47, %v1035_v42  ;;  %v1022_v56 = vadd.f32 %v1002_v45, %v958_v1  ;;  %v959_v57 = vmul.f32 %v1756_v7, %v893_v52  ;;  %v895_v58 = vadd.f32 %v894_v53, %v822_v46 }
 0x153   : > { %v1037_v62 = vmax.f32 %v1021_v50, 0.0  ;;  %v1155_v10 = vld [vmem:[%s1761_s18 + $0x18] sm:$0xff] (%p1491_p5) }
 0x154   : > { %1094 = vst [vmem:[%s1761_s18 + $0x28] sm:$0xff] %v1303_v55  ;;  %v1038_v3 = vmax.f32 %v1022_v56, 0.0  ;;  %v1023_v5 = vadd.f32 %v1007_v60, %v959_v57  ;;  %v960_v6 = vmul.f32 %v1756_v7, %v895_v58  ;;  %v1149_v7 = vld [vmem:[%s1761_s18] sm:$0xff] (%p1491_p5)  ;;  %1156 = vst [vmem:[%s1106_s28 + $0x30] sm:$0xff] (%p1491_p5), %v1155_v10 }
 0x155   : > { %1150 = vst [vmem:[%s1106_s28] sm:$0xff] (%p1491_p5), %v1149_v7 }
 0x156   : > { %v1304_v2 = vpack.c.bf16 %v1038_v3, %v1037_v62  ;;  %v1024_v8 = vadd.f32 %v1007_v60, %v960_v6  ;;  %v1039_v9 = vmax.f32 %v1023_v5, 0.0 }
 0x157   : > { %v1157_v12 = vld [vmem:[%s1761_s18 + $0x20] sm:$0xff] (%p1491_p5) }
 0x158   : > { %1095 = vst [vmem:[%s1761_s18 + $0x30] sm:$0xff] %v1304_v2  ;;  %v1040_v54 = vmax.f32 %v1024_v8, 0.0  ;;  %1103 = sbr.rel (!%p1491_p5) target bundleno = 357 (0x165), region = 82  ;;  %1158 = vst [vmem:[%s1106_s28 + $0x40] sm:$0xff] (%p1491_p5), %v1157_v12 }
 0x15a   : > { %v1305_v59 = vpack.c.bf16 %v1040_v54, %v1039_v9 }
 0x15b   : > { %v1159_v13 = vld [vmem:[%s1761_s18 + $0x28] sm:$0xff] (%p1491_p5) }
 0x15c   : > { %1096 = vst [vmem:[%s1761_s18 + $0x38] sm:$0xff] %v1305_v59  ;;  %1160 = vst [vmem:[%s1106_s28 + $0x50] sm:$0xff] (%p1491_p5), %v1159_v13 }
 0x15f   : > { %v1161_v14 = vld [vmem:[%s1761_s18 + $0x30] sm:$0xff] }
 0x160   : > { %1162 = vst [vmem:[%s1106_s28 + $0x60] sm:$0xff] %v1161_v14 }
 0x163   : > { %v1163_v4 = vld [vmem:[%s1761_s18 + $0x38] sm:$0xff] }
 0x164   : > { %1164 = vst [vmem:[%s1106_s28 + $0x70] sm:$0xff] %v1163_v4 }
 0x165 PF: > { %p12_p10 = scmp.ge.s32.totalorder %s1478_s22, 4   ;;  %s1822_s18 = smov %s1424_s19 }
 0x166   : > { %s1823_s19 = smov %s1489_s25  ;;  %s1824_s20 = smov %s1478_s22 }
 0x167   :  { %14 = sbr.rel (!%p12_p10) target bundleno = 2 (0x2), region = 151 }

// kernel: wide_resnet_forward.15
= control target key start
LH: loop header
LB: loop body
LE: loop exit
PB: predicated region body
PF: predicated region fallthrough
CT: control target
= control target key end

     0   :  { %vm193_vm0 = vcmask 523264   ;;  %v376_v13 = vmov 0   ;;  %vm277_vm1 = vcmask 9216   ;;  %vm275_vm2 = vcmask 15360   ;;  %s458_s1 = inlined_call_operand.vmem [shape: bf16[128,2], index: 1, kind: input, shape index: {}]   ;;  %s459_s0 = inlined_call_operand.vmem [shape: bf16[64,128], index: 0, kind: input, shape index: {}]   ;;  %s460_s2 = inlined_call_operand.vmem [shape: f32[10,64], index: 2, kind: input, shape index: {}]   ;;  %s461_s3 = inlined_call_operand.vmem [shape: f32[10,1], index: 3, kind: input, shape index: {}]   ;;  %s462_s4 = inlined_call_operand.vmem [shape: f32[10,2], index: 4, kind: output, shape index: {}]  }
   0x1   :  { %v364_v0 = vld [vmem:[%s458_s1 + $0x38] sm:$0xff]   ;;  %v365_v1 = vld [vmem:[%s458_s1 + $0x30] sm:$0xff]   ;;  %v366_v2 = vld [vmem:[%s458_s1 + $0x28] sm:$0xff]   ;;  %363 = vset.pattern.permute.xlu0 %v376_v13 }
   0x2   :  { %319 = vmatprep.subr.bf16.mxu0 %v364_v0  ;;  %v367_v3 = vld [vmem:[%s458_s1 + $0x20] sm:$0xff]   ;;  %v368_v5 = vld [vmem:[%s458_s1 + $0x18] sm:$0xff]   ;;  %v369_v6 = vld [vmem:[%s458_s1 + $0x10] sm:$0xff]  }
   0x3   :  { %320 = vmatpush3.bf16.msra.mxu0 %v364_v0  ;;  %v372_v4 = vld [vmem:[%s459_s0] sm:$0xff]   ;;  %v370_v7 = vld [vmem:[%s458_s1 + $0x8] sm:$0xff]   ;;  %v374_v10 = vld [vmem:[%s459_s0 + $0x10] sm:$0xff]  }
   0x4   :  { %321 = vmatprep.subr.bf16.mxu0 %v365_v1  ;;  %335 = vmatprep.mubr.bf16.mxu0 %v372_v4  ;;  %v371_v8 = vld [vmem:[%s458_s1] sm:$0xff]   ;;  %v373_v9 = vld [vmem:[%s459_s0 + $0x8] sm:$0xff]   ;;  %v375_v11 = vld [vmem:[%s459_s0 + $0x18] sm:$0xff]  }
   0x5   :  { %v179_v12 = vld [vmem:[%s460_s2] sm:$0xff]  ;;  %v182_v15 = vld [vmem:[%s461_s3 + $0x8] sm:$0x3] }
   0x6   :  { %359 = vmatprep.mubr.msk.f32.mxu1 %vm193_vm0, %v179_v12  ;;  %v181_v14 = vld [vmem:[%s461_s3] sm:$0xff]  ;;  %v180_v24 = vld [vmem:[%s460_s2 + $0x8] sm:$0x3] }
   0x7   :  { %322 = vmatpush3.bf16.msra.mxu0 %v365_v1  ;;  %185 = vperm.xlu0 %363, %v181_v14  }
   0x8   :  { %323 = vmatprep.subr.bf16.mxu0 %v366_v2 }
   0xb   :  { %324 = vmatpush3.bf16.msra.mxu0 %v366_v2  ;;  %190 = vperm.xlu0 %363, %v182_v15  }
   0xc   :  { %325 = vmatprep.subr.bf16.mxu0 %v367_v3 }
   0xf   :  { %326 = vmatpush3.bf16.msra.mxu0 %v367_v3 }
  0x10   :  { %327 = vmatprep.subr.bf16.mxu0 %v368_v5 }
  0x13   :  { %328 = vmatpush3.bf16.msra.mxu0 %v368_v5 }
  0x14   :  { %329 = vmatprep.subr.bf16.mxu0 %v369_v6 }
  0x17   :  { %330 = vmatpush3.bf16.msra.mxu0 %v369_v6 }
  0x18   :  { %331 = vmatprep.subr.bf16.mxu0 %v370_v7 }
  0x1b   :  { %332 = vmatpush3.bf16.msra.mxu0 %v370_v7 }
  0x1c   :  { %333 = vmatprep.subr.bf16.mxu0 %v371_v8 }
  0x1f   :  { %334 = vmatpush3.bf16.msra.mxu0 %v371_v8 }
  0x22   :  { %336 = vmatmul.mubr.bf16.vlgmr.msra.gmra.mxu0 %v373_v9 }
  0x23   :  { %339 = vmatprep.mubr.bf16.mxu0 %v374_v10 }
  0x2a   :  { %340 = vmatmul.mubr.bf16.gmra.mxu0 %v375_v11 }
  0x82   :  { %v186_v25 = vpop.permute.xlu0 %185 }
  0x86   :  { %v191_v26 = vpop.permute.xlu0 %190 }
  0xe2   :  { %v337_v16 = vpop.f32.mrf.mxu0 }
  0xe4   :  { %v148_v17 = vpop.f32.mrf.mxu0 }
  0xe6   :  { %v338_v18 = vpop.f32.mrf.mxu0 }
  0xe8   :  { %v151_v19 = vpop.f32.mrf.mxu0 }
  0xea   :  { %v341_v20 = vpop.f32.mrf.mxu0 }
  0xec   :  { %v164_v21 = vpop.f32.mrf.mxu0 }
  0xee   :  { %v342_v22 = vpop.f32.mrf.mxu0 }
  0xef   :  { %343 = vmatprep.subr.mxu1 %v342_v22 }
  0xf0   :  { %344 = vmatpush3.msra.mxu1 %v342_v22  ;;  %v167_v23 = vpop.f32.mrf.mxu0 }
  0xf1   :  { %345 = vmatprep.subr.mxu1 %v341_v20 }
  0xf2   :  { %346 = vmatpush3.msra.mxu1 %v341_v20 }
  0xf3   :  { %347 = vmatprep.subr.mxu1 %v167_v23 }
  0xf4   :  { %348 = vmatpush3.msra.mxu1 %v167_v23 }
  0xf5   :  { %349 = vmatprep.subr.mxu1 %v164_v21 }
  0xf6   :  { %350 = vmatpush3.msra.mxu1 %v164_v21 }
  0xf7   :  { %351 = vmatprep.subr.mxu1 %v338_v18 }
  0xf8   :  { %352 = vmatpush3.msra.mxu1 %v338_v18 }
  0xf9   :  { %353 = vmatprep.subr.mxu1 %v337_v16 }
  0xfa   :  { %354 = vmatpush3.msra.mxu1 %v337_v16 }
  0xfb   :  { %355 = vmatprep.subr.mxu1 %v151_v19 }
  0xfc   :  { %356 = vmatpush3.msra.mxu1 %v151_v19 }
  0xfd   :  { %357 = vmatprep.subr.mxu1 %v148_v17 }
  0xfe   :  { %358 = vmatpush3.msra.mxu1 %v148_v17 }
  0xff   :  { %360 = vmatmul.mubr.msk.f32.vlgmr.msra.gmra.mxu1 %vm193_vm0, %v180_v24 }
 0x1bf   :  { %v361_v27 = vpop.f32.mrf.mxu1 }
 0x1c0   :  { %v272_v28 = vadd.f32 %v361_v27, %v191_v26 }
 0x1c1   :  { %v266_v29 = vpop.f32.mrf.mxu1 }
 0x1c2   :  { %278 = vst.msk [vmem:[%s462_s4 + $0x8] sm:$0x3] %vm277_vm1, %v272_v28  ;;  %v267_v30 = vadd.f32 %v266_v29, %v186_v25 }
 0x1c4   :  { %276 = vst.msk [vmem:[%s462_s4] sm:$0xff] %vm275_vm2, %v267_v30 }

// kernel: wide_resnet_forward.14
= control target key start
LH: loop header
LB: loop body
LE: loop exit
PB: predicated region body
PF: predicated region fallthrough
CT: control target
= control target key end

     0   :  { %v1475_v2 = vmov 0   ;;  %vm493_vm0 = vcmask 523264   ;;  %vm745_vm1 = vcmask 261120   ;;  %s1912_s0 = inlined_call_operand.vmem [shape: bf16[576,128], index: 0, kind: input, shape index: {}]   ;;  %s1913_s1 = inlined_call_operand.vmem [shape: bf16[64,576], index: 1, kind: input, shape index: {}]   ;;  %s1914_s2 = inlined_call_operand.vmem [shape: f32[64,1], index: 2, kind: input, shape index: {}]   ;;  %s1915_s3 = inlined_call_operand.vmem [shape: bf16[32,128], index: 3, kind: input, shape index: {}]   ;;  %s1916_s4 = inlined_call_operand.vmem [shape: bf16[64,32], index: 4, kind: input, shape index: {}]   ;;  %s1917_s5 = inlined_call_operand.vmem [shape: f32[64,1], index: 5, kind: input, shape index: {}]   ;;  %s1918_s6 = inlined_call_operand.vmem [shape: f32[64,1], index: 6, kind: input, shape index: {}]   ;;  %s1919_s7 = inlined_call_operand.vmem [shape: f32[64,1], index: 7, kind: input, shape index: {}]   ;;  %s1920_s8 = inlined_call_operand.hbm [shape: bf16[64,128], index: 8, kind: output, shape index: {0}]   ;;  %s1921_s9 = inlined_call_operand.vmem [shape: bf16[64,128], index: 9, kind: output, shape index: {1}]  }
   0x1   :  { %v1383_v0 = vld [vmem:[%s1912_s0 + $0x78] sm:$0xff]   ;;  %1382 = vset.pattern.permute.xlu1 %v1475_v2  ;;  %1381 = vset.pattern.permute.xlu0 %v1475_v2  ;;  %v1387_v5 = vld [vmem:[%s1912_s0 + $0x70] sm:$0xff]   ;;  %v1391_v9 = vld [vmem:[%s1912_s0 + $0x68] sm:$0xff]  }
   0x2   :  { %v1384_v1 = vld [vmem:[%s1912_s0 + $0xf8] sm:$0xff]   ;;  %1255 = vmatprep.subr.bf16.mxu0 %v1383_v0  ;;  %v1388_v6 = vld [vmem:[%s1912_s0 + $0xf0] sm:$0xff]   ;;  %v1392_v10 = vld [vmem:[%s1912_s0 + $0xe8] sm:$0xff]  }
   0x3   :  { %v1385_v3 = vld [vmem:[%s1912_s0 + $0x38] sm:$0xff]   ;;  %1295 = vmatprep.subr.bf16.mxu1 %v1384_v1  ;;  %v1389_v7 = vld [vmem:[%s1912_s0 + $0x30] sm:$0xff]   ;;  %v1393_v11 = vld [vmem:[%s1912_s0 + $0x28] sm:$0xff]  }
   0x4   :  { %v1386_v4 = vld [vmem:[%s1912_s0 + $0xb8] sm:$0xff]   ;;  %1256 = vmatpush3.bf16.msra.mxu0 %v1385_v3  ;;  %v1390_v8 = vld [vmem:[%s1912_s0 + $0xb0] sm:$0xff]   ;;  %v1394_v12 = vld [vmem:[%s1912_s0 + $0xa8] sm:$0xff]  }
   0x5   :  { %1296 = vmatpush3.bf16.msra.mxu1 %v1386_v4  ;;  %1257 = vmatprep.subr.bf16.mxu0 %v1387_v5  ;;  %v1395_v13 = vld [vmem:[%s1912_s0 + $0x60] sm:$0xff]   ;;  %v1399_v17 = vld [vmem:[%s1912_s0 + $0x58] sm:$0xff]   ;;  %v1403_v21 = vld [vmem:[%s1912_s0 + $0x50] sm:$0xff]  }
   0x6   :  { %1297 = vmatprep.subr.bf16.mxu1 %v1388_v6  ;;  %v1396_v14 = vld [vmem:[%s1912_s0 + $0xe0] sm:$0xff]   ;;  %v1400_v18 = vld [vmem:[%s1912_s0 + $0xd8] sm:$0xff]   ;;  %v1404_v22 = vld [vmem:[%s1912_s0 + $0xd0] sm:$0xff]  }
   0x7   :  { %v1397_v15 = vld [vmem:[%s1912_s0 + $0x20] sm:$0xff]   ;;  %v1401_v19 = vld [vmem:[%s1912_s0 + $0x18] sm:$0xff]   ;;  %v1405_v23 = vld [vmem:[%s1912_s0 + $0x10] sm:$0xff]  }
   0x8   :  { %1258 = vmatpush3.bf16.msra.mxu0 %v1389_v7  ;;  %v1398_v16 = vld [vmem:[%s1912_s0 + $0xa0] sm:$0xff]   ;;  %v1402_v20 = vld [vmem:[%s1912_s0 + $0x98] sm:$0xff]   ;;  %v1406_v24 = vld [vmem:[%s1912_s0 + $0x90] sm:$0xff]  }
   0x9   :  { %1298 = vmatpush3.bf16.msra.mxu1 %v1390_v8  ;;  %1259 = vmatprep.subr.bf16.mxu0 %v1391_v9  ;;  %v1407_v25 = vld [vmem:[%s1912_s0 + $0x48] sm:$0xff]   ;;  %v1411_v29 = vld [vmem:[%s1912_s0 + $0x40] sm:$0xff]   ;;  %v1421_v37 = vld [vmem:[%s1912_s0 + $0x118] sm:$0xff]  }
   0xa   :  { %1299 = vmatprep.subr.bf16.mxu1 %v1392_v10  ;;  %v1408_v26 = vld [vmem:[%s1912_s0 + $0xc8] sm:$0xff]   ;;  %v1412_v30 = vld [vmem:[%s1912_s0 + $0xc0] sm:$0xff]   ;;  %v131_v39 = vld [vmem:[%s1914_s2 + $0x10] sm:$0xff] }
   0xb   :  { %v1409_v27 = vld [vmem:[%s1912_s0 + $0x8] sm:$0xff]   ;;  %v1413_v31 = vld [vmem:[%s1912_s0] sm:$0xff]   ;;  %149 = vperm.xlu1 %1382, %v131_v39   ;;  %v132_v43 = vld [vmem:[%s1914_s2 + $0x18] sm:$0xff] }
   0xc   :  { %1260 = vmatpush3.bf16.msra.mxu0 %v1393_v11  ;;  %v1410_v28 = vld [vmem:[%s1912_s0 + $0x88] sm:$0xff]   ;;  %v1414_v32 = vld [vmem:[%s1912_s0 + $0x80] sm:$0xff]   ;;  %v1429_v47 = vld [vmem:[%s1912_s0 + $0x110] sm:$0xff]  }
   0xd   :  { %1300 = vmatpush3.bf16.msra.mxu1 %v1394_v12  ;;  %1261 = vmatprep.subr.bf16.mxu0 %v1395_v13  ;;  %v1415_v33 = vld [vmem:[%s1913_s1] ss:$20 sps:$4 sm:$0xff]   ;;  %v1417_v34 = vld [vmem:[%s1913_s1 + $0x4] ss:$20 sps:$4 sm:$0xff]   ;;  %v1418_v35 = vld [vmem:[%s1913_s1 + $0x8] ss:$20 sps:$4 sm:$0xff]  }
   0xe   :  { %1301 = vmatprep.subr.bf16.mxu1 %v1396_v14  ;;  %v1420_v36 = vld [vmem:[%s1913_s1 + $0xc] ss:$20 sps:$4 sm:$0xff]   ;;  %538 = vmatprep.mubr.bf16.mxu0 %v1417_v34  ;;  %v1425_v42 = vld [vmem:[%s1913_s1 + $0x34] ss:$20 sps:$4 sm:$0xff]   ;;  %v1428_v46 = vld [vmem:[%s1913_s1 + $0x30] ss:$20 sps:$4 sm:$0xff]  }
   0xf   :  { %603 = vmatprep.mubr.bf16.mxu1 %v1420_v36  ;;  %v1422_v38 = vld [vmem:[%s1915_s3 + $0x8] sm:$0xff]   ;;  %v129_v40 = vld [vmem:[%s1914_s2] sm:$0xff]  ;;  %154 = vperm.xlu1 %1382, %v132_v43   ;;  %v1432_v50 = vld [vmem:[%s1913_s1 + $0x5c] ss:$20 sps:$4 sm:$0xff]  }
  0x10   :  { %1262 = vmatpush3.bf16.msra.mxu0 %v1397_v15  ;;  %v1423_v41 = vld [vmem:[%s1913_s1 + $0x2c] ss:$20 sps:$4 sm:$0xff]   ;;  %139 = vperm.xlu0 %1381, %v129_v40   ;;  %v1427_v45 = vld [vmem:[%s1913_s1 + $0x28] ss:$20 sps:$4 sm:$0xff]   ;;  %v135_v54 = vld [vmem:[%s1914_s2 + $0x30] sm:$0xff] }
  0x11   :  { %1302 = vmatpush3.bf16.msra.mxu1 %v1398_v16  ;;  %1263 = vmatprep.subr.bf16.mxu0 %v1399_v17  ;;  %v130_v44 = vld [vmem:[%s1914_s2 + $0x8] sm:$0xff]  ;;  %v133_v51 = vld [vmem:[%s1914_s2 + $0x20] sm:$0xff]  ;;  %v136_v52 = vld [vmem:[%s1914_s2 + $0x38] sm:$0xff] }
  0x12   :  { %1303 = vmatprep.subr.bf16.mxu1 %v1400_v18  ;;  %v1430_v48 = vld [vmem:[%s1913_s1 + $0x54] ss:$20 sps:$4 sm:$0xff]   ;;  %v1434_v55 = vld [vmem:[%s1913_s1 + $0x50] ss:$20 sps:$4 sm:$0xff]   ;;  %v1435_v57 = vld [vmem:[%s1913_s1 + $0x58] ss:$20 sps:$4 sm:$0xff]  }
  0x13   :  { %v134_v49 = vld [vmem:[%s1914_s2 + $0x28] sm:$0xff]  ;;  %v1437_v56 = vld [vmem:[%s1915_s3] sm:$0xff]   ;;  %v1438_v58 = vld [vmem:[%s1913_s1 + $0x7c] ss:$20 sps:$4 sm:$0xff]  }
  0x14   :  { %1264 = vmatpush3.bf16.msra.mxu0 %v1401_v19  ;;  %144 = vperm.xlu0 %1381, %v130_v44   ;;  %v1436_v53 = vld [vmem:[%s1912_s0 + $0x108] sm:$0xff]   ;;  %v1440_v59 = vld [vmem:[%s1913_s1 + $0x84] ss:$20 sps:$4 sm:$0xff]   ;;  %v833_v0 = vld [vmem:[%s1917_s5 + $0x10] sm:$0xff] }
  0x15   :  { %1304 = vmatpush3.bf16.msra.mxu1 %v1402_v20  ;;  %1265 = vmatprep.subr.bf16.mxu0 %v1403_v21  ;;  %v832_v60 = vld [vmem:[%s1917_s5 + $0x8] sm:$0xff]  ;;  %v1444_v61 = vld [vmem:[%s1912_s0 + $0x100] sm:$0xff]   ;;  %v834_v63 = vld [vmem:[%s1917_s5 + $0x18] sm:$0xff] }
  0x16   :  { %1305 = vmatprep.subr.bf16.mxu1 %v1404_v22  ;;  %164 = vperm.xlu1 %1382, %v134_v49   ;;  %v831_v62 = vld [vmem:[%s1917_s5] sm:$0xff]  ;;  %v1442_v1 = vld [vmem:[%s1913_s1 + $0x78] ss:$20 sps:$4 sm:$0xff]   ;;  %v837_v9 = vld [vmem:[%s1917_s5 + $0x30] sm:$0xff] }
  0x17   :  { %v1443_v2 = vld [vmem:[%s1913_s1 + $0x80] ss:$20 sps:$4 sm:$0xff]   ;;  %v1445_v3 = vld [vmem:[%s1913_s1 + $0x10] ss:$20 sps:$4 sm:$0xff]   ;;  %v836_v5 = vld [vmem:[%s1917_s5 + $0x28] sm:$0xff] }
  0x18   :  { %1266 = vmatpush3.bf16.msra.mxu0 %v1405_v23  ;;  %159 = vperm.xlu0 %1381, %v133_v51   ;;  %v1446_v4 = vld [vmem:[%s1916_s4] sm:$0xff]   ;;  %v838_v7 = vld [vmem:[%s1917_s5 + $0x38] sm:$0xff]  ;;  %v1448_v10 = vld [vmem:[%s1916_s4 + $0x8] sm:$0xff]  }
  0x19   :  { %1306 = vmatpush3.bf16.msra.mxu1 %v1406_v24  ;;  %1267 = vmatprep.subr.bf16.mxu0 %v1407_v25  ;;  %v835_v6 = vld [vmem:[%s1917_s5 + $0x20] sm:$0xff]  ;;  %v1447_v8 = vld [vmem:[%s1913_s1 + $0x38] ss:$20 sps:$4 sm:$0xff]   ;;  %v1450_v12 = vld [vmem:[%s1916_s4 + $0x10] sm:$0xff]  }
  0x1a   :  { %1307 = vmatprep.subr.bf16.mxu1 %v1408_v26  ;;  %174 = vperm.xlu1 %1382, %v136_v52   ;;  %v1449_v11 = vld [vmem:[%s1913_s1 + $0x60] ss:$20 sps:$4 sm:$0xff]  }
  0x1c   :  { %1268 = vmatpush3.bf16.msra.mxu0 %v1409_v27  ;;  %169 = vperm.xlu0 %1381, %v135_v54  }
  0x1d   :  { %1308 = vmatpush3.bf16.msra.mxu1 %v1410_v28  ;;  %1269 = vmatprep.subr.bf16.mxu0 %v1411_v29 }
  0x1e   :  { %1309 = vmatprep.subr.bf16.mxu1 %v1412_v30  ;;  %846 = vperm.xlu1 %1382, %v832_v60  }
  0x20   :  { %1270 = vmatpush3.bf16.msra.mxu0 %v1413_v31  ;;  %841 = vperm.xlu0 %1381, %v831_v62  }
  0x21   :  { %1310 = vmatpush3.bf16.msra.mxu1 %v1414_v32  ;;  %1349 = vmatprep.subr.bf16.mxu0 %v1421_v37 }
  0x22   :  { %1365 = vmatprep.subr.bf16.mxu1 %v1422_v38  ;;  %856 = vperm.xlu1 %1382, %v834_v63  }
  0x23   :  { %539 = vmatmul.mubr.bf16.vlgmr.msra.gmra.mxu0 %v1415_v33 }
  0x24   :  { %604 = vmatmul.mubr.bf16.vlgmr.msra.gmra.mxu1 %v1418_v35  ;;  %1350 = vmatpush3.bf16.msra.mxu0 %v1421_v37 }
  0x25   :  { %1366 = vmatpush3.bf16.msra.mxu1 %v1422_v38  ;;  %546 = vmatprep.mubr.bf16.mxu0 %v1423_v41 }
  0x26   :  { %611 = vmatprep.mubr.bf16.mxu1 %v1425_v42  ;;  %1351 = vmatprep.subr.bf16.mxu0 %v1429_v47 }
  0x27   :  { %1367 = vmatprep.subr.bf16.mxu1 %v1437_v56  ;;  %851 = vperm.xlu0 %1381, %v833_v0  }
  0x28   :  { %1352 = vmatpush3.bf16.msra.mxu0 %v1429_v47  ;;  %866 = vperm.xlu1 %1382, %v836_v5  }
  0x29   :  { %1353 = vmatprep.subr.bf16.mxu0 %v1436_v53  ;;  %1368 = vmatpush3.bf16.msra.mxu1 %v1437_v56 }
  0x2b   :  { %547 = vmatmul.mubr.bf16.gmra.mxu0 %v1427_v45  ;;  %861 = vperm.xlu0 %1381, %v835_v6  }
  0x2c   :  { %612 = vmatmul.mubr.bf16.gmra.mxu1 %v1428_v46  ;;  %554 = vmatprep.mubr.bf16.mxu0 %v1430_v48 }
  0x2d   :  { %619 = vmatprep.mubr.bf16.mxu1 %v1432_v50  ;;  %1354 = vmatpush3.bf16.msra.mxu0 %v1436_v53 }
  0x2e   :  { %1355 = vmatprep.subr.bf16.mxu0 %v1444_v61  ;;  %876 = vperm.xlu1 %1382, %v838_v7  }
  0x31   :  { %1356 = vmatpush3.bf16.msra.mxu0 %v1444_v61 }
  0x33   :  { %555 = vmatmul.mubr.bf16.gmra.mxu0 %v1434_v55 }
  0x34   :  { %620 = vmatmul.mubr.bf16.gmra.mxu1 %v1435_v57  ;;  %562 = vmatprep.mubr.bf16.mxu0 %v1438_v58 }
  0x35   :  { %627 = vmatprep.mubr.bf16.mxu1 %v1440_v59 }
  0x3b   :  { %563 = vmatmul.mubr.bf16.gmra.mxu0 %v1442_v1 }
  0x3c   :  { %628 = vmatmul.mubr.bf16.gmra.mxu1 %v1443_v2  ;;  %1357 = vmatprep.mubr.msk.bf16.mxu0 %vm493_vm0, %v1445_v3 }
  0x3d   :  { %1369 = vmatprep.mubr.msk.bf16.mxu1 %vm745_vm1, %v1446_v4 }
  0x3e   :  { %15 = vsyncpa [#allocation3], 0  ;;  %871 = vperm.xlu0 %1381, %v837_v9   ;;  %v928_v13 = vld [vmem:[%s1918_s6 + $0x8] sm:$0xff]  ;;  %v927_v14 = vld [vmem:[%s1918_s6] sm:$0xff] }
  0x3f   :  { %942 = vperm.xlu1 %1382, %v928_v13   ;;  %v930_v15 = vld [vmem:[%s1918_s6 + $0x18] sm:$0xff]  ;;  %v929_v17 = vld [vmem:[%s1918_s6 + $0x10] sm:$0xff]  ;;  %v932_v19 = vld [vmem:[%s1918_s6 + $0x28] sm:$0xff] }
  0x40   :  { %v1451_v16 = vld [vmem:[%s1913_s1 + $0x88] ss:$20 sps:$4 sm:$0xff]   ;;  %v931_v20 = vld [vmem:[%s1918_s6 + $0x20] sm:$0xff]  ;;  %v933_v22 = vld [vmem:[%s1918_s6 + $0x30] sm:$0xff] }
  0x41   :  { %v1452_v18 = vld [vmem:[%s1916_s4 + $0x18] sm:$0xff]   ;;  %v984_v23 = vld [vmem:[%s1919_s7 + $0x8] sm:$0xff]  ;;  %v983_v24 = vld [vmem:[%s1919_s7] sm:$0xff] }
  0x42   :  { %937 = vperm.xlu0 %1381, %v927_v14   ;;  %v934_v21 = vld [vmem:[%s1918_s6 + $0x38] sm:$0xff]  ;;  %v985_v26 = vld [vmem:[%s1919_s7 + $0x10] sm:$0xff]  ;;  %v988_v27 = vld [vmem:[%s1919_s7 + $0x28] sm:$0xff] }
  0x43   :  { %1358 = vmatmul.mubr.msk.bf16.vlgmr.msra.gmra.mxu0 %vm493_vm0, %v1447_v8  ;;  %952 = vperm.xlu1 %1382, %v930_v15   ;;  %v986_v25 = vld [vmem:[%s1919_s7 + $0x18] sm:$0xff]  ;;  %v987_v28 = vld [vmem:[%s1919_s7 + $0x20] sm:$0xff]  ;;  %v989_v30 = vld [vmem:[%s1919_s7 + $0x30] sm:$0xff] }
  0x44   :  { %1370 = vmatmul.mubr.msk.bf16.vlgmr.msra.gmra.mxu1 %vm745_vm1, %v1448_v10  ;;  %1361 = vmatprep.mubr.msk.bf16.mxu0 %vm493_vm0, %v1449_v11  ;;  %v990_v29 = vld [vmem:[%s1919_s7 + $0x38] sm:$0xff]  ;;  %s1476_s7 = smov [#allocation2]  }
  0x45   :  { %1373 = vmatprep.mubr.msk.bf16.mxu1 %vm745_vm1, %v1450_v12  ;;  %s1092_s15 = sshll.u32 %s1476_s7, 4  ;;  %s1093_s15 = int_to_ptr.vmem [resolvable:$true] %s1092_s15 }
  0x46   :  { %947 = vperm.xlu0 %1381, %v929_v17   ;;  %s1453_s2 = scalar_lea.vmem %s1093_s15, 512  ;;  %p1458_p1 = scmp.lt.s32.totalorder %s1093_s15, %s1093_s15 }
  0x47   :  { %962 = vperm.xlu1 %1382, %v932_v19   ;;  %p1454_p0 = scmp.ne.s32.totalorder %s1093_s15, %s1453_s2  ;;  %p1459_p2 = scmp.lt.s32.totalorder %s1453_s2, %s1453_s2 }
  0x49   :  { %p1460_p3 = por %p1459_p2, %p1458_p1 }
  0x4a   :  { %957 = vperm.xlu0 %1381, %v931_v20  }
  0x4b   :  { %1362 = vmatmul.mubr.msk.bf16.gmra.mxu0 %vm493_vm0, %v1451_v16  ;;  %972 = vperm.xlu1 %1382, %v934_v21   ;;  %p1461_p4 = pnand %p1460_p3, %p1454_p0 }
  0x4c   :  { %1374 = vmatmul.mubr.msk.bf16.gmra.mxu1 %vm745_vm1, %v1452_v18 }
  0x4e   :  { %967 = vperm.xlu0 %1381, %v933_v22  }
  0x4f   :  { %998 = vperm.xlu1 %1382, %v984_v23  }
  0x52   :  { %993 = vperm.xlu0 %1381, %v983_v24  }
  0x53   :  { %1008 = vperm.xlu1 %1382, %v986_v25  }
  0x56   :  { %1003 = vperm.xlu0 %1381, %v985_v26  }
  0x57   :  { %1018 = vperm.xlu1 %1382, %v988_v27  }
  0x5a   :  { %1013 = vperm.xlu0 %1381, %v987_v28  }
  0x5b   :  { %1028 = vperm.xlu1 %1382, %v990_v29  }
  0x5e   :  { %1023 = vperm.xlu0 %1381, %v989_v30  }
  0x86   :  { %v150_v32 = vpop.permute.xlu1 %149 }
  0x8a   :  { %v155_v34 = vpop.permute.xlu1 %154 }
  0x8b   :  { %v140_v31 = vpop.permute.xlu0 %139 }
  0x8f   :  { %v1819_v33 = vpop.permute.xlu0 %144 }
  0x91   :  { %v1823_v36 = vpop.permute.xlu1 %164 }
  0x93   :  { %v1821_v35 = vpop.permute.xlu0 %159 }
  0x95   :  { %v1827_v38 = vpop.permute.xlu1 %174 }
  0x97   :  { %v1825_v37 = vpop.permute.xlu0 %169 }
  0x99   :  { %v1831_v40 = vpop.permute.xlu1 %846 }
  0x9b   :  { %v1829_v39 = vpop.permute.xlu0 %841 }
  0x9d   :  { %v1835_v42 = vpop.permute.xlu1 %856 }
  0xa2   :  { %v1833_v41 = vpop.permute.xlu0 %851 }
  0xa3   :  { %v1839_v44 = vpop.permute.xlu1 %866 }
  0xa4   :  { %1922 = vst [vmem:[#allocation5_spill] sm:$0xff] %v1839_v44 }
  0xa6   :  { %v1837_v43 = vpop.permute.xlu0 %861 }
  0xa9   :  { %v1843_v50 = vpop.permute.xlu1 %876 }
  0xb9   :  { %v1841_v47 = vpop.permute.xlu0 %871 }
  0xba   :  { %v1847_v58 = vpop.permute.xlu1 %942 }
  0xbd   :  { %v1845_v55 = vpop.permute.xlu0 %937 }
  0xbe   :  { %v1851_v2 = vpop.permute.xlu1 %952 }
  0xc1   :  { %v1849_v63 = vpop.permute.xlu0 %947 }
  0xc2   :  { %v1861_v10 = vpop.permute.xlu1 %962 }
  0xc3   :  { %1923 = vst [vmem:[#allocation6_spill] sm:$0xff] %v1861_v10 }
  0xc5   :  { %v1857_v7 = vpop.permute.xlu0 %957 }
  0xc6   :  { %v1867_v22 = vpop.permute.xlu1 %972 }
  0xc7   :  { %1924 = vst [vmem:[#allocation7_spill] sm:$0xff] %v1867_v22 }
  0xc9   :  { %v1865_v17 = vpop.permute.xlu0 %967 }
  0xca   :  { %v1870_v22 = vpop.permute.xlu1 %998 }
  0xe3   :  { %v1271_v45 = vpop.f32.mrf.mxu0 }
  0xe4   :  { %v1311_v46 = vpop.f32.mrf.mxu1 }
  0xe5   :  { %v1272_v48 = vpop.f32.mrf.mxu0 }
  0xe6   :  { %v1312_v49 = vpop.f32.mrf.mxu1  ;;  %v1273_v15 = vadd.f32 %v1272_v48, %v1271_v45  ;;  %v994_v45 = vpop.permute.xlu0 %993 }
  0xe7   :  { %v1274_v51 = vpop.f32.mrf.mxu0  ;;  %v1313_v29 = vadd.f32 %v1312_v49, %v1311_v46 }
  0xe8   :  { %v1314_v52 = vpop.f32.mrf.mxu1  ;;  %v541_v24 = vadd.f32 %v1273_v15, %v140_v31 }
  0xe9   :  { %v1275_v53 = vpop.f32.mrf.mxu0 }
  0xea   :  { %v1315_v54 = vpop.f32.mrf.mxu1  ;;  %v1276_v25 = vadd.f32 %v1275_v53, %v1274_v51 }
  0xeb   :  { %v1277_v56 = vpop.f32.mrf.mxu0 }
  0xec   :  { %v1317_v57 = vpop.f32.mrf.mxu1  ;;  %v544_v44 = vadd.f32 %v1276_v25, %v1819_v33  ;;  %v1009_v25 = vpop.permute.xlu1 %1008 }
  0xed   :  { %v1278_v59 = vpop.f32.mrf.mxu0 }
  0xee   :  { %v1318_v60 = vpop.f32.mrf.mxu1  ;;  %v1279_v12 = vadd.f32 %v1278_v59, %v1277_v56 }
  0xef   :  { %v1280_v61 = vpop.f32.mrf.mxu0  ;;  %v1319_v26 = vadd.f32 %v1318_v60, %v1317_v57  ;;  %v1316_v57 = vadd.f32 %v1315_v54, %v1314_v52 }
  0xf0   :  { %v1320_v62 = vpop.f32.mrf.mxu1  ;;  %v549_v19 = vadd.f32 %v1279_v12, %v150_v32  ;;  %v606_v12 = vadd.f32 %v1313_v29, %v541_v24 }
  0xf1   :  { %v1281_v0 = vpop.f32.mrf.mxu0 }
  0xf2   :  { %v1321_v1 = vpop.f32.mrf.mxu1  ;;  %v1282_v20 = vadd.f32 %v1281_v0, %v1280_v61  ;;  %v614_v59 = vadd.f32 %v1319_v26, %v549_v19  ;;  %v609_v19 = vadd.f32 %v1316_v57, %v544_v44 }
  0xf3   :  { %v1283_v3 = vpop.f32.mrf.mxu0  ;;  %v1322_v32 = vadd.f32 %v1321_v1, %v1320_v62 }
  0xf4   :  { %v1853_v4 = vpop.f32.mrf.mxu1  ;;  %v552_v30 = vadd.f32 %v1282_v20, %v155_v34  ;;  %v1004_v20 = vpop.permute.xlu0 %1003 }
  0xf5   :  { %v1284_v5 = vpop.f32.mrf.mxu0 }
  0xf6   :  { %v1855_v6 = vpop.f32.mrf.mxu1  ;;  %v1285_v31 = vadd.f32 %v1284_v5, %v1283_v3  ;;  %v617_v49 = vadd.f32 %v1322_v32, %v552_v30 }
  0xf7   :  { %v1286_v8 = vpop.f32.mrf.mxu0 }
  0xf8   :  { %v1859_v9 = vpop.f32.mrf.mxu1  ;;  %v557_v3 = vadd.f32 %v1285_v31, %v1821_v35 }
  0xf9   :  { %v1287_v11 = vpop.f32.mrf.mxu0 }
  0xfa   :  { %v1863_v13 = vpop.f32.mrf.mxu1  ;;  %v1288_v15 = vadd.f32 %v1287_v11, %v1286_v8 }
  0xfb   :  { %v1289_v14 = vpop.f32.mrf.mxu0 }
  0xfc   :  { %v1329_v16 = vpop.f32.mrf.mxu1  ;;  %v560_v44 = vadd.f32 %v1288_v15, %v1823_v36 }
  0xfd   :  { %v1290_v18 = vpop.f32.mrf.mxu0 }
  0xfe   :  { %v1330_v21 = vpop.f32.mrf.mxu1  ;;  %v1291_v48 = vadd.f32 %v1290_v18, %v1289_v14 }
  0xff   :  { %v1292_v23 = vpop.f32.mrf.mxu0  ;;  %v1331_v5 = vadd.f32 %v1330_v21, %v1329_v16 }
 0x100   :  { %v1332_v27 = vpop.f32.mrf.mxu1  ;;  %v565_v14 = vadd.f32 %v1291_v48, %v1825_v37 }
 0x101   :  { %v1293_v28 = vpop.f32.mrf.mxu0 }
 0x102   :  { %v1333_v56 = vpop.f32.mrf.mxu1  ;;  %v1294_v51 = vadd.f32 %v1293_v28, %v1292_v23  ;;  %v630_v26 = vadd.f32 %v1331_v5, %v565_v14  ;;  %v1926_v5 = vld [vmem:[#allocation5_spill] sm:$0xff] }
 0x103   :  { %v1359_v10 = vpop.f32.mrf.mxu0  ;;  %v1334_v35 = vadd.f32 %v1333_v56, %v1332_v27 }
 0x104   :  { %v679_v61 = vadd.f32 %v1359_v10, %v614_v59  ;;  %v1371_v0 = vpop.f32.mrf.mxu1  ;;  %v568_v52 = vadd.f32 %v1294_v51, %v1827_v38  ;;  %v1019_v51 = vpop.permute.xlu1 %1018 }
 0x105   :  { %v670_v53 = vpop.f32.mrf.mxu0 }
 0x106   :  { %v825_v60 = vadd.f32 %v1371_v0, %v679_v61  ;;  %v671_v46 = vadd.f32 %v670_v53, %v606_v12  ;;  %v792_v34 = vpop.f32.mrf.mxu1  ;;  %v1014_v61 = vpop.permute.xlu0 %1013 }
 0x107   :  { %v1360_v18 = vpop.f32.mrf.mxu0 }
 0x108   :  { %v881_v33 = vadd.f32 %v1833_v41, %v825_v60  ;;  %v823_v62 = vadd.f32 %v792_v34, %v671_v46  ;;  %v682_v1 = vadd.f32 %v1360_v18, %v617_v49  ;;  %v1372_v10 = vpop.f32.mrf.mxu1  ;;  %v1325_v41 = vadd.f32 %v1855_v6, %v1853_v4 }
 0x109   :  { %v673_v54 = vpop.f32.mrf.mxu0  ;;  %v633_v6 = vadd.f32 %v1334_v35, %v568_v52 }
 0x10a   :  { %v977_v23 = vmul.f32 %v1849_v63, %v881_v33  ;;  %v879_v8 = vadd.f32 %v1829_v39, %v823_v62  ;;  %v826_v11 = vadd.f32 %v1372_v10, %v682_v1  ;;  %v674_v37 = vadd.f32 %v673_v54, %v609_v19  ;;  %v795_v24 = vpop.f32.mrf.mxu1  ;;  %v1029_v54 = vpop.permute.xlu1 %1028 }
 0x10b   :  { %v1363_v28 = vpop.f32.mrf.mxu0  ;;  %v1328_v39 = vadd.f32 %v1863_v13, %v1859_v9  ;;  %v622_v30 = vadd.f32 %v1325_v41, %v557_v3  ;;  %v1925_v3 = vld [vmem:[#allocation7_spill] sm:$0xff] }
 0x10c   :  { %v975_v16 = vmul.f32 %v1845_v55, %v879_v8  ;;  %v882_v38 = vadd.f32 %v1835_v42, %v826_v11  ;;  %v824_v21 = vadd.f32 %v795_v24, %v674_v37  ;;  %v1375_v63 = vpop.f32.mrf.mxu1  ;;  %v695_v29 = vadd.f32 %v1363_v28, %v630_v26  ;;  %v1927_v37 = vld [vmem:[#allocation6_spill] sm:$0xff] }
 0x10d   :  { %v686_v59 = vpop.f32.mrf.mxu0  ;;  %v1033_v48 = vadd.f32 %v1004_v20, %v977_v23  ;;  %v625_v13 = vadd.f32 %v1328_v39, %v560_v44 }
 0x10e   :  { %v1217_v32 = vpack.c.bf16 %v882_v38, %v881_v33  ;;  %v978_v4 = vmul.f32 %v1851_v2, %v882_v38  ;;  %v808_v36 = vpop.f32.mrf.mxu1  ;;  %v880_v27 = vadd.f32 %v1831_v40, %v824_v21  ;;  %v829_v55 = vadd.f32 %v1375_v63, %v695_v29 }
 0x10f   :  { %v687_v56 = vadd.f32 %v686_v59, %v622_v30  ;;  %v1364_v42 = vpop.f32.mrf.mxu0  ;;  %v1031_v0 = vadd.f32 %v994_v45, %v975_v16  ;;  %v1041_v34 = vmax.f32 %v1033_v48, 0.0 }
 0x110   :  { %1249 = vst [vmem:[#allocation2 + $0x8] sm:$0xff] %v1217_v32   ;;  %v1034_v12 = vadd.f32 %v1009_v25, %v978_v4  ;;  %v698_v31 = vadd.f32 %v1364_v42, %v633_v6  ;;  %v1376_v9 = vpop.f32.mrf.mxu1  ;;  %v1212_v53 = vpack.c.bf16 %v880_v27, %v879_v8  ;;  %v976_v57 = vmul.f32 %v1847_v58, %v880_v27 }
 0x111   :  { %v885_v2 = vadd.f32 %v1841_v47, %v829_v55  ;;  %v827_v60 = vadd.f32 %v808_v36, %v687_v56  ;;  %v689_v46 = vpop.f32.mrf.mxu0  ;;  %v1024_v47 = vpop.permute.xlu0 %1023  ;;  %v1039_v10 = vmax.f32 %v1031_v0, 0.0 }
 0x112   :  { %v1042_v49 = vmax.f32 %v1034_v12, 0.0  ;;  %v830_v40 = vadd.f32 %v1376_v9, %v698_v31  ;;  %v690_v15 = vadd.f32 %v689_v46, %v625_v13  ;;  %1213 = vst [vmem:[#allocation2] sm:$0xff] %v1212_v53   ;;  %v1032_v45 = vadd.f32 %v1870_v22, %v976_v57  ;;  %v811_v33 = vpop.f32.mrf.mxu1 }
 0x113   :  { %v981_v14 = vmul.f32 %v1865_v17, %v885_v2  ;;  %v883_v18 = vadd.f32 %v1837_v43, %v827_v60 }
 0x114   :  { %v1237_v62 = vpack.c.bf16 %v1042_v49, %v1041_v34  ;;  %v886_v1 = vadd.f32 %v1843_v50, %v830_v40  ;;  %v828_v58 = vadd.f32 %v811_v33, %v690_v15  ;;  %v1040_v19 = vmax.f32 %v1032_v45, 0.0 }
 0x115   :  { %v979_v20 = vmul.f32 %v1857_v7, %v883_v18  ;;  %v1037_v22 = vadd.f32 %v1024_v47, %v981_v14 }
 0x116   :  { %1252 = vst [vmem:[%s1921_s9 + $0x8] sm:$0xff] %v1237_v62   ;;  %v1227_v17 = vpack.c.bf16 %v886_v1, %v885_v2  ;;  %v982_v43 = vmul.f32 %v1925_v3, %v886_v1  ;;  %v884_v52 = vadd.f32 %v1926_v5, %v828_v58  ;;  %v1232_v50 = vpack.c.bf16 %v1040_v19, %v1039_v10 }
 0x117   :  { %v1035_v23 = vadd.f32 %v1014_v61, %v979_v20  ;;  %v1045_v7 = vmax.f32 %v1037_v22, 0.0 }
 0x118   :  { %1251 = vst [vmem:[#allocation2 + $0x18] sm:$0xff] %v1227_v17   ;;  %v1038_v8 = vadd.f32 %v1029_v54, %v982_v43  ;;  %v1222_v11 = vpack.c.bf16 %v884_v52, %v883_v18  ;;  %v980_v24 = vmul.f32 %v1927_v37, %v884_v52  ;;  %1233 = vst [vmem:[%s1921_s9] sm:$0xff] %v1232_v50  }
 0x11a   :  { %v1046_v25 = vmax.f32 %v1038_v8, 0.0  ;;  %1250 = vst [vmem:[#allocation2 + $0x10] sm:$0xff] %v1222_v11   ;;  %v1036_v41 = vadd.f32 %v1019_v51, %v980_v24 }
 0x11b   :  { %1464 = shalt.err (!%p1461_p4)
}
 0x11c   :  { %s1477_s20 = smov 64   ;;  %s1478_s1 = smov 4   ;;  %v1043_v44 = vmax.f32 %v1035_v23, 0.0  ;;  %v1247_v26 = vpack.c.bf16 %v1046_v25, %v1045_v7  ;;  %v1044_v28 = vmax.f32 %v1036_v41, 0.0 }
 0x11d   :  { %1098 = dma.vmem_to_hbm [thread:$0]  %s1093_s15, 512, %s1920_s8, [#allocation3], %s1477_s20, %s1477_s20, %s1478_s1  }
 0x11e   :  { %1254 = vst [vmem:[%s1921_s9 + $0x18] sm:$0xff] %v1247_v26   ;;  %v1242_v35 = vpack.c.bf16 %v1044_v28, %v1043_v44 }
 0x120   :  { %1253 = vst [vmem:[%s1921_s9 + $0x10] sm:$0xff] %v1242_v35  }
 0x121   :  { %1473 = dma.done.wait [#allocation3], 512  }
 0x122   :  { %1474 = vsyncadd [#allocation3], 4294966784 }
 0x123   :  { %1106 = vsyncpa [#allocation3], 1 }

</bundles_post_ra>
